<compile_context>
chip_gen: v7x
topology: tpu7x:2x2x1
jax: 0.10.0
libtpu: 0.0.40
codegen_flags: <defaults>
</compile_context>

<pallas_src>
import jax
import jax.numpy as jnp
import numpy as np
from jax.experimental import pallas as pl
from jax.experimental.pallas import tpu as pltpu

# ---- module hyper-parameters (from the PyTorch source) -----------------------
HEAD_SIZE = 64
NUM_HEADS = 6
N_EMBD = NUM_HEADS * HEAD_SIZE      # 384
HIDDEN = 4 * N_EMBD                 # 1536
LN_EPS = 1e-5
NEG_BIG = -1e30                     # additive causal mask (robust vs. -inf)

ROW_CAP = 512                       # rows per grid step (v7x-safe with 48 MiB VMEM)
MAX_UNROLLED_HEAD_BLOCKS = 12       # static unroll bound for the attention loops


# ---- the fused kernel ---------------------------------------------------------
def block_kernel(x_ref,
                 ln1g_ref, ln1b_ref,
                 wqkv_ref, wp_ref, bp_ref,
                 ln2g_ref, ln2b_ref,
                 w1_ref, b1_ref, w2_ref, b2_ref,
                 out_ref,
                 qkv_scr, attn_scr):
    Bb, T, C = x_ref.shape
    M = Bb * T
    x = x_ref[...].reshape(M, C)                 # (M, C) f32 slab for this step

    def layernorm(v, g, b):
        mu = jnp.mean(v, axis=-1, keepdims=True)
        var = jnp.mean((v - mu) ** 2, axis=-1, keepdims=True)   # biased var (PyTorch LN)
        return (v - mu) * jax.lax.rsqrt(var + LN_EPS) * g + b

    # ---- communication: multi-head causal self-attention --------------------
    xln = layernorm(x, ln1g_ref[...], ln1b_ref[...])            # f32

    # fused QKV matmul (attention scale already folded into the Q columns)
    qkv = jnp.dot(xln.astype(jnp.bfloat16), wqkv_ref[...],
                  preferred_element_type=jnp.float32)           # (M, 3C) f32
    qkv_scr[...] = qkv.astype(jnp.bfloat16)                     # stage once as bf16

    # additive causal bias, computed once
    row = jax.lax.broadcasted_iota(jnp.int32, (T, T), 0)
    col = jax.lax.broadcasted_iota(jnp.int32, (T, T), 1)
    mask_bias = jnp.where(col <= row, 0.0, NEG_BIG).astype(jnp.float32)

    qkt_dims = (((1,), (1,)), ((), ()))          # contract last dims -> q @ k^T, no .T

    def attend_batch(r0):
        """Attention for one batch element whose rows start at r0 (static or traced)."""
        for h in range(NUM_HEADS):               # static unroll over heads
            c0 = h * HEAD_SIZE
            qh = qkv_scr[pl.ds(r0, T), c0:c0 + HEAD_SIZE]
            kh = qkv_scr[pl.ds(r0, T), C + c0:C + c0 + HEAD_SIZE]
            vh = qkv_scr[pl.ds(r0, T), 2 * C + c0:2 * C + c0 + HEAD_SIZE]

            s = jax.lax.dot_general(qh, kh, qkt_dims,
                                    preferred_element_type=jnp.float32) + mask_bias
            m = jnp.max(s, axis=-1, keepdims=True)
            p = jnp.exp(s - m)
            p = p * pl.reciprocal(jnp.sum(p, axis=-1, keepdims=True), approx=True)
            oh = jnp.dot(p.astype(jnp.bfloat16), vh,
                         preferred_element_type=jnp.float32)    # (T, D) f32
            attn_scr[pl.ds(r0, T), c0:c0 + HEAD_SIZE] = oh.astype(jnp.bfloat16)

    if Bb * NUM_HEADS <= MAX_UNROLLED_HEAD_BLOCKS:
        for b in range(Bb):                       # small: static unroll
            attend_batch(b * T)
    else:
        def batch_body(b, carry):                 # large: bounded code size
            attend_batch(pl.multiple_of(b * T, T))
            return carry
        jax.lax.fori_loop(0, Bb, batch_body, 0)

    proj = jnp.dot(attn_scr[...], wp_ref[...],
                   preferred_element_type=jnp.float32) + bp_ref[...]
    x1 = x + proj                                 # first residual (f32)

    # ---- computation: feed-forward -------------------------------------------
    x2ln = layernorm(x1, ln2g_ref[...], ln2b_ref[...])
    h1 = jnp.dot(x2ln.astype(jnp.bfloat16), w1_ref[...],
                 preferred_element_type=jnp.float32) + b1_ref[...]
    h1 = jnp.maximum(h1, 0.0)                                    # ReLU
    h2 = jnp.dot(h1.astype(jnp.bfloat16), w2_ref[...],
                 preferred_element_type=jnp.float32) + b2_ref[...]

    out_ref[...] = (x1 + h2).reshape(Bb, T, C)    # second residual


# ---- wrapper -------------------------------------------------------------------
def _pick_block_b(B, T):
    """Largest divisor of B with block_b*T <= ROW_CAP rows per step, while keeping
    at least 2 grid steps when B >= 2 (so both v7x TensorCores get work)."""
    best = 1
    for d in range(1, B + 1):
        if B % d != 0:
            continue
        if d * T > max(T, ROW_CAP):
            continue
        if B >= 2 and (B // d) < 2:
            continue
        best = d
    return best


def transformer_block(x, params):
    """x: (B, T, C) float32.  params: dict of f32 weights (see init_params)."""
    B, T, C = x.shape
    assert C == N_EMBD
    block_b = _pick_block_b(B, T)

    scale = HEAD_SIZE ** (-0.5)
    bf16 = jnp.bfloat16
    # fuse QKV, fold the attention scale into the Q columns, cast MXU weights to bf16
    wqkv = jnp.concatenate(
        [params["wq"] * scale, params["wk"], params["wv"]], axis=1).astype(bf16)
    wp = params["wp"].astype(bf16)
    w1 = params["w1"].astype(bf16)
    w2 = params["w2"].astype(bf16)

    param_list = [
        params["ln1_g"], params["ln1_b"],
        wqkv, wp, params["bp"],
        params["ln2_g"], params["ln2_b"],
        w1, params["b1"], w2, params["b2"],
    ]

    def full_spec(shape):
        # whole array is one block, same block for every grid step
        return pl.BlockSpec(shape, lambda b: (0,) * len(shape))

    in_specs = [pl.BlockSpec((block_b, T, C), lambda b: (b, 0, 0))] + \
               [full_spec(p.shape) for p in param_list]
    out_spec = pl.BlockSpec((block_b, T, C), lambda b: (b, 0, 0))

    # advisory cost estimate so XLA can schedule the wrapper-side concat/cast around us
    flops = int(24 * B * T * C * C + 4 * B * T * T * C)
    transcendentals = int(B * NUM_HEADS * T * T + 2 * B * T)
    weight_bytes = sum(int(np.prod(p.shape)) * p.dtype.itemsize for p in param_list)
    bytes_accessed = int(2 * B * T * C * 4 + weight_bytes)

    return pl.pallas_call(
        block_kernel,
        out_shape=jax.ShapeDtypeStruct((B, T, C), jnp.float32),
        grid_spec=pltpu.PrefetchScalarGridSpec(
            num_scalar_prefetch=0,
            grid=(B // block_b,),
            in_specs=in_specs,
            out_specs=out_spec,
            scratch_shapes=[
                pltpu.VMEM((block_b * T, 3 * C), jnp.bfloat16),   # staged qkv
                pltpu.VMEM((block_b * T, C), jnp.bfloat16),       # per-head outputs
            ],
        ),
        compiler_params=pltpu.CompilerParams(
            dimension_semantics=("parallel",),
            vmem_limit_bytes=48 * 1024 * 1024,
        ),
        cost_estimate=pl.CostEstimate(
            flops=flops,
            transcendentals=transcendentals,
            bytes_accessed=bytes_accessed,
        ),
    )(x, *param_list)


# ---- deterministic parameter init -----------------------------------------------
def init_params(key):
    ks = jax.random.split(key, 10)
    s = 0.02
    C, H = N_EMBD, HIDDEN
    return {
        "ln1_g": jnp.ones((1, C), jnp.float32),
        "ln1_b": jnp.zeros((1, C), jnp.float32),
        # weights stored as (in, out) so the kernel does x @ W
        "wq": s * jax.random.normal(ks[0], (C, C), jnp.float32),
        "wk": s * jax.random.normal(ks[1], (C, C), jnp.float32),
        "wv": s * jax.random.normal(ks[2], (C, C), jnp.float32),
        "wp": s * jax.random.normal(ks[3], (C, C), jnp.float32),
        "bp": s * jax.random.normal(ks[4], (1, C), jnp.float32),
        "ln2_g": jnp.ones((1, C), jnp.float32),
        "ln2_b": jnp.zeros((1, C), jnp.float32),
        "w1": s * jax.random.normal(ks[5], (C, H), jnp.float32),
        "b1": s * jax.random.normal(ks[6], (1, H), jnp.float32),
        "w2": s * jax.random.normal(ks[7], (H, C), jnp.float32),
        "b2": s * jax.random.normal(ks[8], (1, C), jnp.float32),
    }


# ---- pure-JAX reference (for a sanity check) --------------------------------------
def reference_block(x, p):
    def ln(v, g, b):
        mu = v.mean(-1, keepdims=True)
        var = ((v - mu) ** 2).mean(-1, keepdims=True)
        return (v - mu) / jnp.sqrt(var + LN_EPS) * g + b

    B, T, C = x.shape
    xln = ln(x, p["ln1_g"], p["ln1_b"])
    q = xln @ p["wq"]; k = xln @ p["wk"]; v = xln @ p["wv"]
    qh = q.reshape(B, T, NUM_HEADS, HEAD_SIZE).transpose(0, 2, 1, 3)
    kh = k.reshape(B, T, NUM_HEADS, HEAD_SIZE).transpose(0, 2, 1, 3)
    vh = v.reshape(B, T, NUM_HEADS, HEAD_SIZE).transpose(0, 2, 1, 3)
    s = jnp.einsum("bhqd,bhkd->bhqk", qh, kh) * HEAD_SIZE ** (-0.5)
    mask = jnp.tril(jnp.ones((T, T), bool))
    s = jnp.where(mask, s, -jnp.inf)
    w = jax.nn.softmax(s, axis=-1)
    o = jnp.einsum("bhqk,bhkd->bhqd", w, vh).transpose(0, 2, 1, 3).reshape(B, T, C)
    x1 = x + (o @ p["wp"] + p["bp"])
    x2 = ln(x1, p["ln2_g"], p["ln2_b"])
    ff = jnp.maximum(x2 @ p["w1"] + p["b1"], 0.0) @ p["w2"] + p["b2"]
    return x1 + ff


if __name__ == "__main__":
    key = jax.random.PRNGKey(0)
    k_x, k_p = jax.random.split(key)

    B, T = 2, 64                       # T <= block_size (256)
    x = jax.random.normal(k_x, (B, T, N_EMBD), jnp.float32)
    params = init_params(k_p)

    out = transformer_block(x, params)
    out = jax.block_until_ready(out)

    ref = jax.block_until_ready(reference_block(x, params))
    np.testing.assert_allclose(np.asarray(out), np.asarray(ref), atol=2e-2, rtol=2e-2)

    print("KERNEL_OK")
</pallas_src>

<mosaic_0001>
module attributes {stable_mosaic.version = 11 : i64} {
  func.func @block_kernel(%arg0: i32, %arg1: memref<1x64x384xf32, #tpu.memory_space<vmem>>, %arg2: memref<1x384xf32, #tpu.memory_space<vmem>>, %arg3: memref<1x384xf32, #tpu.memory_space<vmem>>, %arg4: memref<384x1152xbf16, #tpu.memory_space<vmem>>, %arg5: memref<384x384xbf16, #tpu.memory_space<vmem>>, %arg6: memref<1x384xf32, #tpu.memory_space<vmem>>, %arg7: memref<1x384xf32, #tpu.memory_space<vmem>>, %arg8: memref<1x384xf32, #tpu.memory_space<vmem>>, %arg9: memref<384x1536xbf16, #tpu.memory_space<vmem>>, %arg10: memref<1x1536xf32, #tpu.memory_space<vmem>>, %arg11: memref<1536x384xbf16, #tpu.memory_space<vmem>>, %arg12: memref<1x384xf32, #tpu.memory_space<vmem>>, %arg13: memref<1x64x384xf32, #tpu.memory_space<vmem>>, %arg14: memref<64x1152xbf16, #tpu.memory_space<vmem>>, %arg15: memref<64x384xbf16, #tpu.memory_space<vmem>>) attributes {dimension_semantics = [#tpu.dimension_semantics<parallel>], iteration_bounds = array<i64: 2>, scalar_prefetch = 0 : i64, scratch_operands = 2 : i64, tpu.core_type = #tpu.core_type<tc>, window_params = [{transform_indices = @transform_0, window_bounds = array<i64: 1, 64, 384>}, {pipeline_mode = #tpu.pipeline_mode<synchronous>, transform_indices = @transform_1, window_bounds = array<i64: 1, 384>}, {pipeline_mode = #tpu.pipeline_mode<synchronous>, transform_indices = @transform_2, window_bounds = array<i64: 1, 384>}, {pipeline_mode = #tpu.pipeline_mode<synchronous>, transform_indices = @transform_3, window_bounds = array<i64: 384, 1152>}, {pipeline_mode = #tpu.pipeline_mode<synchronous>, transform_indices = @transform_4, window_bounds = array<i64: 384, 384>}, {pipeline_mode = #tpu.pipeline_mode<synchronous>, transform_indices = @transform_5, window_bounds = array<i64: 1, 384>}, {pipeline_mode = #tpu.pipeline_mode<synchronous>, transform_indices = @transform_6, window_bounds = array<i64: 1, 384>}, {pipeline_mode = #tpu.pipeline_mode<synchronous>, transform_indices = @transform_7, window_bounds = array<i64: 1, 384>}, {pipeline_mode = #tpu.pipeline_mode<synchronous>, transform_indices = @transform_8, window_bounds = array<i64: 384, 1536>}, {pipeline_mode = #tpu.pipeline_mode<synchronous>, transform_indices = @transform_9, window_bounds = array<i64: 1, 1536>}, {pipeline_mode = #tpu.pipeline_mode<synchronous>, transform_indices = @transform_10, window_bounds = array<i64: 1536, 384>}, {pipeline_mode = #tpu.pipeline_mode<synchronous>, transform_indices = @transform_11, window_bounds = array<i64: 1, 384>}, {transform_indices = @transform_12, window_bounds = array<i64: 1, 64, 384>}]} {
    %c0 = arith.constant 0 : index
    %c0_0 = arith.constant 0 : index
    %c0_1 = arith.constant 0 : index
    %0 = vector.load %arg1[%c0, %c0_0, %c0_1] : memref<1x64x384xf32, #tpu.memory_space<vmem>>, vector<1x64x384xf32>
    %1 = vector.shape_cast %0 : vector<1x64x384xf32> to vector<64x384xf32>
    %c0_2 = arith.constant 0 : index
    %c0_3 = arith.constant 0 : index
    %2 = vector.load %arg2[%c0_2, %c0_3] : memref<1x384xf32, #tpu.memory_space<vmem>>, vector<1x384xf32>
    %c0_4 = arith.constant 0 : index
    %c0_5 = arith.constant 0 : index
    %3 = vector.load %arg3[%c0_4, %c0_5] : memref<1x384xf32, #tpu.memory_space<vmem>>, vector<1x384xf32>
    %cst = arith.constant dense<0.000000e+00> : vector<64xf32>
    %4 = vector.multi_reduction <add>, %1, %cst [1] : vector<64x384xf32> to vector<64xf32>
    %5 = vector.shape_cast %4 : vector<64xf32> to vector<64x1xf32>
    %cst_6 = arith.constant 3.840000e+02 : f32
    %6 = vector.broadcast %cst_6 : f32 to vector<64x1xf32>
    %7 = arith.divf %5, %6 : vector<64x1xf32>
    %8 = vector.broadcast %7 : vector<64x1xf32> to vector<64x384xf32>
    %9 = arith.subf %1, %8 : vector<64x384xf32>
    %10 = arith.mulf %9, %9 : vector<64x384xf32>
    %cst_7 = arith.constant dense<0.000000e+00> : vector<64xf32>
    %11 = vector.multi_reduction <add>, %10, %cst_7 [1] : vector<64x384xf32> to vector<64xf32>
    %12 = vector.shape_cast %11 : vector<64xf32> to vector<64x1xf32>
    %cst_8 = arith.constant 3.840000e+02 : f32
    %13 = vector.broadcast %cst_8 : f32 to vector<64x1xf32>
    %14 = arith.divf %12, %13 : vector<64x1xf32>
    %15 = vector.broadcast %7 : vector<64x1xf32> to vector<64x384xf32>
    %16 = arith.subf %1, %15 : vector<64x384xf32>
    %cst_9 = arith.constant 9.99999974E-6 : f32
    %17 = vector.broadcast %cst_9 : f32 to vector<64x1xf32>
    %18 = arith.addf %14, %17 : vector<64x1xf32>
    %19 = math.rsqrt %18 : vector<64x1xf32>
    %20 = vector.broadcast %19 : vector<64x1xf32> to vector<64x384xf32>
    %21 = arith.mulf %16, %20 : vector<64x384xf32>
    %22 = vector.broadcast %2 : vector<1x384xf32> to vector<64x384xf32>
    %23 = arith.mulf %21, %22 : vector<64x384xf32>
    %24 = vector.broadcast %3 : vector<1x384xf32> to vector<64x384xf32>
    %25 = arith.addf %23, %24 : vector<64x384xf32>
    %26 = arith.truncf %25 : vector<64x384xf32> to vector<64x384xbf16>
    %c0_10 = arith.constant 0 : index
    %c0_11 = arith.constant 0 : index
    %27 = vector.load %arg4[%c0_10, %c0_11] : memref<384x1152xbf16, #tpu.memory_space<vmem>>, vector<384x1152xbf16>
    %cst_12 = arith.constant dense<0.000000e+00> : vector<64x1152xf32>
    %28 = tpu.matmul %26, %27, %cst_12 {dimension_numbers = #tpu.dot_dimension_numbers<[1], [0], [0], [1], [0, 0, 1, 1], [], []>} : vector<64x384xbf16>, vector<384x1152xbf16>, vector<64x1152xf32> -> vector<64x1152xf32>
    %29 = arith.truncf %28 : vector<64x1152xf32> to vector<64x1152xbf16>
    %c0_13 = arith.constant 0 : index
    %c0_14 = arith.constant 0 : index
    %30 = vector.load %arg14[%c0_13, %c0_14] : memref<64x1152xbf16, #tpu.memory_space<vmem>>, vector<64x1152xbf16>
    tpu.vector_store %arg14[%c0_13, %c0_14], %29 {strides = array<i32>} : memref<64x1152xbf16, #tpu.memory_space<vmem>>, vector<64x1152xbf16>,
    %31 = tpu.iota {dimensions = array<i32: 0>} : vector<64x64xi32>
    %32 = tpu.iota {dimensions = array<i32: 1>} : vector<64x64xi32>
    %33 = arith.cmpi sle, %32, %31 : vector<64x64xi32>
    %cst_15 = arith.constant 0.000000e+00 : f32
    %cst_16 = arith.constant -1.000000e+30 : f32
    %34 = vector.broadcast %cst_15 : f32 to vector<64x64xf32>
    %35 = vector.broadcast %cst_16 : f32 to vector<64x64xf32>
    %36 = arith.select %33, %34, %35 : vector<64x64xi1>, vector<64x64xf32>
    %c0_17 = arith.constant 0 : index
    %c0_18 = arith.constant 0 : index
    %37 = vector.load %arg14[%c0_17, %c0_18] : memref<64x1152xbf16, #tpu.memory_space<vmem>>, vector<64x64xbf16>
    %c0_19 = arith.constant 0 : index
    %c384 = arith.constant 384 : index
    %38 = vector.load %arg14[%c0_19, %c384] : memref<64x1152xbf16, #tpu.memory_space<vmem>>, vector<64x64xbf16>
    %c0_20 = arith.constant 0 : index
    %c768 = arith.constant 768 : index
    %39 = vector.load %arg14[%c0_20, %c768] : memref<64x1152xbf16, #tpu.memory_space<vmem>>, vector<64x64xbf16>
    %cst_21 = arith.constant dense<0.000000e+00> : vector<64x64xf32>
    %40 = tpu.matmul %37, %38, %cst_21 {dimension_numbers = #tpu.dot_dimension_numbers<[1], [1], [0], [0], [0, 0, 1, 0], [], []>} : vector<64x64xbf16>, vector<64x64xbf16>, vector<64x64xf32> -> vector<64x64xf32>
    %41 = arith.addf %40, %36 : vector<64x64xf32>
    %cst_22 = arith.constant dense<0xFF800000> : vector<64xf32>
    %42 = vector.multi_reduction <maximumf>, %41, %cst_22 [1] : vector<64x64xf32> to vector<64xf32>
    %43 = vector.shape_cast %42 : vector<64xf32> to vector<64x1xf32>
    %44 = vector.broadcast %43 : vector<64x1xf32> to vector<64x64xf32>
    %45 = arith.subf %41, %44 : vector<64x64xf32>
    %46 = math.exp %45 : vector<64x64xf32>
    %cst_23 = arith.constant dense<0.000000e+00> : vector<64xf32>
    %47 = vector.multi_reduction <add>, %46, %cst_23 [1] : vector<64x64xf32> to vector<64xf32>
    %48 = vector.shape_cast %47 : vector<64xf32> to vector<64x1xf32>
    %49 = tpu.reciprocal %48 {approx = true} : vector<64x1xf32> -> vector<64x1xf32>
    %50 = vector.broadcast %49 : vector<64x1xf32> to vector<64x64xf32>
    %51 = arith.mulf %46, %50 : vector<64x64xf32>
    %52 = arith.truncf %51 : vector<64x64xf32> to vector<64x64xbf16>
    %cst_24 = arith.constant dense<0.000000e+00> : vector<64x64xf32>
    %53 = tpu.matmul %52, %39, %cst_24 {dimension_numbers = #tpu.dot_dimension_numbers<[1], [0], [0], [1], [0, 0, 1, 1], [], []>} : vector<64x64xbf16>, vector<64x64xbf16>, vector<64x64xf32> -> vector<64x64xf32>
    %54 = arith.truncf %53 : vector<64x64xf32> to vector<64x64xbf16>
    %c0_25 = arith.constant 0 : index
    %c0_26 = arith.constant 0 : index
    %55 = vector.load %arg15[%c0_25, %c0_26] : memref<64x384xbf16, #tpu.memory_space<vmem>>, vector<64x64xbf16>
    tpu.vector_store %arg15[%c0_25, %c0_26], %54 {strides = array<i32>} : memref<64x384xbf16, #tpu.memory_space<vmem>>, vector<64x64xbf16>,
    %c0_27 = arith.constant 0 : index
    %c64 = arith.constant 64 : index
    %56 = vector.load %arg14[%c0_27, %c64] : memref<64x1152xbf16, #tpu.memory_space<vmem>>, vector<64x64xbf16>
    %c0_28 = arith.constant 0 : index
    %c448 = arith.constant 448 : index
    %57 = vector.load %arg14[%c0_28, %c448] : memref<64x1152xbf16, #tpu.memory_space<vmem>>, vector<64x64xbf16>
    %c0_29 = arith.constant 0 : index
    %c832 = arith.constant 832 : index
    %58 = vector.load %arg14[%c0_29, %c832] : memref<64x1152xbf16, #tpu.memory_space<vmem>>, vector<64x64xbf16>
    %cst_30 = arith.constant dense<0.000000e+00> : vector<64x64xf32>
    %59 = tpu.matmul %56, %57, %cst_30 {dimension_numbers = #tpu.dot_dimension_numbers<[1], [1], [0], [0], [0, 0, 1, 0], [], []>} : vector<64x64xbf16>, vector<64x64xbf16>, vector<64x64xf32> -> vector<64x64xf32>
    %60 = arith.addf %59, %36 : vector<64x64xf32>
    %cst_31 = arith.constant dense<0xFF800000> : vector<64xf32>
    %61 = vector.multi_reduction <maximumf>, %60, %cst_31 [1] : vector<64x64xf32> to vector<64xf32>
    %62 = vector.shape_cast %61 : vector<64xf32> to vector<64x1xf32>
    %63 = vector.broadcast %62 : vector<64x1xf32> to vector<64x64xf32>
    %64 = arith.subf %60, %63 : vector<64x64xf32>
    %65 = math.exp %64 : vector<64x64xf32>
    %cst_32 = arith.constant dense<0.000000e+00> : vector<64xf32>
    %66 = vector.multi_reduction <add>, %65, %cst_32 [1] : vector<64x64xf32> to vector<64xf32>
    %67 = vector.shape_cast %66 : vector<64xf32> to vector<64x1xf32>
    %68 = tpu.reciprocal %67 {approx = true} : vector<64x1xf32> -> vector<64x1xf32>
    %69 = vector.broadcast %68 : vector<64x1xf32> to vector<64x64xf32>
    %70 = arith.mulf %65, %69 : vector<64x64xf32>
    %71 = arith.truncf %70 : vector<64x64xf32> to vector<64x64xbf16>
    %cst_33 = arith.constant dense<0.000000e+00> : vector<64x64xf32>
    %72 = tpu.matmul %71, %58, %cst_33 {dimension_numbers = #tpu.dot_dimension_numbers<[1], [0], [0], [1], [0, 0, 1, 1], [], []>} : vector<64x64xbf16>, vector<64x64xbf16>, vector<64x64xf32> -> vector<64x64xf32>
    %73 = arith.truncf %72 : vector<64x64xf32> to vector<64x64xbf16>
    %c0_34 = arith.constant 0 : index
    %c64_35 = arith.constant 64 : index
    %74 = vector.load %arg15[%c0_34, %c64_35] : memref<64x384xbf16, #tpu.memory_space<vmem>>, vector<64x64xbf16>
    tpu.vector_store %arg15[%c0_34, %c64_35], %73 {strides = array<i32>} : memref<64x384xbf16, #tpu.memory_space<vmem>>, vector<64x64xbf16>,
    %c0_36 = arith.constant 0 : index
    %c128 = arith.constant 128 : index
    %75 = vector.load %arg14[%c0_36, %c128] : memref<64x1152xbf16, #tpu.memory_space<vmem>>, vector<64x64xbf16>
    %c0_37 = arith.constant 0 : index
    %c512 = arith.constant 512 : index
    %76 = vector.load %arg14[%c0_37, %c512] : memref<64x1152xbf16, #tpu.memory_space<vmem>>, vector<64x64xbf16>
    %c0_38 = arith.constant 0 : index
    %c896 = arith.constant 896 : index
    %77 = vector.load %arg14[%c0_38, %c896] : memref<64x1152xbf16, #tpu.memory_space<vmem>>, vector<64x64xbf16>
    %cst_39 = arith.constant dense<0.000000e+00> : vector<64x64xf32>
    %78 = tpu.matmul %75, %76, %cst_39 {dimension_numbers = #tpu.dot_dimension_numbers<[1], [1], [0], [0], [0, 0, 1, 0], [], []>} : vector<64x64xbf16>, vector<64x64xbf16>, vector<64x64xf32> -> vector<64x64xf32>
    %79 = arith.addf %78, %36 : vector<64x64xf32>
    %cst_40 = arith.constant dense<0xFF800000> : vector<64xf32>
    %80 = vector.multi_reduction <maximumf>, %79, %cst_40 [1] : vector<64x64xf32> to vector<64xf32>
    %81 = vector.shape_cast %80 : vector<64xf32> to vector<64x1xf32>
    %82 = vector.broadcast %81 : vector<64x1xf32> to vector<64x64xf32>
    %83 = arith.subf %79, %82 : vector<64x64xf32>
    %84 = math.exp %83 : vector<64x64xf32>
    %cst_41 = arith.constant dense<0.000000e+00> : vector<64xf32>
    %85 = vector.multi_reduction <add>, %84, %cst_41 [1] : vector<64x64xf32> to vector<64xf32>
    %86 = vector.shape_cast %85 : vector<64xf32> to vector<64x1xf32>
    %87 = tpu.reciprocal %86 {approx = true} : vector<64x1xf32> -> vector<64x1xf32>
    %88 = vector.broadcast %87 : vector<64x1xf32> to vector<64x64xf32>
    %89 = arith.mulf %84, %88 : vector<64x64xf32>
    %90 = arith.truncf %89 : vector<64x64xf32> to vector<64x64xbf16>
    %cst_42 = arith.constant dense<0.000000e+00> : vector<64x64xf32>
    %91 = tpu.matmul %90, %77, %cst_42 {dimension_numbers = #tpu.dot_dimension_numbers<[1], [0], [0], [1], [0, 0, 1, 1], [], []>} : vector<64x64xbf16>, vector<64x64xbf16>, vector<64x64xf32> -> vector<64x64xf32>
    %92 = arith.truncf %91 : vector<64x64xf32> to vector<64x64xbf16>
    %c0_43 = arith.constant 0 : index
    %c128_44 = arith.constant 128 : index
    %93 = vector.load %arg15[%c0_43, %c128_44] : memref<64x384xbf16, #tpu.memory_space<vmem>>, vector<64x64xbf16>
    tpu.vector_store %arg15[%c0_43, %c128_44], %92 {strides = array<i32>} : memref<64x384xbf16, #tpu.memory_space<vmem>>, vector<64x64xbf16>,
    %c0_45 = arith.constant 0 : index
    %c192 = arith.constant 192 : index
    %94 = vector.load %arg14[%c0_45, %c192] : memref<64x1152xbf16, #tpu.memory_space<vmem>>, vector<64x64xbf16>
    %c0_46 = arith.constant 0 : index
    %c576 = arith.constant 576 : index
    %95 = vector.load %arg14[%c0_46, %c576] : memref<64x1152xbf16, #tpu.memory_space<vmem>>, vector<64x64xbf16>
    %c0_47 = arith.constant 0 : index
    %c960 = arith.constant 960 : index
    %96 = vector.load %arg14[%c0_47, %c960] : memref<64x1152xbf16, #tpu.memory_space<vmem>>, vector<64x64xbf16>
    %cst_48 = arith.constant dense<0.000000e+00> : vector<64x64xf32>
    %97 = tpu.matmul %94, %95, %cst_48 {dimension_numbers = #tpu.dot_dimension_numbers<[1], [1], [0], [0], [0, 0, 1, 0], [], []>} : vector<64x64xbf16>, vector<64x64xbf16>, vector<64x64xf32> -> vector<64x64xf32>
    %98 = arith.addf %97, %36 : vector<64x64xf32>
    %cst_49 = arith.constant dense<0xFF800000> : vector<64xf32>
    %99 = vector.multi_reduction <maximumf>, %98, %cst_49 [1] : vector<64x64xf32> to vector<64xf32>
    %100 = vector.shape_cast %99 : vector<64xf32> to vector<64x1xf32>
    %101 = vector.broadcast %100 : vector<64x1xf32> to vector<64x64xf32>
    %102 = arith.subf %98, %101 : vector<64x64xf32>
    %103 = math.exp %102 : vector<64x64xf32>
    %cst_50 = arith.constant dense<0.000000e+00> : vector<64xf32>
    %104 = vector.multi_reduction <add>, %103, %cst_50 [1] : vector<64x64xf32> to vector<64xf32>
    %105 = vector.shape_cast %104 : vector<64xf32> to vector<64x1xf32>
    %106 = tpu.reciprocal %105 {approx = true} : vector<64x1xf32> -> vector<64x1xf32>
    %107 = vector.broadcast %106 : vector<64x1xf32> to vector<64x64xf32>
    %108 = arith.mulf %103, %107 : vector<64x64xf32>
    %109 = arith.truncf %108 : vector<64x64xf32> to vector<64x64xbf16>
    %cst_51 = arith.constant dense<0.000000e+00> : vector<64x64xf32>
    %110 = tpu.matmul %109, %96, %cst_51 {dimension_numbers = #tpu.dot_dimension_numbers<[1], [0], [0], [1], [0, 0, 1, 1], [], []>} : vector<64x64xbf16>, vector<64x64xbf16>, vector<64x64xf32> -> vector<64x64xf32>
    %111 = arith.truncf %110 : vector<64x64xf32> to vector<64x64xbf16>
    %c0_52 = arith.constant 0 : index
    %c192_53 = arith.constant 192 : index
    %112 = vector.load %arg15[%c0_52, %c192_53] : memref<64x384xbf16, #tpu.memory_space<vmem>>, vector<64x64xbf16>
    tpu.vector_store %arg15[%c0_52, %c192_53], %111 {strides = array<i32>} : memref<64x384xbf16, #tpu.memory_space<vmem>>, vector<64x64xbf16>,
    %c0_54 = arith.constant 0 : index
    %c256 = arith.constant 256 : index
    %113 = vector.load %arg14[%c0_54, %c256] : memref<64x1152xbf16, #tpu.memory_space<vmem>>, vector<64x64xbf16>
    %c0_55 = arith.constant 0 : index
    %c640 = arith.constant 640 : index
    %114 = vector.load %arg14[%c0_55, %c640] : memref<64x1152xbf16, #tpu.memory_space<vmem>>, vector<64x64xbf16>
    %c0_56 = arith.constant 0 : index
    %c1024 = arith.constant 1024 : index
    %115 = vector.load %arg14[%c0_56, %c1024] : memref<64x1152xbf16, #tpu.memory_space<vmem>>, vector<64x64xbf16>
    %cst_57 = arith.constant dense<0.000000e+00> : vector<64x64xf32>
    %116 = tpu.matmul %113, %114, %cst_57 {dimension_numbers = #tpu.dot_dimension_numbers<[1], [1], [0], [0], [0, 0, 1, 0], [], []>} : vector<64x64xbf16>, vector<64x64xbf16>, vector<64x64xf32> -> vector<64x64xf32>
    %117 = arith.addf %116, %36 : vector<64x64xf32>
    %cst_58 = arith.constant dense<0xFF800000> : vector<64xf32>
    %118 = vector.multi_reduction <maximumf>, %117, %cst_58 [1] : vector<64x64xf32> to vector<64xf32>
    %119 = vector.shape_cast %118 : vector<64xf32> to vector<64x1xf32>
    %120 = vector.broadcast %119 : vector<64x1xf32> to vector<64x64xf32>
    %121 = arith.subf %117, %120 : vector<64x64xf32>
    %122 = math.exp %121 : vector<64x64xf32>
    %cst_59 = arith.constant dense<0.000000e+00> : vector<64xf32>
    %123 = vector.multi_reduction <add>, %122, %cst_59 [1] : vector<64x64xf32> to vector<64xf32>
    %124 = vector.shape_cast %123 : vector<64xf32> to vector<64x1xf32>
    %125 = tpu.reciprocal %124 {approx = true} : vector<64x1xf32> -> vector<64x1xf32>
    %126 = vector.broadcast %125 : vector<64x1xf32> to vector<64x64xf32>
    %127 = arith.mulf %122, %126 : vector<64x64xf32>
    %128 = arith.truncf %127 : vector<64x64xf32> to vector<64x64xbf16>
    %cst_60 = arith.constant dense<0.000000e+00> : vector<64x64xf32>
    %129 = tpu.matmul %128, %115, %cst_60 {dimension_numbers = #tpu.dot_dimension_numbers<[1], [0], [0], [1], [0, 0, 1, 1], [], []>} : vector<64x64xbf16>, vector<64x64xbf16>, vector<64x64xf32> -> vector<64x64xf32>
    %130 = arith.truncf %129 : vector<64x64xf32> to vector<64x64xbf16>
    %c0_61 = arith.constant 0 : index
    %c256_62 = arith.constant 256 : index
    %131 = vector.load %arg15[%c0_61, %c256_62] : memref<64x384xbf16, #tpu.memory_space<vmem>>, vector<64x64xbf16>
    tpu.vector_store %arg15[%c0_61, %c256_62], %130 {strides = array<i32>} : memref<64x384xbf16, #tpu.memory_space<vmem>>, vector<64x64xbf16>,
    %c0_63 = arith.constant 0 : index
    %c320 = arith.constant 320 : index
    %132 = vector.load %arg14[%c0_63, %c320] : memref<64x1152xbf16, #tpu.memory_space<vmem>>, vector<64x64xbf16>
    %c0_64 = arith.constant 0 : index
    %c704 = arith.constant 704 : index
    %133 = vector.load %arg14[%c0_64, %c704] : memref<64x1152xbf16, #tpu.memory_space<vmem>>, vector<64x64xbf16>
    %c0_65 = arith.constant 0 : index
    %c1088 = arith.constant 1088 : index
    %134 = vector.load %arg14[%c0_65, %c1088] : memref<64x1152xbf16, #tpu.memory_space<vmem>>, vector<64x64xbf16>
    %cst_66 = arith.constant dense<0.000000e+00> : vector<64x64xf32>
    %135 = tpu.matmul %132, %133, %cst_66 {dimension_numbers = #tpu.dot_dimension_numbers<[1], [1], [0], [0], [0, 0, 1, 0], [], []>} : vector<64x64xbf16>, vector<64x64xbf16>, vector<64x64xf32> -> vector<64x64xf32>
    %136 = arith.addf %135, %36 : vector<64x64xf32>
    %cst_67 = arith.constant dense<0xFF800000> : vector<64xf32>
    %137 = vector.multi_reduction <maximumf>, %136, %cst_67 [1] : vector<64x64xf32> to vector<64xf32>
    %138 = vector.shape_cast %137 : vector<64xf32> to vector<64x1xf32>
    %139 = vector.broadcast %138 : vector<64x1xf32> to vector<64x64xf32>
    %140 = arith.subf %136, %139 : vector<64x64xf32>
    %141 = math.exp %140 : vector<64x64xf32>
    %cst_68 = arith.constant dense<0.000000e+00> : vector<64xf32>
    %142 = vector.multi_reduction <add>, %141, %cst_68 [1] : vector<64x64xf32> to vector<64xf32>
    %143 = vector.shape_cast %142 : vector<64xf32> to vector<64x1xf32>
    %144 = tpu.reciprocal %143 {approx = true} : vector<64x1xf32> -> vector<64x1xf32>
    %145 = vector.broadcast %144 : vector<64x1xf32> to vector<64x64xf32>
    %146 = arith.mulf %141, %145 : vector<64x64xf32>
    %147 = arith.truncf %146 : vector<64x64xf32> to vector<64x64xbf16>
    %cst_69 = arith.constant dense<0.000000e+00> : vector<64x64xf32>
    %148 = tpu.matmul %147, %134, %cst_69 {dimension_numbers = #tpu.dot_dimension_numbers<[1], [0], [0], [1], [0, 0, 1, 1], [], []>} : vector<64x64xbf16>, vector<64x64xbf16>, vector<64x64xf32> -> vector<64x64xf32>
    %149 = arith.truncf %148 : vector<64x64xf32> to vector<64x64xbf16>
    %c0_70 = arith.constant 0 : index
    %c320_71 = arith.constant 320 : index
    %150 = vector.load %arg15[%c0_70, %c320_71] : memref<64x384xbf16, #tpu.memory_space<vmem>>, vector<64x64xbf16>
    tpu.vector_store %arg15[%c0_70, %c320_71], %149 {strides = array<i32>} : memref<64x384xbf16, #tpu.memory_space<vmem>>, vector<64x64xbf16>,
    %c0_72 = arith.constant 0 : index
    %c0_73 = arith.constant 0 : index
    %151 = vector.load %arg15[%c0_72, %c0_73] : memref<64x384xbf16, #tpu.memory_space<vmem>>, vector<64x384xbf16>
    %c0_74 = arith.constant 0 : index
    %c0_75 = arith.constant 0 : index
    %152 = vector.load %arg5[%c0_74, %c0_75] : memref<384x384xbf16, #tpu.memory_space<vmem>>, vector<384x384xbf16>
    %cst_76 = arith.constant dense<0.000000e+00> : vector<64x384xf32>
    %153 = tpu.matmul %151, %152, %cst_76 {dimension_numbers = #tpu.dot_dimension_numbers<[1], [0], [0], [1], [0, 0, 1, 1], [], []>} : vector<64x384xbf16>, vector<384x384xbf16>, vector<64x384xf32> -> vector<64x384xf32>
    %c0_77 = arith.constant 0 : index
    %c0_78 = arith.constant 0 : index
    %154 = vector.load %arg6[%c0_77, %c0_78] : memref<1x384xf32, #tpu.memory_space<vmem>>, vector<1x384xf32>
    %155 = vector.broadcast %154 : vector<1x384xf32> to vector<64x384xf32>
    %156 = arith.addf %153, %155 : vector<64x384xf32>
    %157 = arith.addf %1, %156 : vector<64x384xf32>
    %c0_79 = arith.constant 0 : index
    %c0_80 = arith.constant 0 : index
    %158 = vector.load %arg7[%c0_79, %c0_80] : memref<1x384xf32, #tpu.memory_space<vmem>>, vector<1x384xf32>
    %c0_81 = arith.constant 0 : index
    %c0_82 = arith.constant 0 : index
    %159 = vector.load %arg8[%c0_81, %c0_82] : memref<1x384xf32, #tpu.memory_space<vmem>>, vector<1x384xf32>
    %cst_83 = arith.constant dense<0.000000e+00> : vector<64xf32>
    %160 = vector.multi_reduction <add>, %157, %cst_83 [1] : vector<64x384xf32> to vector<64xf32>
    %161 = vector.shape_cast %160 : vector<64xf32> to vector<64x1xf32>
    %cst_84 = arith.constant 3.840000e+02 : f32
    %162 = vector.broadcast %cst_84 : f32 to vector<64x1xf32>
    %163 = arith.divf %161, %162 : vector<64x1xf32>
    %164 = vector.broadcast %163 : vector<64x1xf32> to vector<64x384xf32>
    %165 = arith.subf %157, %164 : vector<64x384xf32>
    %166 = arith.mulf %165, %165 : vector<64x384xf32>
    %cst_85 = arith.constant dense<0.000000e+00> : vector<64xf32>
    %167 = vector.multi_reduction <add>, %166, %cst_85 [1] : vector<64x384xf32> to vector<64xf32>
    %168 = vector.shape_cast %167 : vector<64xf32> to vector<64x1xf32>
    %cst_86 = arith.constant 3.840000e+02 : f32
    %169 = vector.broadcast %cst_86 : f32 to vector<64x1xf32>
    %170 = arith.divf %168, %169 : vector<64x1xf32>
    %171 = vector.broadcast %163 : vector<64x1xf32> to vector<64x384xf32>
    %172 = arith.subf %157, %171 : vector<64x384xf32>
    %cst_87 = arith.constant 9.99999974E-6 : f32
    %173 = vector.broadcast %cst_87 : f32 to vector<64x1xf32>
    %174 = arith.addf %170, %173 : vector<64x1xf32>
    %175 = math.rsqrt %174 : vector<64x1xf32>
    %176 = vector.broadcast %175 : vector<64x1xf32> to vector<64x384xf32>
    %177 = arith.mulf %172, %176 : vector<64x384xf32>
    %178 = vector.broadcast %158 : vector<1x384xf32> to vector<64x384xf32>
    %179 = arith.mulf %177, %178 : vector<64x384xf32>
    %180 = vector.broadcast %159 : vector<1x384xf32> to vector<64x384xf32>
    %181 = arith.addf %179, %180 : vector<64x384xf32>
    %182 = arith.truncf %181 : vector<64x384xf32> to vector<64x384xbf16>
    %c0_88 = arith.constant 0 : index
    %c0_89 = arith.constant 0 : index
    %183 = vector.load %arg9[%c0_88, %c0_89] : memref<384x1536xbf16, #tpu.memory_space<vmem>>, vector<384x1536xbf16>
    %cst_90 = arith.constant dense<0.000000e+00> : vector<64x1536xf32>
    %184 = tpu.matmul %182, %183, %cst_90 {dimension_numbers = #tpu.dot_dimension_numbers<[1], [0], [0], [1], [0, 0, 1, 1], [], []>} : vector<64x384xbf16>, vector<384x1536xbf16>, vector<64x1536xf32> -> vector<64x1536xf32>
    %c0_91 = arith.constant 0 : index
    %c0_92 = arith.constant 0 : index
    %185 = vector.load %arg10[%c0_91, %c0_92] : memref<1x1536xf32, #tpu.memory_space<vmem>>, vector<1x1536xf32>
    %186 = vector.broadcast %185 : vector<1x1536xf32> to vector<64x1536xf32>
    %187 = arith.addf %184, %186 : vector<64x1536xf32>
    %cst_93 = arith.constant 0.000000e+00 : f32
    %188 = vector.broadcast %cst_93 : f32 to vector<64x1536xf32>
    %189 = arith.maximumf %187, %188 : vector<64x1536xf32>
    %190 = arith.truncf %189 : vector<64x1536xf32> to vector<64x1536xbf16>
    %c0_94 = arith.constant 0 : index
    %c0_95 = arith.constant 0 : index
    %191 = vector.load %arg11[%c0_94, %c0_95] : memref<1536x384xbf16, #tpu.memory_space<vmem>>, vector<1536x384xbf16>
    %cst_96 = arith.constant dense<0.000000e+00> : vector<64x384xf32>
    %192 = tpu.matmul %190, %191, %cst_96 {dimension_numbers = #tpu.dot_dimension_numbers<[1], [0], [0], [1], [0, 0, 1, 1], [], []>} : vector<64x1536xbf16>, vector<1536x384xbf16>, vector<64x384xf32> -> vector<64x384xf32>
    %c0_97 = arith.constant 0 : index
    %c0_98 = arith.constant 0 : index
    %193 = vector.load %arg12[%c0_97, %c0_98] : memref<1x384xf32, #tpu.memory_space<vmem>>, vector<1x384xf32>
    %194 = vector.broadcast %193 : vector<1x384xf32> to vector<64x384xf32>
    %195 = arith.addf %192, %194 : vector<64x384xf32>
    %196 = arith.addf %157, %195 : vector<64x384xf32>
    %197 = vector.shape_cast %196 : vector<64x384xf32> to vector<1x64x384xf32>
    %c0_99 = arith.constant 0 : index
    %c0_100 = arith.constant 0 : index
    %c0_101 = arith.constant 0 : index
    %198 = vector.load %arg13[%c0_99, %c0_100, %c0_101] : memref<1x64x384xf32, #tpu.memory_space<vmem>>, vector<1x64x384xf32>
    tpu.vector_store %arg13[%c0_99, %c0_100, %c0_101], %197 {strides = array<i32>} : memref<1x64x384xf32, #tpu.memory_space<vmem>>, vector<1x64x384xf32>,
    return
  }
  func.func @transform_0(%arg0: i32) -> (i32, i32, i32) {
    %c0_i32 = arith.constant 0 : i32
    %c0_i32_0 = arith.constant 0 : i32
    %c0_i32_1 = arith.constant 0 : i32
    return %arg0, %c0_i32, %c0_i32_0 : i32, i32, i32
  }
  func.func @transform_1(%arg0: i32) -> (i32, i32) {
    %c0_i32 = arith.constant 0 : i32
    %c0_i32_0 = arith.constant 0 : i32
    %c0_i32_1 = arith.constant 0 : i32
    return %c0_i32, %c0_i32_0 : i32, i32
  }
  func.func @transform_2(%arg0: i32) -> (i32, i32) {
    %c0_i32 = arith.constant 0 : i32
    %c0_i32_0 = arith.constant 0 : i32
    %c0_i32_1 = arith.constant 0 : i32
    return %c0_i32, %c0_i32_0 : i32, i32
  }
  func.func @transform_3(%arg0: i32) -> (i32, i32) {
    %c0_i32 = arith.constant 0 : i32
    %c0_i32_0 = arith.constant 0 : i32
    %c0_i32_1 = arith.constant 0 : i32
    return %c0_i32, %c0_i32_0 : i32, i32
  }
  func.func @transform_4(%arg0: i32) -> (i32, i32) {
    %c0_i32 = arith.constant 0 : i32
    %c0_i32_0 = arith.constant 0 : i32
    %c0_i32_1 = arith.constant 0 : i32
    return %c0_i32, %c0_i32_0 : i32, i32
  }
  func.func @transform_5(%arg0: i32) -> (i32, i32) {
    %c0_i32 = arith.constant 0 : i32
    %c0_i32_0 = arith.constant 0 : i32
    %c0_i32_1 = arith.constant 0 : i32
    return %c0_i32, %c0_i32_0 : i32, i32
  }
  func.func @transform_6(%arg0: i32) -> (i32, i32) {
    %c0_i32 = arith.constant 0 : i32
    %c0_i32_0 = arith.constant 0 : i32
    %c0_i32_1 = arith.constant 0 : i32
    return %c0_i32, %c0_i32_0 : i32, i32
  }
  func.func @transform_7(%arg0: i32) -> (i32, i32) {
    %c0_i32 = arith.constant 0 : i32
    %c0_i32_0 = arith.constant 0 : i32
    %c0_i32_1 = arith.constant 0 : i32
    return %c0_i32, %c0_i32_0 : i32, i32
  }
  func.func @transform_8(%arg0: i32) -> (i32, i32) {
    %c0_i32 = arith.constant 0 : i32
    %c0_i32_0 = arith.constant 0 : i32
    %c0_i32_1 = arith.constant 0 : i32
    return %c0_i32, %c0_i32_0 : i32, i32
  }
  func.func @transform_9(%arg0: i32) -> (i32, i32) {
    %c0_i32 = arith.constant 0 : i32
    %c0_i32_0 = arith.constant 0 : i32
    %c0_i32_1 = arith.constant 0 : i32
    return %c0_i32, %c0_i32_0 : i32, i32
  }
  func.func @transform_10(%arg0: i32) -> (i32, i32) {
    %c0_i32 = arith.constant 0 : i32
    %c0_i32_0 = arith.constant 0 : i32
    %c0_i32_1 = arith.constant 0 : i32
    return %c0_i32, %c0_i32_0 : i32, i32
  }
  func.func @transform_11(%arg0: i32) -> (i32, i32) {
    %c0_i32 = arith.constant 0 : i32
    %c0_i32_0 = arith.constant 0 : i32
    %c0_i32_1 = arith.constant 0 : i32
    return %c0_i32, %c0_i32_0 : i32, i32
  }
  func.func @transform_12(%arg0: i32) -> (i32, i32, i32) {
    %c0_i32 = arith.constant 0 : i32
    %c0_i32_0 = arith.constant 0 : i32
    %c0_i32_1 = arith.constant 0 : i32
    return %arg0, %c0_i32, %c0_i32_0 : i32, i32, i32
  }
}

</mosaic_0001>

<bundles_post_ra>
// kernel: tpu_custom_call.1
= control target key start
LH: loop header
LB: loop body
LE: loop exit
PB: predicated region body
PF: predicated region fallthrough
CT: control target
= control target key end

     0   :  { %s18588_s0 = inlined_call_operand.hbm [shape: f32[2,64,384], index: 0, kind: input, shape index: {}]   ;;  %s18589_s1 = inlined_call_operand.hbm [shape: f32[1,384], index: 1, kind: input, shape index: {}]   ;;  %s18590_s2 = inlined_call_operand.hbm [shape: f32[1,384], index: 2, kind: input, shape index: {}]   ;;  %s18591_s3 = inlined_call_operand.hbm [shape: bf16[384,1152], index: 3, kind: input, shape index: {}]   ;;  %s18592_s4 = inlined_call_operand.hbm [shape: bf16[384,384], index: 4, kind: input, shape index: {}]   ;;  %s18593_s5 = inlined_call_operand.hbm [shape: f32[1,384], index: 5, kind: input, shape index: {}]   ;;  %s18594_s6 = inlined_call_operand.hbm [shape: f32[1,384], index: 6, kind: input, shape index: {}]   ;;  %s18595_s7 = inlined_call_operand.hbm [shape: f32[1,384], index: 7, kind: input, shape index: {}]   ;;  %s18596_s8 = inlined_call_operand.hbm [shape: bf16[384,1536], index: 8, kind: input, shape index: {}]   ;;  %s18597_s9 = inlined_call_operand.hbm [shape: f32[1,1536], index: 9, kind: input, shape index: {}]   ;;  %s18598_s10 = inlined_call_operand.hbm [shape: bf16[1536,384], index: 10, kind: input, shape index: {}]   ;;  %s18599_s11 = inlined_call_operand.hbm [shape: f32[1,384], index: 11, kind: input, shape index: {}]   ;;  %s18600_s12 = inlined_call_operand.hbm [shape: f32[2,64,384], index: 12, kind: output, shape index: {}]  }
   0x1   :  { %18632 = sst [smem:[#allocation46_spill]] %s18589_s1 }
   0x2   :  { %18633 = sst [smem:[#allocation47_spill]] %s18590_s2 }
   0x3   :  { %18634 = sst [smem:[#allocation48_spill]] %s18591_s3 }
   0x4   :  { %18635 = sst [smem:[#allocation49_spill]] %s18593_s5 }
   0x5   :  { %18636 = sst [smem:[#allocation50_spill]] %s18600_s12 }
   0x6   :  { %17 = vsyncpa [#allocation5], 0 }
   0x7   :  { %19 = vsyncpa [#allocation5 + $0x1], 0 }
   0x8   :  { %20 = vsyncpa [#allocation8], 0 }
   0x9   :  { %21 = vsyncpa [#allocation11], 0 }
   0xa   :  { %22 = vsyncpa [#allocation14], 0 }
   0xb   :  { %23 = vsyncpa [#allocation17], 0 }
   0xc   :  { %24 = vsyncpa [#allocation20], 0 }
   0xd   :  { %25 = vsyncpa [#allocation23], 0 }
   0xe   :  { %26 = vsyncpa [#allocation6], 0 }
   0xf   :  { %28 = vsyncpa [#allocation6 + $0x1], 0  ;;  %s15964_s21 = smov 0   ;;  %s15966_s22 = smov 0  }
  0x10   :  { %s15968_s23 = smov 0   ;;  %s15970_s24 = smov 0  }
  0x11 LB: > { %s15873_s25 = smov [#allocation7]   ;;  %s15985_s27 = sadd.s32 4294967295, %s15871_s24   ;;  %s15871_s24 = sphi %s15970_s24, %s18715_s24   ;;  %s15867_s23 = sphi %s15968_s23, %s18714_s23   ;;  %s15863_s22 = sphi %s15966_s22, %s18713_s22   ;;  %s15859_s21 = sphi %s15964_s21, %s18712_s21  }
  0x12   : > { %s335_s26 = sshll.u32 %s15873_s25, 4  ;;  %p11750_p0 = scmp.ge.s32.totalorder %s15871_s24, 1  ;;  %s15990_s26 = int_to_ptr.vmem [resolvable:$true] %s335_s26 }
  0x13   : > { %p18603_p1 = scmp.eq.s32.totalorder %s15985_s27, 0  ;;  %p322_p2 = scmp.lt.s32.totalorder %s15871_s24, 3 }
  0x14   : > { %s15874_s29 = smov [#allocation10]   ;;  %s15875_s14 = smov [#allocation13]  }
  0x15   : > { %p15992_p3 = pnand %p11750_p0, %p322_p2  ;;  %s356_s30 = sshll.u32 %s15874_s29, 4  ;;  %s15999_s30 = int_to_ptr.vmem [resolvable:$true] %s356_s30 }
  0x16   : > { %s383_s15 = sshll.u32 %s15875_s14, 4  ;;  %s18640_s1 = sld [smem:[#allocation46_spill]]  ;;  %s16007_s15 = int_to_ptr.vmem [resolvable:$true] %s383_s15 }
  0x17   : > { %s18637_s28 = scalar_select %p15992_p3, 1, 0 }
  0x18   : > { %p13831_p5 = pneg %p15992_p3 }
  0x19   : > { %18638 = sst [smem:[#allocation33_spill]] %s18637_s28 }
  0x1a   : > { %p16003_p6 = pnand %p13831_p5, %p18603_p1 }
  0x1c   : > { %s15443_s18 = scalar_lea.hbm %s18640_s1, 48  ;;  %p16017_p8 = pneg %p16003_p6 }
  0x1d   : > { %p15444_p7 = scmp.ne.s32.totalorder %s18640_s1, %s15443_s18  ;;  %p15450_p11 = scmp.lt.u32.totalorder %s15443_s18, %s18640_s1 }
  0x1f   : > { %p15446_p9 = pnand %p16017_p8, %p15444_p7 }
  0x21   : > { %p15447_p10 = pneg %p15446_p9 }
  0x23   : > { %p15452_p12 = pnand %p15450_p11, %p15447_p10 }
  0x25   : > { %15455 = shalt.err (!%p15452_p12)
}
  0x26   : > { %s15456_s16 = scalar_lea.vmem %s15990_s26, 48  ;;  %s15463_s17 = scalar_lea.vmem %s15990_s26, 64 }
  0x27   : > { %p15457_p13 = scmp.ne.s32.totalorder %s15990_s26, %s15456_s16  ;;  %p15464_p5 = scmp.lt.s32.totalorder %s15990_s26, %s15990_s26 }
  0x28   : > { %p15465_p7 = scmp.lt.s32.totalorder %s15463_s17, %s15456_s16 }
  0x29   : > { %p15459_p0 = pnand %p15457_p13, %p16017_p8 }
  0x2a   : > { %p15466_p9 = por %p15465_p7, %p15464_p5 }
  0x2b   : > { %p15460_p2 = pneg %p15459_p0 }
  0x2d   : > { %p15467_p4 = pnand %p15466_p9, %p15460_p2 }
  0x2f   : > { %15470 = shalt.err (!%p15467_p4)
}
  0x30   : > { %13834 = dma.hbm_to_vmem [thread:$0]  (!%p16003_p6), %s18640_s1, 48, %s15990_s26, [#allocation8]  }
  0x31   : > { %s18642_s3 = sld [smem:[#allocation48_spill]] }
  0x37   : > { %s15471_s14 = scalar_lea.hbm %s18642_s3, 27648 }
  0x38   : > { %p15472_p10 = scmp.ne.s32.totalorder %s18642_s3, %s15471_s14  ;;  %p15478_p4 = scmp.lt.u32.totalorder %s15471_s14, %s18642_s3 }
  0x3a   : > { %p15474_p11 = pnand %p15472_p10, %p16017_p8 }
  0x3c   : > { %p15475_p12 = pneg %p15474_p11 }
  0x3e   : > { %p15480_p13 = pnand %p15478_p4, %p15475_p12 }
  0x40   : > { %15483 = shalt.err (!%p15480_p13)
}
  0x41   : > { %s15484_s26 = scalar_lea.vmem %s15999_s30, 27648  ;;  %p15492_p7 = scmp.lt.s32.totalorder %s15999_s30, %s15999_s30 }
  0x42   : > { %p15485_p0 = scmp.ne.s32.totalorder %s15999_s30, %s15484_s26  ;;  %p15493_p9 = scmp.lt.s32.totalorder %s15484_s26, %s15484_s26 }
  0x44   : > { %p15487_p2 = pnand %p15485_p0, %p16017_p8  ;;  %p15494_p10 = por %p15493_p9, %p15492_p7 }
  0x46   : > { %p15488_p5 = pneg %p15487_p2 }
  0x48   : > { %p15495_p11 = pnand %p15494_p10, %p15488_p5 }
  0x4a   : > { %15498 = shalt.err (!%p15495_p11)
}
  0x4b   : > { %s15876_s12 = smov 576   ;;  %s15877_s28 = smov 36  }
  0x4c   : > { %13840 = dma.hbm_to_vmem [thread:$0]  (!%p16003_p6), %s18642_s3, 27648, %s15999_s30, [#allocation11], %s15876_s12, %s15876_s12, %s15877_s28  }
  0x4d   : > { %s18643_s5 = sld [smem:[#allocation49_spill]] }
  0x53   : > { %s15499_s14 = scalar_lea.hbm %s18643_s5, 48 }
  0x54   : > { %p15500_p12 = scmp.ne.s32.totalorder %s18643_s5, %s15499_s14  ;;  %p15506_p0 = scmp.lt.u32.totalorder %s15499_s14, %s18643_s5 }
  0x56   : > { %p15502_p4 = pnand %p15500_p12, %p16017_p8 }
  0x58   : > { %p15503_p13 = pneg %p15502_p4 }
  0x5a   : > { %p15508_p2 = pnand %p15506_p0, %p15503_p13 }
  0x5c   : > { %15511 = shalt.err (!%p15508_p2)
}
  0x5d   : > { %s15512_s30 = scalar_lea.vmem %s16007_s15, 48  ;;  %s15519_s12 = scalar_lea.vmem %s16007_s15, 64 }
  0x5e   : > { %p15513_p5 = scmp.ne.s32.totalorder %s16007_s15, %s15512_s30  ;;  %p15520_p10 = scmp.lt.s32.totalorder %s16007_s15, %s16007_s15 }
  0x5f   : > { %p15521_p11 = scmp.lt.s32.totalorder %s15519_s12, %s15512_s30 }
  0x60   : > { %p15515_p7 = pnand %p15513_p5, %p16017_p8 }
  0x61   : > { %p15522_p12 = por %p15521_p11, %p15520_p10 }
  0x62   : > { %p15516_p9 = pneg %p15515_p7 }
  0x64   : > { %p15523_p4 = pnand %p15522_p12, %p15516_p9 }
  0x66   : > { %15526 = shalt.err (!%p15523_p4)
}
  0x67   : > { %13846 = dma.hbm_to_vmem [thread:$0]  (!%p16003_p6), %s18643_s5, 48, %s16007_s15, [#allocation14]  }
  0x68   : > { %s15878_s18 = smov [#allocation16]   ;;  %s15879_s20 = smov [#allocation19]  }
  0x69   : > { %s405_s19 = sshll.u32 %s15878_s18, 4  ;;  %s429_s29 = sshll.u32 %s15879_s20, 4  ;;  %s406_s19 = int_to_ptr.vmem [resolvable:$true] %s405_s19  ;;  %s430_s29 = int_to_ptr.vmem [resolvable:$true] %s429_s29 }
  0x6a   : > { %s15527_s17 = scalar_lea.hbm %s18595_s7, 48 }
  0x6b   : > { %p15528_p13 = scmp.ne.s32.totalorder %s18595_s7, %s15527_s17  ;;  %p15534_p5 = scmp.lt.u32.totalorder %s15527_s17, %s18595_s7 }
  0x6d   : > { %p15530_p0 = pnand %p15528_p13, %p16017_p8 }
  0x6f   : > { %p15531_p2 = pneg %p15530_p0 }
  0x71   : > { %p15536_p7 = pnand %p15534_p5, %p15531_p2 }
  0x73   : > { %15539 = shalt.err (!%p15536_p7)
}
  0x74   : > { %s15540_s15 = scalar_lea.vmem %s406_s19, 48  ;;  %s15547_s28 = scalar_lea.vmem %s406_s19, 64 }
  0x75   : > { %p15541_p9 = scmp.ne.s32.totalorder %s406_s19, %s15540_s15  ;;  %p15548_p12 = scmp.lt.s32.totalorder %s406_s19, %s406_s19 }
  0x76   : > { %p15549_p4 = scmp.lt.s32.totalorder %s15547_s28, %s15540_s15 }
  0x77   : > { %p15543_p10 = pnand %p15541_p9, %p16017_p8 }
  0x78   : > { %p15550_p1 = por %p15549_p4, %p15548_p12 }
  0x79   : > { %p15544_p11 = pneg %p15543_p10 }
  0x7b   : > { %p15551_p3 = pnand %p15550_p1, %p15544_p11 }
  0x7d   : > { %15554 = shalt.err (!%p15551_p3)
}
  0x7e   : > { %13852 = dma.hbm_to_vmem [thread:$0]  (!%p16003_p6), %s18595_s7, 48, %s406_s19, [#allocation17]  }
  0x7f   : > { %s15555_s17 = scalar_lea.hbm %s18597_s9, 192 }
  0x80   : > { %p15556_p13 = scmp.ne.s32.totalorder %s18597_s9, %s15555_s17  ;;  %p15562_p3 = scmp.lt.u32.totalorder %s15555_s17, %s18597_s9 }
  0x82   : > { %p15558_p0 = pnand %p15556_p13, %p16017_p8 }
  0x84   : > { %p15559_p1 = pneg %p15558_p0 }
  0x86   : > { %p15564_p2 = pnand %p15562_p3, %p15559_p1 }
  0x88   : > { %15567 = shalt.err (!%p15564_p2)
}
  0x89   : > { %s15568_s15 = scalar_lea.vmem %s430_s29, 192  ;;  %p15576_p10 = scmp.lt.s32.totalorder %s430_s29, %s430_s29 }
  0x8a   : > { %p15569_p5 = scmp.ne.s32.totalorder %s430_s29, %s15568_s15  ;;  %p15577_p11 = scmp.lt.s32.totalorder %s15568_s15, %s15568_s15 }
  0x8c   : > { %p15571_p7 = pnand %p15569_p5, %p16017_p8  ;;  %p15578_p12 = por %p15577_p11, %p15576_p10 }
  0x8e   : > { %p15572_p9 = pneg %p15571_p7 }
  0x90   : > { %p15579_p4 = pnand %p15578_p12, %p15572_p9 }
  0x92   : > { %15582 = shalt.err (!%p15579_p4)
}
  0x93   : > { %13858 = dma.hbm_to_vmem [thread:$0]  (!%p16003_p6), %s18597_s9, 192, %s430_s29, [#allocation20]  }
  0x94   : > { %s15880_s18 = smov [#allocation9]   ;;  %s15881_s14 = smov [#allocation12]  }
  0x95   : > { %s346_s20 = sshll.u32 %s15880_s18, 4  ;;  %s369_s16 = sshll.u32 %s15881_s14, 4  ;;  %s347_s20 = int_to_ptr.vmem [resolvable:$true] %s346_s20  ;;  %s370_s16 = int_to_ptr.vmem [resolvable:$true] %s369_s16 }
  0x96   : > { %s18644_s2 = sld [smem:[#allocation47_spill]] }
  0x9c   : > { %s15583_s30 = scalar_lea.hbm %s18644_s2, 48 }
  0x9d   : > { %p15584_p13 = scmp.ne.s32.totalorder %s18644_s2, %s15583_s30  ;;  %p15590_p3 = scmp.lt.u32.totalorder %s15583_s30, %s18644_s2 }
  0x9f   : > { %p15586_p0 = pnand %p15584_p13, %p16017_p8 }
  0xa1   : > { %p15587_p1 = pneg %p15586_p0 }
  0xa3   : > { %p15592_p2 = pnand %p15590_p3, %p15587_p1 }
  0xa5   : > { %15595 = shalt.err (!%p15592_p2)
}
  0xa6   : > { %s15596_s29 = scalar_lea.vmem %s347_s20, 48  ;;  %s15603_s28 = scalar_lea.vmem %s347_s20, 64 }
  0xa7   : > { %p15597_p5 = scmp.ne.s32.totalorder %s347_s20, %s15596_s29  ;;  %p15604_p10 = scmp.lt.s32.totalorder %s347_s20, %s347_s20 }
  0xa8   : > { %p15605_p11 = scmp.lt.s32.totalorder %s15603_s28, %s15596_s29 }
  0xa9   : > { %p15599_p7 = pnand %p15597_p5, %p16017_p8 }
  0xaa   : > { %p15606_p12 = por %p15605_p11, %p15604_p10 }
  0xab   : > { %p15600_p9 = pneg %p15599_p7 }
  0xad   : > { %p15607_p4 = pnand %p15606_p12, %p15600_p9 }
  0xaf   : > { %15610 = shalt.err (!%p15607_p4)
}
  0xb0   : > { %13837 = dma.hbm_to_vmem [thread:$0]  (!%p16003_p6), %s18644_s2, 48, %s347_s20, [#allocation8]  }
  0xb1   : > { %s15611_s30 = scalar_lea.hbm %s18592_s4, 9216 }
  0xb2   : > { %p15612_p13 = scmp.ne.s32.totalorder %s18592_s4, %s15611_s30  ;;  %p15618_p3 = scmp.lt.u32.totalorder %s15611_s30, %s18592_s4 }
  0xb4   : > { %p15614_p0 = pnand %p15612_p13, %p16017_p8 }
  0xb6   : > { %p15615_p1 = pneg %p15614_p0 }
  0xb8   : > { %p15620_p2 = pnand %p15618_p3, %p15615_p1 }
  0xba   : > { %15623 = shalt.err (!%p15620_p2)
}
  0xbb   : > { %s15624_s29 = scalar_lea.vmem %s370_s16, 9216  ;;  %p15632_p10 = scmp.lt.s32.totalorder %s370_s16, %s370_s16 }
  0xbc   : > { %p15625_p5 = scmp.ne.s32.totalorder %s370_s16, %s15624_s29  ;;  %p15633_p11 = scmp.lt.s32.totalorder %s15624_s29, %s15624_s29 }
  0xbe   : > { %p15627_p7 = pnand %p15625_p5, %p16017_p8  ;;  %p15634_p12 = por %p15633_p11, %p15632_p10 }
  0xc0   : > { %p15628_p9 = pneg %p15627_p7 }
  0xc2   : > { %p15635_p4 = pnand %p15634_p12, %p15628_p9 }
  0xc4   : > { %15638 = shalt.err (!%p15635_p4)
}
  0xc5   : > { %s18605_s20 = smov 192   ;;  %s18606_s28 = smov 12  }
  0xc6   : > { %13843 = dma.hbm_to_vmem [thread:$0]  (!%p16003_p6), %s18592_s4, 9216, %s370_s16, [#allocation11], %s18605_s20, %s18605_s20, %s18606_s28  }
  0xc7   : > { %s15884_s17 = smov [#allocation15]   ;;  %s15885_s30 = smov [#allocation18]  }
  0xc8   : > { %s394_s26 = sshll.u32 %s15884_s17, 4  ;;  %s415_s12 = sshll.u32 %s15885_s30, 4  ;;  %s395_s26 = int_to_ptr.vmem [resolvable:$true] %s394_s26  ;;  %s416_s12 = int_to_ptr.vmem [resolvable:$true] %s415_s12 }
  0xc9   : > { %s15639_s19 = scalar_lea.hbm %s18594_s6, 48 }
  0xca   : > { %p15640_p13 = scmp.ne.s32.totalorder %s18594_s6, %s15639_s19  ;;  %p15646_p3 = scmp.lt.u32.totalorder %s15639_s19, %s18594_s6 }
  0xcc   : > { %p15642_p0 = pnand %p15640_p13, %p16017_p8 }
  0xce   : > { %p15643_p1 = pneg %p15642_p0 }
  0xd0   : > { %p15648_p2 = pnand %p15646_p3, %p15643_p1 }
  0xd2   : > { %15651 = shalt.err (!%p15648_p2)
}
  0xd3   : > { %s15652_s16 = scalar_lea.vmem %s395_s26, 48  ;;  %s15659_s18 = scalar_lea.vmem %s395_s26, 64 }
  0xd4   : > { %p15653_p5 = scmp.ne.s32.totalorder %s395_s26, %s15652_s16  ;;  %p15660_p10 = scmp.lt.s32.totalorder %s395_s26, %s395_s26 }
  0xd5   : > { %p15661_p11 = scmp.lt.s32.totalorder %s15659_s18, %s15652_s16 }
  0xd6   : > { %p15655_p7 = pnand %p15653_p5, %p16017_p8 }
  0xd7   : > { %p15662_p12 = por %p15661_p11, %p15660_p10 }
  0xd8   : > { %p15656_p9 = pneg %p15655_p7 }
  0xda   : > { %p15663_p4 = pnand %p15662_p12, %p15656_p9 }
  0xdc   : > { %15666 = shalt.err (!%p15663_p4)
}
  0xdd   : > { %13849 = dma.hbm_to_vmem [thread:$0]  (!%p16003_p6), %s18594_s6, 48, %s395_s26, [#allocation14]  }
  0xde   : > { %s15667_s17 = scalar_lea.hbm %s18596_s8, 36864 }
  0xdf   : > { %p15668_p13 = scmp.ne.s32.totalorder %s18596_s8, %s15667_s17  ;;  %p15674_p3 = scmp.lt.u32.totalorder %s15667_s17, %s18596_s8 }
  0xe1   : > { %p15670_p0 = pnand %p15668_p13, %p16017_p8 }
  0xe3   : > { %p15671_p1 = pneg %p15670_p0 }
  0xe5   : > { %p15676_p2 = pnand %p15674_p3, %p15671_p1 }
  0xe7   : > { %15679 = shalt.err (!%p15676_p2)
}
  0xe8   : > { %s15680_s29 = scalar_lea.vmem %s416_s12, 36864  ;;  %p15688_p10 = scmp.lt.s32.totalorder %s416_s12, %s416_s12 }
  0xe9   : > { %p15681_p5 = scmp.ne.s32.totalorder %s416_s12, %s15680_s29  ;;  %p15689_p11 = scmp.lt.s32.totalorder %s15680_s29, %s15680_s29 }
  0xeb   : > { %p15683_p7 = pnand %p15681_p5, %p16017_p8  ;;  %p15690_p12 = por %p15689_p11, %p15688_p10 }
  0xed   : > { %p15684_p9 = pneg %p15683_p7 }
  0xef   : > { %p15691_p4 = pnand %p15690_p12, %p15684_p9 }
  0xf1   : > { %15694 = shalt.err (!%p15691_p4)
}
  0xf2   : > { %s15886_s26 = smov 768   ;;  %s15887_s16 = smov 48  }
  0xf3   : > { %13855 = dma.hbm_to_vmem [thread:$0]  (!%p16003_p6), %s18596_s8, 36864, %s416_s12, [#allocation17], %s15886_s26, %s15886_s26, %s15887_s16  }
  0xf4   : > { %s15888_s14 = smov [#allocation21]   ;;  %s15889_s5 = smov [#allocation22]  }
  0xf5   : > { %s439_s3 = sshll.u32 %s15888_s14, 4  ;;  %s453_s17 = sshll.u32 %s15889_s5, 4  ;;  %s440_s3 = int_to_ptr.vmem [resolvable:$true] %s439_s3  ;;  %s454_s17 = int_to_ptr.vmem [resolvable:$true] %s453_s17 }
  0xf6   : > { %s15695_s15 = scalar_lea.hbm %s18598_s10, 36864 }
  0xf7   : > { %p15696_p13 = scmp.ne.s32.totalorder %s18598_s10, %s15695_s15  ;;  %p15702_p3 = scmp.lt.u32.totalorder %s15695_s15, %s18598_s10 }
  0xf9   : > { %p15698_p0 = pnand %p15696_p13, %p16017_p8 }
  0xfb   : > { %p15699_p1 = pneg %p15698_p0 }
  0xfd   : > { %p15704_p2 = pnand %p15702_p3, %p15699_p1 }
  0xff   : > { %15707 = shalt.err (!%p15704_p2)
}
 0x100   : > { %s15708_s12 = scalar_lea.vmem %s440_s3, 36864  ;;  %p15716_p10 = scmp.lt.s32.totalorder %s440_s3, %s440_s3 }
 0x101   : > { %p15709_p5 = scmp.ne.s32.totalorder %s440_s3, %s15708_s12  ;;  %p15717_p11 = scmp.lt.s32.totalorder %s15708_s12, %s15708_s12 }
 0x103   : > { %p15711_p7 = pnand %p15709_p5, %p16017_p8  ;;  %p15718_p12 = por %p15717_p11, %p15716_p10 }
 0x105   : > { %p15712_p9 = pneg %p15711_p7 }
 0x107   : > { %p15719_p4 = pnand %p15718_p12, %p15712_p9 }
 0x109   : > { %15722 = shalt.err (!%p15719_p4)
}
 0x10a   : > { %s18645_s26 = smov 12   ;;  %s18646_s16 = smov 192  }
 0x10b   : > { %13861 = dma.hbm_to_vmem [thread:$0]  (!%p16003_p6), %s18598_s10, 36864, %s440_s3, [#allocation20], %s18646_s16, %s18646_s16, %s18645_s26  }
 0x10c   : > { %s15723_s14 = scalar_lea.hbm %s18599_s11, 48 }
 0x10d   : > { %p15724_p13 = scmp.ne.s32.totalorder %s18599_s11, %s15723_s14  ;;  %p15730_p3 = scmp.lt.u32.totalorder %s15723_s14, %s18599_s11 }
 0x10f   : > { %p15726_p0 = pnand %p15724_p13, %p16017_p8 }
 0x111   : > { %p15727_p1 = pneg %p15726_p0 }
 0x113   : > { %p15732_p2 = pnand %p15730_p3, %p15727_p1 }
 0x115   : > { %15735 = shalt.err (!%p15732_p2)
}
 0x116   : > { %s15736_s19 = scalar_lea.vmem %s454_s17, 48  ;;  %s15743_s3 = scalar_lea.vmem %s454_s17, 64 }
 0x117   : > { %p15737_p5 = scmp.ne.s32.totalorder %s454_s17, %s15736_s19  ;;  %p15744_p10 = scmp.lt.s32.totalorder %s454_s17, %s454_s17 }
 0x118   : > { %p15745_p11 = scmp.lt.s32.totalorder %s15743_s3, %s15736_s19 }
 0x119   : > { %p15739_p7 = pnand %p15737_p5, %p16017_p8 }
 0x11a   : > { %p15746_p12 = por %p15745_p11, %p15744_p10 }
 0x11b   : > { %p15740_p9 = pneg %p15739_p7 }
 0x11d   : > { %p15747_p4 = pnand %p15746_p12, %p15740_p9 }
 0x11f   : > { %15750 = shalt.err (!%p15747_p4)
}
 0x120   : > { %13864 = dma.hbm_to_vmem [thread:$0]  (!%p16003_p6), %s18599_s11, 48, %s454_s17, [#allocation23]  }
 0x121   : > { %s11749_s25 = sadd.s32 4294967294, %s15871_s24   ;;  %s16238_s13 = sadd.s32 1, %s15871_s24  }
 0x122   : > { %s41_s26 = sadd.s32 1, %s15867_s23  ;;  %s38_s16 = ssub.s32 %s15871_s24, %s16238_s13 }
 0x123   : > { %p48_p8 = scmp.ne.s32.totalorder %s15867_s23, %s15863_s22  ;;  %p39_p13 = scmp.eq.s32.totalorder %s38_s16, 0 }
 0x124   : > { %p49_p0 = scmp.eq.s32.totalorder %s15871_s24, 0  ;;  %p54_p1 = scmp.ne.s32.totalorder %s15863_s22, %s15859_s21 }
 0x125   : > { %p309_p3 = scmp.eq.s32.totalorder %s15985_s27, 1  ;;  %p18647_p5 = scmp.eq.s32.totalorder %s15985_s27, 0 }
 0x126   : > { %s16250_s20 = scalar_select %p39_p13, %s15867_s23, %s41_s26  }
 0x127   : > { %p50_p2 = por %p49_p0, %p48_p8  ;;  %p16254_p7 = por %p18647_p5, %p54_p1 }
 0x128   : > { %p16258_p6 = por %p309_p3, %p48_p8  ;;  %p315_p9 = scmp.eq.s32.totalorder %s11749_s25, 1 }
 0x129   : > { %p13884_p10 = scmp.lt.s32.totalorder %s15871_s24, 2  ;;  %s464_s18 = sand.u32 1, %s15867_s23  }
 0x12a   : > { %s18649_s17 = scalar_select %p16258_p6, 1, 0 }
 0x12b   : > { %p16264_p11 = por %p315_p9, %p54_p1  ;;  %s13779_s14 = smul.u32 192, %s464_s18 }
 0x12c   : > { %p16268_p12 = pnand %p13884_p10, %p50_p2  ;;  %s13780_s30 = smul.u32 3072, %s15871_s24 }
 0x12d   : > { %s18650_s2 = scalar_select %p16264_p11, 1, 0 }
 0x12e   : > { %s16276_s19 = scalar_lea.hbm %s18588_s0, %s13780_s30  ;;  %s468_s3 = scalar_lea.vmem [#allocation4], %s13779_s14 }
 0x12f   : > { %s475_s29 = sshll.u32 %s468_s3, 4  ;;  %s16280_s12 = scalar_lea.sflag [#allocation5], %s464_s18  ;;  %s16278_s29 = int_to_ptr.vmem [resolvable:$true] %s475_s29 }
 0x130   : > { %s15751_s25 = scalar_lea.hbm %s16276_s19, 3072  ;;  %p15753_p8 = pneg %p16268_p12 }
 0x131   : > { %p15752_p4 = scmp.ne.s32.totalorder %s16276_s19, %s15751_s25  ;;  %s15756_s30 = scalar_lea.hbm %s18588_s0, 6144 }
 0x132   : > { %p15757_p1 = scmp.lt.u32.totalorder %s16276_s19, %s18588_s0  ;;  %p15758_p3 = scmp.lt.u32.totalorder %s15756_s30, %s15751_s25 }
 0x133   : > { %p15754_p13 = pnand %p15753_p8, %p15752_p4  ;;  %p15760_p5 = scmp.lt.u32.totalorder %s15751_s25, %s16276_s19 }
 0x134   : > { %p15759_p2 = por %p15758_p3, %p15757_p1 }
 0x135   : > { %p15755_p0 = pneg %p15754_p13 }
 0x136   : > { %p15761_p9 = por %p15760_p5, %p15759_p2 }
 0x138   : > { %p15762_p10 = pnand %p15761_p9, %p15755_p0 }
 0x13a   : > { %15765 = shalt.err (!%p15762_p10)
}
 0x13b   : > { %s15766_s18 = scalar_lea.vmem %s16278_s29, 3072  ;;  %s15890_s14 = smov [#allocation4]  }
 0x13c   : > { %p15767_p4 = scmp.ne.s32.totalorder %s16278_s29, %s15766_s18  ;;  %s15771_s3 = sshll.u32 %s15890_s14, 4  ;;  %s15772_s3 = int_to_ptr.vmem [resolvable:$false] %s15771_s3 }
 0x13d   : > { %s15773_s26 = scalar_lea.vmem %s15772_s3, 6144  ;;  %p15774_p6 = scmp.lt.s32.totalorder %s16278_s29, %s15772_s3 }
 0x13e   : > { %p15769_p13 = pnand %p15767_p4, %p15753_p8  ;;  %p15775_p1 = scmp.lt.s32.totalorder %s15773_s26, %s15766_s18 }
 0x140   : > { %p15770_p11 = pneg %p15769_p13  ;;  %p15776_p3 = por %p15775_p1, %p15774_p6 }
 0x142   : > { %p15777_p2 = pnand %p15776_p3, %p15770_p11 }
 0x144   : > { %15780 = shalt.err (!%p15777_p2)
}
 0x145   : > { %s15891_s25 = smov 384   ;;  %s15892_s16 = smov 24  }
 0x146   : > { %13868 = dma.hbm_to_vmem [thread:$0]  (!%p16268_p12), %s16276_s19, 3072, %s16278_s29, %s16280_s12, %s15891_s25, %s15891_s25, %s15892_s16  }
 0x147   : > { %s18652_s30 = sld [smem:[#allocation33_spill]] }
 0x14d   : > { %p18653_p8 = scmp.ne.s32.totalorder %s18652_s30, 0 }
 0x14f   : > { %487 = sbr.rel (%p18653_p8) target bundleno = 5902 (0x170e), region = 68 }
 0x156   : > { %s16311_s1 = sand.u32 1, %s15863_s22  }
 0x157   : > { %s13781_s15 = smul.u32 192, %s16311_s1  ;;  %s490_s18 = scalar_lea.sflag [#allocation5], %s16311_s1 }
 0x159   : > { %s16317_s14 = scalar_lea.vmem [#allocation4], %s13781_s15 }
 0x15a   : > { %15826 = dma.done.wait (%p16254_p7), %s490_s18, 3072  }
 0x15b   : > { %15828 = vsyncadd (%p16254_p7), %s490_s18, 4294964224  ;;  %p18654_p6 = scmp.eq.s32.totalorder %s15985_s27, 0 }
 0x15d   : > { %15830 = dma.done.wait (%p18654_p6), [#allocation8], 96   ;;  %p18655_p11 = pmov %p18654_p6 }
 0x15e   : > { %p18656_p12 = pmov %p18654_p6 }
 0x15f   : > { %15832 = vsyncadd (%p18655_p11), [#allocation8], 4294967200 }
 0x160   : > { %15834 = dma.done.wait (%p18656_p12), [#allocation11], 36864   ;;  %p18657_p0 = pmov %p18654_p6 }
 0x162   : > { %15836 = vsyncadd (%p18657_p0), [#allocation11], 4294930432  ;;  %p18658_p5 = pmov %p18657_p0 }
 0x163   : > { %p18659_p9 = pmov %p18657_p0 }
 0x164   : > { %15838 = dma.done.wait (%p18658_p5), [#allocation14], 96  }
 0x165   : > { %15840 = vsyncadd (%p18659_p9), [#allocation14], 4294967200  ;;  %p18660_p7 = pmov %p18657_p0 }
 0x166   : > { %p18661_p10 = pmov %p18657_p0 }
 0x167   : > { %15842 = dma.done.wait (%p18660_p7), [#allocation17], 36912  }
 0x168   : > { %15844 = vsyncadd (%p18661_p10), [#allocation17], 4294930384  ;;  %p18662_p4 = pmov %p18657_p0 }
 0x169   : > { %p18663_p13 = pmov %p18657_p0 }
 0x16a   : > { %15846 = dma.done.wait (%p18662_p4), [#allocation20], 37056  }
 0x16b   : > { %15848 = vsyncadd (%p18663_p13), [#allocation20], 4294930240  ;;  %p18664_p1 = pmov %p18657_p0 }
 0x16c   : > { %p18665_p3 = pmov %p18657_p0 }
 0x16d   : > { %15850 = dma.done.wait (%p18664_p1), [#allocation23], 48  }
 0x16e   : > { %15852 = vsyncadd (%p18665_p3), [#allocation23], 4294967248  ;;  %v16348_v0 = vld [vmem:[%s16317_s14] sm:$0xff]  ;;  %v16351_v1 = vld [vmem:[%s16317_s14 + $0x8] sm:$0xff]  ;;  %vm3035_vm0 = vcmask 523264   ;;  %s15894_s28 = smov 64  }
 0x16f   : > { %v16354_v2 = vld [vmem:[%s16317_s14 + $0x10] sm:$0xff]  ;;  %v605_v3 = vadd.f32 %v16351_v1, %v16348_v0  ;;  %v16362_v5 = vld [vmem:[%s16317_s14 + $0x38] sm:$0xff]  ;;  %v16365_v6 = vld [vmem:[%s16317_s14 + $0x40] sm:$0xff]  ;;  %vm3632_vm9 = vcmask 1048064   ;;  %s18484_s5 = scalar_lea.vmem [#allocation24], %s13781_s15  ;;  %s13782_s19 = smul.u32 3072, %s15985_s27 }
 0x170   : > { %v16359_v4 = vld [vmem:[%s16317_s14 + $0x30] sm:$0xff]  ;;  %v582_v8 = vld [vmem:[%s16317_s14 + $0x18] sm:$0xff]  ;;  %v583_v9 = vld [vmem:[%s16317_s14 + $0x20] sm:$0xff]  ;;  %s11571_s29 = sshll.u32 %s18484_s5, 4  ;;  %s18707_s26 = sld [smem:[#allocation50_spill]]  ;;  %s18542_s29 = int_to_ptr.vmem [resolvable:$true] %s11571_s29 }
 0x171   : > { %v613_v7 = vadd.f32 %v16362_v5, %v16359_v4  ;;  %v584_v10 = vld [vmem:[%s16317_s14 + $0x28] sm:$0xff]  ;;  %v606_v11 = vadd.f32 %v605_v3, %v16354_v2  ;;  %v609_v12 = vadd.f32 %v583_v9, %v582_v8  ;;  %v589_v14 = vld [vmem:[%s16317_s14 + $0x50] sm:$0xff]  ;;  %v590_v15 = vld [vmem:[%s16317_s14 + $0x58] sm:$0xff]  ;;  %s11558_s25 = scalar_lea.sflag [#allocation6], %s16311_s1  ;;  %s15781_s16 = scalar_lea.vmem %s18542_s29, 3072 }
 0x172   : > { %v588_v13 = vld [vmem:[%s16317_s14 + $0x48] sm:$0xff]  ;;  %v591_v18 = vld [vmem:[%s16317_s14 + $0x60] sm:$0xff]  ;;  %v594_v22 = vld [vmem:[%s16317_s14 + $0x78] sm:$0xff]  ;;  %p15782_p2 = scmp.ne.s32.totalorder %s18542_s29, %s15781_s16  ;;  %p18709_p8 = scmp.ne.s32.totalorder %s18649_s17, 0 }
 0x173   : > { %v614_v16 = vadd.f32 %v613_v7, %v16365_v6  ;;  %v617_v17 = vadd.f32 %v589_v14, %v588_v13  ;;  %v592_v19 = vld [vmem:[%s16317_s14 + $0x68] sm:$0xff]  ;;  %607 = vadd.xlane.f32.xlu0 %v606_v11  ;;  %v610_v20 = vadd.f32 %v609_v12, %v584_v10  ;;  %v595_v23 = vld [vmem:[%s16317_s14 + $0x80] sm:$0xff]  ;;  %v593_v25 = vld [vmem:[%s16317_s14 + $0x70] sm:$0xff]  ;;  %s15896_s30 = smov [#allocation24]  }
 0x174   : > { %v621_v21 = vadd.f32 %v592_v19, %v591_v18  ;;  %v625_v26 = vadd.f32 %v595_v23, %v594_v22  ;;  %v597_v27 = vld [vmem:[%s16317_s14 + $0x90] sm:$0xff]  ;;  %v598_v28 = vld [vmem:[%s16317_s14 + $0x98] sm:$0xff]  ;;  %v596_v29 = vld [vmem:[%s16317_s14 + $0x88] sm:$0xff]  ;;  %p15783_p6 = pnand %p15782_p2, %p18709_p8  ;;  %s15785_s15 = sshll.u32 %s15896_s30, 4  ;;  %s15786_s15 = int_to_ptr.vmem [resolvable:$false] %s15785_s15 }
 0x175   : > { %615 = vadd.xlane.f32.xlu1 %v614_v16  ;;  %v618_v24 = vadd.f32 %v617_v17, %v590_v15  ;;  %v600_v30 = vld [vmem:[%s16317_s14 + $0xa8] sm:$0xff]  ;;  %v601_v31 = vld [vmem:[%s16317_s14 + $0xb0] sm:$0xff]  ;;  %v599_v32 = vld [vmem:[%s16317_s14 + $0xa0] sm:$0xff]  ;;  %v629_v34 = vadd.f32 %v598_v28, %v597_v27  ;;  %s15787_s18 = scalar_lea.vmem %s15786_s15, 6144  ;;  %p15788_p12 = scmp.lt.s32.totalorder %s18542_s29, %s15786_s15 }
 0x176   : > { %v622_v33 = vadd.f32 %v621_v21, %v593_v25  ;;  %v602_v35 = vld [vmem:[%s16317_s14 + $0xb8] sm:$0xff]  ;;  %v626_v36 = vadd.f32 %v625_v26, %v596_v29  ;;  %v633_v37 = vadd.f32 %v601_v31, %v600_v30  ;;  %v13953_v40 = vld [vmem:[#allocation10 + $0x4] ss:$36 sps:$4 sm:$0xff]   ;;  %v13962_v49 = vld [vmem:[#allocation10 + $0xdc] ss:$36 sps:$4 sm:$0xff]   ;;  %s18538_s27 = scalar_lea.hbm %s18707_s26, %s13782_s19  ;;  %p15784_p11 = pneg %p15783_p6 }
 0x177   : > { %611 = vadd.xlane.f32.xlu0 %v610_v20  ;;  %v630_v38 = vadd.f32 %v629_v34, %v599_v32  ;;  %v13955_v41 = vld [vmem:[#allocation10] ss:$36 sps:$4 sm:$0xff]   ;;  %v13956_v42 = vld [vmem:[#allocation10 + $0x4c] ss:$36 sps:$4 sm:$0xff]   ;;  %2210 = vmatprep.subr.bf16.mxu0 %v13953_v40  ;;  %v13959_v44 = vld [vmem:[#allocation10 + $0x94] ss:$36 sps:$4 sm:$0xff]   ;;  %p15789_p0 = scmp.lt.s32.totalorder %s15787_s18, %s15781_s16 }
 0x178   : > { %v634_v39 = vadd.f32 %v633_v37, %v602_v35  ;;  %2211 = vmatpush1.bf16.msra.mxu0 %v13955_v41  ;;  %v13958_v43 = vld [vmem:[#allocation10 + $0x48] ss:$36 sps:$4 sm:$0xff]   ;;  %v13961_v46 = vld [vmem:[#allocation10 + $0x90] ss:$36 sps:$4 sm:$0xff]   ;;  %v13964_v51 = vld [vmem:[#allocation10 + $0xd8] ss:$36 sps:$4 sm:$0xff]  }
 0x179   : > { %619 = vadd.xlane.f32.xlu1 %v618_v24  ;;  %2212 = vmatprep.subr.bf16.mxu0 %v13956_v42  ;;  %v13977_v45 = vld [vmem:[#allocation10 + $0x48c] ss:$36 sps:$4 sm:$0xff]   ;;  %v13983_v48 = vld [vmem:[#allocation10 + $0x4d4] ss:$36 sps:$4 sm:$0xff]   ;;  %v13965_v52 = vld [vmem:[#allocation10 + $0x124] ss:$36 sps:$4 sm:$0xff]   ;;  %p15790_p5 = por %p15789_p0, %p15788_p12 }
 0x17a   : > { %v13981_v47 = vld [vmem:[#allocation10 + $0x488] ss:$36 sps:$4 sm:$0xff]   ;;  %2429 = vmatprep.subr.bf16.mxu1 %v13977_v45  ;;  %v13987_v50 = vld [vmem:[#allocation10 + $0x4d0] ss:$36 sps:$4 sm:$0xff]   ;;  %v13967_v53 = vld [vmem:[#allocation10 + $0x120] ss:$36 sps:$4 sm:$0xff]  }
 0x17b   : > { %623 = vadd.xlane.f32.xlu0 %v622_v33  ;;  %2430 = vmatpush1.bf16.msra.mxu1 %v13981_v47  ;;  %v13968_v54 = vld [vmem:[#allocation10 + $0x16c] ss:$36 sps:$4 sm:$0xff]   ;;  %v13971_v56 = vld [vmem:[#allocation10 + $0x1b4] ss:$36 sps:$4 sm:$0xff]   ;;  %v13974_v58 = vld [vmem:[#allocation10 + $0x1fc] ss:$36 sps:$4 sm:$0xff]   ;;  %p15791_p9 = pnand %p15790_p5, %p15784_p11 }
 0x17c   : > { %2213 = vmatpush1.bf16.msra.mxu0 %v13958_v43  ;;  %2431 = vmatprep.subr.bf16.mxu1 %v13983_v48  ;;  %v13970_v55 = vld [vmem:[#allocation10 + $0x168] ss:$36 sps:$4 sm:$0xff]   ;;  %v13973_v57 = vld [vmem:[#allocation10 + $0x1b0] ss:$36 sps:$4 sm:$0xff]   ;;  %v13976_v59 = vld [vmem:[#allocation10 + $0x1f8] ss:$36 sps:$4 sm:$0xff]  }
 0x17d   : > { %627 = vadd.xlane.f32.xlu1 %v626_v36  ;;  %2214 = vmatprep.subr.bf16.mxu0 %v13959_v44  ;;  %v13979_v60 = vld [vmem:[#allocation10 + $0x244] ss:$36 sps:$4 sm:$0xff]   ;;  %v13985_v62 = vld [vmem:[#allocation10 + $0x28c] ss:$36 sps:$4 sm:$0xff]   ;;  %v15402_v21 = vld [vmem:[%s16317_s14 + $0x20] sm:$0xff] }
 0x17e   : > { %v13982_v61 = vld [vmem:[#allocation10 + $0x240] ss:$36 sps:$4 sm:$0xff]   ;;  %v15401_v19 = vld [vmem:[%s16317_s14 + $0x18] sm:$0xff]  ;;  %v15405_v28 = vld [vmem:[%s16317_s14 + $0x50] sm:$0xff] }
 0x17f   : > { %631 = vadd.xlane.f32.xlu0 %v630_v38  ;;  %2432 = vmatpush1.bf16.msra.mxu1 %v13987_v50  ;;  %v15403_v24 = vld [vmem:[%s16317_s14 + $0x28] sm:$0xff]  ;;  %v15406_v32 = vld [vmem:[%s16317_s14 + $0x58] sm:$0xff]  ;;  %v15407_v43 = vld [vmem:[%s16317_s14 + $0x60] sm:$0xff] }
 0x180   : > { %2215 = vmatpush1.bf16.msra.mxu0 %v13961_v46  ;;  %v15404_v26 = vld [vmem:[%s16317_s14 + $0x48] sm:$0xff] }
 0x181   : > { %635 = vadd.xlane.f32.xlu1 %v634_v39  ;;  %2216 = vmatprep.subr.bf16.mxu0 %v13962_v49  ;;  %v15408_v45 = vld [vmem:[%s16317_s14 + $0x68] sm:$0xff]  ;;  %v15409_v49 = vld [vmem:[%s16317_s14 + $0x78] sm:$0xff] }
 0x184   : > { %2217 = vmatpush1.bf16.msra.mxu0 %v13964_v51  ;;  %v15410_v51 = vld [vmem:[%s16317_s14 + $0x80] sm:$0xff] }
 0x185   : > { %2218 = vmatprep.subr.bf16.mxu0 %v13965_v52 }
 0x188   : > { %2219 = vmatpush1.bf16.msra.mxu0 %v13967_v53 }
 0x189   : > { %2220 = vmatprep.subr.bf16.mxu0 %v13968_v54 }
 0x18c   : > { %2221 = vmatpush1.bf16.msra.mxu0 %v13970_v55  ;;  %v15411_v55 = vld [vmem:[%s16317_s14 + $0x70] sm:$0xff] }
 0x18d   : > { %2222 = vmatprep.subr.bf16.mxu0 %v13971_v56 }
 0x190   : > { %2223 = vmatpush1.bf16.msra.mxu0 %v13973_v57 }
 0x191   : > { %2224 = vmatprep.subr.bf16.mxu0 %v13974_v58 }
 0x194   : > { %2225 = vmatpush1.bf16.msra.mxu0 %v13976_v59 }
 0x195   : > { %2226 = vmatprep.subr.bf16.mxu0 %v13979_v60 }
 0x198   : > { %2227 = vmatpush1.bf16.msra.mxu0 %v13982_v61 }
 0x199   : > { %2228 = vmatprep.subr.bf16.mxu0 %v13985_v62 }
 0x200   : > { %v608_v63 = vpop.xlane.xlu0 %607 }
 0x201   : > { %v638_v3 = vmul.f32 0.0026041667, %v608_v63 }
 0x202   : > { %v616_v7 = vpop.xlane.xlu1 %615 }
 0x203   : > { %v640_v8 = vmul.f32 0.0026041667, %v616_v7  ;;  %v16390_v9 = vsub.f32 %v16348_v0, %v638_v3  ;;  %v16393_v10 = vsub.f32 %v16351_v1, %v638_v3  ;;  %v16396_v11 = vsub.f32 %v16354_v2, %v638_v3  ;;  %v15412_v7 = vld [vmem:[%s16317_s14 + $0x88] sm:$0xff] }
 0x204   : > { %v612_v14 = vpop.xlane.xlu0 %611 }
 0x205   : > { %v16399_v12 = vsub.f32 %v16359_v4, %v640_v8  ;;  %v16402_v13 = vsub.f32 %v16362_v5, %v640_v8  ;;  %v16405_v15 = vsub.f32 %v16365_v6, %v640_v8  ;;  %v639_v0 = vmul.f32 0.0026041667, %v612_v14  ;;  %v15413_v14 = vld [vmem:[%s16317_s14 + $0x90] sm:$0xff] }
 0x206   : > { %v620_v16 = vpop.xlane.xlu1 %619  ;;  %v670_v1 = vmul.f32 %v16390_v9, %v16390_v9  ;;  %v671_v2 = vmul.f32 %v16393_v10, %v16393_v10  ;;  %v672_v4 = vmul.f32 %v16396_v11, %v16396_v11 }
 0x207   : > { %v641_v5 = vmul.f32 0.0026041667, %v620_v16  ;;  %v676_v17 = vmul.f32 %v16399_v12, %v16399_v12  ;;  %v677_v6 = vmul.f32 %v16402_v13, %v16402_v13  ;;  %v678_v18 = vmul.f32 %v16405_v15, %v16405_v15  ;;  %v15414_v16 = vld [vmem:[%s16317_s14 + $0x98] sm:$0xff] }
 0x208   : > { %v16420_v20 = vsub.f32 %v15401_v19, %v639_v0  ;;  %v16423_v22 = vsub.f32 %v15402_v21, %v639_v0  ;;  %v694_v23 = vadd.f32 %v671_v2, %v670_v1  ;;  %v16426_v25 = vsub.f32 %v15403_v24, %v639_v0  ;;  %v624_v30 = vpop.xlane.xlu0 %623  ;;  %v15417_v24 = vld [vmem:[%s16317_s14 + $0xa0] sm:$0xff] }
 0x209   : > { %v16429_v27 = vsub.f32 %v15404_v26, %v641_v5  ;;  %v16432_v29 = vsub.f32 %v15405_v28, %v641_v5  ;;  %v702_v31 = vadd.f32 %v677_v6, %v676_v17  ;;  %v16435_v33 = vsub.f32 %v15406_v32, %v641_v5  ;;  %v15416_v17 = vld [vmem:[%s16317_s14 + $0xb0] sm:$0xff]  ;;  %v15418_v32 = vld [vmem:[%s16317_s14 + $0xb8] sm:$0xff] }
 0x20a   : > { %v642_v34 = vmul.f32 0.0026041667, %v624_v30  ;;  %v695_v35 = vadd.f32 %v694_v23, %v672_v4  ;;  %v628_v36 = vpop.xlane.xlu1 %627  ;;  %v673_v37 = vmul.f32 %v16420_v20, %v16420_v20  ;;  %v674_v38 = vmul.f32 %v16423_v22, %v16423_v22  ;;  %v15415_v4 = vld [vmem:[%s16317_s14 + $0xa8] sm:$0xff] }
 0x20b   : > { %v643_v39 = vmul.f32 0.0026041667, %v628_v36  ;;  %v703_v40 = vadd.f32 %v702_v31, %v678_v18  ;;  %v675_v41 = vmul.f32 %v16426_v25, %v16426_v25  ;;  %v679_v42 = vmul.f32 %v16429_v27, %v16429_v27 }
 0x20c   : > { %v16446_v44 = vsub.f32 %v15407_v43, %v642_v34  ;;  %v16449_v46 = vsub.f32 %v15408_v45, %v642_v34  ;;  %696 = vadd.xlane.f32.xlu0 %v695_v35  ;;  %v698_v47 = vadd.f32 %v674_v38, %v673_v37  ;;  %v680_v48 = vmul.f32 %v16432_v29, %v16432_v29  ;;  %v632_v53 = vpop.xlane.xlu0 %631 }
 0x20d   : > { %v16454_v50 = vsub.f32 %v15409_v49, %v643_v39  ;;  %v16457_v52 = vsub.f32 %v15410_v51, %v643_v39  ;;  %v681_v54 = vmul.f32 %v16435_v33, %v16435_v33  ;;  %v16462_v56 = vsub.f32 %v15411_v55, %v642_v34  ;;  %v13991_v49 = vld [vmem:[#allocation10 + $0x2d4] ss:$36 sps:$4 sm:$0xff]   ;;  %v13997_v55 = vld [vmem:[#allocation10 + $0x31c] ss:$36 sps:$4 sm:$0xff]  }
 0x20e   : > { %v644_v57 = vmul.f32 0.0026041667, %v632_v53  ;;  %v699_v58 = vadd.f32 %v698_v47, %v675_v41  ;;  %v636_v59 = vpop.xlane.xlu1 %635  ;;  %v706_v60 = vadd.f32 %v680_v48, %v679_v42  ;;  %v682_v61 = vmul.f32 %v16446_v44, %v16446_v44  ;;  %v13988_v47 = vld [vmem:[#allocation10 + $0x288] ss:$36 sps:$4 sm:$0xff]   ;;  %v13989_v48 = vld [vmem:[#allocation10 + $0x51c] ss:$36 sps:$4 sm:$0xff]  }
 0x20f   : > { %v645_v62 = vmul.f32 0.0026041667, %v636_v59  ;;  %v683_v63 = vmul.f32 %v16449_v46, %v16449_v46  ;;  %v684_v3 = vmul.f32 %v16462_v56, %v16462_v56  ;;  %v16471_v8 = vsub.f32 %v15412_v7, %v643_v39  ;;  %2229 = vmatpush1.bf16.msra.mxu0 %v13988_v47  ;;  %v13993_v51 = vld [vmem:[#allocation10 + $0x518] ss:$36 sps:$4 sm:$0xff]   ;;  %2433 = vmatprep.subr.bf16.mxu1 %v13989_v48  ;;  %v13994_v53 = vld [vmem:[#allocation10 + $0x2d0] ss:$36 sps:$4 sm:$0xff]  }
 0x210   : > { %v16474_v0 = vsub.f32 %v15413_v14, %v644_v57  ;;  %v16477_v1 = vsub.f32 %v15414_v16, %v644_v57  ;;  %704 = vadd.xlane.f32.xlu0 %v703_v40  ;;  %700 = vadd.xlane.f32.xlu1 %v699_v58  ;;  %v707_v2 = vadd.f32 %v706_v60, %v681_v54  ;;  %v13995_v54 = vld [vmem:[#allocation10 + $0x564] ss:$36 sps:$4 sm:$0xff]   ;;  %v14000_v58 = vld [vmem:[#allocation10 + $0x318] ss:$36 sps:$4 sm:$0xff]   ;;  %v14001_v59 = vld [vmem:[#allocation10 + $0x5ac] ss:$36 sps:$4 sm:$0xff]  }
 0x211   : > { %v16480_v5 = vsub.f32 %v15415_v4, %v645_v62  ;;  %v16483_v6 = vsub.f32 %v15416_v17, %v645_v62  ;;  %v710_v18 = vadd.f32 %v683_v63, %v682_v61  ;;  %v685_v19 = vmul.f32 %v16454_v50, %v16454_v50  ;;  %2230 = vmatprep.subr.bf16.mxu0 %v13991_v49  ;;  %v14003_v60 = vld [vmem:[#allocation10 + $0x364] ss:$36 sps:$4 sm:$0xff]   ;;  %v14007_v63 = vld [vmem:[#allocation10 + $0x5f4] ss:$36 sps:$4 sm:$0xff]   ;;  %v14013_v16 = vld [vmem:[#allocation10 + $0x63c] ss:$36 sps:$4 sm:$0xff]  }
 0x212   : > { %v686_v21 = vmul.f32 %v16457_v52, %v16457_v52  ;;  %v687_v23 = vmul.f32 %v16471_v8, %v16471_v8  ;;  %v16492_v26 = vsub.f32 %v15417_v24, %v644_v57  ;;  %v688_v28 = vmul.f32 %v16474_v0, %v16474_v0  ;;  %2434 = vmatpush1.bf16.msra.mxu1 %v13993_v51  ;;  %v13999_v57 = vld [vmem:[#allocation10 + $0x560] ss:$36 sps:$4 sm:$0xff]   ;;  %v14005_v61 = vld [vmem:[#allocation10 + $0x5a8] ss:$36 sps:$4 sm:$0xff]   ;;  %v14011_v7 = vld [vmem:[#allocation10 + $0x5f0] ss:$36 sps:$4 sm:$0xff]  }
 0x213   : > { %v711_v30 = vadd.f32 %v710_v18, %v684_v3  ;;  %v689_v31 = vmul.f32 %v16477_v1, %v16477_v1  ;;  %v16499_v34 = vsub.f32 %v15418_v32, %v645_v62  ;;  %v691_v35 = vmul.f32 %v16480_v5, %v16480_v5  ;;  %2231 = vmatpush1.bf16.msra.mxu0 %v13994_v53  ;;  %v14006_v62 = vld [vmem:[#allocation10 + $0x360] ss:$36 sps:$4 sm:$0xff]   ;;  %v14009_v3 = vld [vmem:[#allocation10 + $0x3ac] ss:$36 sps:$4 sm:$0xff]   ;;  %v14017_v4 = vld [vmem:[#allocation10 + $0x638] ss:$36 sps:$4 sm:$0xff]  }
 0x214   : > { %708 = vadd.xlane.f32.xlu1 %v707_v2  ;;  %v714_v36 = vadd.f32 %v686_v21, %v685_v19  ;;  %v690_v37 = vmul.f32 %v16492_v26, %v16492_v26  ;;  %v692_v38 = vmul.f32 %v16483_v6, %v16483_v6  ;;  %2435 = vmatprep.subr.bf16.mxu1 %v13995_v54  ;;  %v14012_v14 = vld [vmem:[#allocation10 + $0x3a8] ss:$36 sps:$4 sm:$0xff]   ;;  %v14015_v2 = vld [vmem:[#allocation10 + $0x3f4] ss:$36 sps:$4 sm:$0xff]   ;;  %v14021_v19 = vld [vmem:[#allocation10 + $0x43c] ss:$36 sps:$4 sm:$0xff]   ;;  %v775_v32 = vlaneseq }
 0x215   : > { %712 = vadd.xlane.f32.xlu0 %v711_v30  ;;  %v718_v39 = vadd.f32 %v689_v31, %v688_v28  ;;  %v693_v40 = vmul.f32 %v16499_v34, %v16499_v34  ;;  %2232 = vmatprep.subr.bf16.mxu0 %v13997_v55  ;;  %v14018_v17 = vld [vmem:[#allocation10 + $0x3f0] ss:$36 sps:$4 sm:$0xff]   ;;  %v14019_v18 = vld [vmem:[#allocation10 + $0x684] ss:$36 sps:$4 sm:$0xff]   ;;  %v14027_v24 = vld [vmem:[#allocation10 + $0x1c] ss:$36 sps:$4 sm:$0xff]  }
 0x216   : > { %v715_v41 = vadd.f32 %v714_v36, %v687_v23  ;;  %v722_v42 = vadd.f32 %v692_v38, %v691_v35  ;;  %2436 = vmatpush1.bf16.msra.mxu1 %v13999_v57  ;;  %v14023_v21 = vld [vmem:[#allocation10 + $0x680] ss:$36 sps:$4 sm:$0xff]   ;;  %v14024_v23 = vld [vmem:[#allocation10 + $0x438] ss:$36 sps:$4 sm:$0xff]   ;;  %v18608_v28 = vmov 0  }
 0x217   : > { %v719_v43 = vadd.f32 %v718_v39, %v690_v37  ;;  %2233 = vmatpush1.bf16.msra.mxu0 %v14000_v58  ;;  %2437 = vmatprep.subr.bf16.mxu1 %v14001_v59  ;;  %v14030_v30 = vld [vmem:[#allocation10 + $0x484] ss:$36 sps:$4 sm:$0xff]   ;;  %v16511_v39 = vshrl.u32 %v775_v32, 7  ;;  %v603_v53 = vld [vmem:[#allocation7] sm:$0x7] }
 0x218   : > { %716 = vadd.xlane.f32.xlu1 %v715_v41  ;;  %v723_v45 = vadd.f32 %v722_v42, %v693_v40  ;;  %2234 = vmatprep.subr.bf16.mxu0 %v14003_v60 }
 0x219   : > { %720 = vadd.xlane.f32.xlu0 %v719_v43  ;;  %2461 = vmatprep.mubr.bf16.mxu1 %v18608_v28  ;;  %18666 = vst [vmem:[#allocation34_spill] sm:$0xff] %v16511_v39  ;;  %v16514_v47 = vsub.s32 1, %v16511_v39  ;;  %v16517_v48 = vsub.s32 2, %v16511_v39 }
 0x21a   : > { %2438 = vmatpush1.bf16.msra.mxu1 %v14005_v61  ;;  %v16520_v61 = vsub.s32 0, %v16511_v39 }
 0x21b   : > { %2235 = vmatpush1.bf16.msra.mxu0 %v14006_v62  ;;  %2439 = vmatprep.subr.bf16.mxu1 %v14007_v63  ;;  %18667 = vst [vmem:[#allocation35_spill] sm:$0xff] %v16514_v47  ;;  %18668 = vst [vmem:[#allocation36_spill] sm:$0xff] %v16517_v48  ;;  %v16523_v63 = vrot.slane %v603_v53, %v16514_v47 }
 0x21c   : > { %724 = vadd.xlane.f32.xlu1 %v723_v45  ;;  %2236 = vmatprep.subr.bf16.mxu0 %v14009_v3  ;;  %18669 = vst [vmem:[#allocation37_spill] sm:$0xff] %v16520_v61  ;;  %v16526_v3 = vrot.slane %v603_v53, %v16517_v48 }
 0x21e   : > { %2440 = vmatpush1.bf16.msra.mxu1 %v14011_v7 }
 0x21f   : > { %2237 = vmatpush1.bf16.msra.mxu0 %v14012_v14  ;;  %2441 = vmatprep.subr.bf16.mxu1 %v14013_v16  ;;  %v604_v16 = vld [vmem:[#allocation9] sm:$0x7] }
 0x220   : > { %2238 = vmatprep.subr.bf16.mxu0 %v14015_v2 }
 0x222   : > { %2442 = vmatpush1.bf16.msra.mxu1 %v14017_v4 }
 0x223   : > { %2239 = vmatpush1.bf16.msra.mxu0 %v14018_v17  ;;  %2443 = vmatprep.subr.bf16.mxu1 %v14019_v18 }
 0x224   : > { %2240 = vmatprep.subr.bf16.mxu0 %v14021_v19 }
 0x226   : > { %2444 = vmatpush1.bf16.msra.mxu1 %v14023_v21 }
 0x227   : > { %2241 = vmatpush1.bf16.msra.mxu0 %v14024_v23  ;;  %2648 = vmatprep.subr.bf16.mxu1 %v14027_v24  ;;  %v16532_v23 = vrot.slane %v603_v53, %v16520_v61 }
 0x228   : > { %2283 = vmatprep.subr.bf16.mxu0 %v14030_v30  ;;  %v16536_v30 = vrot.slane %v604_v16, %v16514_v47 }
 0x299   : > { %v697_v31 = vpop.xlane.xlu0 %696 }
 0x29a   : > { %v726_v35 = vmul.f32 0.0026041667, %v697_v31 }
 0x29c   : > { %v734_v36 = vadd.f32 1e-05, %v726_v35  ;;  %v16540_v35 = vrot.slane %v604_v16, %v16517_v48 }
 0x29d   : > { %v701_v37 = vpop.xlane.xlu1 %700  ;;  %v705_v38 = vpop.xlane.xlu0 %704 }
 0x29e   : > { %15177 = vrsqrt.f32 %v734_v36  ;;  %v727_v40 = vmul.f32 0.0026041667, %v701_v37  ;;  %v728_v41 = vmul.f32 0.0026041667, %v705_v38  ;;  %v16545_v38 = vrot.slane %v604_v16, %v16520_v61 }
 0x2a0   : > { %v735_v42 = vadd.f32 1e-05, %v727_v40  ;;  %v736_v43 = vadd.f32 1e-05, %v728_v41 }
 0x2a1   : > { %v709_v45 = vpop.xlane.xlu1 %708 }
 0x2a2   : > { %15179 = vrsqrt.f32 %v735_v42  ;;  %v729_v49 = vmul.f32 0.0026041667, %v709_v45  ;;  %v713_v51 = vpop.xlane.xlu0 %712 }
 0x2a3   : > { %15181 = vrsqrt.f32 %v736_v43  ;;  %v730_v54 = vmul.f32 0.0026041667, %v713_v51 }
 0x2a4   : > { %v737_v55 = vadd.f32 1e-05, %v729_v49 }
 0x2a5   : > { %v738_v57 = vadd.f32 1e-05, %v730_v54  ;;  %v717_v58 = vpop.xlane.xlu1 %716 }
 0x2a6   : > { %15183 = vrsqrt.f32 %v737_v55  ;;  %v731_v59 = vmul.f32 0.0026041667, %v717_v58  ;;  %v721_v60 = vpop.xlane.xlu0 %720 }
 0x2a7   : > { %v732_v62 = vmul.f32 0.0026041667, %v721_v60  ;;  %15185 = vrsqrt.f32 %v738_v57  ;;  %v14028_v57 = vld [vmem:[#allocation10 + $0x480] ss:$36 sps:$4 sm:$0xff]  }
 0x2a8   : > { %v15178_v7 = vpop.eup %15177  ;;  %v739_v14 = vadd.f32 1e-05, %v731_v59  ;;  %v14033_v59 = vld [vmem:[#allocation10 + $0x64] ss:$36 sps:$4 sm:$0xff]  }
 0x2a9   : > { %v740_v2 = vadd.f32 1e-05, %v732_v62  ;;  %v725_v4 = vpop.xlane.xlu1 %724  ;;  %v751_v17 = vmul.f32 %v15178_v7, %v16393_v10  ;;  %v752_v18 = vmul.f32 %v15178_v7, %v16396_v11  ;;  %v750_v21 = vmul.f32 %v15178_v7, %v16390_v9 }
 0x2aa   : > { %15187 = vrsqrt.f32 %v739_v14  ;;  %v733_v19 = vmul.f32 0.0026041667, %v725_v4 }
 0x2ab   : > { %v791_v24 = vmul.f32 %v16523_v63, %v751_v17  ;;  %v792_v31 = vmul.f32 %v16526_v3, %v752_v18  ;;  %15189 = vrsqrt.f32 %v740_v2  ;;  %v790_v41 = vmul.f32 %v16532_v23, %v750_v21  ;;  %v14036_v2 = vld [vmem:[#allocation10 + $0x4cc] ss:$36 sps:$4 sm:$0xff]  }
 0x2ac   : > { %v15180_v10 = vpop.eup %15179  ;;  %v741_v36 = vadd.f32 1e-05, %v733_v19 }
 0x2ad   : > { %v15182_v11 = vpop.eup %15181  ;;  %v754_v37 = vmul.f32 %v15180_v10, %v16423_v22  ;;  %v755_v9 = vmul.f32 %v15180_v10, %v16426_v25  ;;  %v753_v40 = vmul.f32 %v15180_v10, %v16420_v20  ;;  %v831_v45 = vadd.f32 %v16536_v30, %v791_v24  ;;  %v14025_v25 = vld [vmem:[#allocation10 + $0x18] ss:$36 sps:$4 sm:$0xff]   ;;  %v14034_v10 = vld [vmem:[#allocation10 + $0x4c8] ss:$36 sps:$4 sm:$0xff]  }
 0x2ae   : > { %15191 = vrsqrt.f32 %v741_v36  ;;  %v757_v42 = vmul.f32 %v15182_v11, %v16402_v13  ;;  %v832_v22 = vadd.f32 %v16540_v35, %v792_v31  ;;  %v758_v20 = vmul.f32 %v15182_v11, %v16405_v15 }
 0x2af   : > { %v794_v43 = vmul.f32 %v16523_v63, %v754_v37  ;;  %v795_v49 = vmul.f32 %v16526_v3, %v755_v9  ;;  %v793_v53 = vmul.f32 %v16532_v23, %v753_v40  ;;  %v756_v55 = vmul.f32 %v15182_v11, %v16399_v12 }
 0x2b0   : > { %v15184_v51 = vpop.eup %15183  ;;  %v797_v54 = vmul.f32 %v16523_v63, %v757_v42  ;;  %v830_v14 = vadd.f32 %v16545_v38, %v790_v41  ;;  %v798_v21 = vmul.f32 %v16526_v3, %v758_v20  ;;  %v14039_v42 = vld [vmem:[#allocation10 + $0xac] ss:$36 sps:$4 sm:$0xff]  }
 0x2b1   : > { %v834_v13 = vadd.f32 %v16536_v30, %v794_v43  ;;  %v835_v58 = vadd.f32 %v16540_v35, %v795_v49  ;;  %v760_v60 = vmul.f32 %v15184_v51, %v16432_v29  ;;  %v761_v62 = vmul.f32 %v15184_v51, %v16435_v33  ;;  %v15186_v7 = vpop.eup %15185  ;;  %v14042_v43 = vld [vmem:[#allocation10 + $0x514] ss:$36 sps:$4 sm:$0xff]  }
 0x2b2   : > { %v833_v16 = vadd.f32 %v16545_v38, %v793_v53  ;;  %v759_v15 = vmul.f32 %v15184_v51, %v16429_v27  ;;  %v837_v33 = vadd.f32 %v16536_v30, %v797_v54  ;;  %v14031_v27 = vld [vmem:[#allocation10 + $0x60] ss:$36 sps:$4 sm:$0xff]   ;;  %v796_v36 = vmul.f32 %v16532_v23, %v756_v55 }
 0x2b3   : > { %v16565_v4 = vpack.c.bf16 %v834_v13, %v831_v45  ;;  %v16567_v12 = vpack.c.bf16 %v835_v58, %v832_v22  ;;  %v800_v17 = vmul.f32 %v16523_v63, %v760_v60  ;;  %v801_v18 = vmul.f32 %v16526_v3, %v761_v62  ;;  %v14045_v58 = vld [vmem:[#allocation10 + $0xf4] ss:$36 sps:$4 sm:$0xff]  }
 0x2b4   : > { %v15188_v19 = vpop.eup %15187  ;;  %v16571_v29 = vpack.c.bf16 %v833_v16, %v830_v14  ;;  %v799_v24 = vmul.f32 %v16532_v23, %v759_v15  ;;  %v763_v11 = vmul.f32 %v15186_v7, %v16449_v46  ;;  %v14037_v46 = vld [vmem:[#allocation10 + $0xa8] ss:$36 sps:$4 sm:$0xff]   ;;  %v838_v22 = vadd.f32 %v16540_v35, %v798_v21 }
 0x2b5   : > { %2242 = vmatprep.mubr.bf16.mxu0 %v16565_v4  ;;  %2462 = vmatmul.mubr.bf16.vlgmr.msra.gmra.mrb[0].mxu1 %v16567_v12  ;;  %v840_v31 = vadd.f32 %v16536_v30, %v800_v17  ;;  %v841_v37 = vadd.f32 %v16540_v35, %v801_v18  ;;  %v766_v9 = vmul.f32 %v15188_v19, %v16457_v52  ;;  %v16584_v40 = vpop.eup %15189  ;;  %v14051_v17 = vld [vmem:[#allocation10 + $0x13c] ss:$36 sps:$4 sm:$0xff]   ;;  %v14054_v18 = vld [vmem:[#allocation10 + $0x5a4] ss:$36 sps:$4 sm:$0xff]  }
 0x2b6   : > { %2649 = vmatpush1.bf16.msra.mxu1 %v14025_v25  ;;  %2243 = vmatmul.mubr.bf16.vlgmr.msra.gmra.mrb[0].mxu0 %v16571_v29  ;;  %v803_v45 = vmul.f32 %v16523_v63, %v763_v11  ;;  %v839_v51 = vadd.f32 %v16545_v38, %v799_v24  ;;  %v14040_v25 = vld [vmem:[#allocation10 + $0x510] ss:$36 sps:$4 sm:$0xff]   ;;  %v836_v53 = vadd.f32 %v16545_v38, %v796_v36  ;;  %v14049_v24 = vld [vmem:[#allocation10 + $0x138] ss:$36 sps:$4 sm:$0xff]  }
 0x2b7   : > { %2284 = vmatpush1.bf16.msra.mxu0 %v14028_v57  ;;  %2650 = vmatprep.subr.bf16.mxu1 %v14033_v59  ;;  %v16586_v41 = vpack.c.bf16 %v840_v31, %v837_v33  ;;  %v806_v52 = vmul.f32 %v16523_v63, %v766_v9  ;;  %v764_v54 = vmul.f32 %v15186_v7, %v16462_v56  ;;  %v14048_v59 = vld [vmem:[#allocation10 + $0x55c] ss:$36 sps:$4 sm:$0xff]  }
 0x2b8   : > { %v15192_v49 = vpop.eup %15191  ;;  %2285 = vmatprep.subr.bf16.mxu0 %v14036_v2  ;;  %2471 = vmatprep.mubr.bf16.mxu1 %v18608_v28  ;;  %v767_v20 = vmul.f32 %v15188_v19, %v16471_v8  ;;  %v765_v55 = vmul.f32 %v15188_v19, %v16454_v50  ;;  %v16598_v13 = vpack.c.bf16 %v841_v37, %v838_v22  ;;  %v14052_v31 = vld [vmem:[#allocation10 + $0x5a0] ss:$36 sps:$4 sm:$0xff]  }
 0x2b9   : > { %2252 = vmatprep.mubr.bf16.mxu0 %v16586_v41  ;;  %v846_v57 = vadd.f32 %v16536_v30, %v806_v52  ;;  %v762_v60 = vmul.f32 %v15186_v7, %v16446_v44  ;;  %v772_v62 = vmul.f32 %v15192_v49, %v16483_v6  ;;  %v843_v14 = vadd.f32 %v16536_v30, %v803_v45  ;;  %v14043_v44 = vld [vmem:[#allocation10 + $0xf0] ss:$36 sps:$4 sm:$0xff]   ;;  %v14046_v6 = vld [vmem:[#allocation10 + $0x558] ss:$36 sps:$4 sm:$0xff]  }
 0x2ba   : > { %2651 = vmatpush1.bf16.msra.mxu1 %v14031_v27  ;;  %v807_v56 = vmul.f32 %v16526_v3, %v767_v20  ;;  %v769_v50 = vmul.f32 %v16584_v40, %v16477_v1  ;;  %v16607_v8 = vpack.c.bf16 %v839_v51, %v836_v53  ;;  %v805_v16 = vmul.f32 %v16532_v23, %v765_v55  ;;  %v14060_v45 = vld [vmem:[#allocation10 + $0x5ec] ss:$36 sps:$4 sm:$0xff]   ;;  %v14066_v52 = vld [vmem:[#allocation10 + $0x634] ss:$36 sps:$4 sm:$0xff]  }
 0x2bb   : > { %2286 = vmatpush1.bf16.msra.mxu0 %v14034_v10  ;;  %2652 = vmatprep.subr.bf16.mxu1 %v14039_v42  ;;  %v16611_v2 = vpack.c.bf16 %v846_v57, %v843_v14  ;;  %v804_v7 = vmul.f32 %v16526_v3, %v764_v54  ;;  %v812_v15 = vmul.f32 %v16523_v63, %v772_v62  ;;  %v14063_v51 = vld [vmem:[#allocation10 + $0x1cc] ss:$36 sps:$4 sm:$0xff]   ;;  %v14069_v57 = vld [vmem:[#allocation10 + $0x214] ss:$36 sps:$4 sm:$0xff]  }
 0x2bc   : > { %2287 = vmatprep.subr.bf16.mxu0 %v14042_v43  ;;  %v802_v1 = vmul.f32 %v16532_v23, %v762_v60  ;;  %v847_v19 = vadd.f32 %v16540_v35, %v807_v56  ;;  %v809_v33 = vmul.f32 %v16523_v63, %v769_v50  ;;  %v773_v21 = vmul.f32 %v15192_v49, %v16499_v34  ;;  %v14057_v43 = vld [vmem:[#allocation10 + $0x184] ss:$36 sps:$4 sm:$0xff]   ;;  %v14067_v60 = vld [vmem:[#allocation10 + $0x210] ss:$36 sps:$4 sm:$0xff]   ;;  %v14070_v62 = vld [vmem:[#allocation10 + $0x678] ss:$36 sps:$4 sm:$0xff]  }
 0x2bd   : > { %2472 = vmatmul.mubr.bf16.gmra.mrb[4].mxu1 %v16598_v13  ;;  %v845_v27 = vadd.f32 %v16545_v38, %v805_v16  ;;  %v844_v10 = vadd.f32 %v16540_v35, %v804_v7  ;;  %v852_v36 = vadd.f32 %v16536_v30, %v812_v15  ;;  %v770_v11 = vmul.f32 %v16584_v40, %v16492_v26  ;;  %v14061_v53 = vld [vmem:[#allocation10 + $0x1c8] ss:$36 sps:$4 sm:$0xff]   ;;  %v14073_v14 = vld [vmem:[#allocation10 + $0x258] ss:$36 sps:$4 sm:$0xff]  }
 0x2be   : > { %2653 = vmatpush1.bf16.msra.mxu1 %v14037_v46  ;;  %2253 = vmatmul.mubr.bf16.gmra.mrb[4].mxu0 %v16607_v8  ;;  %v771_v37 = vmul.f32 %v15192_v49, %v16480_v5  ;;  %v842_v34 = vadd.f32 %v16545_v38, %v802_v1  ;;  %v768_v63 = vmul.f32 %v16584_v40, %v16474_v0  ;;  %v14055_v5 = vld [vmem:[#allocation10 + $0x180] ss:$36 sps:$4 sm:$0xff]   ;;  %v14058_v0 = vld [vmem:[#allocation10 + $0x5e8] ss:$36 sps:$4 sm:$0xff]   ;;  %v14084_v16 = vld [vmem:[#allocation10 + $0x54] ss:$36 sps:$4 sm:$0xff]  }
 0x2bf   : > { %2288 = vmatpush1.bf16.msra.mxu0 %v14040_v25  ;;  %2262 = vmatprep.mubr.bf16.mxu0 %v16611_v2  ;;  %v16631_v9 = vpack.c.bf16 %v847_v19, %v844_v10  ;;  %v849_v42 = vadd.f32 %v16536_v30, %v809_v33  ;;  %v813_v46 = vmul.f32 %v16526_v3, %v773_v21  ;;  %v14076_v56 = vld [vmem:[#allocation10 + $0x8] ss:$36 sps:$4 sm:$0xff]   ;;  %v14090_v15 = vld [vmem:[#allocation10 + $0x9c] ss:$36 sps:$4 sm:$0xff]   ;;  %v14091_v33 = vld [vmem:[#allocation10 + $0x330] ss:$36 sps:$4 sm:$0xff]  }
 0x2c0   : > { %2654 = vmatprep.subr.bf16.mxu1 %v14045_v58  ;;  %2289 = vmatprep.subr.bf16.mxu0 %v14048_v59  ;;  %v16635_v26 = vpack.c.bf16 %v845_v27, %v842_v34  ;;  %v811_v49 = vmul.f32 %v16532_v23, %v771_v37  ;;  %v810_v40 = vmul.f32 %v16526_v3, %v770_v11  ;;  %v14064_v3 = vld [vmem:[#allocation10 + $0x630] ss:$36 sps:$4 sm:$0xff]   ;;  %v14072_v58 = vld [vmem:[#allocation10 + $0x67c] ss:$36 sps:$4 sm:$0xff]   ;;  %v14081_v50 = vld [vmem:[#allocation10 + $0x2a4] ss:$36 sps:$4 sm:$0xff]  }
 0x2c1   : > { %2481 = vmatprep.mubr.bf16.mxu1 %v18608_v28  ;;  %v16639_v22 = vpack.c.bf16 %v852_v36, %v849_v42  ;;  %v808_v30 = vmul.f32 %v16532_v23, %v768_v63  ;;  %v853_v25 = vadd.f32 %v16540_v35, %v813_v46  ;;  %v14087_v7 = vld [vmem:[#allocation10 + $0x2ec] ss:$36 sps:$4 sm:$0xff]   ;;  %v14096_v19 = vld [vmem:[#allocation10 + $0xe4] ss:$36 sps:$4 sm:$0xff]   ;;  %v14108_v11 = vld [vmem:[#allocation10 + $0x174] ss:$36 sps:$4 sm:$0xff]  }
 0x2c2   : > { %2655 = vmatpush1.bf16.msra.mxu1 %v14043_v44  ;;  %v851_v54 = vadd.f32 %v16545_v38, %v811_v49  ;;  %v850_v20 = vadd.f32 %v16540_v35, %v810_v40  ;;  %v14075_v35 = vld [vmem:[#allocation10 + $0x25c] ss:$36 sps:$4 sm:$0xff]   ;;  %v14085_v1 = vld [vmem:[#allocation10 + $0x2e8] ss:$36 sps:$4 sm:$0xff]   ;;  %v14106_v34 = vld [vmem:[#allocation10 + $0x170] ss:$36 sps:$4 sm:$0xff]  }
 0x2c3   : > { %2290 = vmatpush1.bf16.msra.mxu0 %v14046_v6  ;;  %2656 = vmatprep.subr.bf16.mxu1 %v14051_v17  ;;  %v848_v23 = vadd.f32 %v16545_v38, %v808_v30  ;;  %v14078_v38 = vld [vmem:[#allocation10 + $0xc] ss:$36 sps:$4 sm:$0xff]   ;;  %v14079_v44 = vld [vmem:[#allocation10 + $0x2a0] ss:$36 sps:$4 sm:$0xff]   ;;  %v14088_v17 = vld [vmem:[#allocation10 + $0x98] ss:$36 sps:$4 sm:$0xff]  }
 0x2c4   : > { %2291 = vmatprep.subr.bf16.mxu0 %v14054_v18  ;;  %v16650_v55 = vpack.c.bf16 %v853_v25, %v850_v20  ;;  %v14082_v6 = vld [vmem:[#allocation10 + $0x50] ss:$36 sps:$4 sm:$0xff]   ;;  %v14094_v21 = vld [vmem:[#allocation10 + $0xe0] ss:$36 sps:$4 sm:$0xff]   ;;  %v14100_v10 = vld [vmem:[#allocation10 + $0x128] ss:$36 sps:$4 sm:$0xff]  }
 0x2c5   : > { %2482 = vmatmul.mubr.bf16.gmra.mrb[8].mxu1 %v16631_v9  ;;  %v16652_v59 = vpack.c.bf16 %v851_v54, %v848_v23  ;;  %v14093_v18 = vld [vmem:[#allocation10 + $0x334] ss:$36 sps:$4 sm:$0xff]   ;;  %v14102_v27 = vld [vmem:[#allocation10 + $0x12c] ss:$36 sps:$4 sm:$0xff]   ;;  %v14105_v36 = vld [vmem:[#allocation10 + $0x3c4] ss:$36 sps:$4 sm:$0xff]  }
 0x2c6   : > { %2657 = vmatpush1.bf16.msra.mxu1 %v14049_v24  ;;  %2263 = vmatmul.mubr.bf16.gmra.mrb[8].mxu0 %v16635_v26  ;;  %v14099_v24 = vld [vmem:[#allocation10 + $0x37c] ss:$36 sps:$4 sm:$0xff]   ;;  %v14111_v63 = vld [vmem:[#allocation10 + $0x40c] ss:$36 sps:$4 sm:$0xff]   ;;  %v14117_v46 = vld [vmem:[#allocation10 + $0x454] ss:$36 sps:$4 sm:$0xff]  }
 0x2c7   : > { %2292 = vmatpush1.bf16.msra.mxu0 %v14052_v31  ;;  %2272 = vmatprep.mubr.bf16.mxu0 %v16639_v22  ;;  %v14097_v31 = vld [vmem:[#allocation10 + $0x378] ss:$36 sps:$4 sm:$0xff]   ;;  %v14103_v37 = vld [vmem:[#allocation10 + $0x3c0] ss:$36 sps:$4 sm:$0xff]   ;;  %v14115_v49 = vld [vmem:[#allocation10 + $0x450] ss:$36 sps:$4 sm:$0xff]  }
 0x2c8   : > { %2658 = vmatprep.subr.bf16.mxu1 %v14057_v43  ;;  %2293 = vmatprep.subr.bf16.mxu0 %v14060_v45  ;;  %v14114_v42 = vld [vmem:[#allocation10 + $0x1bc] ss:$36 sps:$4 sm:$0xff]   ;;  %v14109_v43 = vld [vmem:[#allocation10 + $0x408] ss:$36 sps:$4 sm:$0xff]  }
 0x2c9   : > { %2491 = vmatprep.mubr.bf16.mxu1 %v18608_v28  ;;  %v14112_v45 = vld [vmem:[#allocation10 + $0x1b8] ss:$36 sps:$4 sm:$0xff]   ;;  %v14126_v30 = vld [vmem:[#allocation10 + $0x24c] ss:$36 sps:$4 sm:$0xff]   ;;  %v14129_v25 = vld [vmem:[#allocation10 + $0x4e4] ss:$36 sps:$4 sm:$0xff]  }
 0x2ca   : > { %2659 = vmatpush1.bf16.msra.mxu1 %v14055_v5  ;;  %v14120_v5 = vld [vmem:[#allocation10 + $0x204] ss:$36 sps:$4 sm:$0xff]   ;;  %v14123_v40 = vld [vmem:[#allocation10 + $0x49c] ss:$36 sps:$4 sm:$0xff]   ;;  %v14135_v20 = vld [vmem:[#allocation10 + $0x52c] ss:$36 sps:$4 sm:$0xff]  }
 0x2cb   : > { %2294 = vmatpush1.bf16.msra.mxu0 %v14058_v0  ;;  %2660 = vmatprep.subr.bf16.mxu1 %v14063_v51  ;;  %v14118_v0 = vld [vmem:[#allocation10 + $0x200] ss:$36 sps:$4 sm:$0xff]   ;;  %v14121_v51 = vld [vmem:[#allocation10 + $0x498] ss:$36 sps:$4 sm:$0xff]   ;;  %v14133_v23 = vld [vmem:[#allocation10 + $0x528] ss:$36 sps:$4 sm:$0xff]  }
 0x2cc   : > { %2295 = vmatprep.subr.bf16.mxu0 %v14066_v52  ;;  %v14124_v52 = vld [vmem:[#allocation10 + $0x248] ss:$36 sps:$4 sm:$0xff]   ;;  %v14127_v54 = vld [vmem:[#allocation10 + $0x4e0] ss:$36 sps:$4 sm:$0xff]  }
 0x2cd   : > { %2492 = vmatmul.mubr.bf16.gmra.mrb[12].mxu1 %v16650_v55 }
 0x2ce   : > { %2661 = vmatpush1.bf16.msra.mxu1 %v14061_v53  ;;  %2273 = vmatmul.mubr.bf16.gmra.mrb[12].mxu0 %v16652_v59  ;;  %v14132_v53 = vld [vmem:[#allocation10 + $0x294] ss:$36 sps:$4 sm:$0xff]  }
 0x2cf   : > { %2296 = vmatpush1.bf16.msra.mxu0 %v14064_v3  ;;  %2680 = vmatprep.mubr.bf16.mxu1 %v16565_v4  ;;  %v14130_v3 = vld [vmem:[#allocation10 + $0x290] ss:$36 sps:$4 sm:$0xff]  }
 0x2d0   : > { %2662 = vmatprep.subr.bf16.mxu1 %v14069_v57  ;;  %2297 = vmatprep.subr.bf16.mxu0 %v14072_v58  ;;  %v14138_v57 = vld [vmem:[#allocation10 + $0x2dc] ss:$36 sps:$4 sm:$0xff]  }
 0x2d1   : > { %2315 = vmatprep.mubr.bf16.mxu0 %v18608_v28  ;;  %v14136_v58 = vld [vmem:[#allocation10 + $0x2d8] ss:$36 sps:$4 sm:$0xff]  }
 0x2d2   : > { %2663 = vmatpush1.bf16.msra.mxu1 %v14067_v60  ;;  %v14141_v60 = vld [vmem:[#allocation10 + $0x574] ss:$36 sps:$4 sm:$0xff]  }
 0x2d3   : > { %2298 = vmatpush1.bf16.msra.mxu0 %v14070_v62  ;;  %2664 = vmatprep.subr.bf16.mxu1 %v14075_v35  ;;  %v14144_v62 = vld [vmem:[#allocation10 + $0x324] ss:$36 sps:$4 sm:$0xff]   ;;  %v14139_v35 = vld [vmem:[#allocation10 + $0x570] ss:$36 sps:$4 sm:$0xff]  }
 0x2d4   : > { %2356 = vmatprep.subr.bf16.mxu0 %v14078_v38  ;;  %v14142_v38 = vld [vmem:[#allocation10 + $0x320] ss:$36 sps:$4 sm:$0xff]  }
 0x2d6   : > { %2665 = vmatpush1.bf16.msra.mxu1 %v14073_v14  ;;  %2316 = vmatmul.mubr.bf16.vlgmr.msra.gmra.mrb[0].mxu0 %v16567_v12  ;;  %v14147_v14 = vld [vmem:[#allocation10 + $0x5bc] ss:$36 sps:$4 sm:$0xff]  }
 0x2d7   : > { %2357 = vmatpush1.bf16.msra.mxu0 %v14076_v56  ;;  %2666 = vmatprep.subr.bf16.mxu1 %v14081_v50  ;;  %v14145_v56 = vld [vmem:[#allocation10 + $0x5b8] ss:$36 sps:$4 sm:$0xff]   ;;  %v14150_v50 = vld [vmem:[#allocation10 + $0x36c] ss:$36 sps:$4 sm:$0xff]  }
 0x2d8   : > { %2358 = vmatprep.subr.bf16.mxu0 %v14084_v16  ;;  %2325 = vmatprep.mubr.bf16.mxu0 %v18608_v28  ;;  %v14148_v16 = vld [vmem:[#allocation10 + $0x368] ss:$36 sps:$4 sm:$0xff]  }
 0x2da   : > { %2667 = vmatpush1.bf16.msra.mxu1 %v14079_v44  ;;  %v14153_v44 = vld [vmem:[#allocation10 + $0x604] ss:$36 sps:$4 sm:$0xff]  }
 0x2db   : > { %2359 = vmatpush1.bf16.msra.mxu0 %v14082_v6  ;;  %2668 = vmatprep.subr.bf16.mxu1 %v14087_v7  ;;  %v14156_v6 = vld [vmem:[#allocation10 + $0x3b4] ss:$36 sps:$4 sm:$0xff]   ;;  %v14151_v7 = vld [vmem:[#allocation10 + $0x600] ss:$36 sps:$4 sm:$0xff]  }
 0x2dc   : > { %2360 = vmatprep.subr.bf16.mxu0 %v14090_v15  ;;  %v14154_v15 = vld [vmem:[#allocation10 + $0x3b0] ss:$36 sps:$4 sm:$0xff]  }
 0x2de   : > { %2669 = vmatpush1.bf16.msra.mxu1 %v14085_v1  ;;  %2326 = vmatmul.mubr.bf16.gmra.mrb[4].mxu0 %v16598_v13  ;;  %v14159_v1 = vld [vmem:[#allocation10 + $0x64c] ss:$36 sps:$4 sm:$0xff]  }
 0x2df   : > { %2361 = vmatpush1.bf16.msra.mxu0 %v14088_v17  ;;  %2670 = vmatprep.subr.bf16.mxu1 %v14093_v18  ;;  %v14162_v17 = vld [vmem:[#allocation10 + $0x3fc] ss:$36 sps:$4 sm:$0xff]   ;;  %v14157_v18 = vld [vmem:[#allocation10 + $0x648] ss:$36 sps:$4 sm:$0xff]  }
 0x2e0   : > { %2362 = vmatprep.subr.bf16.mxu0 %v14096_v19  ;;  %2335 = vmatprep.mubr.bf16.mxu0 %v18608_v28  ;;  %v14160_v19 = vld [vmem:[#allocation10 + $0x3f8] ss:$36 sps:$4 sm:$0xff]  }
 0x2e2   : > { %2671 = vmatpush1.bf16.msra.mxu1 %v14091_v33  ;;  %v14165_v33 = vld [vmem:[#allocation10 + $0x694] ss:$36 sps:$4 sm:$0xff]  }
 0x2e3   : > { %2363 = vmatpush1.bf16.msra.mxu0 %v14094_v21  ;;  %2672 = vmatprep.subr.bf16.mxu1 %v14099_v24  ;;  %v14168_v21 = vld [vmem:[#allocation10 + $0x444] ss:$36 sps:$4 sm:$0xff]   ;;  %v14163_v24 = vld [vmem:[#allocation10 + $0x690] ss:$36 sps:$4 sm:$0xff]  }
 0x2e4   : > { %2364 = vmatprep.subr.bf16.mxu0 %v14102_v27  ;;  %v14166_v27 = vld [vmem:[#allocation10 + $0x440] ss:$36 sps:$4 sm:$0xff]  }
 0x2e6   : > { %2673 = vmatpush1.bf16.msra.mxu1 %v14097_v31  ;;  %2336 = vmatmul.mubr.bf16.gmra.mrb[8].mxu0 %v16631_v9  ;;  %v14169_v31 = vld [vmem:[#allocation10 + $0x4a0] ss:$36 sps:$4 sm:$0xff]  }
 0x2e7   : > { %2365 = vmatpush1.bf16.msra.mxu0 %v14100_v10  ;;  %2674 = vmatprep.subr.bf16.mxu1 %v14105_v36  ;;  %v14172_v10 = vld [vmem:[#allocation10 + $0x14] ss:$36 sps:$4 sm:$0xff]  }
 0x2e8   : > { %2366 = vmatprep.subr.bf16.mxu0 %v14108_v11  ;;  %2345 = vmatprep.mubr.bf16.mxu0 %v18608_v28  ;;  %v14170_v36 = vld [vmem:[#allocation10 + $0x10] ss:$36 sps:$4 sm:$0xff]   ;;  %v14173_v11 = vld [vmem:[#allocation10 + $0x4e8] ss:$36 sps:$4 sm:$0xff]  }
 0x2ea   : > { %2675 = vmatpush1.bf16.msra.mxu1 %v14103_v37  ;;  %v14176_v37 = vld [vmem:[#allocation10 + $0x5c] ss:$36 sps:$4 sm:$0xff]  }
 0x2eb   : > { %2367 = vmatpush1.bf16.msra.mxu0 %v14106_v34  ;;  %2676 = vmatprep.subr.bf16.mxu1 %v14111_v63  ;;  %v14174_v34 = vld [vmem:[#allocation10 + $0x58] ss:$36 sps:$4 sm:$0xff]   ;;  %v14177_v63 = vld [vmem:[#allocation10 + $0x530] ss:$36 sps:$4 sm:$0xff]  }
 0x2ec   : > { %2368 = vmatprep.subr.bf16.mxu0 %v14114_v42  ;;  %v14180_v42 = vld [vmem:[#allocation10 + $0xa4] ss:$36 sps:$4 sm:$0xff]  }
 0x2ee   : > { %2677 = vmatpush1.bf16.msra.mxu1 %v14109_v43  ;;  %2346 = vmatmul.mubr.bf16.gmra.mrb[12].mxu0 %v16650_v55  ;;  %v14178_v43 = vld [vmem:[#allocation10 + $0xa0] ss:$36 sps:$4 sm:$0xff]  }
 0x2ef   : > { %2369 = vmatpush1.bf16.msra.mxu0 %v14112_v45  ;;  %2388 = vmatprep.mubr.bf16.mxu0 %v16565_v4  ;;  %v14181_v45 = vld [vmem:[#allocation10 + $0x578] ss:$36 sps:$4 sm:$0xff]  }
 0x2f0   : > { %2678 = vmatprep.subr.bf16.mxu1 %v14117_v46  ;;  %2370 = vmatprep.subr.bf16.mxu0 %v14120_v5  ;;  %v14184_v46 = vld [vmem:[#allocation10 + $0xec] ss:$36 sps:$4 sm:$0xff]  }
 0x2f1   : > { %v14182_v5 = vld [vmem:[#allocation10 + $0xe8] ss:$36 sps:$4 sm:$0xff]  }
 0x2f2   : > { %2679 = vmatpush1.bf16.msra.mxu1 %v14115_v49  ;;  %v14185_v49 = vld [vmem:[#allocation10 + $0x5c0] ss:$36 sps:$4 sm:$0xff]  }
 0x2f3   : > { %2371 = vmatpush1.bf16.msra.mxu0 %v14118_v0  ;;  %2721 = vmatprep.subr.bf16.mxu1 %v14123_v40  ;;  %v14188_v0 = vld [vmem:[#allocation10 + $0x134] ss:$36 sps:$4 sm:$0xff]  }
 0x2f4   : > { %2372 = vmatprep.subr.bf16.mxu0 %v14126_v30  ;;  %v14186_v40 = vld [vmem:[#allocation10 + $0x130] ss:$36 sps:$4 sm:$0xff]   ;;  %v14189_v30 = vld [vmem:[#allocation10 + $0x608] ss:$36 sps:$4 sm:$0xff]  }
 0x2f5   : > { %2681 = vmatmul.mubr.bf16.vlgmr.msra.gmra.mrb[16].mxu1 %v16571_v29 }
 0x2f6   : > { %2690 = vmatprep.mubr.bf16.mxu1 %v16586_v41  ;;  %2722 = vmatpush1.bf16.msra.mxu1 %v14121_v51  ;;  %v14192_v51 = vld [vmem:[#allocation10 + $0x17c] ss:$36 sps:$4 sm:$0xff]  }
 0x2f7   : > { %2373 = vmatpush1.bf16.msra.mxu0 %v14124_v52  ;;  %2723 = vmatprep.subr.bf16.mxu1 %v14129_v25  ;;  %v14190_v52 = vld [vmem:[#allocation10 + $0x178] ss:$36 sps:$4 sm:$0xff]   ;;  %v14193_v25 = vld [vmem:[#allocation10 + $0x650] ss:$36 sps:$4 sm:$0xff]  }
 0x2f8   : > { %2374 = vmatprep.subr.bf16.mxu0 %v14132_v53  ;;  %v14196_v53 = vld [vmem:[#allocation10 + $0x1c4] ss:$36 sps:$4 sm:$0xff]  }
 0x2fa   : > { %2724 = vmatpush1.bf16.msra.mxu1 %v14127_v54  ;;  %v14194_v54 = vld [vmem:[#allocation10 + $0x1c0] ss:$36 sps:$4 sm:$0xff]  }
 0x2fb   : > { %2375 = vmatpush1.bf16.msra.mxu0 %v14130_v3  ;;  %2725 = vmatprep.subr.bf16.mxu1 %v14135_v20  ;;  %v14197_v3 = vld [vmem:[#allocation10 + $0x698] ss:$36 sps:$4 sm:$0xff]   ;;  %v14200_v20 = vld [vmem:[#allocation10 + $0x20c] ss:$36 sps:$4 sm:$0xff]  }
 0x2fc   : > { %2376 = vmatprep.subr.bf16.mxu0 %v14138_v57  ;;  %v14203_v57 = vld [vmem:[#allocation10 + $0x254] ss:$36 sps:$4 sm:$0xff]  }
 0x2fd   : > { %2691 = vmatmul.mubr.bf16.gmra.mrb[20].mxu1 %v16607_v8 }
 0x2fe   : > { %2700 = vmatprep.mubr.bf16.mxu1 %v16611_v2  ;;  %2726 = vmatpush1.bf16.msra.mxu1 %v14133_v23  ;;  %v14198_v23 = vld [vmem:[#allocation10 + $0x208] ss:$36 sps:$4 sm:$0xff]  }
 0x2ff   : > { %2377 = vmatpush1.bf16.msra.mxu0 %v14136_v58  ;;  %2727 = vmatprep.subr.bf16.mxu1 %v14141_v60  ;;  %v14201_v58 = vld [vmem:[#allocation10 + $0x250] ss:$36 sps:$4 sm:$0xff]   ;;  %v14206_v60 = vld [vmem:[#allocation10 + $0x29c] ss:$36 sps:$4 sm:$0xff]  }
 0x300   : > { %2378 = vmatprep.subr.bf16.mxu0 %v14144_v62  ;;  %v14204_v62 = vld [vmem:[#allocation10 + $0x298] ss:$36 sps:$4 sm:$0xff]  }
 0x302   : > { %2728 = vmatpush1.bf16.msra.mxu1 %v14139_v35  ;;  %v14209_v35 = vld [vmem:[#allocation10 + $0x2e4] ss:$36 sps:$4 sm:$0xff]  }
 0x303   : > { %2379 = vmatpush1.bf16.msra.mxu0 %v14142_v38  ;;  %2729 = vmatprep.subr.bf16.mxu1 %v14147_v14  ;;  %v14207_v38 = vld [vmem:[#allocation10 + $0x2e0] ss:$36 sps:$4 sm:$0xff]   ;;  %v14212_v14 = vld [vmem:[#allocation10 + $0x32c] ss:$36 sps:$4 sm:$0xff]  }
 0x304   : > { %2380 = vmatprep.subr.bf16.mxu0 %v14150_v50  ;;  %v14215_v50 = vld [vmem:[#allocation10 + $0x374] ss:$36 sps:$4 sm:$0xff]  }
 0x305   : > { %2701 = vmatmul.mubr.bf16.gmra.mrb[24].mxu1 %v16635_v26 }
 0x306   : > { %2710 = vmatprep.mubr.bf16.mxu1 %v16639_v22  ;;  %2730 = vmatpush1.bf16.msra.mxu1 %v14145_v56  ;;  %v14210_v56 = vld [vmem:[#allocation10 + $0x328] ss:$36 sps:$4 sm:$0xff]  }
 0x307   : > { %2381 = vmatpush1.bf16.msra.mxu0 %v14148_v16  ;;  %2731 = vmatprep.subr.bf16.mxu1 %v14153_v44  ;;  %v14213_v16 = vld [vmem:[#allocation10 + $0x370] ss:$36 sps:$4 sm:$0xff]   ;;  %v14218_v44 = vld [vmem:[#allocation10 + $0x3bc] ss:$36 sps:$4 sm:$0xff]  }
 0x308   : > { %2382 = vmatprep.subr.bf16.mxu0 %v14156_v6  ;;  %v14216_v6 = vld [vmem:[#allocation10 + $0x3b8] ss:$36 sps:$4 sm:$0xff]  }
 0x30a   : > { %2732 = vmatpush1.bf16.msra.mxu1 %v14151_v7  ;;  %v14221_v7 = vld [vmem:[#allocation10 + $0x404] ss:$36 sps:$4 sm:$0xff]  }
 0x30b   : > { %2383 = vmatpush1.bf16.msra.mxu0 %v14154_v15  ;;  %2733 = vmatprep.subr.bf16.mxu1 %v14159_v1  ;;  %v14219_v15 = vld [vmem:[#allocation10 + $0x400] ss:$36 sps:$4 sm:$0xff]   ;;  %v14224_v1 = vld [vmem:[#allocation10 + $0x44c] ss:$36 sps:$4 sm:$0xff]  }
 0x30c   : > { %2384 = vmatprep.subr.bf16.mxu0 %v14162_v17  ;;  %v14222_v17 = vld [vmem:[#allocation10 + $0x448] ss:$36 sps:$4 sm:$0xff]  }
 0x30d   : > { %2711 = vmatmul.mubr.bf16.gmra.mrb[28].mxu1 %v16652_v59 }
 0x30e   : > { %2734 = vmatpush1.bf16.msra.mxu1 %v14157_v18  ;;  %2753 = vmatprep.mubr.bf16.mxu1 %v18608_v28  ;;  %v14227_v18 = vld [vmem:[#allocation10 + $0x494] ss:$36 sps:$4 sm:$0xff]  }
 0x30f   : > { %2385 = vmatpush1.bf16.msra.mxu0 %v14160_v19  ;;  %2735 = vmatprep.subr.bf16.mxu1 %v14165_v33  ;;  %v14225_v19 = vld [vmem:[#allocation10 + $0x490] ss:$36 sps:$4 sm:$0xff]   ;;  %v14230_v33 = vld [vmem:[#allocation10 + $0x4dc] ss:$36 sps:$4 sm:$0xff]  }
 0x310   : > { %2386 = vmatprep.subr.bf16.mxu0 %v14168_v21  ;;  %v14228_v21 = vld [vmem:[#allocation10 + $0x4d8] ss:$36 sps:$4 sm:$0xff]  }
 0x312   : > { %2736 = vmatpush1.bf16.msra.mxu1 %v14163_v24  ;;  %v14233_v24 = vld [vmem:[#allocation10 + $0x524] ss:$36 sps:$4 sm:$0xff]  }
 0x313   : > { %2387 = vmatpush1.bf16.msra.mxu0 %v14166_v27  ;;  %13131 = vmatprep.subr.bf16.mxu1 %v14169_v31  ;;  %v14231_v27 = vld [vmem:[#allocation10 + $0x520] ss:$36 sps:$4 sm:$0xff]  }
 0x314   : > { %2502 = vmatprep.subr.bf16.mxu0 %v14172_v10  ;;  %v14234_v10 = vld [vmem:[#allocation10 + $0x568] ss:$36 sps:$4 sm:$0xff]  }
 0x315   : > { %2754 = vmatmul.mubr.bf16.vlgmr.msra.gmra.mrb[16].mxu1 %v16567_v12 }
 0x316   : > { %2389 = vmatmul.mubr.bf16.vlgmr.msra.gmra.mrb[16].mxu0 %v16571_v29  ;;  %13132 = vmatpush3.bf16.msra.mxu1 %v14169_v31  ;;  %v14236_v31 = vld [vmem:[#allocation10 + $0x56c] ss:$36 sps:$4 sm:$0xff]  }
 0x317   : > { %2398 = vmatprep.mubr.bf16.mxu0 %v16586_v41  ;;  %2503 = vmatpush1.bf16.msra.mxu0 %v14170_v36  ;;  %v14239_v36 = vld [vmem:[#allocation10 + $0x5b4] ss:$36 sps:$4 sm:$0xff]  }
 0x318   : > { %13133 = vmatprep.subr.bf16.mxu1 %v14173_v11  ;;  %2504 = vmatprep.subr.bf16.mxu0 %v14176_v37  ;;  %v14242_v37 = vld [vmem:[#allocation10 + $0x5fc] ss:$36 sps:$4 sm:$0xff]  }
 0x319   : > { %2763 = vmatprep.mubr.bf16.mxu1 %v18608_v28 }
 0x31a   : > { %13134 = vmatpush3.bf16.msra.mxu1 %v14173_v11  ;;  %v14237_v11 = vld [vmem:[#allocation10 + $0x5b0] ss:$36 sps:$4 sm:$0xff]  }
 0x31b   : > { %2505 = vmatpush1.bf16.msra.mxu0 %v14174_v34  ;;  %13135 = vmatprep.subr.bf16.mxu1 %v14177_v63  ;;  %v14240_v34 = vld [vmem:[#allocation10 + $0x5f8] ss:$36 sps:$4 sm:$0xff]  }
 0x31c   : > { %2506 = vmatprep.subr.bf16.mxu0 %v14180_v42  ;;  %v14243_v42 = vld [vmem:[#allocation10 + $0x640] ss:$36 sps:$4 sm:$0xff]  }
 0x31d   : > { %2764 = vmatmul.mubr.bf16.gmra.mrb[20].mxu1 %v16598_v13 }
 0x31e   : > { %2399 = vmatmul.mubr.bf16.gmra.mrb[20].mxu0 %v16607_v8  ;;  %13136 = vmatpush3.bf16.msra.mxu1 %v14177_v63  ;;  %v14245_v63 = vld [vmem:[#allocation10 + $0x644] ss:$36 sps:$4 sm:$0xff]  }
 0x31f   : > { %2408 = vmatprep.mubr.bf16.mxu0 %v16611_v2  ;;  %2507 = vmatpush1.bf16.msra.mxu0 %v14178_v43  ;;  %v14248_v43 = vld [vmem:[#allocation10 + $0x68c] ss:$36 sps:$4 sm:$0xff]  }
 0x320   : > { %13137 = vmatprep.subr.bf16.mxu1 %v14181_v45  ;;  %2508 = vmatprep.subr.bf16.mxu0 %v14184_v46  ;;  %v14249_v46 = vld [vmem:[#allocation10 + $0x260] ss:$36 sps:$4 sm:$0xff]  }
 0x321   : > { %2773 = vmatprep.mubr.bf16.mxu1 %v18608_v28 }
 0x322   : > { %13138 = vmatpush3.bf16.msra.mxu1 %v14181_v45  ;;  %v14246_v45 = vld [vmem:[#allocation10 + $0x688] ss:$36 sps:$4 sm:$0xff]  }
 0x323   : > { %2509 = vmatpush1.bf16.msra.mxu0 %v14182_v5  ;;  %13139 = vmatprep.subr.bf16.mxu1 %v14185_v49  ;;  %v14250_v5 = vld [vmem:[#allocation10 + $0x20] ss:$36 sps:$4 sm:$0xff]  }
 0x324   : > { %2510 = vmatprep.subr.bf16.mxu0 %v14188_v0  ;;  %v14252_v0 = vld [vmem:[#allocation10 + $0x68] ss:$36 sps:$4 sm:$0xff]  }
 0x325   : > { %2774 = vmatmul.mubr.bf16.gmra.mrb[24].mxu1 %v16631_v9 }
 0x326   : > { %2409 = vmatmul.mubr.bf16.gmra.mrb[24].mxu0 %v16635_v26  ;;  %13140 = vmatpush3.bf16.msra.mxu1 %v14185_v49  ;;  %v14251_v49 = vld [vmem:[#allocation10 + $0x2a8] ss:$36 sps:$4 sm:$0xff]  }
 0x327   : > { %2418 = vmatprep.mubr.bf16.mxu0 %v16639_v22  ;;  %2511 = vmatpush1.bf16.msra.mxu0 %v14186_v40  ;;  %v14253_v40 = vld [vmem:[#allocation10 + $0x2f0] ss:$36 sps:$4 sm:$0xff]  }
 0x328   : > { %13141 = vmatprep.subr.bf16.mxu1 %v14189_v30  ;;  %2512 = vmatprep.subr.bf16.mxu0 %v14192_v51  ;;  %v14255_v51 = vld [vmem:[#allocation10 + $0x338] ss:$36 sps:$4 sm:$0xff]  }
 0x329   : > { %2783 = vmatprep.mubr.bf16.mxu1 %v18608_v28 }
 0x32a   : > { %13142 = vmatpush3.bf16.msra.mxu1 %v14189_v30  ;;  %v14254_v30 = vld [vmem:[#allocation10 + $0xb0] ss:$36 sps:$4 sm:$0xff]  }
 0x32b   : > { %2513 = vmatpush1.bf16.msra.mxu0 %v14190_v52  ;;  %13143 = vmatprep.subr.bf16.mxu1 %v14193_v25  ;;  %v14256_v52 = vld [vmem:[#allocation10 + $0xf8] ss:$36 sps:$4 sm:$0xff]  }
 0x32c   : > { %2514 = vmatprep.subr.bf16.mxu0 %v14196_v53  ;;  %v14259_v53 = vld [vmem:[#allocation10 + $0x3c8] ss:$36 sps:$4 sm:$0xff]  }
 0x32d   : > { %2784 = vmatmul.mubr.bf16.gmra.mrb[28].mxu1 %v16650_v55 }
 0x32e   : > { %2419 = vmatmul.mubr.bf16.gmra.mrb[28].mxu0 %v16652_v59  ;;  %13144 = vmatpush3.bf16.msra.mxu1 %v14193_v25  ;;  %v14257_v25 = vld [vmem:[#allocation10 + $0x380] ss:$36 sps:$4 sm:$0xff]  }
 0x32f   : > { %13147 = vmatprep.mubr.bf16.mxu1 %v16567_v12  ;;  %2515 = vmatpush1.bf16.msra.mxu0 %v14194_v54  ;;  %v14260_v54 = vld [vmem:[#allocation10 + $0x188] ss:$36 sps:$4 sm:$0xff]  }
 0x330   : > { %2534 = vmatprep.mubr.bf16.mxu0 %v16565_v4  ;;  %13145 = vmatprep.subr.bf16.mxu1 %v14197_v3 }
 0x331   : > { %2516 = vmatprep.subr.bf16.mxu0 %v14200_v20 }
 0x332   : > { %13146 = vmatpush3.bf16.msra.mxu1 %v14197_v3 }
 0x333   : > { %2517 = vmatpush1.bf16.msra.mxu0 %v14198_v23 }
 0x334   : > { %2518 = vmatprep.subr.bf16.mxu0 %v14203_v57 }
 0x335   : > { %13148 = vmatmul.mubr.bf16.vlgmr.msra.gmra.mrb[32].mxu1 %v16598_v13 }
 0x336   : > { %13151 = vmatprep.mubr.bf16.mxu1 %v16631_v9 }
 0x337   : > { %2519 = vmatpush1.bf16.msra.mxu0 %v14201_v58  ;;  %v14262_v58 = vld [vmem:[#allocation10 + $0x1d0] ss:$36 sps:$4 sm:$0xff]  }
 0x338   : > { %2520 = vmatprep.subr.bf16.mxu0 %v14206_v60  ;;  %v14263_v60 = vld [vmem:[#allocation10 + $0x458] ss:$36 sps:$4 sm:$0xff]  }
 0x33b   : > { %2521 = vmatpush1.bf16.msra.mxu0 %v14204_v62 }
 0x33c   : > { %2522 = vmatprep.subr.bf16.mxu0 %v14209_v35 }
 0x33d   : > { %13152 = vmatmul.mubr.bf16.gmra.mrb[36].mxu1 %v16650_v55 }
 0x33f   : > { %2523 = vmatpush1.bf16.msra.mxu0 %v14207_v38 }
 0x340   : > { %2524 = vmatprep.subr.bf16.mxu0 %v14212_v14 }
 0x343   : > { %2525 = vmatpush1.bf16.msra.mxu0 %v14210_v56 }
 0x344   : > { %2526 = vmatprep.subr.bf16.mxu0 %v14215_v50 }
 0x347   : > { %2527 = vmatpush1.bf16.msra.mxu0 %v14213_v16 }
 0x348   : > { %2528 = vmatprep.subr.bf16.mxu0 %v14218_v44 }
 0x34b   : > { %2529 = vmatpush1.bf16.msra.mxu0 %v14216_v6 }
 0x34c   : > { %2530 = vmatprep.subr.bf16.mxu0 %v14221_v7 }
 0x34f   : > { %2531 = vmatpush1.bf16.msra.mxu0 %v14219_v15 }
 0x350   : > { %2532 = vmatprep.subr.bf16.mxu0 %v14224_v1 }
 0x353   : > { %2533 = vmatpush1.bf16.msra.mxu0 %v14222_v17 }
 0x354   : > { %2575 = vmatprep.subr.bf16.mxu0 %v14227_v18 }
 0x356   : > { %2535 = vmatmul.mubr.bf16.vlgmr.msra.gmra.mrb[32].mxu0 %v16571_v29 }
 0x357   : > { %2544 = vmatprep.mubr.bf16.mxu0 %v16586_v41  ;;  %2576 = vmatpush1.bf16.msra.mxu0 %v14225_v19 }
 0x358   : > { %2577 = vmatprep.subr.bf16.mxu0 %v14230_v33 }
 0x35b   : > { %2578 = vmatpush1.bf16.msra.mxu0 %v14228_v21 }
 0x35c   : > { %2579 = vmatprep.subr.bf16.mxu0 %v14233_v24 }
 0x35e   : > { %2545 = vmatmul.mubr.bf16.gmra.mrb[36].mxu0 %v16607_v8 }
 0x35f   : > { %2554 = vmatprep.mubr.bf16.mxu0 %v16611_v2  ;;  %2580 = vmatpush1.bf16.msra.mxu0 %v14231_v27 }
 0x360   : > { %2581 = vmatprep.subr.bf16.mxu0 %v14236_v31 }
 0x363   : > { %2582 = vmatpush1.bf16.msra.mxu0 %v14234_v10 }
 0x364   : > { %2583 = vmatprep.subr.bf16.mxu0 %v14239_v36 }
 0x366   : > { %2555 = vmatmul.mubr.bf16.gmra.mrb[40].mxu0 %v16635_v26 }
 0x367   : > { %2564 = vmatprep.mubr.bf16.mxu0 %v16639_v22  ;;  %2584 = vmatpush1.bf16.msra.mxu0 %v14237_v11 }
 0x368   : > { %2585 = vmatprep.subr.bf16.mxu0 %v14242_v37 }
 0x36b   : > { %2586 = vmatpush1.bf16.msra.mxu0 %v14240_v34 }
 0x36c   : > { %2587 = vmatprep.subr.bf16.mxu0 %v14245_v63 }
 0x36e   : > { %2565 = vmatmul.mubr.bf16.gmra.mrb[44].mxu0 %v16652_v59 }
 0x36f   : > { %2588 = vmatpush1.bf16.msra.mxu0 %v14243_v42  ;;  %2607 = vmatprep.mubr.bf16.mxu0 %v18608_v28 }
 0x370   : > { %2589 = vmatprep.subr.bf16.mxu0 %v14248_v43 }
 0x373   : > { %2590 = vmatpush1.bf16.msra.mxu0 %v14246_v45 }
 0x374   : > { %12691 = vmatprep.subr.bf16.mxu0 %v14249_v46 }
 0x376   : > { %2608 = vmatmul.mubr.bf16.vlgmr.msra.gmra.mrb[32].mxu0 %v16567_v12  ;;  %v14258_v12 = vld [vmem:[#allocation10 + $0x140] ss:$36 sps:$4 sm:$0xff]  }
 0x377   : > { %12692 = vmatpush3.bf16.msra.mxu0 %v14250_v5  ;;  %2617 = vmatprep.mubr.bf16.mxu0 %v18608_v28 }
 0x378   : > { %12693 = vmatprep.subr.bf16.mxu0 %v14251_v49 }
 0x37b   : > { %12694 = vmatpush3.bf16.msra.mxu0 %v14252_v0 }
 0x37c   : > { %12695 = vmatprep.subr.bf16.mxu0 %v14253_v40 }
 0x37e   : > { %2618 = vmatmul.mubr.bf16.gmra.mrb[36].mxu0 %v16598_v13  ;;  %v14261_v13 = vld [vmem:[#allocation10 + $0x410] ss:$36 sps:$4 sm:$0xff]  }
 0x37f   : > { %12696 = vmatpush3.bf16.msra.mxu0 %v14254_v30  ;;  %2627 = vmatprep.mubr.bf16.mxu0 %v18608_v28 }
 0x380   : > { %12697 = vmatprep.subr.bf16.mxu0 %v14255_v51 }
 0x383   : > { %12698 = vmatpush3.bf16.msra.mxu0 %v14256_v52 }
 0x384   : > { %12699 = vmatprep.subr.bf16.mxu0 %v14257_v25 }
 0x386   : > { %2628 = vmatmul.mubr.bf16.gmra.mrb[40].mxu0 %v16631_v9  ;;  %v14264_v9 = vld [vmem:[#allocation10 + $0x218] ss:$36 sps:$4 sm:$0xff]  }
 0x387   : > { %12700 = vmatpush3.bf16.msra.mxu0 %v14258_v12  ;;  %2637 = vmatprep.mubr.bf16.mxu0 %v18608_v28 }
 0x388   : > { %v16707_v3 = vpop.f32.mrb[0].mxu1  ;;  %12701 = vmatprep.subr.bf16.mxu0 %v14259_v53 }
 0x389   : > { %v16709_v20 = vpop.f32.mrb[1].mxu1 }
 0x38a   : > { %v16711_v23 = vpop.f32.mrb[2].mxu1 }
 0x38b   : > { %12702 = vmatpush3.bf16.msra.mxu0 %v14260_v54  ;;  %v16713_v57 = vpop.f32.mrb[3].mxu1 }
 0x38c   : > { %12703 = vmatprep.subr.bf16.mxu0 %v14261_v13 }
 0x38e   : > { %2638 = vmatmul.mubr.bf16.gmra.mrb[44].mxu0 %v16650_v55 }
 0x38f   : > { %12704 = vmatpush3.bf16.msra.mxu0 %v14262_v58  ;;  %2826 = vmatprep.mubr.bf16.mxu0 %v16565_v4 }
 0x390   : > { %v16717_v62 = vpop.f32.mrb[4].mxu1  ;;  %12705 = vmatprep.subr.bf16.mxu0 %v14263_v60 }
 0x391   : > { %v16719_v35 = vpop.f32.mrb[5].mxu1 }
 0x392   : > { %v16721_v38 = vpop.f32.mrb[6].mxu1 }
 0x393   : > { %12706 = vmatpush3.bf16.msra.mxu0 %v14264_v9  ;;  %v16723_v14 = vpop.f32.mrb[7].mxu1 }
 0x396   : > { %2827 = vmatmul.mubr.bf16.vlgmr.msra.gmra.mrb[48].mxu0 %v16571_v29 }
 0x397   : > { %2834 = vmatprep.mubr.bf16.mxu0 %v16586_v41 }
 0x398   : > { %v16727_v56 = vpop.f32.mrb[8].mxu1 }
 0x399   : > { %v16729_v55 = vpop.f32.mrb[9].mxu1 }
 0x39a   : > { %v16731_v4 = vpop.f32.mrb[10].mxu1 }
 0x39b   : > { %v16733_v50 = vpop.f32.mrb[11].mxu1 }
 0x39e   : > { %2835 = vmatmul.mubr.bf16.gmra.mrb[52].mxu0 %v16607_v8 }
 0x39f   : > { %2842 = vmatprep.mubr.bf16.mxu0 %v16611_v2 }
 0x3a0   : > { %v16737_v16 = vpop.f32.mrb[12].mxu1 }
 0x3a1   : > { %v16739_v44 = vpop.f32.mrb[13].mxu1 }
 0x3a2   : > { %v16741_v6 = vpop.f32.mrb[14].mxu1 }
 0x3a3   : > { %v16743_v29 = vpop.f32.mrb[15].mxu1 }
 0x3a6   : > { %2843 = vmatmul.mubr.bf16.gmra.mrb[56].mxu0 %v16635_v26 }
 0x3a7   : > { %2850 = vmatprep.mubr.bf16.mxu0 %v16639_v22 }
 0x3a9   : > { %v2317_v41 = vpop.f32.mrb[0].mxu0 }
 0x3aa   : > { %v2319_v7 = vpop.f32.mrb[1].mxu0 }
 0x3ab   : > { %v2321_v15 = vpop.f32.mrb[2].mxu0 }
 0x3ac   : > { %v2924_v1 = vpack.c.bf16 %v2321_v15, %v2317_v41  ;;  %v2323_v17 = vpop.f32.mrb[3].mxu0 }
 0x3ad   : > { %v16747_v8 = vpack.c.bf16 %v2323_v17, %v2319_v7 }
 0x3ae   : > { %2851 = vmatmul.mubr.bf16.gmra.mrb[60].mxu0 %v16652_v59 }
 0x3af   : > { %13163 = vmatprep.mubr.msk.bf16.mxu0 %vm3035_vm0, %v2924_v1 }
 0x3b1   : > { %v2327_v2 = vpop.f32.mrb[4].mxu0 }
 0x3b2   : > { %v2329_v18 = vpop.f32.mrb[5].mxu0 }
 0x3b3   : > { %v2331_v19 = vpop.f32.mrb[6].mxu0 }
 0x3b4   : > { %v16751_v33 = vpack.c.bf16 %v2331_v19, %v2327_v2  ;;  %v2333_v26 = vpop.f32.mrb[7].mxu0 }
 0x3b5   : > { %v16753_v21 = vpack.c.bf16 %v2333_v26, %v2329_v18 }
 0x3b9   : > { %v2337_v22 = vpop.f32.mrb[8].mxu0 }
 0x3ba   : > { %v2339_v24 = vpop.f32.mrb[9].mxu0 }
 0x3bb   : > { %v2341_v27 = vpop.f32.mrb[10].mxu0 }
 0x3bc   : > { %v16755_v31 = vpack.c.bf16 %v2341_v27, %v2337_v22  ;;  %v2343_v10 = vpop.f32.mrb[11].mxu0 }
 0x3bd   : > { %v16757_v36 = vpack.c.bf16 %v2343_v10, %v2339_v24 }
 0x3c1   : > { %v2347_v11 = vpop.f32.mrb[12].mxu0 }
 0x3c2   : > { %v2349_v59 = vpop.f32.mrb[13].mxu0 }
 0x3c3   : > { %v2351_v37 = vpop.f32.mrb[14].mxu0 }
 0x3c4   : > { %v16759_v34 = vpack.c.bf16 %v2351_v37, %v2347_v11  ;;  %v2353_v63 = vpop.f32.mrb[15].mxu0 }
 0x3c5   : > { %v16761_v42 = vpack.c.bf16 %v2353_v63, %v2349_v59 }
 0x3e8   : > { %v2755_v43 = vpop.f32.mrb[16].mxu1 }
 0x3e9   : > { %v2390_v45 = vpop.f32.mrb[16].mxu0  ;;  %v2757_v46 = vpop.f32.mrb[17].mxu1 }
 0x3ea   : > { %v2464_v5 = vadd.f32 %v16707_v3, %v2390_v45  ;;  %v2392_v49 = vpop.f32.mrb[17].mxu0  ;;  %v2759_v0 = vpop.f32.mrb[18].mxu1 }
 0x3eb   : > { %v2466_v40 = vadd.f32 %v16709_v20, %v2392_v49  ;;  %v16765_v30 = vpack.c.bf16 %v2759_v0, %v2755_v43  ;;  %v2394_v51 = vpop.f32.mrb[18].mxu0  ;;  %v2761_v52 = vpop.f32.mrb[19].mxu1 }
 0x3ec   : > { %v2468_v25 = vadd.f32 %v16711_v23, %v2394_v51  ;;  %v16768_v12 = vpack.c.bf16 %v2761_v52, %v2757_v46  ;;  %v2396_v53 = vpop.f32.mrb[19].mxu0 }
 0x3ed   : > { %v2470_v54 = vadd.f32 %v16713_v57, %v2396_v53 }
 0x3ee   : > { %v16771_v13 = vpack.c.bf16 %v2468_v25, %v2464_v5 }
 0x3ef   : > { %v2927_v58 = vpack.c.bf16 %v2470_v54, %v2466_v40 }
 0x3f0   : > { %v2765_v60 = vpop.f32.mrb[20].mxu1 }
 0x3f1   : > { %v2767_v3 = vpop.f32.mrb[21].mxu1  ;;  %3330 = vrot.lane.b32.xlu0 %v2927_v58, %s15894_s28  ;;  %v2400_v20 = vpop.f32.mrb[20].mxu0  ;;  %13755 = vmatprep.subr.msk.bf16.mxu0 %vm3035_vm0, %v2927_v58  ;;  %v3049_v9 = vsel %vm3035_vm0, %v2927_v58, 0 }
 0x3f2   : > { %v2474_v23 = vadd.f32 %v16717_v62, %v2400_v20  ;;  %v2402_v41 = vpop.f32.mrb[21].mxu0  ;;  %v2769_v7 = vpop.f32.mrb[22].mxu1  ;;  %13156 = vmatpush3.bf16.xpose.msra.mxu0 %v3049_v9 }
 0x3f3   : > { %v2476_v57 = vadd.f32 %v16719_v35, %v2402_v41  ;;  %v16778_v15 = vpack.c.bf16 %v2769_v7, %v2765_v60  ;;  %v2404_v17 = vpop.f32.mrb[22].mxu0  ;;  %v2771_v2 = vpop.f32.mrb[23].mxu1 }
 0x3f4   : > { %v2478_v18 = vadd.f32 %v16721_v38, %v2404_v17  ;;  %v16781_v19 = vpack.c.bf16 %v2771_v2, %v2767_v3  ;;  %v2406_v26 = vpop.f32.mrb[23].mxu0 }
 0x3f5   : > { %v2480_v22 = vadd.f32 %v16723_v14, %v2406_v26  ;;  %3318 = vrot.lane.b32.xlu0 %v2924_v1, %s15894_s28 }
 0x3f6   : > { %v16785_v24 = vpack.c.bf16 %v2478_v18, %v2474_v23 }
 0x3f7   : > { %v2936_v62 = vpack.c.bf16 %v2480_v22, %v2476_v57 }
 0x3f8   : > { %18670 = vst [vmem:[#allocation38_spill] sm:$0xff] %v16785_v24  ;;  %v2775_v27 = vpop.f32.mrb[24].mxu1 }
 0x3f9   : > { %v2777_v10 = vpop.f32.mrb[25].mxu1  ;;  %3322 = vrot.lane.b32.xlu0 %v16755_v31, %s15894_s28  ;;  %3332 = vrot.lane.b32.xlu1 %v2936_v62, %s15894_s28  ;;  %v2410_v35 = vpop.f32.mrb[24].mxu0  ;;  %v3052_v38 = vsel %vm3035_vm0, %v2936_v62, 0 }
 0x3fa   : > { %v2484_v11 = vadd.f32 %v16727_v56, %v2410_v35  ;;  %13756 = vmatprep.subr.msk.bf16.mxu0 %vm3035_vm0, %v2936_v62  ;;  %v2412_v14 = vpop.f32.mrb[25].mxu0  ;;  %v2779_v59 = vpop.f32.mrb[26].mxu1 }
 0x3fb   : > { %v2486_v1 = vadd.f32 %v16729_v55, %v2412_v14  ;;  %v16794_v37 = vpack.c.bf16 %v2779_v59, %v2775_v27  ;;  %13158 = vmatpush3.bf16.xpose.msra.mxu0 %v3052_v38  ;;  %v2414_v63 = vpop.f32.mrb[26].mxu0  ;;  %v2781_v43 = vpop.f32.mrb[27].mxu1 }
 0x3fc   : > { %v2488_v45 = vadd.f32 %v16731_v4, %v2414_v63  ;;  %v16797_v46 = vpack.c.bf16 %v2781_v43, %v2777_v10  ;;  %v2416_v5 = vpop.f32.mrb[27].mxu0 }
 0x3fd   : > { %v2490_v49 = vadd.f32 %v16733_v50, %v2416_v5 }
 0x3fe   : > { %v16800_v0 = vpack.c.bf16 %v2488_v45, %v2484_v11 }
 0x3ff   : > { %v2945_v56 = vpack.c.bf16 %v2490_v49, %v2486_v1 }
 0x400   : > { %18671 = vst [vmem:[#allocation39_spill] sm:$0xff] %v16800_v0  ;;  %v2785_v40 = vpop.f32.mrb[28].mxu1 }
 0x401   : > { %v2787_v51 = vpop.f32.mrb[29].mxu1  ;;  %3334 = vrot.lane.b32.xlu1 %v2945_v56, %s15894_s28  ;;  %v2420_v55 = vpop.f32.mrb[28].mxu0  ;;  %13757 = vmatprep.subr.msk.bf16.mxu0 %vm3035_vm0, %v2945_v56  ;;  %v3055_v52 = vsel %vm3035_vm0, %v2945_v56, 0 }
 0x402   : > { %v2494_v25 = vadd.f32 %v16737_v16, %v2420_v55  ;;  %v2422_v4 = vpop.f32.mrb[29].mxu0  ;;  %v2789_v53 = vpop.f32.mrb[30].mxu1 }
 0x403   : > { %v2496_v54 = vadd.f32 %v16739_v44, %v2422_v4  ;;  %v16807_v58 = vpack.c.bf16 %v2789_v53, %v2785_v40  ;;  %13160 = vmatpush3.bf16.xpose.msra.mxu0 %v3055_v52  ;;  %v2424_v50 = vpop.f32.mrb[30].mxu0  ;;  %v2791_v60 = vpop.f32.mrb[31].mxu1 }
 0x404   : > { %v2498_v3 = vadd.f32 %v16741_v6, %v2424_v50  ;;  %v16810_v20 = vpack.c.bf16 %v2791_v60, %v2787_v51  ;;  %v2426_v9 = vpop.f32.mrb[31].mxu0 }
 0x405   : > { %v2500_v23 = vadd.f32 %v16743_v29, %v2426_v9 }
 0x406   : > { %v16813_v41 = vpack.c.bf16 %v2498_v3, %v2494_v25 }
 0x407   : > { %v2954_v7 = vpack.c.bf16 %v2500_v23, %v2496_v54 }
 0x408   : > { %18672 = vst [vmem:[#allocation40_spill] sm:$0xff] %v16813_v41  ;;  %v16815_v16 = vpop.f32.mrb[32].mxu1 }
 0x409   : > { %v2893_v57 = vpop.f32.mrb[33].mxu1  ;;  %3336 = vrot.lane.b32.xlu1 %v2954_v7, %s15894_s28  ;;  %13758 = vmatprep.subr.msk.bf16.mxu0 %vm3035_vm0, %v2954_v7  ;;  %v3058_v44 = vsel %vm3035_vm0, %v2954_v7, 0 }
 0x40a   : > { %v16820_v17 = vpop.f32.mrb[34].mxu1 }
 0x40b   : > { %13162 = vmatpush3.bf16.xpose.msra.mxu0 %v3058_v44  ;;  %v2896_v6 = vpop.f32.mrb[35].mxu1 }
 0x40c   : > { %13171 = vmatprep.subr.bf16.mxu0 %v16765_v30 }
 0x40d   : > { %3320 = vrot.lane.b32.xlu1 %v16751_v33, %s15894_s28 }
 0x410   : > { %v16825_v29 = vpop.f32.mrb[36].mxu1 }
 0x411   : > { %v16827_v2 = vpop.f32.mrb[37].mxu1  ;;  %3324 = vrot.lane.b32.xlu1 %v16759_v34, %s15894_s28 }
 0x412   : > { %13164 = vmatmul.mubr.msk.bf16.vlgmr.msra.gmra.mrb[64].mxu0 %vm3035_vm0, %v16751_v33  ;;  %v16833_v18 = vpop.f32.mrb[38].mxu1 }
 0x413   : > { %13167 = vmatprep.mubr.msk.bf16.mxu0 %vm3035_vm0, %v16755_v31  ;;  %13172 = vmatpush3.bf16.msra.mxu0 %v16765_v30  ;;  %v16838_v26 = vpop.f32.mrb[39].mxu1 }
 0x414   : > { %13173 = vmatprep.subr.bf16.mxu0 %v16778_v15 }
 0x417   : > { %13174 = vmatpush3.bf16.msra.mxu0 %v16778_v15 }
 0x418   : > { %13175 = vmatprep.subr.bf16.mxu0 %v16794_v37 }
 0x41a   : > { %13168 = vmatmul.mubr.msk.bf16.gmra.mrb[68].mxu0 %vm3035_vm0, %v16759_v34 }
 0x41b   : > { %13176 = vmatpush3.bf16.msra.mxu0 %v16794_v37 }
 0x41c   : > { %13177 = vmatprep.subr.bf16.mxu0 %v16807_v58 }
 0x41f   : > { %13178 = vmatpush3.bf16.msra.mxu0 %v16807_v58 }
 0x449   : > { %v2609_v33 = vpop.f32.mrb[32].mxu0 }
 0x44a   : > { %v2611_v31 = vpop.f32.mrb[33].mxu0 }
 0x44b   : > { %v2613_v22 = vpop.f32.mrb[34].mxu0 }
 0x44c   : > { %v16848_v62 = vpack.c.bf16 %v2613_v22, %v2609_v33  ;;  %v2615_v27 = vpop.f32.mrb[35].mxu0 }
 0x44d   : > { %v16850_v10 = vpack.c.bf16 %v2615_v27, %v2611_v31 }
 0x451   : > { %v2619_v35 = vpop.f32.mrb[36].mxu0 }
 0x452   : > { %v2621_v38 = vpop.f32.mrb[37].mxu0 }
 0x453   : > { %v2623_v11 = vpop.f32.mrb[38].mxu0 }
 0x454   : > { %v16852_v14 = vpack.c.bf16 %v2623_v11, %v2619_v35  ;;  %v2625_v34 = vpop.f32.mrb[39].mxu0 }
 0x455   : > { %v16854_v59 = vpack.c.bf16 %v2625_v34, %v2621_v38 }
 0x459   : > { %v2629_v1 = vpop.f32.mrb[40].mxu0 }
 0x45a   : > { %v2631_v63 = vpop.f32.mrb[41].mxu0 }
 0x45b   : > { %v2633_v43 = vpop.f32.mrb[42].mxu0 }
 0x45c   : > { %v16856_v45 = vpack.c.bf16 %v2633_v43, %v2629_v1  ;;  %v2635_v5 = vpop.f32.mrb[43].mxu0 }
 0x45d   : > { %v16858_v49 = vpack.c.bf16 %v2635_v5, %v2631_v63 }
 0x461   : > { %v2639_v56 = vpop.f32.mrb[44].mxu0 }
 0x462   : > { %v2641_v40 = vpop.f32.mrb[45].mxu0 }
 0x463   : > { %v3331_v51 = vpop.permute.xlu0 %3330  ;;  %v2643_v55 = vpop.f32.mrb[46].mxu0 }
 0x464   : > { %v16860_v52 = vpack.c.bf16 %v2643_v55, %v2639_v56  ;;  %v2645_v25 = vpop.f32.mrb[47].mxu0  ;;  %13759 = vmatprep.subr.msk.bf16.mxu1 %vm3035_vm0, %v3331_v51  ;;  %v3351_v4 = vsel %vm3035_vm0, %v3331_v51, 0 }
 0x465   : > { %v16864_v53 = vpack.c.bf16 %v2645_v25, %v2641_v40  ;;  %13188 = vmatpush3.bf16.xpose.msra.mxu1 %v3351_v4 }
 0x467   : > { %v3319_v54 = vpop.permute.xlu0 %3318 }
 0x468   : > { %13195 = vmatprep.mubr.msk.bf16.mxu1 %vm3035_vm0, %v3319_v54 }
 0x469   : > { %v12707_v50 = vpop.f32.mrb[48].mxu0 }
 0x46a   : > { %v12708_v60 = vpop.f32.mrb[49].mxu0 }
 0x46b   : > { %v12709_v3 = vadd.f32 %v12708_v60, %v12707_v50  ;;  %v3333_v9 = vpop.permute.xlu1 %3332  ;;  %v12710_v23 = vpop.f32.mrb[50].mxu0 }
 0x46c   : > { %13760 = vmatprep.subr.msk.bf16.mxu1 %vm3035_vm0, %v3333_v9  ;;  %v3354_v7 = vsel %vm3035_vm0, %v3333_v9, 0  ;;  %v12711_v33 = vpop.f32.mrb[51].mxu0 }
 0x46d   : > { %v2894_v44 = vadd.f32 %v12709_v3, %v2893_v57  ;;  %13190 = vmatpush3.bf16.xpose.msra.mxu1 %v3354_v7  ;;  %v12712_v31 = vadd.f32 %v12711_v33, %v12710_v23 }
 0x46f   : > { %v2897_v22 = vadd.f32 %v12712_v31, %v2896_v6  ;;  %v3323_v31 = vpop.permute.xlu0 %3322 }
 0x471   : > { %v12713_v27 = vpop.f32.mrb[52].mxu0  ;;  %v16869_v38 = vpack.c.bf16 %v2897_v22, %v2894_v44 }
 0x472   : > { %v12714_v35 = vpop.f32.mrb[53].mxu0 }
 0x473   : > { %v12715_v11 = vadd.f32 %v12714_v35, %v12713_v27  ;;  %v3335_v34 = vpop.permute.xlu1 %3334  ;;  %v12716_v1 = vpop.f32.mrb[54].mxu0 }
 0x474   : > { %v12717_v63 = vpop.f32.mrb[55].mxu0  ;;  %13761 = vmatprep.subr.msk.bf16.mxu1 %vm3035_vm0, %v3335_v34  ;;  %v3357_v43 = vsel %vm3035_vm0, %v3335_v34, 0  ;;  %v3006_v34 = vand.u32 127, %v775_v32 }
 0x475   : > { %v2902_v5 = vadd.f32 %v16815_v16, %v12715_v11  ;;  %v12718_v56 = vadd.f32 %v12717_v63, %v12716_v1  ;;  %13192 = vmatpush3.bf16.xpose.msra.mxu1 %v3357_v43  ;;  %v3000_v1 = vadd.s32 24, %v16511_v39  ;;  %v15895_v63 = vmov -1e+30  }
 0x476   : > { %vm3007_vm2 = vcmp.le.s32.totalorder %v3006_v34, %v16511_v39 }
 0x477   : > { %v2905_v57 = vadd.f32 %v16820_v17, %v12718_v56  ;;  %v16905_v56 = vsel %vm3007_vm2, 0.0, %v15895_v63  ;;  %vm3010_vm4 = vcmp.le.s32.totalorder %v3006_v34, %v3000_v1 }
 0x479   : > { %v12719_v40 = vpop.f32.mrb[56].mxu0  ;;  %v16875_v6 = vpack.c.bf16 %v2905_v57, %v2902_v5 }
 0x47a   : > { %v12720_v51 = vpop.f32.mrb[57].mxu0 }
 0x47b   : > { %v12721_v55 = vadd.f32 %v12720_v51, %v12719_v40  ;;  %v12722_v25 = vpop.f32.mrb[58].mxu0  ;;  %v3337_v4 = vpop.permute.xlu1 %3336  ;;  %v3001_v51 = vadd.s32 32, %v16511_v39 }
 0x47c   : > { %v12723_v54 = vpop.f32.mrb[59].mxu0  ;;  %13762 = vmatprep.subr.msk.bf16.mxu1 %vm3035_vm0, %v3337_v4  ;;  %v3360_v50 = vsel %vm3035_vm0, %v3337_v4, 0 }
 0x47d   : > { %v2910_v60 = vadd.f32 %v12721_v55, %v16827_v2  ;;  %v12724_v3 = vadd.f32 %v12723_v54, %v12722_v25  ;;  %13194 = vmatpush3.bf16.xpose.msra.mxu1 %v3360_v50  ;;  %v3004_v55 = vadd.s32 56, %v16511_v39  ;;  %vm3011_vm5 = vcmp.le.s32.totalorder %v3006_v34, %v3001_v51 }
 0x47e   : > { %13235 = vmatprep.subr.bf16.mxu1 %v16768_v12 }
 0x47f   : > { %v2913_v16 = vadd.f32 %v12724_v3, %v16838_v26  ;;  %v3321_v7 = vpop.permute.xlu1 %3320  ;;  %v16920_v3 = vsel %vm3010_vm4, 0.0, %v15895_v63  ;;  %vm3014_vm6 = vcmp.le.s32.totalorder %v3006_v34, %v3004_v55 }
 0x481   : > { %v12725_v17 = vpop.f32.mrb[60].mxu0  ;;  %v16882_v9 = vpack.c.bf16 %v2913_v16, %v2910_v60  ;;  %v3002_v60 = vadd.s32 40, %v16511_v39 }
 0x482   : > { %v12726_v23 = vpop.f32.mrb[61].mxu0 }
 0x483   : > { %v12727_v44 = vadd.f32 %v12726_v23, %v12725_v17  ;;  %v12728_v33 = vpop.f32.mrb[62].mxu0  ;;  %v3325_v11 = vpop.permute.xlu1 %3324  ;;  %v3003_v17 = vadd.s32 48, %v16511_v39  ;;  %vm3012_vm7 = vcmp.le.s32.totalorder %v3006_v34, %v3002_v60 }
 0x484   : > { %v12729_v22 = vpop.f32.mrb[63].mxu0  ;;  %13196 = vmatmul.mubr.msk.bf16.vlgmr.msra.gmra.mrb[40].mxu1 %vm3035_vm0, %v3321_v7 }
 0x485   : > { %v2918_v27 = vadd.f32 %v16825_v29, %v12727_v44  ;;  %v12730_v2 = vadd.f32 %v12729_v22, %v12728_v33  ;;  %13199 = vmatprep.mubr.msk.bf16.mxu1 %vm3035_vm0, %v3323_v31  ;;  %13236 = vmatpush3.bf16.msra.mxu1 %v16768_v12  ;;  %v2999_v29 = vadd.s32 16, %v16511_v39  ;;  %v16933_v31 = vsel %vm3011_vm5, 0.0, %v15895_v63 }
 0x486   : > { %13237 = vmatprep.subr.bf16.mxu1 %v16781_v19  ;;  %v16935_v22 = vsel %vm3014_vm6, 0.0, %v15895_v63  ;;  %vm3013_vm8 = vcmp.le.s32.totalorder %v3006_v34, %v3003_v17 }
 0x487   : > { %v2921_v26 = vadd.f32 %v16833_v18, %v12730_v2  ;;  %v2998_v18 = vadd.s32 8, %v16511_v39  ;;  %vm3009_vm1 = vcmp.le.s32.totalorder %v3006_v34, %v2999_v29 }
 0x488   : > { %v16903_v43 = vsel %vm3009_vm1, 0.0, %v15895_v63 }
 0x489   : > { %13238 = vmatpush3.bf16.msra.mxu1 %v16781_v19  ;;  %v16891_v35 = vpack.c.bf16 %v2921_v26, %v2918_v27  ;;  %vm3008_vm3 = vcmp.le.s32.totalorder %v3006_v34, %v2998_v18  ;;  %v16937_v26 = vsel %vm3012_vm7, 0.0, %v15895_v63 }
 0x48a   : > { %13239 = vmatprep.subr.bf16.mxu1 %v16797_v46  ;;  %v16910_v32 = vsel %vm3008_vm3, 0.0, %v15895_v63 }
 0x48c   : > { %13200 = vmatmul.mubr.msk.bf16.gmra.mrb[44].mxu1 %vm3035_vm0, %v3325_v11 }
 0x48d   : > { %13240 = vmatpush3.bf16.msra.mxu1 %v16797_v46 }
 0x48e   : > { %13241 = vmatprep.subr.bf16.mxu1 %v16810_v20 }
 0x491   : > { %13242 = vmatpush3.bf16.msra.mxu1 %v16810_v20 }
 0x4e5   : > { %v13165_v5 = vpop.f32.mrb[64].mxu0 }
 0x4e6   : > { %v16908_v57 = vadd.f32 %v13165_v5, %v16903_v43  ;;  %v3094_v40 = vpop.f32.mrb[65].mxu0  ;;  %v16947_v5 = vsel %vm3013_vm8, 0.0, %v15895_v63 }
 0x4e7   : > { %v13166_v25 = vpop.f32.mrb[66].mxu0  ;;  %v16915_v4 = vadd.f32 %v3094_v40, %v16905_v56 }
 0x4e8   : > { %v3097_v54 = vpop.f32.mrb[67].mxu0  ;;  %v3131_v50 = vsel %vm3035_vm0, %v16908_v57, -inf  ;;  %v16929_v7 = vadd.f32 %v13166_v25, %v16920_v3 }
 0x4e9   : > { %v16923_v16 = vadd.f32 %v3097_v54, %v16910_v32  ;;  %3132 = vmax.xlane.f32.xlu0 %v3131_v50  ;;  %v3125_v44 = vsel %vm3035_vm0, %v16915_v4, -inf }
 0x4ea   : > { %v3134_v1 = vsel %vm3035_vm0, %v16929_v7, -inf }
 0x4eb   : > { %v3128_v23 = vsel %vm3035_vm0, %v16923_v16, -inf }
 0x4ec   : > { %3129 = vmax.xlane.f32.xlu1 %v3128_v23 }
 0x4ed   : > { %v13169_v33 = vpop.f32.mrb[68].mxu0  ;;  %3126 = vmax.xlane.f32.xlu0 %v3125_v44 }
 0x4ee   : > { %v3110_v27 = vpop.f32.mrb[69].mxu0  ;;  %v16955_v51 = vadd.f32 %v13169_v33, %v16947_v5 }
 0x4ef   : > { %v13170_v2 = vpop.f32.mrb[70].mxu0  ;;  %v16940_v11 = vadd.f32 %v3110_v27, %v16933_v31 }
 0x4f0   : > { %v16943_v29 = vadd.f32 %v13170_v2, %v16935_v22  ;;  %v3113_v18 = vpop.f32.mrb[71].mxu0  ;;  %v3143_v63 = vsel %vm3035_vm0, %v16955_v51, -inf }
 0x4f1   : > { %3135 = vmax.xlane.f32.xlu0 %v3134_v1  ;;  %v16950_v40 = vadd.f32 %v3113_v18, %v16937_v26  ;;  %v3137_v55 = vsel %vm3035_vm0, %v16940_v11, -inf }
 0x4f2   : > { %v3146_v34 = vsel %vm3035_vm0, %v16943_v29, -inf }
 0x4f3   : > { %3147 = vmax.xlane.f32.xlu1 %v3146_v34  ;;  %v3140_v25 = vsel %vm3035_vm0, %v16950_v40, -inf }
 0x4f5   : > { %3138 = vmax.xlane.f32.xlu0 %v3137_v55 }
 0x4f7   : > { %3141 = vmax.xlane.f32.xlu1 %v3140_v25 }
 0x4f9   : > { %3144 = vmax.xlane.f32.xlu0 %v3143_v63 }
 0x557   : > { %v13197_v54 = vpop.f32.mrb[40].mxu1 }
 0x558   : > { %v3396_v50 = vpop.f32.mrb[41].mxu1  ;;  %v16970_v33 = vadd.f32 %v13197_v54, %v16903_v43 }
 0x559   : > { %v16964_v60 = vadd.f32 %v3396_v50, %v16905_v56  ;;  %v13198_v17 = vpop.f32.mrb[42].mxu1 }
 0x55a   : > { %v16967_v23 = vadd.f32 %v13198_v17, %v16920_v3  ;;  %v3399_v44 = vpop.f32.mrb[43].mxu1  ;;  %v3433_v34 = vsel %vm3035_vm0, %v16970_v33, -inf }
 0x55b   : > { %v3427_v27 = vsel %vm3035_vm0, %v16964_v60, -inf  ;;  %v16975_v2 = vadd.f32 %v3399_v44, %v16910_v32 }
 0x55c   : > { %3428 = vmax.xlane.f32.xlu0 %v3427_v27  ;;  %v3436_v18 = vsel %vm3035_vm0, %v16967_v23, -inf }
 0x55d   : > { %3437 = vmax.xlane.f32.xlu1 %v3436_v18  ;;  %v3430_v25 = vsel %vm3035_vm0, %v16975_v2, -inf }
 0x55f   : > { %v13201_v1 = vpop.f32.mrb[44].mxu1 }
 0x560   : > { %v3412_v55 = vpop.f32.mrb[45].mxu1  ;;  %3434 = vmax.xlane.f32.xlu0 %v3433_v34  ;;  %v16990_v44 = vadd.f32 %v13201_v1, %v16947_v5 }
 0x561   : > { %v16984_v63 = vadd.f32 %v3412_v55, %v16933_v31  ;;  %v13202_v54 = vpop.f32.mrb[46].mxu1  ;;  %3431 = vmax.xlane.f32.xlu1 %v3430_v25 }
 0x562   : > { %v16987_v50 = vadd.f32 %v13202_v54, %v16935_v22  ;;  %v3415_v17 = vpop.f32.mrb[47].mxu1  ;;  %v3445_v55 = vsel %vm3035_vm0, %v16990_v44, -inf }
 0x563   : > { %v3439_v27 = vsel %vm3035_vm0, %v16984_v63, -inf  ;;  %v16995_v18 = vadd.f32 %v3415_v17, %v16937_v26 }
 0x564   : > { %3440 = vmax.xlane.f32.xlu0 %v3439_v27  ;;  %v3448_v34 = vsel %vm3035_vm0, %v16987_v50, -inf }
 0x565   : > { %3449 = vmax.xlane.f32.xlu1 %v3448_v34  ;;  %v3442_v25 = vsel %vm3035_vm0, %v16995_v18, -inf }
 0x568   : > { %3446 = vmax.xlane.f32.xlu0 %v3445_v55 }
 0x569   : > { %3443 = vmax.xlane.f32.xlu1 %v3442_v25 }
 0x576   : > { %v3133_v1 = vpop.xlane.xlu0 %3132 }
 0x577   : > { %v3151_v54 = vsub.f32 %v16908_v57, %v3133_v1 }
 0x579   : > { %v3161_v28 = vmul.f32 1.442695, %v3151_v54  ;;  %v3130_v39 = vpop.xlane.xlu1 %3129 }
 0x57a   : > { %v3127_v17 = vpop.xlane.xlu0 %3126  ;;  %v3150_v47 = vsub.f32 %v16923_v16, %v3130_v39 }
 0x57b   : > { %15193 = vpow2.f32 %v3161_v28  ;;  %v3149_v27 = vsub.f32 %v16915_v4, %v3127_v17 }
 0x57c   : > { %v3159_v41 = vmul.f32 1.442695, %v3150_v47 }
 0x57d   : > { %v3157_v34 = vmul.f32 1.442695, %v3149_v27 }
 0x57e   : > { %v3136_v48 = vpop.xlane.xlu0 %3135 }
 0x57f   : > { %15195 = vpow2.f32 %v3157_v34  ;;  %v3152_v55 = vsub.f32 %v16929_v7, %v3136_v48 }
 0x580   : > { %v3148_v61 = vpop.xlane.xlu1 %3147 }
 0x581   : > { %v3163_v0 = vmul.f32 1.442695, %v3152_v55  ;;  %v3156_v25 = vsub.f32 %v16943_v29, %v3148_v61 }
 0x582   : > { %v3139_v24 = vpop.xlane.xlu0 %3138 }
 0x583   : > { %15197 = vpow2.f32 %v3163_v0  ;;  %v3153_v57 = vsub.f32 %v16940_v11, %v3139_v24  ;;  %v3171_v4 = vmul.f32 1.442695, %v3156_v25 }
 0x584   : > { %v3142_v1 = vpop.xlane.xlu1 %3141  ;;  %15199 = vpow2.f32 %v3159_v41 }
 0x585   : > { %v17009_v28 = vpop.eup %15193  ;;  %v3154_v39 = vsub.f32 %v16950_v40, %v3142_v1  ;;  %v3165_v7 = vmul.f32 1.442695, %v3153_v57  ;;  %15201 = vpow2.f32 %v3171_v4 }
 0x586   : > { %v3145_v16 = vpop.xlane.xlu0 %3144  ;;  %v3179_v48 = vsel %vm3035_vm0, %v17009_v28, 0.0 }
 0x587   : > { %v3155_v47 = vsub.f32 %v16955_v51, %v3145_v16  ;;  %3180 = vadd.xlane.f32.xlu0 %v3179_v48  ;;  %v3167_v0 = vmul.f32 1.442695, %v3154_v39 }
 0x589   : > { %v17015_v61 = vpop.eup %15195  ;;  %v3169_v24 = vmul.f32 1.442695, %v3155_v47 }
 0x58a   : > { %v3173_v11 = vsel %vm3035_vm0, %v17015_v61, 0.0 }
 0x58b   : > { %15203 = vpow2.f32 %v3169_v24  ;;  %3174 = vadd.xlane.f32.xlu0 %v3173_v11 }
 0x58c   : > { %15205 = vpow2.f32 %v3165_v7 }
 0x58d   : > { %v17019_v41 = vpop.eup %15197  ;;  %15207 = vpow2.f32 %v3167_v0 }
 0x58e   : > { %v3182_v29 = vsel %vm3035_vm0, %v17019_v41, 0.0  ;;  %v17023_v40 = vpop.eup %15199 }
 0x58f   : > { %3183 = vadd.xlane.f32.xlu1 %v3182_v29  ;;  %v3176_v51 = vsel %vm3035_vm0, %v17023_v40, 0.0  ;;  %v17027_v54 = vpop.eup %15201 }
 0x590   : > { %v3194_v34 = vsel %vm3035_vm0, %v17027_v54, 0.0 }
 0x593   : > { %3177 = vadd.xlane.f32.xlu1 %v3176_v51 }
 0x595   : > { %v17029_v17 = vpop.eup %15203 }
 0x596   : > { %v17031_v27 = vpop.eup %15205  ;;  %v3191_v55 = vsel %vm3035_vm0, %v17029_v17, 0.0 }
 0x597   : > { %v17037_v25 = vpop.eup %15207  ;;  %3195 = vadd.xlane.f32.xlu1 %v3194_v34  ;;  %3192 = vadd.xlane.f32.xlu0 %v3191_v55  ;;  %v3185_v1 = vsel %vm3035_vm0, %v17031_v27, 0.0 }
 0x598   : > { %v3188_v57 = vsel %vm3035_vm0, %v17037_v25, 0.0 }
 0x59b   : > { %3189 = vadd.xlane.f32.xlu1 %v3188_v57  ;;  %3186 = vadd.xlane.f32.xlu0 %v3185_v1 }
 0x5ac   : > { %3525 = vrot.lane.b32.xlu1 %v16778_v15, %s15894_s28 }
 0x5b0   : > { %3527 = vrot.lane.b32.xlu1 %v16794_v37, %s15894_s28 }
 0x5e9   : > { %v3429_v4 = vpop.xlane.xlu0 %3428 }
 0x5ea   : > { %v3438_v39 = vpop.xlane.xlu1 %3437  ;;  %v3451_v48 = vsub.f32 %v16964_v60, %v3429_v4 }
 0x5eb   : > { %v3454_v16 = vsub.f32 %v16967_v23, %v3438_v39 }
 0x5ec   : > { %v3459_v29 = vmul.f32 1.442695, %v3451_v48 }
 0x5ed   : > { %v3465_v47 = vmul.f32 1.442695, %v3454_v16  ;;  %v3435_v7 = vpop.xlane.xlu0 %3434 }
 0x5ee   : > { %v3453_v0 = vsub.f32 %v16970_v33, %v3435_v7  ;;  %v3432_v24 = vpop.xlane.xlu1 %3431 }
 0x5ef   : > { %15209 = vpow2.f32 %v3465_v47  ;;  %v3452_v11 = vsub.f32 %v16975_v2, %v3432_v24 }
 0x5f0   : > { %v3463_v51 = vmul.f32 1.442695, %v3453_v0 }
 0x5f1   : > { %v3461_v15 = vmul.f32 1.442695, %v3452_v11  ;;  %v3441_v1 = vpop.xlane.xlu0 %3440 }
 0x5f2   : > { %15211 = vpow2.f32 %v3463_v51  ;;  %v3450_v4 = vpop.xlane.xlu1 %3449  ;;  %v3455_v24 = vsub.f32 %v16984_v63, %v3441_v1 }
 0x5f3   : > { %15213 = vpow2.f32 %v3461_v15 }
 0x5f4   : > { %15215 = vpow2.f32 %v3459_v29 }
 0x5f5   : > { %v3447_v39 = vpop.xlane.xlu0 %3446 }
 0x5f6   : > { %v3444_v48 = vpop.xlane.xlu1 %3443 }
 0x5f7   : > { %v3456_v0 = vsub.f32 %v16995_v18, %v3444_v48 }
 0x5f9   : > { %v17051_v37 = vpop.eup %15209  ;;  %v3469_v29 = vmul.f32 1.442695, %v3456_v0 }
 0x5fa   : > { %v3484_v23 = vsel %vm3035_vm0, %v17051_v37, 0.0 }
 0x5fb   : > { %3485 = vadd.xlane.f32.xlu1 %v3484_v23  ;;  %v3457_v23 = vsub.f32 %v16990_v44, %v3447_v39 }
 0x5fc   : > { %v17055_v60 = vpop.eup %15211 }
 0x5fd   : > { %v17057_v34 = vpop.eup %15213  ;;  %v3481_v33 = vsel %vm3035_vm0, %v17055_v60, 0.0  ;;  %v3471_v63 = vmul.f32 1.442695, %v3457_v23 }
 0x5fe   : > { %v17061_v2 = vpop.eup %15215  ;;  %3482 = vadd.xlane.f32.xlu0 %v3481_v33  ;;  %v3478_v55 = vsel %vm3035_vm0, %v17057_v34, 0.0 }
 0x5ff   : > { %3479 = vadd.xlane.f32.xlu1 %v3478_v55  ;;  %v3475_v57 = vsel %vm3035_vm0, %v17061_v2, 0.0 }
 0x602   : > { %3476 = vadd.xlane.f32.xlu0 %v3475_v57  ;;  %v3458_v57 = vsub.f32 %v16987_v50, %v3450_v4 }
 0x604   : > { %v3473_v39 = vmul.f32 1.442695, %v3458_v57 }
 0x610   : > { %3529 = vrot.lane.b32.xlu1 %v16807_v58, %s15894_s28  ;;  %v3467_v58 = vmul.f32 1.442695, %v3455_v24 }
 0x614   : > { %v3181_v16 = vpop.xlane.xlu0 %3180 }
 0x618   : > { %3523 = vrot.lane.b32.xlu0 %v16765_v30, %s15894_s28  ;;  %v3175_v47 = vpop.xlane.xlu0 %3174 }
 0x61c   : > { %v3184_v7 = vpop.xlane.xlu1 %3183 }
 0x61d   : > { %15217 = vrcp.f32 %v3184_v7 }
 0x61e   : > { %15219 = vrcp.f32 %v3175_v47 }
 0x61f   : > { %15221 = vrcp.f32 %v3181_v16 }
 0x620   : > { %v3178_v11 = vpop.xlane.xlu1 %3177 }
 0x621   : > { %15223 = vrcp.f32 %v3178_v11 }
 0x622   : > { %15225 = vpow2.f32 %v3469_v29 }
 0x624   : > { %v3196_v51 = vpop.xlane.xlu1 %3195  ;;  %v3193_v15 = vpop.xlane.xlu0 %3192 }
 0x625   : > { %15227 = vrcp.f32 %v3196_v51 }
 0x626   : > { %15229 = vrcp.f32 %v3193_v15 }
 0x627   : > { %v15218_v30 = vpop.eup %15217  ;;  %15231 = vpow2.f32 %v3467_v58 }
 0x628   : > { %v3190_v33 = vpop.xlane.xlu1 %3189  ;;  %v3187_v18 = vpop.xlane.xlu0 %3186  ;;  %v3208_v48 = vmul.f32 %v15218_v30, %v17019_v41 }
 0x629   : > { %v15220_v55 = vpop.eup %15219  ;;  %15233 = vrcp.f32 %v3190_v33 }
 0x62a   : > { %v15222_v1 = vpop.eup %15221  ;;  %15235 = vrcp.f32 %v3187_v18  ;;  %v3205_v47 = vmul.f32 %v15220_v55, %v17015_v61 }
 0x62b   : > { %v15224_v16 = vpop.eup %15223  ;;  %15237 = vpow2.f32 %v3471_v63  ;;  %v3207_v7 = vmul.f32 %v15222_v1, %v17009_v28 }
 0x62c   : > { %v3206_v44 = vmul.f32 %v15224_v16, %v17023_v40  ;;  %v17079_v24 = vpop.eup %15225  ;;  %15239 = vpow2.f32 %v3473_v39 }
 0x62d   : > { %v3214_v11 = vpack.c.bf16 %v3208_v48, %v3207_v7  ;;  %v3490_v40 = vsel %vm3035_vm0, %v17079_v24, 0.0 }
 0x62e   : > { %v3213_v0 = vpack.c.bf16 %v3206_v44, %v3205_v47 }
 0x62f   : > { %v15228_v50 = vpop.eup %15227 }
 0x630   : > { %13179 = vmatprep.mubr.msk.bf16.mxu0 %vm3035_vm0, %v3213_v0  ;;  %v15230_v4 = vpop.eup %15229  ;;  %v3212_v51 = vmul.f32 %v15228_v50, %v17027_v54 }
 0x631   : > { %13180 = vmatmul.mubr.msk.bf16.vlgmr.msra.gmra.mrb[72].mxu0 %vm3035_vm0, %v3214_v11  ;;  %v17083_v41 = vpop.eup %15231  ;;  %v3211_v58 = vmul.f32 %v15230_v4, %v17029_v17 }
 0x632   : > { %v3487_v23 = vsel %vm3035_vm0, %v17083_v41, 0.0 }
 0x633   : > { %v15234_v61 = vpop.eup %15233  ;;  %v3216_v18 = vpack.c.bf16 %v3212_v51, %v3211_v58 }
 0x634   : > { %v15236_v29 = vpop.eup %15235  ;;  %3491 = vadd.xlane.f32.xlu1 %v3490_v40  ;;  %v3210_v28 = vmul.f32 %v15234_v61, %v17037_v25 }
 0x635   : > { %v3209_v15 = vmul.f32 %v15236_v29, %v17031_v27  ;;  %v17093_v30 = vpop.eup %15237  ;;  %v3526_v27 = vpop.permute.xlu1 %3525 }
 0x636   : > { %v3493_v25 = vsel %vm3035_vm0, %v17093_v30, 0.0  ;;  %v17099_v17 = vpop.eup %15239 }
 0x637   : > { %3488 = vadd.xlane.f32.xlu0 %v3487_v23  ;;  %v3215_v33 = vpack.c.bf16 %v3210_v28, %v3209_v15  ;;  %v3496_v54 = vsel %vm3035_vm0, %v17099_v17, 0.0  ;;  %v3671_v28 = vsel %vm3035_vm0, %v16860_v52, 0 }
 0x639   : > { %13183 = vmatprep.mubr.msk.bf16.mxu0 %vm3035_vm0, %v3215_v33  ;;  %v3528_v55 = vpop.permute.xlu1 %3527 }
 0x63a   : > { %13184 = vmatmul.mubr.msk.bf16.gmra.mrb[76].mxu0 %vm3035_vm0, %v3216_v18 }
 0x63b   : > { %3494 = vadd.xlane.f32.xlu0 %v3493_v25 }
 0x63f   : > { %3497 = vadd.xlane.f32.xlu0 %v3496_v54 }
 0x688   : > { %v3486_v57 = vpop.xlane.xlu1 %3485 }
 0x68b   : > { %v3483_v63 = vpop.xlane.xlu0 %3482 }
 0x68c   : > { %v3480_v1 = vpop.xlane.xlu1 %3479 }
 0x68d   : > { %15241 = vrcp.f32 %v3480_v1 }
 0x68f   : > { %v3477_v16 = vpop.xlane.xlu0 %3476 }
 0x690   : > { %15243 = vrcp.f32 %v3477_v16  ;;  %v3530_v50 = vpop.permute.xlu1 %3529 }
 0x691   : > { %15245 = vrcp.f32 %v3483_v63 }
 0x692   : > { %15247 = vrcp.f32 %v3486_v57 }
 0x693   : > { %v3524_v48 = vpop.permute.xlu0 %3523 }
 0x694   : > { %13203 = vmatprep.subr.bf16.mxu0 %v3524_v48 }
 0x695   : > { %13204 = vmatpush3.bf16.msra.mxu0 %v3524_v48 }
 0x696   : > { %13205 = vmatprep.subr.bf16.mxu0 %v3526_v27 }
 0x697   : > { %v15242_v47 = vpop.eup %15241 }
 0x698   : > { %v3508_v0 = vmul.f32 %v15242_v47, %v17057_v34  ;;  %v3662_v34 = vsel %vm3035_vm0, %v16848_v62, 0 }
 0x699   : > { %13206 = vmatpush3.bf16.msra.mxu0 %v3526_v27 }
 0x69a   : > { %v15244_v44 = vpop.eup %15243  ;;  %13207 = vmatprep.subr.bf16.mxu0 %v3528_v55 }
 0x69b   : > { %v15246_v39 = vpop.eup %15245  ;;  %v3507_v7 = vmul.f32 %v15244_v44, %v17061_v2 }
 0x69c   : > { %v15248_v11 = vpop.eup %15247  ;;  %v3509_v61 = vmul.f32 %v15246_v39, %v17055_v60  ;;  %v3665_v60 = vsel %vm3035_vm0, %v16852_v14, 0 }
 0x69d   : > { %13208 = vmatpush3.bf16.msra.mxu0 %v3528_v55  ;;  %v3515_v4 = vpack.c.bf16 %v3508_v0, %v3507_v7  ;;  %v3510_v40 = vmul.f32 %v15248_v11, %v17051_v37  ;;  %v3668_v37 = vsel %vm3035_vm0, %v16856_v45, 0 }
 0x69e   : > { %13209 = vmatprep.subr.bf16.mxu0 %v3530_v50 }
 0x69f   : > { %13211 = vmatprep.mubr.msk.bf16.mxu0 %vm3035_vm0, %v3515_v4  ;;  %v3516_v29 = vpack.c.bf16 %v3510_v40, %v3509_v61 }
 0x6a1   : > { %13210 = vmatpush3.bf16.msra.mxu0 %v3530_v50 }
 0x6a2   : > { %13763 = vmatprep.subr.msk.bf16.mxu0 %vm3035_vm0, %v16848_v62 }
 0x6a4   : > { %13212 = vmatmul.mubr.msk.bf16.vlgmr.msra.gmra.mrb[80].mxu0 %vm3035_vm0, %v3516_v29 }
 0x6aa   : > { %13220 = vmatpush3.bf16.xpose.msra.mxu0 %v3662_v34 }
 0x6ab   : > { %13764 = vmatprep.subr.msk.bf16.mxu0 %vm3035_vm0, %v16852_v14 }
 0x6b2   : > { %13222 = vmatpush3.bf16.xpose.msra.mxu0 %v3665_v60 }
 0x6b3   : > { %13765 = vmatprep.subr.msk.bf16.mxu0 %vm3035_vm0, %v16856_v45 }
 0x6ba   : > { %13224 = vmatpush3.bf16.xpose.msra.mxu0 %v3668_v37 }
 0x6bb   : > { %13766 = vmatprep.subr.msk.bf16.mxu0 %vm3035_vm0, %v16860_v52 }
 0x6c1   : > { %v3492_v2 = vpop.xlane.xlu1 %3491 }
 0x6c2   : > { %13226 = vmatpush3.bf16.xpose.msra.mxu0 %v3671_v28  ;;  %15249 = vrcp.f32 %v3492_v2 }
 0x6c4   : > { %v3489_v58 = vpop.xlane.xlu0 %3488 }
 0x6c5   : > { %15251 = vrcp.f32 %v3489_v58 }
 0x6c8   : > { %v3495_v51 = vpop.xlane.xlu0 %3494 }
 0x6c9   : > { %15253 = vrcp.f32 %v3495_v51 }
 0x6cc   : > { %v3498_v15 = vpop.xlane.xlu0 %3497  ;;  %v15250_v23 = vpop.eup %15249 }
 0x6cd   : > { %15255 = vrcp.f32 %v3498_v15  ;;  %v3512_v25 = vmul.f32 %v15250_v23, %v17079_v24 }
 0x6cf   : > { %v15252_v33 = vpop.eup %15251 }
 0x6d0   : > { %v3511_v18 = vmul.f32 %v15252_v33, %v17083_v41 }
 0x6d2   : > { %v3517_v54 = vpack.c.bf16 %v3512_v25, %v3511_v18 }
 0x6d3   : > { %v15254_v27 = vpop.eup %15253 }
 0x6d4   : > { %13215 = vmatprep.mubr.msk.bf16.mxu0 %vm3035_vm0, %v3517_v54  ;;  %v3513_v57 = vmul.f32 %v15254_v27, %v17093_v30 }
 0x6d7   : > { %v15256_v55 = vpop.eup %15255 }
 0x6d8   : > { %v3514_v63 = vmul.f32 %v15256_v55, %v17099_v17 }
 0x6da   : > { %v3518_v1 = vpack.c.bf16 %v3514_v63, %v3513_v57 }
 0x6dc   : > { %13216 = vmatmul.mubr.msk.bf16.gmra.mrb[84].mxu0 %vm3035_vm0, %v3518_v1 }
 0x6dd   : > { %13227 = vmatprep.mubr.msk.bf16.mxu0 %vm3035_vm0, %v16747_v8 }
 0x6e4   : > { %13228 = vmatmul.mubr.msk.bf16.vlgmr.msra.gmra.mrb[88].mxu0 %vm3035_vm0, %v16753_v21 }
 0x6e5   : > { %13231 = vmatprep.mubr.msk.bf16.mxu0 %vm3035_vm0, %v16757_v36 }
 0x6ec   : > { %13232 = vmatmul.mubr.msk.bf16.gmra.mrb[92].mxu0 %vm3035_vm0, %v16761_v42 }
 0x704   : > { %v13181_v24 = vpop.f32.mrb[72].mxu0 }
 0x705   : > { %v3263_v41 = vpop.f32.mrb[73].mxu0 }
 0x706   : > { %v13182_v30 = vpop.f32.mrb[74].mxu0 }
 0x707   : > { %v3295_v16 = vpack.c.bf16 %v13182_v30, %v13181_v24  ;;  %v3266_v17 = vpop.f32.mrb[75].mxu0 }
 0x708   : > { %v3294_v48 = vpack.c.bf16 %v3266_v17, %v3263_v41 }
 0x709   : > { %3299 = vst.msk [vmem:[#allocation3 + $0x18] sm:$0xff] %vm3035_vm0, %v3295_v16 }
 0x70a   : > { %3298 = vst.msk [vmem:[#allocation3] sm:$0xff] %vm3035_vm0, %v3294_v48 }
 0x70d   : > { %v13185_v47 = vpop.f32.mrb[76].mxu0 }
 0x70e   : > { %v3279_v44 = vpop.f32.mrb[77].mxu0 }
 0x70f   : > { %v13186_v39 = vpop.f32.mrb[78].mxu0 }
 0x710   : > { %v3297_v7 = vpack.c.bf16 %v13186_v39, %v13185_v47  ;;  %v3282_v0 = vpop.f32.mrb[79].mxu0 }
 0x711   : > { %v3296_v11 = vpack.c.bf16 %v3282_v0, %v3279_v44 }
 0x712   : > { %3301 = vst.msk [vmem:[#allocation3 + $0x48] sm:$0xff] %vm3035_vm0, %v3297_v7 }
 0x713   : > { %3300 = vst.msk [vmem:[#allocation3 + $0x30] sm:$0xff] %vm3035_vm0, %v3296_v11 }
 0x777   : > { %v17143_v50 = vpop.f32.mrb[80].mxu0 }
 0x778   : > { %v17145_v4 = vpop.f32.mrb[81].mxu0 }
 0x779   : > { %v17147_v61 = vpop.f32.mrb[82].mxu0 }
 0x77a   : > { %v17151_v29 = vpop.f32.mrb[83].mxu0 }
 0x7af   : > { %v17155_v60 = vpop.f32.mrb[84].mxu0 }
 0x7b0   : > { %v17157_v37 = vpop.f32.mrb[85].mxu0 }
 0x7b1   : > { %v17159_v2 = vpop.f32.mrb[86].mxu0 }
 0x7b2   : > { %v17163_v58 = vpop.f32.mrb[87].mxu0 }
 0x7b7   : > { %v13229_v15 = vpop.f32.mrb[88].mxu0 }
 0x7b8   : > { %v3707_v23 = vpop.f32.mrb[89].mxu0  ;;  %v3716_v54 = vadd.f32 %v13229_v15, %v16903_v43 }
 0x7b9   : > { %v3708_v33 = vadd.f32 %v3707_v23, %v16905_v56  ;;  %v13230_v18 = vpop.f32.mrb[90].mxu0 }
 0x7ba   : > { %v3710_v25 = vpop.f32.mrb[91].mxu0  ;;  %v3719_v57 = vadd.f32 %v13230_v18, %v16920_v3  ;;  %v3744_v24 = vsel %vm3035_vm0, %v3716_v54, -inf }
 0x7bb   : > { %v3711_v27 = vadd.f32 %v3710_v25, %v16910_v32  ;;  %v3738_v55 = vsel %vm3035_vm0, %v3708_v33, -inf }
 0x7bc   : > { %3739 = vmax.xlane.f32.xlu0 %v3738_v55  ;;  %v3747_v17 = vsel %vm3035_vm0, %v3719_v57, -inf }
 0x7bd   : > { %v3741_v63 = vsel %vm3035_vm0, %v3711_v27, -inf }
 0x7be   : > { %3742 = vmax.xlane.f32.xlu1 %v3741_v63 }
 0x7bf   : > { %v13233_v1 = vpop.f32.mrb[92].mxu0 }
 0x7c0   : > { %v3723_v41 = vpop.f32.mrb[93].mxu0  ;;  %3745 = vmax.xlane.f32.xlu0 %v3744_v24  ;;  %v3732_v47 = vadd.f32 %v13233_v1, %v16947_v5 }
 0x7c1   : > { %v3724_v30 = vadd.f32 %v3723_v41, %v16933_v31  ;;  %v13234_v16 = vpop.f32.mrb[94].mxu0 }
 0x7c2   : > { %v3726_v48 = vpop.f32.mrb[95].mxu0  ;;  %3748 = vmax.xlane.f32.xlu1 %v3747_v17  ;;  %v3735_v7 = vadd.f32 %v13234_v16, %v16935_v22  ;;  %v3756_v11 = vsel %vm3035_vm0, %v3732_v47, -inf }
 0x7c3   : > { %v3727_v44 = vadd.f32 %v3726_v48, %v16937_v26  ;;  %v3750_v39 = vsel %vm3035_vm0, %v3724_v30, -inf }
 0x7c4   : > { %3751 = vmax.xlane.f32.xlu0 %v3750_v39  ;;  %v3759_v15 = vsel %vm3035_vm0, %v3735_v7, -inf }
 0x7c5   : > { %v3753_v0 = vsel %vm3035_vm0, %v3727_v44, -inf }
 0x7c6   : > { %3754 = vmax.xlane.f32.xlu1 %v3753_v0 }
 0x7c8   : > { %3757 = vmax.xlane.f32.xlu0 %v3756_v11 }
 0x7ca   : > { %3760 = vmax.xlane.f32.xlu1 %v3759_v15 }
 0x849   : > { %v3740_v23 = vpop.xlane.xlu0 %3739 }
 0x84a   : > { %v3762_v18 = vsub.f32 %v3708_v33, %v3740_v23 }
 0x84b   : > { %v3743_v25 = vpop.xlane.xlu1 %3742 }
 0x84c   : > { %v3763_v63 = vsub.f32 %v3711_v27, %v3743_v25  ;;  %v3770_v24 = vmul.f32 1.442695, %v3762_v18 }
 0x84d   : > { %v3746_v55 = vpop.xlane.xlu0 %3745 }
 0x84e   : > { %v3764_v1 = vsub.f32 %v3716_v54, %v3746_v55  ;;  %v3772_v39 = vmul.f32 1.442695, %v3763_v63 }
 0x84f   : > { %v3749_v41 = vpop.xlane.xlu1 %3748 }
 0x850   : > { %v3774_v17 = vmul.f32 1.442695, %v3764_v1  ;;  %v3765_v48 = vsub.f32 %v3719_v57, %v3749_v41 }
 0x851   : > { %v3752_v16 = vpop.xlane.xlu0 %3751 }
 0x852   : > { %15257 = vpow2.f32 %v3774_v17  ;;  %v3776_v0 = vmul.f32 1.442695, %v3765_v48  ;;  %v3766_v11 = vsub.f32 %v3724_v30, %v3752_v16 }
 0x853   : > { %15259 = vpow2.f32 %v3770_v24  ;;  %v3755_v1 = vpop.xlane.xlu1 %3754 }
 0x854   : > { %15261 = vpow2.f32 %v3776_v0  ;;  %v3778_v51 = vmul.f32 1.442695, %v3766_v11  ;;  %v3767_v17 = vsub.f32 %v3727_v44, %v3755_v1 }
 0x855   : > { %v3758_v28 = vpop.xlane.xlu0 %3757  ;;  %15263 = vpow2.f32 %v3772_v39 }
 0x856   : > { %v3768_v15 = vsub.f32 %v3732_v47, %v3758_v28  ;;  %v3780_v16 = vmul.f32 1.442695, %v3767_v17 }
 0x857   : > { %v3761_v24 = vpop.xlane.xlu1 %3760 }
 0x858   : > { %v3782_v33 = vmul.f32 1.442695, %v3768_v15  ;;  %v3769_v41 = vsub.f32 %v3735_v7, %v3761_v24 }
 0x85a   : > { %15265 = vpow2.f32 %v3782_v33  ;;  %v3784_v48 = vmul.f32 1.442695, %v3769_v41 }
 0x85b   : > { %15267 = vpow2.f32 %v3778_v51 }
 0x85c   : > { %v15258_v23 = vpop.eup %15257  ;;  %15269 = vpow2.f32 %v3784_v48 }
 0x85d   : > { %v15260_v54 = vpop.eup %15259  ;;  %v3792_v27 = vsel %vm3035_vm0, %v15258_v23, 0.0  ;;  %15271 = vpow2.f32 %v3780_v16 }
 0x85e   : > { %v15262_v18 = vpop.eup %15261  ;;  %3793 = vadd.xlane.f32.xlu0 %v3792_v27  ;;  %v3786_v55 = vsel %vm3035_vm0, %v15260_v54, 0.0 }
 0x85f   : > { %v3795_v57 = vsel %vm3035_vm0, %v15262_v18, 0.0  ;;  %v15264_v25 = vpop.eup %15263 }
 0x860   : > { %3796 = vadd.xlane.f32.xlu1 %v3795_v57  ;;  %v3789_v30 = vsel %vm3035_vm0, %v15264_v25, 0.0 }
 0x862   : > { %3787 = vadd.xlane.f32.xlu0 %v3786_v55 }
 0x864   : > { %v17187_v28 = vpop.eup %15265  ;;  %3790 = vadd.xlane.f32.xlu1 %v3789_v30 }
 0x865   : > { %v3804_v51 = vsel %vm3035_vm0, %v17187_v28, 0.0  ;;  %v17191_v47 = vpop.eup %15267 }
 0x866   : > { %3805 = vadd.xlane.f32.xlu0 %v3804_v51  ;;  %v3798_v63 = vsel %vm3035_vm0, %v17191_v47, 0.0 }
 0x86a   : > { %3799 = vadd.xlane.f32.xlu0 %v3798_v63 }
 0x875   : > { %3945 = vrot.lane.b32.xlu1 %v16852_v14, %s15894_s28  ;;  %v15270_v14 = vpop.eup %15269 }
 0x876   : > { %v15272_v39 = vpop.eup %15271 }
 0x879   : > { %3947 = vrot.lane.b32.xlu1 %v16856_v45, %s15894_s28  ;;  %v3807_v45 = vsel %vm3035_vm0, %v15270_v14, 0.0 }
 0x880   : > { %3943 = vrot.lane.b32.xlu0 %v16848_v62, %s15894_s28  ;;  %v3801_v62 = vsel %vm3035_vm0, %v15272_v39, 0.0 }
 0x884   : > { %3931 = vrot.lane.b32.xlu0 %v16747_v8, %s15894_s28 }
 0x888   : > { %3935 = vrot.lane.b32.xlu0 %v16757_v36, %s15894_s28 }
 0x89d   : > { %3808 = vadd.xlane.f32.xlu1 %v3807_v45 }
 0x8a1   : > { %3802 = vadd.xlane.f32.xlu1 %v3801_v62 }
 0x8b2   : > { %3949 = vrot.lane.b32.xlu1 %v16860_v52, %s15894_s28 }
 0x8b6   : > { %3933 = vrot.lane.b32.xlu1 %v16753_v21, %s15894_s28 }
 0x8ba   : > { %3937 = vrot.lane.b32.xlu1 %v16761_v42, %s15894_s28 }
 0x8eb   : > { %v3794_v8 = vpop.xlane.xlu0 %3793 }
 0x8ed   : > { %v3797_v36 = vpop.xlane.xlu1 %3796 }
 0x8ee   : > { %15273 = vrcp.f32 %v3797_v36 }
 0x8ef   : > { %v3788_v44 = vpop.xlane.xlu0 %3787 }
 0x8f0   : > { %15275 = vrcp.f32 %v3788_v44 }
 0x8f1   : > { %15277 = vrcp.f32 %v3794_v8  ;;  %v3791_v7 = vpop.xlane.xlu1 %3790 }
 0x8f2   : > { %15279 = vrcp.f32 %v3791_v7 }
 0x8f3   : > { %v3806_v0 = vpop.xlane.xlu0 %3805 }
 0x8f5   : > { %v3946_v24 = vpop.permute.xlu1 %3945 }
 0x8f6   : > { %v3967_v41 = vsel %vm3035_vm0, %v3946_v24, 0 }
 0x8f7   : > { %v3800_v11 = vpop.xlane.xlu0 %3799 }
 0x8f8   : > { %v15274_v15 = vpop.eup %15273 }
 0x8f9   : > { %v3821_v55 = vmul.f32 %v15274_v15, %v15262_v18  ;;  %v3948_v18 = vpop.permute.xlu1 %3947 }
 0x8fa   : > { %v15276_v33 = vpop.eup %15275 }
 0x8fb   : > { %v15278_v27 = vpop.eup %15277  ;;  %v3944_v52 = vpop.permute.xlu0 %3943  ;;  %v3818_v21 = vmul.f32 %v15276_v33, %v15260_v54 }
 0x8fc   : > { %v15280_v57 = vpop.eup %15279  ;;  %13767 = vmatprep.subr.msk.bf16.mxu1 %vm3035_vm0, %v3944_v52  ;;  %v3820_v30 = vmul.f32 %v15278_v27, %v15258_v23  ;;  %v3964_v1 = vsel %vm3035_vm0, %v3944_v52, 0  ;;  %v3970_v23 = vsel %vm3035_vm0, %v3948_v18, 0 }
 0x8fd   : > { %v3819_v42 = vmul.f32 %v15280_v57, %v15264_v25 }
 0x8fe   : > { %v3827_v63 = vpack.c.bf16 %v3821_v55, %v3820_v30 }
 0x8ff   : > { %v3826_v51 = vpack.c.bf16 %v3819_v42, %v3818_v21  ;;  %v3932_v33 = vpop.permute.xlu0 %3931 }
 0x901   : > { %13243 = vmatprep.mubr.msk.bf16.mxu1 %vm3035_vm0, %v3826_v51 }
 0x902   : > { %13244 = vmatmul.mubr.msk.bf16.vlgmr.msra.gmra.mrb[48].mxu1 %vm3035_vm0, %v3827_v63 }
 0x903   : > { %13252 = vmatpush3.bf16.xpose.msra.mxu1 %v3964_v1  ;;  %v3936_v52 = vpop.permute.xlu0 %3935 }
 0x904   : > { %13768 = vmatprep.subr.msk.bf16.mxu1 %vm3035_vm0, %v3946_v24 }
 0x90b   : > { %13254 = vmatpush3.bf16.xpose.msra.mxu1 %v3967_v41 }
 0x90c   : > { %13769 = vmatprep.subr.msk.bf16.mxu1 %vm3035_vm0, %v3948_v18 }
 0x913   : > { %13256 = vmatpush3.bf16.xpose.msra.mxu1 %v3970_v23 }
 0x92a   : > { %v3809_v54 = vpop.xlane.xlu1 %3808 }
 0x92b   : > { %15281 = vrcp.f32 %v3809_v54 }
 0x92c   : > { %15283 = vrcp.f32 %v3800_v11 }
 0x92d   : > { %15285 = vrcp.f32 %v3806_v0 }
 0x92e   : > { %v3803_v25 = vpop.xlane.xlu1 %3802 }
 0x92f   : > { %15287 = vrcp.f32 %v3803_v25 }
 0x932   : > { %v3950_v17 = vpop.permute.xlu1 %3949 }
 0x933   : > { %v3973_v48 = vsel %vm3035_vm0, %v3950_v17, 0  ;;  %13770 = vmatprep.subr.msk.bf16.mxu1 %vm3035_vm0, %v3950_v17 }
 0x934   : > { %13258 = vmatpush3.bf16.xpose.msra.mxu1 %v3973_v48 }
 0x935   : > { %13299 = vmatprep.subr.bf16.mxu1 %v16869_v38  ;;  %v15282_v16 = vpop.eup %15281 }
 0x936   : > { %v15284_v45 = vpop.eup %15283  ;;  %v3825_v36 = vmul.f32 %v15282_v16, %v15270_v14  ;;  %v3934_v27 = vpop.permute.xlu1 %3933 }
 0x937   : > { %v15286_v62 = vpop.eup %15285  ;;  %v3822_v44 = vmul.f32 %v15284_v45, %v17191_v47 }
 0x938   : > { %v3824_v0 = vmul.f32 %v15286_v62, %v17187_v28 }
 0x939   : > { %v15288_v8 = vpop.eup %15287 }
 0x93a   : > { %v3823_v7 = vmul.f32 %v15288_v8, %v15272_v39  ;;  %v3829_v15 = vpack.c.bf16 %v3825_v36, %v3824_v0  ;;  %v3938_v28 = vpop.permute.xlu1 %3937 }
 0x93c   : > { %v3828_v11 = vpack.c.bf16 %v3823_v7, %v3822_v44 }
 0x93e   : > { %13247 = vmatprep.mubr.msk.bf16.mxu1 %vm3035_vm0, %v3828_v11 }
 0x93f   : > { %13248 = vmatmul.mubr.msk.bf16.gmra.mrb[52].mxu1 %vm3035_vm0, %v3829_v15 }
 0x940   : > { %13259 = vmatprep.mubr.msk.bf16.mxu1 %vm3035_vm0, %v3932_v33 }
 0x947   : > { %13260 = vmatmul.mubr.msk.bf16.vlgmr.msra.gmra.mrb[56].mxu1 %vm3035_vm0, %v3934_v27 }
 0x948   : > { %13300 = vmatpush3.bf16.msra.mxu1 %v16869_v38  ;;  %13263 = vmatprep.mubr.msk.bf16.mxu1 %vm3035_vm0, %v3936_v52 }
 0x949   : > { %13301 = vmatprep.subr.bf16.mxu1 %v16875_v6 }
 0x94c   : > { %13302 = vmatpush3.bf16.msra.mxu1 %v16875_v6 }
 0x94d   : > { %13303 = vmatprep.subr.bf16.mxu1 %v16882_v9 }
 0x94f   : > { %13264 = vmatmul.mubr.msk.bf16.gmra.mrb[60].mxu1 %vm3035_vm0, %v3938_v28 }
 0x950   : > { %13304 = vmatpush3.bf16.msra.mxu1 %v16882_v9 }
 0x951   : > { %13305 = vmatprep.subr.bf16.mxu1 %v16891_v35 }
 0x954   : > { %13306 = vmatpush3.bf16.msra.mxu1 %v16891_v35 }
 0x9d5   : > { %v13245_v47 = vpop.f32.mrb[48].mxu1 }
 0x9d6   : > { %v3876_v14 = vpop.f32.mrb[49].mxu1 }
 0x9d7   : > { %v13246_v39 = vpop.f32.mrb[50].mxu1 }
 0x9d8   : > { %v3908_v57 = vpack.c.bf16 %v13246_v39, %v13245_v47  ;;  %v3879_v55 = vpop.f32.mrb[51].mxu1 }
 0x9d9   : > { %v3907_v21 = vpack.c.bf16 %v3879_v55, %v3876_v14 }
 0x9da   : > { %3912 = vst.msk [vmem:[#allocation3 + $0x20] sm:$0xff] %vm3035_vm0, %v3908_v57 }
 0x9db   : > { %3911 = vst.msk [vmem:[#allocation3 + $0x8] sm:$0xff] %vm3035_vm0, %v3907_v21 }
 0xa12   : > { %v13249_v42 = vpop.f32.mrb[52].mxu1 }
 0xa13   : > { %v3892_v30 = vpop.f32.mrb[53].mxu1 }
 0xa14   : > { %v13250_v51 = vpop.f32.mrb[54].mxu1 }
 0xa15   : > { %v3910_v63 = vpack.c.bf16 %v13250_v51, %v13249_v42  ;;  %v3895_v1 = vpop.f32.mrb[55].mxu1 }
 0xa16   : > { %v3909_v24 = vpack.c.bf16 %v3895_v1, %v3892_v30 }
 0xa17   : > { %3914 = vst.msk [vmem:[#allocation3 + $0x50] sm:$0xff] %vm3035_vm0, %v3910_v63 }
 0xa18   : > { %3913 = vst.msk [vmem:[#allocation3 + $0x38] sm:$0xff] %vm3035_vm0, %v3909_v24 }
 0xa1a   : > { %v13261_v41 = vpop.f32.mrb[56].mxu1 }
 0xa1b   : > { %v4018_v18 = vadd.f32 %v13261_v41, %v16903_v43  ;;  %v4009_v23 = vpop.f32.mrb[57].mxu1 }
 0xa1c   : > { %v13262_v54 = vpop.f32.mrb[58].mxu1  ;;  %v4010_v25 = vadd.f32 %v4009_v23, %v16905_v56 }
 0xa1d   : > { %v4012_v17 = vpop.f32.mrb[59].mxu1  ;;  %v4046_v48 = vsel %vm3035_vm0, %v4018_v18, -inf  ;;  %v4021_v62 = vadd.f32 %v13262_v54, %v16920_v3 }
 0xa1e   : > { %v4013_v16 = vadd.f32 %v4012_v17, %v16910_v32  ;;  %4047 = vmax.xlane.f32.xlu0 %v4046_v48  ;;  %v4040_v8 = vsel %vm3035_vm0, %v4010_v25, -inf }
 0xa1f   : > { %v4049_v33 = vsel %vm3035_vm0, %v4021_v62, -inf }
 0xa20   : > { %v4043_v45 = vsel %vm3035_vm0, %v4013_v16, -inf }
 0xa21   : > { %4044 = vmax.xlane.f32.xlu1 %v4043_v45 }
 0xa22   : > { %4041 = vmax.xlane.f32.xlu0 %v4040_v8  ;;  %v13265_v36 = vpop.f32.mrb[60].mxu1 }
 0xa23   : > { %v4025_v44 = vpop.f32.mrb[61].mxu1  ;;  %v4034_v28 = vadd.f32 %v13265_v36, %v16947_v5 }
 0xa24   : > { %v13266_v7 = vpop.f32.mrb[62].mxu1  ;;  %v4026_v0 = vadd.f32 %v4025_v44, %v16933_v31 }
 0xa25   : > { %v4037_v11 = vadd.f32 %v13266_v7, %v16935_v22  ;;  %v4028_v15 = vpop.f32.mrb[63].mxu1  ;;  %v4058_v39 = vsel %vm3035_vm0, %v4034_v28, -inf }
 0xa26   : > { %4050 = vmax.xlane.f32.xlu0 %v4049_v33  ;;  %v4029_v27 = vadd.f32 %v4028_v15, %v16937_v26  ;;  %v4052_v47 = vsel %vm3035_vm0, %v4026_v0, -inf }
 0xa27   : > { %v4061_v52 = vsel %vm3035_vm0, %v4037_v11, -inf }
 0xa28   : > { %4062 = vmax.xlane.f32.xlu1 %v4061_v52  ;;  %v4055_v14 = vsel %vm3035_vm0, %v4029_v27, -inf }
 0xa2a   : > { %4053 = vmax.xlane.f32.xlu0 %v4052_v47 }
 0xa2c   : > { %4056 = vmax.xlane.f32.xlu1 %v4055_v14 }
 0xa2e   : > { %4059 = vmax.xlane.f32.xlu0 %v4058_v39 }
 0xa3d   : > { %4138 = vrot.lane.b32.xlu1 %v16781_v19, %s15894_s28 }
 0xa41   : > { %4140 = vrot.lane.b32.xlu1 %v16797_v46, %s15894_s28 }
 0xaab   : > { %v4048_v57 = vpop.xlane.xlu0 %4047 }
 0xaac   : > { %v4066_v55 = vsub.f32 %v4018_v18, %v4048_v57 }
 0xaae   : > { %v4076_v21 = vmul.f32 1.442695, %v4066_v55  ;;  %v4045_v42 = vpop.xlane.xlu1 %4044 }
 0xaaf   : > { %v4042_v30 = vpop.xlane.xlu0 %4041  ;;  %v4065_v63 = vsub.f32 %v4013_v16, %v4045_v42 }
 0xab0   : > { %15289 = vpow2.f32 %v4076_v21  ;;  %v4064_v51 = vsub.f32 %v4010_v25, %v4042_v30 }
 0xab1   : > { %v4074_v23 = vmul.f32 1.442695, %v4065_v63 }
 0xab2   : > { %v4072_v1 = vmul.f32 1.442695, %v4064_v51 }
 0xab3   : > { %v4051_v24 = vpop.xlane.xlu0 %4050 }
 0xab4   : > { %15291 = vpow2.f32 %v4072_v1  ;;  %v4067_v41 = vsub.f32 %v4021_v62, %v4051_v24 }
 0xab5   : > { %v4063_v8 = vpop.xlane.xlu1 %4062 }
 0xab6   : > { %v4078_v54 = vmul.f32 1.442695, %v4067_v41  ;;  %v4071_v52 = vsub.f32 %v4037_v11, %v4063_v8 }
 0xab7   : > { %v4054_v62 = vpop.xlane.xlu0 %4053 }
 0xab8   : > { %15293 = vpow2.f32 %v4078_v54  ;;  %v4068_v36 = vsub.f32 %v4026_v0, %v4054_v62  ;;  %v4086_v39 = vmul.f32 1.442695, %v4071_v52 }
 0xab9   : > { %15295 = vpow2.f32 %v4074_v23  ;;  %v4057_v33 = vpop.xlane.xlu1 %4056 }
 0xaba   : > { %v17263_v17 = vpop.eup %15289  ;;  %v4080_v7 = vmul.f32 1.442695, %v4068_v36  ;;  %v4069_v47 = vsub.f32 %v4029_v27, %v4057_v33 }
 0xabb   : > { %v4094_v19 = vsel %vm3035_vm0, %v17263_v17, 0.0  ;;  %v4060_v44 = vpop.xlane.xlu0 %4059 }
 0xabc   : > { %4095 = vadd.xlane.f32.xlu0 %v4094_v19  ;;  %v4070_v15 = vsub.f32 %v4034_v28, %v4060_v44  ;;  %15297 = vpow2.f32 %v4080_v7  ;;  %v4082_v57 = vmul.f32 1.442695, %v4069_v47 }
 0xabd   : > { %v4139_v42 = vpop.permute.xlu1 %4138 }
 0xabe   : > { %v17267_v46 = vpop.eup %15291  ;;  %v4084_v14 = vmul.f32 1.442695, %v4070_v15  ;;  %v4274_v15 = vsel %vm3035_vm0, %v16850_v10, 0 }
 0xabf   : > { %v4088_v18 = vsel %vm3035_vm0, %v17267_v46, 0.0 }
 0xac0   : > { %4089 = vadd.xlane.f32.xlu0 %v4088_v18  ;;  %15299 = vpow2.f32 %v4084_v14 }
 0xac1   : > { %15301 = vpow2.f32 %v4086_v39  ;;  %v4141_v51 = vpop.permute.xlu1 %4140 }
 0xac2   : > { %v15294_v25 = vpop.eup %15293  ;;  %15303 = vpow2.f32 %v4082_v57 }
 0xac3   : > { %v4097_v48 = vsel %vm3035_vm0, %v15294_v25, 0.0  ;;  %v15296_v16 = vpop.eup %15295 }
 0xac4   : > { %4098 = vadd.xlane.f32.xlu1 %v4097_v48  ;;  %v4091_v45 = vsel %vm3035_vm0, %v15296_v16, 0.0 }
 0xac8   : > { %4092 = vadd.xlane.f32.xlu1 %v4091_v45 }
 0xad6   : > { %4136 = vrot.lane.b32.xlu0 %v16768_v12, %s15894_s28  ;;  %v17277_v12 = vpop.eup %15297 }
 0xad7   : > { %v17281_v55 = vpop.eup %15299 }
 0xad8   : > { %v17283_v0 = vpop.eup %15301  ;;  %v4106_v11 = vsel %vm3035_vm0, %v17281_v55, 0.0 }
 0xad9   : > { %4142 = vrot.lane.b32.xlu1 %v16810_v20, %s15894_s28  ;;  %v4100_v20 = vsel %vm3035_vm0, %v17277_v12, 0.0  ;;  %v17287_v27 = vpop.eup %15303  ;;  %v4109_v21 = vsel %vm3035_vm0, %v17283_v0, 0.0 }
 0xada   : > { %v4103_v28 = vsel %vm3035_vm0, %v17287_v27, 0.0 }
 0xaf5   : > { %4101 = vadd.xlane.f32.xlu0 %v4100_v20 }
 0xaf9   : > { %4107 = vadd.xlane.f32.xlu0 %v4106_v11 }
 0xafd   : > { %4104 = vadd.xlane.f32.xlu1 %v4103_v28  ;;  %4110 = vadd.xlane.f32.xlu0 %v4109_v21 }
 0xb49   : > { %v4096_v30 = vpop.xlane.xlu0 %4095 }
 0xb4d   : > { %v4090_v63 = vpop.xlane.xlu0 %4089 }
 0xb51   : > { %v4099_v1 = vpop.xlane.xlu1 %4098  ;;  %v4137_v24 = vpop.permute.xlu0 %4136 }
 0xb52   : > { %13267 = vmatprep.subr.bf16.mxu0 %v4137_v24  ;;  %15305 = vrcp.f32 %v4099_v1  ;;  %v18674_v1 = vld [vmem:[#allocation39_spill] sm:$0xff] }
 0xb53   : > { %13268 = vmatpush3.bf16.msra.mxu0 %v4137_v24  ;;  %15307 = vrcp.f32 %v4090_v63  ;;  %v18673_v63 = vld [vmem:[#allocation38_spill] sm:$0xff] }
 0xb54   : > { %13269 = vmatprep.subr.bf16.mxu0 %v4139_v42  ;;  %15309 = vrcp.f32 %v4096_v30 }
 0xb55   : > { %v4093_v41 = vpop.xlane.xlu1 %4092 }
 0xb56   : > { %15311 = vrcp.f32 %v4093_v41 }
 0xb57   : > { %13270 = vmatpush3.bf16.msra.mxu0 %v4139_v42 }
 0xb58   : > { %13271 = vmatprep.subr.bf16.mxu0 %v4141_v51 }
 0xb59   : > { %v4143_v23 = vpop.permute.xlu1 %4142 }
 0xb5b   : > { %13272 = vmatpush3.bf16.msra.mxu0 %v4141_v51 }
 0xb5c   : > { %13273 = vmatprep.subr.bf16.mxu0 %v4143_v23  ;;  %v15306_v54 = vpop.eup %15305 }
 0xb5d   : > { %v15308_v19 = vpop.eup %15307  ;;  %v4123_v45 = vmul.f32 %v15306_v54, %v15294_v25  ;;  %v4277_v25 = vsel %vm3035_vm0, %v16854_v59, 0 }
 0xb5e   : > { %v15310_v18 = vpop.eup %15309  ;;  %v4120_v62 = vmul.f32 %v15308_v19, %v17267_v46  ;;  %v4283_v46 = vsel %vm3035_vm0, %v16864_v53, 0 }
 0xb5f   : > { %13274 = vmatpush3.bf16.msra.mxu0 %v4143_v23  ;;  %v4122_v36 = vmul.f32 %v15310_v18, %v17263_v17  ;;  %v4280_v17 = vsel %vm3035_vm0, %v16858_v49, 0 }
 0xb60   : > { %v15312_v48 = vpop.eup %15311  ;;  %13771 = vmatprep.subr.msk.bf16.mxu0 %vm3035_vm0, %v16850_v10 }
 0xb61   : > { %v4121_v8 = vmul.f32 %v15312_v48, %v15296_v16  ;;  %v4129_v7 = vpack.c.bf16 %v4123_v45, %v4122_v36 }
 0xb63   : > { %v4128_v44 = vpack.c.bf16 %v4121_v8, %v4120_v62 }
 0xb65   : > { %13275 = vmatprep.mubr.msk.bf16.mxu0 %vm3035_vm0, %v4128_v44 }
 0xb66   : > { %13276 = vmatmul.mubr.msk.bf16.vlgmr.msra.gmra.mrb[96].mxu0 %vm3035_vm0, %v4129_v7 }
 0xb68   : > { %13284 = vmatpush3.bf16.xpose.msra.mxu0 %v4274_v15 }
 0xb69   : > { %13772 = vmatprep.subr.msk.bf16.mxu0 %vm3035_vm0, %v16854_v59 }
 0xb70   : > { %13286 = vmatpush3.bf16.xpose.msra.mxu0 %v4277_v25 }
 0xb71   : > { %13773 = vmatprep.subr.msk.bf16.mxu0 %vm3035_vm0, %v16858_v49 }
 0xb78   : > { %13288 = vmatpush3.bf16.xpose.msra.mxu0 %v4280_v17 }
 0xb79   : > { %13774 = vmatprep.subr.msk.bf16.mxu0 %vm3035_vm0, %v16864_v53 }
 0xb80   : > { %13290 = vmatpush3.bf16.xpose.msra.mxu0 %v4283_v46 }
 0xb82   : > { %v4102_v16 = vpop.xlane.xlu0 %4101 }
 0xb83   : > { %15313 = vrcp.f32 %v4102_v16 }
 0xb86   : > { %v4108_v33 = vpop.xlane.xlu0 %4107 }
 0xb87   : > { %15315 = vrcp.f32 %v4108_v33 }
 0xb8a   : > { %v4105_v52 = vpop.xlane.xlu1 %4104  ;;  %v4111_v47 = vpop.xlane.xlu0 %4110 }
 0xb8b   : > { %15317 = vrcp.f32 %v4105_v52 }
 0xb8c   : > { %15319 = vrcp.f32 %v4111_v47 }
 0xb8d   : > { %v15314_v14 = vpop.eup %15313 }
 0xb8e   : > { %v4124_v11 = vmul.f32 %v15314_v14, %v17277_v12  ;;  %v18675_v12 = vld [vmem:[#allocation40_spill] sm:$0xff] }
 0xb91   : > { %v15316_v39 = vpop.eup %15315 }
 0xb92   : > { %v4126_v21 = vmul.f32 %v15316_v39, %v17281_v55 }
 0xb95   : > { %v15318_v57 = vpop.eup %15317 }
 0xb96   : > { %v15320_v20 = vpop.eup %15319  ;;  %v4125_v28 = vmul.f32 %v15318_v57, %v17287_v27 }
 0xb97   : > { %v4127_v42 = vmul.f32 %v15320_v20, %v17283_v0 }
 0xb98   : > { %v4130_v30 = vpack.c.bf16 %v4125_v28, %v4124_v11 }
 0xb99   : > { %v4131_v51 = vpack.c.bf16 %v4127_v42, %v4126_v21 }
 0xb9a   : > { %13279 = vmatprep.mubr.msk.bf16.mxu0 %vm3035_vm0, %v4130_v30 }
 0xb9b   : > { %13280 = vmatmul.mubr.msk.bf16.gmra.mrb[100].mxu0 %vm3035_vm0, %v4131_v51 }
 0xb9c   : > { %13291 = vmatprep.mubr.msk.bf16.mxu0 %vm3035_vm0, %v16771_v13 }
 0xba3   : > { %13292 = vmatmul.mubr.msk.bf16.vlgmr.msra.gmra.mrb[104].mxu0 %vm3035_vm0, %v18673_v63 }
 0xba4   : > { %13295 = vmatprep.mubr.msk.bf16.mxu0 %vm3035_vm0, %v18674_v1 }
 0xbab   : > { %13296 = vmatmul.mubr.msk.bf16.gmra.mrb[108].mxu0 %vm3035_vm0, %v18675_v12 }
 0xc39   : > { %v17327_v55 = vpop.f32.mrb[96].mxu0 }
 0xc3a   : > { %v17329_v0 = vpop.f32.mrb[97].mxu0 }
 0xc3b   : > { %v17331_v27 = vpop.f32.mrb[98].mxu0 }
 0xc3c   : > { %v4226_v24 = vpack.c.bf16 %v17331_v27, %v17327_v55  ;;  %v17335_v41 = vpop.f32.mrb[99].mxu0  ;;  %v14274_v55 = vld [vmem:[#allocation12 + $0x68] ss:$12 sps:$4 sm:$0xff]   ;;  %v14275_v27 = vld [vmem:[#allocation12 + $0x140] ss:$12 sps:$4 sm:$0xff]  }
 0xc3d   : > { %v4225_v23 = vpack.c.bf16 %v17335_v41, %v17329_v0  ;;  %v14273_v0 = vld [vmem:[#allocation12 + $0x128] ss:$12 sps:$4 sm:$0xff]   ;;  %v18676_v41 = vpack.c.bf16 %v17151_v29, %v17145_v4  ;;  %v18679_v4 = vpack.c.bf16 %v17163_v58, %v17157_v37  ;;  %v14278_v29 = vld [vmem:[#allocation12 + $0x98] ss:$12 sps:$4 sm:$0xff]  }
 0xc6e   : > { %v17339_v54 = vpop.f32.mrb[100].mxu0 }
 0xc6f   : > { %v17341_v19 = vpop.f32.mrb[101].mxu0 }
 0xc70   : > { %v17343_v18 = vpop.f32.mrb[102].mxu0 }
 0xc71   : > { %v17347_v45 = vpop.f32.mrb[103].mxu0 }
 0xc72   : > { %v4227_v62 = vpack.c.bf16 %v17347_v45, %v17341_v19  ;;  %v14277_v19 = vld [vmem:[#allocation12 + $0x158] ss:$12 sps:$4 sm:$0xff]  }
 0xc76   : > { %v13293_v8 = vpop.f32.mrb[104].mxu0 }
 0xc77   : > { %v4319_v36 = vpop.f32.mrb[105].mxu0  ;;  %v4328_v25 = vadd.f32 %v13293_v8, %v16903_v43 }
 0xc78   : > { %v4320_v44 = vadd.f32 %v4319_v36, %v16905_v56  ;;  %v13294_v7 = vpop.f32.mrb[106].mxu0 }
 0xc79   : > { %v4322_v15 = vpop.f32.mrb[107].mxu0  ;;  %v4331_v16 = vadd.f32 %v13294_v7, %v16920_v3  ;;  %v4356_v47 = vsel %vm3035_vm0, %v4328_v25, -inf }
 0xc7a   : > { %v4323_v17 = vadd.f32 %v4322_v15, %v16910_v32  ;;  %v4350_v46 = vsel %vm3035_vm0, %v4320_v44, -inf }
 0xc7b   : > { %4351 = vmax.xlane.f32.xlu0 %v4350_v46  ;;  %v4359_v20 = vsel %vm3035_vm0, %v4331_v16, -inf }
 0xc7c   : > { %v4353_v33 = vsel %vm3035_vm0, %v4323_v17, -inf }
 0xc7d   : > { %4354 = vmax.xlane.f32.xlu1 %v4353_v33 }
 0xc7e   : > { %v13297_v52 = vpop.f32.mrb[108].mxu0 }
 0xc7f   : > { %v4335_v14 = vpop.f32.mrb[109].mxu0  ;;  %4357 = vmax.xlane.f32.xlu0 %v4356_v47  ;;  %v4344_v28 = vadd.f32 %v13297_v52, %v16947_v5 }
 0xc80   : > { %v4336_v39 = vadd.f32 %v4335_v14, %v16933_v31  ;;  %v13298_v57 = vpop.f32.mrb[110].mxu0 }
 0xc81   : > { %v4338_v11 = vpop.f32.mrb[111].mxu0  ;;  %4360 = vmax.xlane.f32.xlu1 %v4359_v20  ;;  %v4347_v30 = vadd.f32 %v13298_v57, %v16935_v22  ;;  %v4368_v8 = vsel %vm3035_vm0, %v4344_v28, -inf }
 0xc82   : > { %v4339_v21 = vadd.f32 %v4338_v11, %v16937_v26  ;;  %v4362_v42 = vsel %vm3035_vm0, %v4336_v39, -inf }
 0xc83   : > { %4363 = vmax.xlane.f32.xlu0 %v4362_v42  ;;  %v4371_v36 = vsel %vm3035_vm0, %v4347_v30, -inf }
 0xc84   : > { %v4365_v51 = vsel %vm3035_vm0, %v4339_v21, -inf }
 0xc85   : > { %4366 = vmax.xlane.f32.xlu1 %v4365_v51 }
 0xc87   : > { %4369 = vmax.xlane.f32.xlu0 %v4368_v8 }
 0xc89   : > { %4372 = vmax.xlane.f32.xlu1 %v4371_v36 }
 0xd08   : > { %v4352_v7 = vpop.xlane.xlu0 %4351 }
 0xd09   : > { %v4374_v15 = vsub.f32 %v4320_v44, %v4352_v7 }
 0xd0a   : > { %v4355_v46 = vpop.xlane.xlu1 %4354 }
 0xd0b   : > { %v4375_v52 = vsub.f32 %v4323_v17, %v4355_v46  ;;  %v4382_v14 = vmul.f32 1.442695, %v4374_v15 }
 0xd0c   : > { %v4358_v33 = vpop.xlane.xlu0 %4357 }
 0xd0d   : > { %v4376_v47 = vsub.f32 %v4328_v25, %v4358_v33  ;;  %v4384_v40 = vmul.f32 1.442695, %v4375_v52 }
 0xd0e   : > { %v4361_v20 = vpop.xlane.xlu1 %4360 }
 0xd0f   : > { %v4386_v11 = vmul.f32 1.442695, %v4376_v47  ;;  %v4377_v42 = vsub.f32 %v4331_v16, %v4361_v20 }
 0xd10   : > { %v4364_v57 = vpop.xlane.xlu0 %4363 }
 0xd11   : > { %15321 = vpow2.f32 %v4386_v11  ;;  %v4388_v51 = vmul.f32 1.442695, %v4377_v42  ;;  %v4378_v8 = vsub.f32 %v4336_v39, %v4364_v57 }
 0xd12   : > { %15323 = vpow2.f32 %v4382_v14  ;;  %v4367_v52 = vpop.xlane.xlu1 %4366 }
 0xd13   : > { %15325 = vpow2.f32 %v4388_v51  ;;  %v4390_v34 = vmul.f32 1.442695, %v4378_v8  ;;  %v4379_v20 = vsub.f32 %v4339_v21, %v4367_v52 }
 0xd14   : > { %v4370_v48 = vpop.xlane.xlu0 %4369  ;;  %15327 = vpow2.f32 %v4384_v40 }
 0xd15   : > { %v4380_v36 = vsub.f32 %v4344_v28, %v4370_v48  ;;  %v4392_v42 = vmul.f32 1.442695, %v4379_v20 }
 0xd16   : > { %v4373_v47 = vpop.xlane.xlu1 %4372 }
 0xd17   : > { %v4394_v44 = vmul.f32 1.442695, %v4380_v36  ;;  %v4381_v14 = vsub.f32 %v4347_v30, %v4373_v47 }
 0xd19   : > { %15329 = vpow2.f32 %v4394_v44  ;;  %v4396_v11 = vmul.f32 1.442695, %v4381_v14 }
 0xd1a   : > { %15331 = vpow2.f32 %v4390_v34 }
 0xd1b   : > { %v15322_v7 = vpop.eup %15321  ;;  %15333 = vpow2.f32 %v4396_v11 }
 0xd1c   : > { %v15324_v25 = vpop.eup %15323  ;;  %v4404_v17 = vsel %vm3035_vm0, %v15322_v7, 0.0  ;;  %15335 = vpow2.f32 %v4392_v42 }
 0xd1d   : > { %v15326_v15 = vpop.eup %15325  ;;  %4405 = vadd.xlane.f32.xlu0 %v4404_v17  ;;  %v4398_v33 = vsel %vm3035_vm0, %v15324_v25, 0.0 }
 0xd1e   : > { %v4407_v16 = vsel %vm3035_vm0, %v15326_v15, 0.0  ;;  %v15328_v46 = vpop.eup %15327 }
 0xd1f   : > { %4408 = vadd.xlane.f32.xlu1 %v4407_v16  ;;  %v4401_v40 = vsel %vm3035_vm0, %v15328_v46, 0.0 }
 0xd21   : > { %4399 = vadd.xlane.f32.xlu0 %v4398_v33 }
 0xd23   : > { %v17371_v48 = vpop.eup %15329  ;;  %4402 = vadd.xlane.f32.xlu1 %v4401_v40 }
 0xd24   : > { %v4416_v34 = vsel %vm3035_vm0, %v17371_v48, 0.0  ;;  %v17375_v39 = vpop.eup %15331 }
 0xd25   : > { %4417 = vadd.xlane.f32.xlu0 %v4416_v34  ;;  %v4410_v28 = vsel %vm3035_vm0, %v17375_v39, 0.0 }
 0xd29   : > { %4411 = vadd.xlane.f32.xlu0 %v4410_v28 }
 0xd34   : > { %4557 = vrot.lane.b32.xlu1 %v16854_v59, %s15894_s28  ;;  %v15334_v59 = vpop.eup %15333 }
 0xd35   : > { %v15336_v57 = vpop.eup %15335 }
 0xd38   : > { %4559 = vrot.lane.b32.xlu1 %v16858_v49, %s15894_s28  ;;  %v4419_v49 = vsel %vm3035_vm0, %v15334_v59, 0.0 }
 0xd3f   : > { %4555 = vrot.lane.b32.xlu0 %v16850_v10, %s15894_s28  ;;  %v4413_v10 = vsel %vm3035_vm0, %v15336_v57, 0.0 }
 0xd43   : > { %4543 = vrot.lane.b32.xlu0 %v16771_v13, %s15894_s28 }
 0xd47   : > { %4547 = vrot.lane.b32.xlu0 %v18674_v1, %s15894_s28 }
 0xd5c   : > { %4420 = vadd.xlane.f32.xlu1 %v4419_v49 }
 0xd60   : > { %4414 = vadd.xlane.f32.xlu1 %v4413_v10 }
 0xd71   : > { %4561 = vrot.lane.b32.xlu1 %v16864_v53, %s15894_s28 }
 0xd75   : > { %4545 = vrot.lane.b32.xlu1 %v18673_v63, %s15894_s28 }
 0xd79   : > { %4549 = vrot.lane.b32.xlu1 %v18675_v12, %s15894_s28 }
 0xdaa   : > { %v4406_v13 = vpop.xlane.xlu0 %4405 }
 0xdac   : > { %v4409_v1 = vpop.xlane.xlu1 %4408 }
 0xdad   : > { %15337 = vrcp.f32 %v4409_v1 }
 0xdae   : > { %v4400_v21 = vpop.xlane.xlu0 %4399 }
 0xdaf   : > { %15339 = vrcp.f32 %v4400_v21 }
 0xdb0   : > { %15341 = vrcp.f32 %v4406_v13  ;;  %v4403_v30 = vpop.xlane.xlu1 %4402 }
 0xdb1   : > { %15343 = vrcp.f32 %v4403_v30 }
 0xdb2   : > { %v4418_v51 = vpop.xlane.xlu0 %4417 }
 0xdb4   : > { %v4558_v47 = vpop.permute.xlu1 %4557 }
 0xdb5   : > { %v4579_v14 = vsel %vm3035_vm0, %v4558_v47, 0 }
 0xdb6   : > { %v4412_v8 = vpop.xlane.xlu0 %4411 }
 0xdb7   : > { %v15338_v36 = vpop.eup %15337 }
 0xdb8   : > { %v4433_v33 = vmul.f32 %v15338_v36, %v15326_v15  ;;  %v4560_v15 = vpop.permute.xlu1 %4559 }
 0xdb9   : > { %v15340_v44 = vpop.eup %15339 }
 0xdba   : > { %v15342_v17 = vpop.eup %15341  ;;  %v4556_v53 = vpop.permute.xlu0 %4555  ;;  %v4430_v63 = vmul.f32 %v15340_v44, %v15324_v25 }
 0xdbb   : > { %v15344_v16 = vpop.eup %15343  ;;  %13775 = vmatprep.subr.msk.bf16.mxu1 %vm3035_vm0, %v4556_v53  ;;  %v4432_v40 = vmul.f32 %v15342_v17, %v15322_v7  ;;  %v4576_v52 = vsel %vm3035_vm0, %v4556_v53, 0  ;;  %v4582_v7 = vsel %vm3035_vm0, %v4560_v15, 0 }
 0xdbc   : > { %v4431_v12 = vmul.f32 %v15344_v16, %v15328_v46 }
 0xdbd   : > { %v4439_v28 = vpack.c.bf16 %v4433_v33, %v4432_v40 }
 0xdbe   : > { %v4438_v34 = vpack.c.bf16 %v4431_v12, %v4430_v63  ;;  %v4544_v44 = vpop.permute.xlu0 %4543 }
 0xdc0   : > { %13307 = vmatprep.mubr.msk.bf16.mxu1 %vm3035_vm0, %v4438_v34 }
 0xdc1   : > { %13308 = vmatmul.mubr.msk.bf16.vlgmr.msra.gmra.mrb[64].mxu1 %vm3035_vm0, %v4439_v28 }
 0xdc2   : > { %13316 = vmatpush3.bf16.xpose.msra.mxu1 %v4576_v52  ;;  %v4548_v53 = vpop.permute.xlu0 %4547 }
 0xdc3   : > { %13776 = vmatprep.subr.msk.bf16.mxu1 %vm3035_vm0, %v4558_v47 }
 0xdca   : > { %13318 = vmatpush3.bf16.xpose.msra.mxu1 %v4579_v14 }
 0xdcb   : > { %13777 = vmatprep.subr.msk.bf16.mxu1 %vm3035_vm0, %v4560_v15 }
 0xdd2   : > { %13320 = vmatpush3.bf16.xpose.msra.mxu1 %v4582_v7 }
 0xde9   : > { %v4421_v25 = vpop.xlane.xlu1 %4420 }
 0xdea   : > { %15345 = vrcp.f32 %v4421_v25 }
 0xdeb   : > { %15347 = vrcp.f32 %v4412_v8 }
 0xdec   : > { %15349 = vrcp.f32 %v4418_v51 }
 0xded   : > { %v4415_v46 = vpop.xlane.xlu1 %4414 }
 0xdee   : > { %15351 = vrcp.f32 %v4415_v46 }
 0xdf1   : > { %v4562_v20 = vpop.permute.xlu1 %4561 }
 0xdf2   : > { %v4585_v11 = vsel %vm3035_vm0, %v4562_v20, 0  ;;  %13778 = vmatprep.subr.msk.bf16.mxu1 %vm3035_vm0, %v4562_v20 }
 0xdf3   : > { %13322 = vmatpush3.bf16.xpose.msra.mxu1 %v4585_v11 }
 0xdf4   : > { %v15346_v42 = vpop.eup %15345 }
 0xdf5   : > { %v15348_v49 = vpop.eup %15347  ;;  %v4437_v1 = vmul.f32 %v15346_v42, %v15334_v59  ;;  %v4546_v17 = vpop.permute.xlu1 %4545 }
 0xdf6   : > { %v15350_v10 = vpop.eup %15349  ;;  %v4434_v21 = vmul.f32 %v15348_v49, %v17375_v39 }
 0xdf7   : > { %v4436_v36 = vmul.f32 %v15350_v10, %v17371_v48 }
 0xdf8   : > { %v15352_v13 = vpop.eup %15351 }
 0xdf9   : > { %v4435_v30 = vmul.f32 %v15352_v13, %v15336_v57  ;;  %v4441_v51 = vpack.c.bf16 %v4437_v1, %v4436_v36  ;;  %v4550_v59 = vpop.permute.xlu1 %4549 }
 0xdfb   : > { %v4440_v8 = vpack.c.bf16 %v4435_v30, %v4434_v21 }
 0xdfd   : > { %13311 = vmatprep.mubr.msk.bf16.mxu1 %vm3035_vm0, %v4440_v8 }
 0xdfe   : > { %13312 = vmatmul.mubr.msk.bf16.gmra.mrb[68].mxu1 %vm3035_vm0, %v4441_v51 }
 0xdff   : > { %13323 = vmatprep.mubr.msk.bf16.mxu1 %vm3035_vm0, %v4544_v44 }
 0xe06   : > { %13324 = vmatmul.mubr.msk.bf16.vlgmr.msra.gmra.mrb[72].mxu1 %vm3035_vm0, %v4546_v17 }
 0xe07   : > { %13327 = vmatprep.mubr.msk.bf16.mxu1 %vm3035_vm0, %v4548_v53 }
 0xe0e   : > { %13328 = vmatmul.mubr.msk.bf16.gmra.mrb[76].mxu1 %vm3035_vm0, %v4550_v59 }
 0xe94   : > { %v13309_v39 = vpop.f32.mrb[64].mxu1 }
 0xe95   : > { %v4488_v48 = vpop.f32.mrb[65].mxu1 }
 0xe96   : > { %v13310_v57 = vpop.f32.mrb[66].mxu1 }
 0xe97   : > { %v4520_v16 = vpack.c.bf16 %v13310_v57, %v13309_v39  ;;  %v4491_v33 = vpop.f32.mrb[67].mxu1 }
 0xe98   : > { %v4519_v63 = vpack.c.bf16 %v4491_v33, %v4488_v48 }
 0xe99   : > { %4524 = vst.msk [vmem:[#allocation3 + $0x28] sm:$0xff] %vm3035_vm0, %v4520_v16 }
 0xe9a   : > { %4523 = vst.msk [vmem:[#allocation3 + $0x10] sm:$0xff] %vm3035_vm0, %v4519_v63 }
 0xed1   : > { %v13313_v12 = vpop.f32.mrb[68].mxu1 }
 0xed2   : > { %v4504_v40 = vpop.f32.mrb[69].mxu1 }
 0xed3   : > { %v13314_v34 = vpop.f32.mrb[70].mxu1 }
 0xed4   : > { %v4522_v28 = vpack.c.bf16 %v13314_v34, %v13313_v12  ;;  %v4507_v52 = vpop.f32.mrb[71].mxu1 }
 0xed5   : > { %v4521_v47 = vpack.c.bf16 %v4507_v52, %v4504_v40 }
 0xed6   : > { %4526 = vst.msk [vmem:[#allocation3 + $0x58] sm:$0xff] %vm3035_vm0, %v4522_v28 }
 0xed7   : > { %4525 = vst.msk [vmem:[#allocation3 + $0x40] sm:$0xff] %vm3035_vm0, %v4521_v47 }
 0xed9   : > { %v13325_v14 = vpop.f32.mrb[72].mxu1 }
 0xeda   : > { %v4621_v15 = vpop.f32.mrb[73].mxu1  ;;  %v4630_v20 = vadd.f32 %v13325_v14, %v16903_v43 }
 0xedb   : > { %v4622_v7 = vadd.f32 %v4621_v15, %v16905_v56  ;;  %v13326_v25 = vpop.f32.mrb[74].mxu1 }
 0xedc   : > { %v4624_v46 = vpop.f32.mrb[75].mxu1  ;;  %v4633_v10 = vadd.f32 %v13326_v25, %v16920_v3  ;;  %v4658_v1 = vsel %vm3035_vm0, %v4630_v20, -inf }
 0xedd   : > { %v4625_v11 = vadd.f32 %v4624_v46, %v16910_v32  ;;  %v4652_v42 = vsel %vm3035_vm0, %v4622_v7, -inf }
 0xede   : > { %4653 = vmax.xlane.f32.xlu0 %v4652_v42  ;;  %v4661_v32 = vsel %vm3035_vm0, %v4633_v10, -inf }
 0xedf   : > { %v4655_v49 = vsel %vm3035_vm0, %v4625_v11, -inf }
 0xee0   : > { %4656 = vmax.xlane.f32.xlu1 %v4655_v49 }
 0xee1   : > { %v13329_v13 = vpop.f32.mrb[76].mxu1 }
 0xee2   : > { %4659 = vmax.xlane.f32.xlu0 %v4658_v1  ;;  %v4637_v21 = vpop.f32.mrb[77].mxu1  ;;  %v4646_v3 = vadd.f32 %v13329_v13, %v16947_v5 }
 0xee3   : > { %v13330_v56 = vpop.f32.mrb[78].mxu1  ;;  %v4638_v36 = vadd.f32 %v4637_v21, %v16933_v31 }
 0xee4   : > { %v4640_v30 = vpop.f32.mrb[79].mxu1  ;;  %v4649_v8 = vadd.f32 %v13330_v56, %v16935_v22  ;;  %v4670_v31 = vsel %vm3035_vm0, %v4646_v3, -inf }
 0xee5   : > { %v4641_v43 = vadd.f32 %v4640_v30, %v16937_v26  ;;  %v4664_v44 = vsel %vm3035_vm0, %v4638_v36, -inf }
 0xee6   : > { %4662 = vmax.xlane.f32.xlu0 %v4661_v32  ;;  %v4673_v17 = vsel %vm3035_vm0, %v4649_v8, -inf }
 0xee7   : > { %v4667_v51 = vsel %vm3035_vm0, %v4641_v43, -inf }
 0xee8   : > { %4668 = vmax.xlane.f32.xlu1 %v4667_v51 }
 0xeea   : > { %4665 = vmax.xlane.f32.xlu0 %v4664_v44 }
 0xeec   : > { %4674 = vmax.xlane.f32.xlu1 %v4673_v17 }
 0xeee   : > { %4671 = vmax.xlane.f32.xlu0 %v4670_v31  ;;  %v14265_v31 = vld [vmem:[#allocation12 + $0xc8] ss:$12 sps:$4 sm:$0xff]  }
 0xeef   : > { %12839 = vmatprep.subr.bf16.mxu1 %v14265_v31 }
 0xf04   : > { %4748 = vrot.lane.b32.xlu0 %v16869_v38, %s15894_s28 }
 0xf6b   : > { %v4654_v26 = vpop.xlane.xlu0 %4653 }
 0xf6c   : > { %v4676_v53 = vsub.f32 %v4622_v7, %v4654_v26  ;;  %v14266_v26 = vld [vmem:[#allocation12 + $0x8] ss:$12 sps:$4 sm:$0xff]  }
 0xf6d   : > { %v4657_v22 = vpop.xlane.xlu1 %4656  ;;  %12840 = vmatpush3.bf16.msra.mxu1 %v14266_v26 }
 0xf6e   : > { %v4684_v48 = vmul.f32 1.442695, %v4676_v53  ;;  %v4677_v57 = vsub.f32 %v4625_v11, %v4657_v22  ;;  %v14267_v53 = vld [vmem:[#allocation12 + $0xe0] ss:$12 sps:$4 sm:$0xff]  }
 0xf6f   : > { %v4660_v59 = vpop.xlane.xlu0 %4659  ;;  %v14268_v22 = vld [vmem:[#allocation12 + $0x20] ss:$12 sps:$4 sm:$0xff]   ;;  %12841 = vmatprep.subr.bf16.mxu1 %v14267_v53 }
 0xf70   : > { %v4678_v39 = vsub.f32 %v4630_v20, %v4660_v59  ;;  %v4686_v12 = vmul.f32 1.442695, %v4677_v57  ;;  %v14269_v59 = vld [vmem:[#allocation12 + $0xf8] ss:$12 sps:$4 sm:$0xff]   ;;  %v14289_v53 = vld [vmem:[#allocation12 + $0x34] ss:$12 sps:$4 sm:$0xff]  }
 0xf71   : > { %12842 = vmatpush3.bf16.msra.mxu1 %v14268_v22 }
 0xf72   : > { %v4688_v5 = vmul.f32 1.442695, %v4678_v39  ;;  %v14270_v39 = vld [vmem:[#allocation12 + $0x38] ss:$12 sps:$4 sm:$0xff]   ;;  %12843 = vmatprep.subr.bf16.mxu1 %v14269_v59 }
 0xf73   : > { %v4663_v16 = vpop.xlane.xlu0 %4662 }
 0xf74   : > { %15353 = vpow2.f32 %v4688_v5  ;;  %v4679_v33 = vsub.f32 %v4633_v10, %v4663_v16 }
 0xf75   : > { %v4669_v63 = vpop.xlane.xlu1 %4668  ;;  %15355 = vpow2.f32 %v4684_v48  ;;  %12844 = vmatpush3.bf16.msra.mxu1 %v14270_v39  ;;  %v14287_v39 = vld [vmem:[#allocation12 + $0x30] ss:$12 sps:$4 sm:$0xff]  }
 0xf76   : > { %v4690_v40 = vmul.f32 1.442695, %v4679_v33  ;;  %v4681_v49 = vsub.f32 %v4641_v43, %v4669_v63 }
 0xf77   : > { %v4666_v34 = vpop.xlane.xlu0 %4665 }
 0xf78   : > { %15357 = vpow2.f32 %v4690_v40  ;;  %v4680_v28 = vsub.f32 %v4638_v36, %v4666_v34  ;;  %v4694_v56 = vmul.f32 1.442695, %v4681_v49 }
 0xf79   : > { %15359 = vpow2.f32 %v4686_v12  ;;  %v4675_v38 = vpop.xlane.xlu1 %4674 }
 0xf7a   : > { %v4692_v15 = vmul.f32 1.442695, %v4680_v28  ;;  %v4683_v7 = vsub.f32 %v4649_v8, %v4675_v38 }
 0xf7b   : > { %v4672_v52 = vpop.xlane.xlu0 %4671 }
 0xf7c   : > { %v4682_v47 = vsub.f32 %v4646_v3, %v4672_v52  ;;  %v4698_v10 = vmul.f32 1.442695, %v4683_v7 }
 0xf7e   : > { %v17437_v14 = vpop.eup %15353  ;;  %v4696_v25 = vmul.f32 1.442695, %v4682_v47 }
 0xf7f   : > { %v4749_v46 = vpop.permute.xlu0 %4748  ;;  %v4706_v20 = vsel %vm3035_vm0, %v17437_v14, 0.0  ;;  %v17441_v11 = vpop.eup %15355 }
 0xf80   : > { %15361 = vpow2.f32 %v4696_v25  ;;  %4707 = vadd.xlane.f32.xlu0 %v4706_v20  ;;  %13331 = vmatprep.subr.bf16.mxu0 %v4749_v46  ;;  %v4700_v13 = vsel %vm3035_vm0, %v17441_v11, 0.0 }
 0xf81   : > { %13332 = vmatpush3.bf16.msra.mxu0 %v4749_v46  ;;  %15363 = vpow2.f32 %v4692_v15 }
 0xf82   : > { %v17443_v42 = vpop.eup %15357  ;;  %15365 = vpow2.f32 %v4698_v10  ;;  %v14283_v10 = vld [vmem:[#allocation12 + $0x4] ss:$12 sps:$4 sm:$0xff]  }
 0xf83   : > { %v4709_v1 = vsel %vm3035_vm0, %v17443_v42, 0.0  ;;  %v17449_v21 = vpop.eup %15359  ;;  %15367 = vpow2.f32 %v4694_v56  ;;  %v14281_v56 = vld [vmem:[#allocation12] ss:$12 sps:$4 sm:$0xff]  }
 0xf84   : > { %4701 = vadd.xlane.f32.xlu0 %v4700_v13  ;;  %4710 = vadd.xlane.f32.xlu1 %v4709_v1  ;;  %v4703_v30 = vsel %vm3035_vm0, %v17449_v21, 0.0 }
 0xf88   : > { %4704 = vadd.xlane.f32.xlu1 %v4703_v30 }
 0xf8a   : > { %v17453_v36 = vpop.eup %15361 }
 0xf8b   : > { %v4718_v43 = vsel %vm3035_vm0, %v17453_v36, 0.0  ;;  %v17457_v32 = vpop.eup %15363 }
 0xf8c   : > { %4719 = vadd.xlane.f32.xlu1 %v4718_v43  ;;  %v4712_v8 = vsel %vm3035_vm0, %v17457_v32, 0.0  ;;  %v17461_v51 = vpop.eup %15365 }
 0xf8d   : > { %v4721_v3 = vsel %vm3035_vm0, %v17461_v51, 0.0  ;;  %v17465_v44 = vpop.eup %15367 }
 0xf8e   : > { %v4715_v17 = vsel %vm3035_vm0, %v17465_v44, 0.0 }
 0xf90   : > { %4713 = vadd.xlane.f32.xlu1 %v4712_v8  ;;  %v14286_v8 = vld [vmem:[#allocation12 + $0x1c] ss:$12 sps:$4 sm:$0xff]  }
 0xf94   : > { %4722 = vadd.xlane.f32.xlu1 %v4721_v3 }
 0xf98   : > { %4716 = vadd.xlane.f32.xlu1 %v4715_v17 }
 0xf9a   : > { %4752 = vrot.lane.b32.xlu0 %v16882_v9, %s15894_s28  ;;  %v14271_v9 = vld [vmem:[#allocation12 + $0x110] ss:$12 sps:$4 sm:$0xff]  }
 0xf9b   : > { %12845 = vmatprep.subr.bf16.mxu1 %v14271_v9 }
 0xf9e   : > { %4754 = vrot.lane.b32.xlu0 %v16891_v35, %s15894_s28  ;;  %v14272_v35 = vld [vmem:[#allocation12 + $0x50] ss:$12 sps:$4 sm:$0xff]  }
 0xf9f   : > { %12846 = vmatpush3.bf16.msra.mxu1 %v14272_v35  ;;  %v14292_v35 = vld [vmem:[#allocation12 + $0x4c] ss:$12 sps:$4 sm:$0xff]  }
 0xfa0   : > { %12847 = vmatprep.subr.bf16.mxu1 %v14273_v0 }
 0xfa2   : > { %4233 = vrot.lane.b32.xlu0 %v4225_v23, %s15894_s28  ;;  %v14276_v23 = vld [vmem:[#allocation12 + $0x80] ss:$12 sps:$4 sm:$0xff]  }
 0xfa3   : > { %12848 = vmatpush3.bf16.msra.mxu1 %v14274_v55  ;;  %v14295_v55 = vld [vmem:[#allocation12 + $0x64] ss:$12 sps:$4 sm:$0xff]  }
 0xfa4   : > { %12849 = vmatprep.subr.bf16.mxu1 %v14275_v27 }
 0xfa6   : > { %4235 = vrot.lane.b32.xlu0 %v4226_v24, %s15894_s28  ;;  %v18678_v24 = vpack.c.bf16 %v17147_v61, %v17143_v50  ;;  %v14280_v50 = vld [vmem:[#allocation12 + $0xb0] ss:$12 sps:$4 sm:$0xff]  }
 0xfa7   : > { %12850 = vmatpush3.bf16.msra.mxu1 %v14276_v23  ;;  %v14296_v23 = vld [vmem:[#allocation12 + $0x78] ss:$12 sps:$4 sm:$0xff]  }
 0xfa8   : > { %12851 = vmatprep.subr.bf16.mxu1 %v14277_v19  ;;  %v14301_v19 = vld [vmem:[#allocation12 + $0x94] ss:$12 sps:$4 sm:$0xff]  }
 0xfa9   : > { %4750 = vrot.lane.b32.xlu1 %v16875_v6, %s15894_s28  ;;  %v18677_v6 = vpack.c.bf16 %v17343_v18, %v17339_v54  ;;  %v14279_v54 = vld [vmem:[#allocation12 + $0x170] ss:$12 sps:$4 sm:$0xff]   ;;  %v18680_v18 = vpack.c.bf16 %v17159_v2, %v17155_v60 }
 0xfaa   : > { %4237 = vrot.lane.b32.xlu0 %v4227_v62, %s15894_s28 }
 0xfab   : > { %12852 = vmatpush3.bf16.msra.mxu1 %v14278_v29  ;;  %v14304_v29 = vld [vmem:[#allocation12 + $0xac] ss:$12 sps:$4 sm:$0xff]  }
 0xfac   : > { %12853 = vmatprep.subr.bf16.mxu1 %v14279_v54 }
 0xfad   : > { %3620 = vrot.lane.b32.xlu1 %v18676_v41, %s15894_s28  ;;  %v14290_v41 = vld [vmem:[#allocation12 + $0x48] ss:$12 sps:$4 sm:$0xff]  }
 0xfae   : > { %4239 = vrot.lane.b32.xlu0 %v18677_v6, %s15894_s28  ;;  %v14298_v6 = vld [vmem:[#allocation12 + $0x7c] ss:$12 sps:$4 sm:$0xff]  }
 0xfaf   : > { %12854 = vmatpush3.bf16.msra.mxu1 %v14280_v50  ;;  %v14307_v50 = vld [vmem:[#allocation12 + $0xc4] ss:$12 sps:$4 sm:$0xff]  }
 0xfb1   : > { %3622 = vrot.lane.b32.xlu1 %v18678_v24, %s15894_s28 }
 0xfb5   : > { %3624 = vrot.lane.b32.xlu1 %v18679_v4, %s15894_s28  ;;  %v14299_v4 = vld [vmem:[#allocation12 + $0x90] ss:$12 sps:$4 sm:$0xff]  }
 0xfb9   : > { %3626 = vrot.lane.b32.xlu1 %v18680_v18, %s15894_s28  ;;  %v14302_v18 = vld [vmem:[#allocation12 + $0xa8] ss:$12 sps:$4 sm:$0xff]  }
0x100d   : > { %v4708_v61 = vpop.xlane.xlu0 %4707 }
0x1011   : > { %v4711_v45 = vpop.xlane.xlu1 %4710  ;;  %v4702_v62 = vpop.xlane.xlu0 %4701 }
0x1012   : > { %15369 = vrcp.f32 %v4702_v62  ;;  %v14308_v62 = vld [vmem:[#allocation12 + $0xd8] ss:$12 sps:$4 sm:$0xff]  }
0x1015   : > { %v4705_v48 = vpop.xlane.xlu1 %4704  ;;  %v4753_v37 = vpop.permute.xlu0 %4752 }
0x1016   : > { %15371 = vrcp.f32 %v4705_v48  ;;  %v14313_v48 = vld [vmem:[#allocation12 + $0xf4] ss:$12 sps:$4 sm:$0xff]  }
0x1017   : > { %15373 = vrcp.f32 %v4711_v45  ;;  %v14310_v45 = vld [vmem:[#allocation12 + $0xdc] ss:$12 sps:$4 sm:$0xff]  }
0x1018   : > { %15375 = vrcp.f32 %v4708_v61  ;;  %v14305_v61 = vld [vmem:[#allocation12 + $0xc0] ss:$12 sps:$4 sm:$0xff]  }
0x1019   : > { %v4720_v58 = vpop.xlane.xlu1 %4719  ;;  %v4755_v57 = vpop.permute.xlu0 %4754 }
0x101c   : > { %v15370_v33 = vpop.eup %15369 }
0x101d   : > { %v4714_v5 = vpop.xlane.xlu1 %4713  ;;  %v4234_v16 = vpop.permute.xlu0 %4233  ;;  %v4732_v12 = vmul.f32 %v15370_v33, %v17441_v11  ;;  %v14322_v33 = vld [vmem:[#allocation12 + $0x13c] ss:$12 sps:$4 sm:$0xff]  }
0x101e   : > { %4245 = vst.msk [vmem:[#allocation3 + $0x8] sm:$0xff] %vm3632_vm9, %v4234_v16  ;;  %15377 = vrcp.f32 %v4714_v5  ;;  %v14319_v5 = vld [vmem:[#allocation12 + $0x124] ss:$12 sps:$4 sm:$0xff]   ;;  %v14317_v16 = vld [vmem:[#allocation12 + $0x120] ss:$12 sps:$4 sm:$0xff]  }
0x1020   : > { %v15372_v60 = vpop.eup %15371 }
0x1021   : > { %v4723_v2 = vpop.xlane.xlu1 %4722  ;;  %v4236_v63 = vpop.permute.xlu0 %4235  ;;  %v4733_v40 = vmul.f32 %v15372_v60, %v17449_v21  ;;  %v14320_v60 = vld [vmem:[#allocation12 + $0x138] ss:$12 sps:$4 sm:$0xff]  }
0x1022   : > { %4246 = vst.msk [vmem:[#allocation3 + $0x20] sm:$0xff] %vm3632_vm9, %v4236_v63  ;;  %v15374_v7 = vpop.eup %15373  ;;  %v14323_v63 = vld [vmem:[#allocation12 + $0x150] ss:$12 sps:$4 sm:$0xff]  }
0x1023   : > { %v4740_v34 = vpack.c.bf16 %v4733_v40, %v4732_v12  ;;  %v15376_v46 = vpop.eup %15375  ;;  %v4735_v49 = vmul.f32 %v15374_v7, %v17443_v42  ;;  %v14328_v12 = vld [vmem:[#allocation12 + $0x16c] ss:$12 sps:$4 sm:$0xff]   ;;  %v14326_v40 = vld [vmem:[#allocation12 + $0x168] ss:$12 sps:$4 sm:$0xff]  }
0x1024   : > { %v4734_v21 = vmul.f32 %v15376_v46, %v17437_v14  ;;  %v14333_v7 = vld [vmem:[#allocation12 + $0x198] ss:$12 sps:$4 sm:$0xff]  }
0x1025   : > { %v4717_v28 = vpop.xlane.xlu1 %4716  ;;  %13339 = vmatprep.mubr.msk.bf16.mxu0 %vm3035_vm0, %v4740_v34  ;;  %v4238_v38 = vpop.permute.xlu0 %4237  ;;  %v4862_v52 = vld [vmem:[#allocation3 + $0x8] sm:$0xff]  ;;  %v18681_v34 = vmov 0  }
0x1026   : > { %15379 = vrcp.f32 %v4717_v28  ;;  %4247 = vst.msk [vmem:[#allocation3 + $0x38] sm:$0xff] %vm3632_vm9, %v4238_v38  ;;  %5548 = vmatprep.mubr.bf16.mxu1 %v4862_v52  ;;  %v4741_v43 = vpack.c.bf16 %v4735_v49, %v4734_v21  ;;  %v14329_v28 = vld [vmem:[#allocation12 + $0x180] ss:$12 sps:$4 sm:$0xff]   ;;  %v14331_v38 = vld [vmem:[#allocation12 + $0x184] ss:$12 sps:$4 sm:$0xff]  }
0x1027   : > { %15381 = vrcp.f32 %v4723_v2  ;;  %v14325_v2 = vld [vmem:[#allocation12 + $0x154] ss:$12 sps:$4 sm:$0xff]   ;;  %v14340_v46 = vld [vmem:[#allocation12 + $0x1b8] ss:$12 sps:$4 sm:$0xff]   ;;  %v14344_v49 = vld [vmem:[#allocation12 + $0x1d0] ss:$12 sps:$4 sm:$0xff]  }
0x1028   : > { %15383 = vrcp.f32 %v4720_v58  ;;  %v15378_v20 = vpop.eup %15377  ;;  %v14316_v58 = vld [vmem:[#allocation12 + $0x10c] ss:$12 sps:$4 sm:$0xff]  }
0x1029   : > { %v4751_v47 = vpop.permute.xlu1 %4750  ;;  %v4240_v15 = vpop.permute.xlu0 %4239  ;;  %v4736_v30 = vmul.f32 %v15378_v20, %v17457_v32  ;;  %v14284_v32 = vld [vmem:[#allocation12 + $0x18] ss:$12 sps:$4 sm:$0xff]   ;;  %v14337_v20 = vld [vmem:[#allocation12 + $0x1b0] ss:$12 sps:$4 sm:$0xff]   ;;  %v14345_v21 = vld [vmem:[#allocation12 + $0x1e0] ss:$12 sps:$4 sm:$0xff]  }
0x102a   : > { %4248 = vst.msk [vmem:[#allocation3 + $0x50] sm:$0xff] %vm3632_vm9, %v4240_v15  ;;  %13333 = vmatprep.subr.bf16.mxu0 %v4751_v47  ;;  %v14336_v15 = vld [vmem:[#allocation12 + $0x1a0] ss:$12 sps:$4 sm:$0xff]  }
0x102b   : > { %13334 = vmatpush3.bf16.msra.mxu0 %v4751_v47  ;;  %v14335_v47 = vld [vmem:[#allocation12 + $0x19c] ss:$12 sps:$4 sm:$0xff]  }
0x102c   : > { %13335 = vmatprep.subr.bf16.mxu0 %v4753_v37 }
0x102d   : > { %v3621_v25 = vpop.permute.xlu1 %3620 }
0x102e   : > { %3633 = vst.msk [vmem:[#allocation3] sm:$0xff] %vm3632_vm9, %v3621_v25  ;;  %v14339_v25 = vld [vmem:[#allocation12 + $0x1b4] ss:$12 sps:$4 sm:$0xff]  }
0x102f   : > { %13336 = vmatpush3.bf16.msra.mxu0 %v4753_v37  ;;  %v14311_v37 = vld [vmem:[#allocation12 + $0xf0] ss:$12 sps:$4 sm:$0xff]  }
0x1030   : > { %v15380_v11 = vpop.eup %15379  ;;  %13337 = vmatprep.subr.bf16.mxu0 %v4755_v57 }
0x1031   : > { %v3623_v13 = vpop.permute.xlu1 %3622  ;;  %v4737_v1 = vmul.f32 %v15380_v11, %v17465_v44  ;;  %v15382_v3 = vpop.eup %15381  ;;  %v17526_v44 = vld [vmem:[#allocation3 + $0x20] sm:$0xff]  ;;  %v4871_v24 = vld [vmem:[#allocation3 + $0x50] sm:$0xff] }
0x1032   : > { %3634 = vst.msk [vmem:[#allocation3 + $0x18] sm:$0xff] %vm3632_vm9, %v3623_v13  ;;  %v15384_v14 = vpop.eup %15383  ;;  %v4739_v26 = vmul.f32 %v15382_v3, %v17461_v51  ;;  %v4868_v51 = vld [vmem:[#allocation3 + $0x38] sm:$0xff]  ;;  %v14343_v11 = vld [vmem:[#allocation12 + $0x1cc] ss:$12 sps:$4 sm:$0xff]  }
0x1033   : > { %13338 = vmatpush3.bf16.msra.mxu0 %v4755_v57  ;;  %v4742_v42 = vpack.c.bf16 %v4737_v1, %v4736_v30  ;;  %v4738_v59 = vmul.f32 %v15384_v14, %v17453_v36  ;;  %v14293_v36 = vld [vmem:[#allocation12 + $0x60] ss:$12 sps:$4 sm:$0xff]   ;;  %v14314_v57 = vld [vmem:[#allocation12 + $0x108] ss:$12 sps:$4 sm:$0xff]   ;;  %v14347_v13 = vld [vmem:[#allocation12 + $0x1e4] ss:$12 sps:$4 sm:$0xff]  }
0x1034   : > { %5370 = vmatprep.subr.bf16.mxu0 %v14283_v10  ;;  %v14341_v10 = vld [vmem:[#allocation12 + $0x1c8] ss:$12 sps:$4 sm:$0xff]   ;;  %v14352_v30 = vld [vmem:[#allocation12 + $0x200] ss:$12 sps:$4 sm:$0xff]  }
0x1035   : > { %v3625_v17 = vpop.permute.xlu1 %3624  ;;  %v17520_v31 = vld [vmem:[#allocation3] sm:$0xff]  ;;  %v4743_v9 = vpack.c.bf16 %v4739_v26, %v4738_v59  ;;  %v14348_v1 = vld [vmem:[#allocation12 + $0x1e8] ss:$12 sps:$4 sm:$0xff]  }
0x1036   : > { %3635 = vst.msk [vmem:[#allocation3 + $0x30] sm:$0xff] %vm3632_vm9, %v3625_v17  ;;  %13340 = vmatmul.mubr.msk.bf16.vlgmr.msra.gmra.mrb[112].mxu0 %vm3035_vm0, %v4741_v43  ;;  %5549 = vmatmul.mubr.bf16.vlgmr.msra.gmra.mrb[80].mxu1 %v17520_v31  ;;  %v14349_v43 = vld [vmem:[#allocation12 + $0x1f8] ss:$12 sps:$4 sm:$0xff]   ;;  %v14355_v3 = vld [vmem:[#allocation12 + $0x214] ss:$12 sps:$4 sm:$0xff]  }
0x1037   : > { %13343 = vmatprep.mubr.msk.bf16.mxu0 %vm3035_vm0, %v4742_v42  ;;  %5371 = vmatpush1.bf16.msra.mxu0 %v14281_v56  ;;  %v14351_v56 = vld [vmem:[#allocation12 + $0x1fc] ss:$12 sps:$4 sm:$0xff]   ;;  %v14356_v17 = vld [vmem:[#allocation12 + $0x218] ss:$12 sps:$4 sm:$0xff]  }
0x1038   : > { %5556 = vmatprep.mubr.bf16.mxu1 %v17526_v44  ;;  %5372 = vmatprep.subr.bf16.mxu0 %v14286_v8  ;;  %v14353_v8 = vld [vmem:[#allocation12 + $0x210] ss:$12 sps:$4 sm:$0xff]   ;;  %v14357_v14 = vld [vmem:[#allocation12 + $0x228] ss:$12 sps:$4 sm:$0xff]  }
0x1039   : > { %v3627_v22 = vpop.permute.xlu1 %3626  ;;  %v17532_v0 = vld [vmem:[#allocation3 + $0x18] sm:$0xff] }
0x103a   : > { %3636 = vst.msk [vmem:[#allocation3 + $0x48] sm:$0xff] %vm3632_vm9, %v3627_v22  ;;  %v14360_v42 = vld [vmem:[#allocation12 + $0x230] ss:$12 sps:$4 sm:$0xff]  }
0x103b   : > { %5373 = vmatpush1.bf16.msra.mxu0 %v14284_v32 }
0x103c   : > { %5374 = vmatprep.subr.bf16.mxu0 %v14289_v53 }
0x103d   : > { %v4867_v27 = vld [vmem:[#allocation3 + $0x30] sm:$0xff] }
0x103e   : > { %13344 = vmatmul.mubr.msk.bf16.gmra.mrb[116].mxu0 %vm3035_vm0, %v4743_v9  ;;  %5557 = vmatmul.mubr.bf16.gmra.mrb[84].mxu1 %v17532_v0 }
0x103f   : > { %5375 = vmatpush1.bf16.msra.mxu0 %v14287_v39  ;;  %5402 = vmatprep.mubr.bf16.mxu0 %v4862_v52  ;;  %v14332_v52 = vld [vmem:[#allocation12 + $0x188] ss:$12 sps:$4 sm:$0xff]  }
0x1040   : > { %5564 = vmatprep.mubr.bf16.mxu1 %v4868_v51  ;;  %5376 = vmatprep.subr.bf16.mxu0 %v14292_v35 }
0x1041   : > { %v4870_v54 = vld [vmem:[#allocation3 + $0x48] sm:$0xff]  ;;  %13347 = vmatprep.subr.bf16.mxu1 %v14332_v52 }
0x1042   : > { %13348 = vmatpush3.bf16.msra.mxu1 %v14332_v52 }
0x1043   : > { %5377 = vmatpush1.bf16.msra.mxu0 %v14290_v41  ;;  %13349 = vmatprep.subr.bf16.mxu1 %v14336_v15 }
0x1044   : > { %5378 = vmatprep.subr.bf16.mxu0 %v14295_v55 }
0x1046   : > { %5565 = vmatmul.mubr.bf16.gmra.mrb[88].mxu1 %v4867_v27 }
0x1047   : > { %5379 = vmatpush1.bf16.msra.mxu0 %v14293_v36  ;;  %5572 = vmatprep.mubr.bf16.mxu1 %v4871_v24 }
0x1048   : > { %5380 = vmatprep.subr.bf16.mxu0 %v14298_v6  ;;  %13350 = vmatpush3.bf16.msra.mxu1 %v14336_v15 }
0x1049   : > { %13351 = vmatprep.subr.bf16.mxu1 %v14340_v46 }
0x104b   : > { %5381 = vmatpush1.bf16.msra.mxu0 %v14296_v23 }
0x104c   : > { %5382 = vmatprep.subr.bf16.mxu0 %v14301_v19  ;;  %13352 = vmatpush3.bf16.msra.mxu1 %v14340_v46 }
0x104d   : > { %13353 = vmatprep.subr.bf16.mxu1 %v14344_v49 }
0x104e   : > { %5573 = vmatmul.mubr.bf16.gmra.mrb[92].mxu1 %v4870_v54 }
0x104f   : > { %5383 = vmatpush1.bf16.msra.mxu0 %v14299_v4 }
0x1050   : > { %5384 = vmatprep.subr.bf16.mxu0 %v14304_v29  ;;  %13354 = vmatpush3.bf16.msra.mxu1 %v14344_v49  ;;  %v18684_v49 = vld [vmem:[#allocation35_spill] sm:$0xff] }
0x1051   : > { %13355 = vmatprep.subr.bf16.mxu1 %v14348_v1 }
0x1053   : > { %5385 = vmatpush1.bf16.msra.mxu0 %v14302_v18 }
0x1054   : > { %5386 = vmatprep.subr.bf16.mxu0 %v14307_v50  ;;  %13356 = vmatpush3.bf16.msra.mxu1 %v14348_v1 }
0x1055   : > { %13357 = vmatprep.subr.bf16.mxu1 %v14352_v30 }
0x1057   : > { %5387 = vmatpush1.bf16.msra.mxu0 %v14305_v61 }
0x1058   : > { %5388 = vmatprep.subr.bf16.mxu0 %v14310_v45  ;;  %13358 = vmatpush3.bf16.msra.mxu1 %v14352_v30 }
0x1059   : > { %13359 = vmatprep.subr.bf16.mxu1 %v14356_v17 }
0x105b   : > { %5389 = vmatpush1.bf16.msra.mxu0 %v14308_v62 }
0x105c   : > { %5390 = vmatprep.subr.bf16.mxu0 %v14313_v48  ;;  %13360 = vmatpush3.bf16.msra.mxu1 %v14356_v17 }
0x105d   : > { %13361 = vmatprep.subr.bf16.mxu1 %v14360_v42 }
0x105f   : > { %5391 = vmatpush1.bf16.msra.mxu0 %v14311_v37 }
0x1060   : > { %5392 = vmatprep.subr.bf16.mxu0 %v14316_v58  ;;  %13362 = vmatpush3.bf16.msra.mxu1 %v14360_v42 }
0x1063   : > { %5393 = vmatpush1.bf16.msra.mxu0 %v14314_v57 }
0x1064   : > { %5394 = vmatprep.subr.bf16.mxu0 %v14319_v5 }
0x1067   : > { %5395 = vmatpush1.bf16.msra.mxu0 %v14317_v16 }
0x1068   : > { %5396 = vmatprep.subr.bf16.mxu0 %v14322_v33 }
0x106b   : > { %5397 = vmatpush1.bf16.msra.mxu0 %v14320_v60 }
0x106c   : > { %5398 = vmatprep.subr.bf16.mxu0 %v14325_v2 }
0x106f   : > { %5399 = vmatpush1.bf16.msra.mxu0 %v14323_v63 }
0x1070   : > { %5400 = vmatprep.subr.bf16.mxu0 %v14328_v12 }
0x1073   : > { %5401 = vmatpush1.bf16.msra.mxu0 %v14326_v40 }
0x1074   : > { %5443 = vmatprep.subr.bf16.mxu0 %v14331_v38 }
0x1076   : > { %5403 = vmatmul.mubr.bf16.vlgmr.msra.gmra.mrb[120].mxu0 %v17520_v31  ;;  %v14359_v31 = vld [vmem:[#allocation12 + $0x22c] ss:$12 sps:$4 sm:$0xff]  }
0x1077   : > { %5412 = vmatprep.mubr.bf16.mxu0 %v17526_v44  ;;  %5444 = vmatpush1.bf16.msra.mxu0 %v14329_v28 }
0x1078   : > { %5445 = vmatprep.subr.bf16.mxu0 %v14335_v47 }
0x107b   : > { %5446 = vmatpush1.bf16.msra.mxu0 %v14333_v7  ;;  %v4969_v7 = vld [vmem:[#allocation13] sm:$0x7] }
0x107c   : > { %5447 = vmatprep.subr.bf16.mxu0 %v14339_v25  ;;  %v18682_v25 = vld [vmem:[#allocation37_spill] sm:$0xff] }
0x107d   : > { %v17564_v46 = vrot.slane %v4969_v7, %v18682_v25 }
0x107e   : > { %5413 = vmatmul.mubr.bf16.gmra.mrb[124].mxu0 %v17532_v0 }
0x107f   : > { %5422 = vmatprep.mubr.bf16.mxu0 %v4868_v51  ;;  %5448 = vmatpush1.bf16.msra.mxu0 %v14337_v20  ;;  %v18683_v20 = vld [vmem:[#allocation36_spill] sm:$0xff] }
0x1080   : > { %5449 = vmatprep.subr.bf16.mxu0 %v14343_v11  ;;  %v4982_v11 = vrot.slane %v4969_v7, %v18683_v20 }
0x1083   : > { %5450 = vmatpush1.bf16.msra.mxu0 %v14341_v10  ;;  %v17568_v10 = vrot.slane %v4969_v7, %v18684_v49  ;;  %v15426_v7 = vld [vmem:[%s16317_s14 + $0x38] sm:$0xff] }
0x1084   : > { %5451 = vmatprep.subr.bf16.mxu0 %v14347_v13 }
0x1086   : > { %5423 = vmatmul.mubr.bf16.gmra.mrb[128].mxu0 %v4867_v27 }
0x1087   : > { %5432 = vmatprep.mubr.bf16.mxu0 %v4871_v24  ;;  %5452 = vmatpush1.bf16.msra.mxu0 %v14345_v21 }
0x1088   : > { %5453 = vmatprep.subr.bf16.mxu0 %v14351_v56 }
0x108b   : > { %5454 = vmatpush1.bf16.msra.mxu0 %v14349_v43 }
0x108c   : > { %5455 = vmatprep.subr.bf16.mxu0 %v14355_v3 }
0x108e   : > { %5433 = vmatmul.mubr.bf16.gmra.mrb[132].mxu0 %v4870_v54 }
0x108f   : > { %5475 = vmatprep.mubr.bf16.mxu0 %v18681_v34  ;;  %5456 = vmatpush1.bf16.msra.mxu0 %v14353_v8 }
0x1090   : > { %5457 = vmatprep.subr.bf16.mxu0 %v14359_v31 }
0x1093   : > { %5458 = vmatpush1.bf16.msra.mxu0 %v14357_v14  ;;  %v15419_v14 = vld [vmem:[%s16317_s14] sm:$0xff] }
0x1109   : > { %v13341_v44 = vpop.f32.mrb[112].mxu0  ;;  %v12855_v32 = vpop.f32.mrb[80].mxu1 }
0x110a   : > { %v4806_v26 = vpop.f32.mrb[113].mxu0  ;;  %v12856_v53 = vpop.f32.mrb[81].mxu1 }
0x110b   : > { %v17540_v22 = vadd.f32 %v12856_v53, %v12855_v32  ;;  %v13342_v59 = vpop.f32.mrb[114].mxu0  ;;  %v12858_v39 = vpop.f32.mrb[82].mxu1 }
0x110c   : > { %v4838_v9 = vpack.c.bf16 %v13342_v59, %v13341_v44  ;;  %v4809_v35 = vpop.f32.mrb[115].mxu0  ;;  %v12859_v0 = vpop.f32.mrb[83].mxu1 }
0x110d   : > { %v4837_v51 = vpack.c.bf16 %v4809_v35, %v4806_v26  ;;  %v17542_v41 = vadd.f32 %v12859_v0, %v12858_v39  ;;  %v5551_v43 = vadd.f32 %v17540_v22, %v4982_v11  ;;  %v15420_v39 = vld [vmem:[%s16317_s14 + $0x8] sm:$0xff] }
0x110e   : > { %4847 = vrot.lane.b32.xlu1 %v4838_v9, %s15894_s28 }
0x110f   : > { %4845 = vrot.lane.b32.xlu0 %v4837_v51, %s15894_s28  ;;  %v5554_v22 = vadd.f32 %v17542_v41, %v4982_v11 }
0x1111   : > { %v13345_v55 = vpop.f32.mrb[116].mxu0  ;;  %v12861_v36 = vpop.f32.mrb[84].mxu1 }
0x1112   : > { %v4822_v6 = vpop.f32.mrb[117].mxu0  ;;  %v12862_v27 = vpop.f32.mrb[85].mxu1 }
0x1113   : > { %v12863_v24 = vadd.f32 %v12862_v27, %v12861_v36  ;;  %v13346_v23 = vpop.f32.mrb[118].mxu0  ;;  %v12864_v19 = vpop.f32.mrb[86].mxu1 }
0x1114   : > { %v4840_v4 = vpack.c.bf16 %v13346_v23, %v13345_v55  ;;  %v4825_v29 = vpop.f32.mrb[119].mxu0  ;;  %v12865_v54 = vpop.f32.mrb[87].mxu1  ;;  %v15421_v55 = vld [vmem:[%s16317_s14 + $0x18] sm:$0xff]  ;;  %v15423_v23 = vld [vmem:[%s16317_s14 + $0x20] sm:$0xff] }
0x1115   : > { %v4839_v18 = vpack.c.bf16 %v4825_v29, %v4822_v6  ;;  %v12866_v50 = vadd.f32 %v12865_v54, %v12864_v19  ;;  %v5559_v1 = vadd.f32 %v12863_v24, %v4982_v11  ;;  %v15422_v6 = vld [vmem:[%s16317_s14 + $0x10] sm:$0xff] }
0x1116   : > { %4851 = vrot.lane.b32.xlu1 %v4840_v4, %s15894_s28  ;;  %v15424_v4 = vld [vmem:[%s16317_s14 + $0x28] sm:$0xff] }
0x1117   : > { %4849 = vrot.lane.b32.xlu0 %v4839_v18, %s15894_s28  ;;  %v5562_v42 = vadd.f32 %v12866_v50, %v4982_v11 }
0x1119   : > { %v12867_v61 = vpop.f32.mrb[88].mxu1 }
0x111a   : > { %v12868_v45 = vpop.f32.mrb[89].mxu1 }
0x111b   : > { %v17548_v62 = vadd.f32 %v12868_v45, %v12867_v61  ;;  %v12870_v48 = vpop.f32.mrb[90].mxu1 }
0x111c   : > { %v12871_v37 = vpop.f32.mrb[91].mxu1 }
0x111d   : > { %v17550_v58 = vadd.f32 %v12871_v37, %v12870_v48 }
0x1121   : > { %v12873_v57 = vpop.f32.mrb[92].mxu1 }
0x1122   : > { %v12874_v5 = vpop.f32.mrb[93].mxu1 }
0x1123   : > { %v17552_v16 = vadd.f32 %v12874_v5, %v12873_v57  ;;  %v12876_v33 = vpop.f32.mrb[94].mxu1  ;;  %v5567_v57 = vadd.f32 %v17548_v62, %v4982_v11 }
0x1124   : > { %v12877_v60 = vpop.f32.mrb[95].mxu1 }
0x1125   : > { %v17554_v2 = vadd.f32 %v12877_v60, %v12876_v33  ;;  %v5575_v18 = vadd.f32 %v17552_v16, %v4982_v11 }
0x1127   : > { %v5578_v16 = vadd.f32 %v17554_v2, %v4982_v11 }
0x1180   : > { %v4848_v63 = vpop.permute.xlu1 %4847 }
0x1181   : > { %4858 = vst.msk [vmem:[#allocation3 + $0x28] sm:$0xff] %vm3632_vm9, %v4848_v63  ;;  %v4846_v12 = vpop.permute.xlu0 %4845 }
0x1182   : > { %4857 = vst.msk [vmem:[#allocation3 + $0x10] sm:$0xff] %vm3632_vm9, %v4846_v12 }
0x1188   : > { %v4852_v40 = vpop.permute.xlu1 %4851  ;;  %v4866_v52 = vld [vmem:[#allocation3 + $0x28] sm:$0xff] }
0x1189   : > { %4860 = vst.msk [vmem:[#allocation3 + $0x58] sm:$0xff] %vm3632_vm9, %v4852_v40  ;;  %v4850_v28 = vpop.permute.xlu0 %4849  ;;  %v4863_v38 = vld [vmem:[#allocation3 + $0x10] sm:$0xff] }
0x118a   : > { %4859 = vst.msk [vmem:[#allocation3 + $0x40] sm:$0xff] %vm3632_vm9, %v4850_v28  ;;  %5476 = vmatmul.mubr.bf16.vlgmr.msra.gmra.mrb[120].mxu0 %v4863_v38  ;;  %13363 = vmatprep.mubr.bf16.mxu1 %v4863_v38  ;;  %v15425_v40 = vld [vmem:[%s16317_s14 + $0x30] sm:$0xff] }
0x118b   : > { %13364 = vmatmul.mubr.bf16.vlgmr.msra.gmra.mrb[96].mxu1 %v4866_v52  ;;  %5485 = vmatprep.mubr.bf16.mxu0 %v18681_v34 }
0x1190   : > { %v4872_v15 = vld [vmem:[#allocation3 + $0x58] sm:$0xff] }
0x1191   : > { %v4869_v47 = vld [vmem:[#allocation3 + $0x40] sm:$0xff] }
0x1192   : > { %5486 = vmatmul.mubr.bf16.gmra.mrb[124].mxu0 %v4866_v52  ;;  %13367 = vmatprep.mubr.bf16.mxu1 %v4869_v47 }
0x1193   : > { %13368 = vmatmul.mubr.bf16.gmra.mrb[100].mxu1 %v4872_v15  ;;  %5495 = vmatprep.mubr.bf16.mxu0 %v18681_v34 }
0x119a   : > { %5496 = vmatmul.mubr.bf16.gmra.mrb[128].mxu0 %v4869_v47 }
0x119b   : > { %5505 = vmatprep.mubr.bf16.mxu0 %v18681_v34 }
0x11a2   : > { %5506 = vmatmul.mubr.bf16.gmra.mrb[132].mxu0 %v4872_v15  ;;  %v5570_v15 = vadd.f32 %v17550_v58, %v4982_v11 }
0x125d   : > { %v5477_v13 = vpop.f32.mrb[120].mxu0 }
0x125e   : > { %v13387_v21 = vadd.f32 %v5477_v13, %v17564_v46  ;;  %v5479_v56 = vpop.f32.mrb[121].mxu0  ;;  %v13365_v30 = vpop.f32.mrb[96].mxu1 }
0x125f   : > { %v13388_v8 = vadd.f32 %v5479_v56, %v17568_v10  ;;  %v5624_v3 = vadd.f32 %v13365_v30, %v5559_v1  ;;  %v5481_v17 = vpop.f32.mrb[122].mxu0  ;;  %v5615_v31 = vpop.f32.mrb[97].mxu1  ;;  %v15427_v56 = vld [vmem:[%s16317_s14 + $0x48] sm:$0xff] }
0x1260   : > { %v17574_v44 = vadd.f32 %v15419_v14, %v13387_v21  ;;  %v13389_v32 = vadd.f32 %v5481_v17, %v17564_v46  ;;  %v5616_v26 = vadd.f32 %v5615_v31, %v5551_v43  ;;  %v5483_v53 = vpop.f32.mrb[123].mxu0  ;;  %v13366_v59 = vpop.f32.mrb[98].mxu1  ;;  %v15429_v31 = vld [vmem:[%s16317_s14 + $0x50] sm:$0xff] }
0x1261   : > { %v17579_v9 = vadd.f32 %v15420_v39, %v13388_v8  ;;  %v13390_v35 = vadd.f32 %v5483_v53, %v17568_v10  ;;  %v5627_v0 = vadd.f32 %v13366_v59, %v5562_v42  ;;  %v5618_v51 = vpop.f32.mrb[99].mxu1  ;;  %v15428_v8 = vld [vmem:[%s16317_s14 + $0x40] sm:$0xff] }
0x1262   : > { %v17583_v36 = vadd.f32 %v15421_v55, %v13389_v32  ;;  %v17586_v27 = vadd.f32 %v15422_v6, %v5616_v26  ;;  %v5619_v24 = vadd.f32 %v5618_v51, %v5554_v22  ;;  %v17622_v17 = vadd.f32 %v15428_v8, %v5624_v3  ;;  %v15430_v3 = vld [vmem:[%s16317_s14 + $0x58] sm:$0xff] }
0x1263   : > { %v17589_v19 = vadd.f32 %v15423_v23, %v13390_v35  ;;  %v5672_v41 = vadd.f32 %v17579_v9, %v17574_v44  ;;  %v17634_v59 = vadd.f32 %v15430_v3, %v5627_v0  ;;  %v15431_v35 = vld [vmem:[%s16317_s14 + $0x60] sm:$0xff] }
0x1264   : > { %v17594_v29 = vadd.f32 %v15424_v4, %v5619_v24  ;;  %v15432_v24 = vld [vmem:[%s16317_s14 + $0x68] sm:$0xff]  ;;  %v15433_v4 = vld [vmem:[%s16317_s14 + $0x78] sm:$0xff] }
0x1265   : > { %v5487_v54 = vpop.f32.mrb[124].mxu0  ;;  %v5673_v50 = vadd.f32 %v5672_v41, %v17586_v27  ;;  %v5676_v61 = vadd.f32 %v17589_v19, %v17583_v36 }
0x1266   : > { %v13391_v45 = vadd.f32 %v5487_v54, %v17564_v46  ;;  %v5489_v48 = vpop.f32.mrb[125].mxu0  ;;  %v13369_v37 = vpop.f32.mrb[100].mxu1 }
0x1267   : > { %v13392_v5 = vadd.f32 %v5489_v48, %v17568_v10  ;;  %v17603_v33 = vadd.f32 %v13369_v37, %v5575_v18  ;;  %5674 = vadd.xlane.f32.xlu0 %v5673_v50  ;;  %v5491_v60 = vpop.f32.mrb[126].mxu0  ;;  %v5631_v63 = vpop.f32.mrb[101].mxu1  ;;  %v5677_v12 = vadd.f32 %v5676_v61, %v17594_v29  ;;  %v15434_v18 = vld [vmem:[%s16317_s14 + $0x70] sm:$0xff]  ;;  %v15435_v61 = vld [vmem:[%s16317_s14 + $0x80] sm:$0xff]  ;;  %v15436_v37 = vld [vmem:[%s16317_s14 + $0x88] sm:$0xff] }
0x1268   : > { %v17608_v28 = vadd.f32 %v15425_v40, %v13391_v45  ;;  %v13393_v38 = vadd.f32 %v5491_v60, %v17564_v46  ;;  %v5632_v62 = vadd.f32 %v5631_v63, %v5567_v57  ;;  %v5493_v52 = vpop.f32.mrb[127].mxu0  ;;  %v13370_v47 = vpop.f32.mrb[102].mxu1 }
0x1269   : > { %v17613_v13 = vadd.f32 %v15426_v7, %v13392_v5  ;;  %v13394_v1 = vadd.f32 %v5493_v52, %v17568_v10  ;;  %v17616_v2 = vadd.f32 %v13370_v47, %v5578_v16  ;;  %5678 = vadd.xlane.f32.xlu1 %v5677_v12  ;;  %v5634_v21 = vpop.f32.mrb[103].mxu1  ;;  %v15437_v52 = vld [vmem:[%s16317_s14 + $0x90] sm:$0xff] }
0x126a   : > { %v17619_v30 = vadd.f32 %v15427_v56, %v13393_v38  ;;  %v5635_v43 = vadd.f32 %v5634_v21, %v5570_v15  ;;  %v17650_v50 = vadd.f32 %v15434_v18, %v5632_v62  ;;  %v14376_v18 = vld [vmem:[#allocation18 + $0xc8] ss:$48 sps:$4 sm:$0xff]  }
0x126b   : > { %18685 = vst [vmem:[#allocation38_spill] sm:$0xff] %v17613_v13  ;;  %v17625_v58 = vadd.f32 %v15429_v31, %v13394_v1  ;;  %v5680_v11 = vadd.f32 %v17613_v13, %v17608_v28  ;;  %v15438_v1 = vld [vmem:[%s16317_s14 + $0x98] sm:$0xff]  ;;  %v15440_v31 = vld [vmem:[%s16317_s14 + $0xa0] sm:$0xff] }
0x126c   : > { %18686 = vst [vmem:[#allocation39_spill] sm:$0xff] %v17619_v30  ;;  %v17658_v57 = vadd.f32 %v15436_v37, %v5635_v43  ;;  %v15439_v43 = vld [vmem:[%s16317_s14 + $0xa8] sm:$0xff]  ;;  %v14379_v37 = vld [vmem:[#allocation18 + $0x120] ss:$48 sps:$4 sm:$0xff]  }
0x126d   : > { %18687 = vst [vmem:[#allocation40_spill] sm:$0xff] %v17625_v58  ;;  %v5497_v42 = vpop.f32.mrb[128].mxu0  ;;  %v5681_v14 = vadd.f32 %v5680_v11, %v17622_v17  ;;  %v5684_v32 = vadd.f32 %v17625_v58, %v17619_v30  ;;  %v17679_v11 = vadd.f32 %v15440_v31, %v17603_v33  ;;  %v14361_v33 = vld [vmem:[#allocation18] ss:$48 sps:$4 sm:$0xff]   ;;  %v14408_v31 = vld [vmem:[#allocation18 + $0x2ac] ss:$48 sps:$4 sm:$0xff]  }
0x126e   : > { %v13395_v26 = vadd.f32 %v5497_v42, %v17564_v46  ;;  %v5499_v53 = vpop.f32.mrb[129].mxu0  ;;  %v15441_v42 = vld [vmem:[%s16317_s14 + $0xb0] sm:$0xff] }
0x126f   : > { %v13396_v22 = vadd.f32 %v5499_v53, %v17568_v10  ;;  %v5501_v39 = vpop.f32.mrb[130].mxu0  ;;  %5682 = vadd.xlane.f32.xlu0 %v5681_v14  ;;  %v5685_v0 = vadd.f32 %v5684_v32, %v17634_v59  ;;  %v15442_v32 = vld [vmem:[%s16317_s14 + $0xb8] sm:$0xff] }
0x1270   : > { %v17638_v51 = vadd.f32 %v15431_v35, %v13395_v26  ;;  %v13397_v55 = vadd.f32 %v5501_v39, %v17564_v46  ;;  %v5503_v6 = vpop.f32.mrb[131].mxu0  ;;  %v17688_v26 = vadd.f32 %v15442_v32, %v17616_v2  ;;  %v14364_v39 = vld [vmem:[#allocation18 + $0x8] ss:$48 sps:$4 sm:$0xff]   ;;  %v14366_v35 = vld [vmem:[#allocation18 + $0xc] ss:$48 sps:$4 sm:$0xff]  }
0x1271   : > { %v17642_v23 = vadd.f32 %v15432_v24, %v13396_v22  ;;  %v13398_v41 = vadd.f32 %v5503_v6, %v17568_v10  ;;  %v14363_v22 = vld [vmem:[#allocation18 + $0x4] ss:$48 sps:$4 sm:$0xff]   ;;  %v14372_v6 = vld [vmem:[#allocation18 + $0x6c] ss:$48 sps:$4 sm:$0xff]   ;;  %7870 = vmatprep.subr.bf16.mxu0 %v14366_v35  ;;  %v14367_v2 = vld [vmem:[#allocation18 + $0x60] ss:$48 sps:$4 sm:$0xff]  }
0x1272   : > { %18688 = vst [vmem:[#allocation37_spill] sm:$0xff] %v17638_v51  ;;  %v17647_v54 = vadd.f32 %v15433_v4, %v13397_v55  ;;  %v14369_v55 = vld [vmem:[#allocation18 + $0x64] ss:$48 sps:$4 sm:$0xff]   ;;  %7724 = vmatprep.subr.bf16.mxu1 %v14363_v22  ;;  %7871 = vmatpush1.bf16.msra.mxu0 %v14364_v39  ;;  %v14370_v24 = vld [vmem:[#allocation18 + $0x68] ss:$48 sps:$4 sm:$0xff]  }
0x1273   : > { %18689 = vst [vmem:[#allocation36_spill] sm:$0xff] %v17642_v23  ;;  %v17653_v45 = vadd.f32 %v15435_v61, %v13398_v41  ;;  %5686 = vadd.xlane.f32.xlu0 %v5685_v0  ;;  %v5688_v48 = vadd.f32 %v17642_v23, %v17638_v51  ;;  %7725 = vmatpush1.bf16.msra.mxu1 %v14361_v33  ;;  %v14375_v41 = vld [vmem:[#allocation18 + $0xc4] ss:$48 sps:$4 sm:$0xff]   ;;  %v14378_v0 = vld [vmem:[#allocation18 + $0xcc] ss:$48 sps:$4 sm:$0xff]  }
0x1274   : > { %18690 = vst [vmem:[#allocation35_spill] sm:$0xff] %v17647_v54  ;;  %7726 = vmatprep.subr.bf16.mxu1 %v14369_v55  ;;  %7872 = vmatprep.subr.bf16.mxu0 %v14372_v6  ;;  %v14373_v4 = vld [vmem:[#allocation18 + $0xc0] ss:$48 sps:$4 sm:$0xff]   ;;  %v14381_v61 = vld [vmem:[#allocation18 + $0x124] ss:$48 sps:$4 sm:$0xff]  }
0x1275   : > { %18691 = vst [vmem:[#allocation41_spill] sm:$0xff] %v17653_v45  ;;  %v5507_v5 = vpop.f32.mrb[132].mxu0  ;;  %v5689_v60 = vadd.f32 %v5688_v48, %v17650_v50  ;;  %v5692_v63 = vadd.f32 %v17653_v45, %v17647_v54  ;;  %v14384_v48 = vld [vmem:[#allocation18 + $0x12c] ss:$48 sps:$4 sm:$0xff]   ;;  %v14411_v32 = vld [vmem:[#allocation18 + $0x304] ss:$48 sps:$4 sm:$0xff]  }
0x1276   : > { %v13399_v16 = vadd.f32 %v5507_v5, %v17564_v46  ;;  %v5509_v12 = vpop.f32.mrb[133].mxu0  ;;  %7873 = vmatpush1.bf16.msra.mxu0 %v14370_v24  ;;  %v14382_v5 = vld [vmem:[#allocation18 + $0x128] ss:$48 sps:$4 sm:$0xff]   ;;  %v14417_v33 = vld [vmem:[#allocation18 + $0x364] ss:$48 sps:$4 sm:$0xff]  }
0x1277   : > { %v13400_v40 = vadd.f32 %v5509_v12, %v17568_v10  ;;  %5690 = vadd.xlane.f32.xlu0 %v5689_v60  ;;  %v5511_v38 = vpop.f32.mrb[134].mxu0  ;;  %v5693_v62 = vadd.f32 %v5692_v63, %v17658_v57  ;;  %7727 = vmatpush1.bf16.msra.mxu1 %v14367_v2  ;;  %v14387_v60 = vld [vmem:[#allocation18 + $0x184] ss:$48 sps:$4 sm:$0xff]   ;;  %v14390_v63 = vld [vmem:[#allocation18 + $0x18c] ss:$48 sps:$4 sm:$0xff]  }
0x1278   : > { %v17667_v47 = vadd.f32 %v15437_v52, %v13399_v16  ;;  %v13401_v15 = vadd.f32 %v5511_v38, %v17564_v46  ;;  %v5513_v7 = vpop.f32.mrb[135].mxu0  ;;  %7728 = vmatprep.subr.bf16.mxu1 %v14375_v41  ;;  %7874 = vmatprep.subr.bf16.mxu0 %v14378_v0  ;;  %v14385_v16 = vld [vmem:[#allocation18 + $0x180] ss:$48 sps:$4 sm:$0xff]   ;;  %v14388_v12 = vld [vmem:[#allocation18 + $0x188] ss:$48 sps:$4 sm:$0xff]  }
0x1279   : > { %v17671_v21 = vadd.f32 %v15438_v1, %v13400_v40  ;;  %v13402_v56 = vadd.f32 %v5513_v7, %v17568_v10  ;;  %5694 = vadd.xlane.f32.xlu1 %v5693_v62  ;;  %v14393_v40 = vld [vmem:[#allocation18 + $0x1e4] ss:$48 sps:$4 sm:$0xff]   ;;  %v14396_v38 = vld [vmem:[#allocation18 + $0x1ec] ss:$48 sps:$4 sm:$0xff]   ;;  %v14391_v62 = vld [vmem:[#allocation18 + $0x1e0] ss:$48 sps:$4 sm:$0xff]  }
0x127a   : > { %18692 = vst [vmem:[#allocation42_spill] sm:$0xff] %v17667_v47  ;;  %v17675_v8 = vadd.f32 %v15439_v43, %v13401_v15  ;;  %7875 = vmatpush1.bf16.msra.mxu0 %v14376_v18  ;;  %v14394_v52 = vld [vmem:[#allocation18 + $0x1e8] ss:$48 sps:$4 sm:$0xff]   ;;  %v14399_v15 = vld [vmem:[#allocation18 + $0x244] ss:$48 sps:$4 sm:$0xff]  }
0x127b   : > { %18693 = vst [vmem:[#allocation43_spill] sm:$0xff] %v17671_v21  ;;  %v17682_v14 = vadd.f32 %v15441_v42, %v13402_v56  ;;  %v5696_v46 = vadd.f32 %v17671_v21, %v17667_v47  ;;  %7729 = vmatpush1.bf16.msra.mxu1 %v14373_v4  ;;  %7876 = vmatprep.subr.bf16.mxu0 %v14384_v48  ;;  %v14402_v7 = vld [vmem:[#allocation18 + $0x24c] ss:$48 sps:$4 sm:$0xff]   ;;  %v14397_v1 = vld [vmem:[#allocation18 + $0x240] ss:$48 sps:$4 sm:$0xff]  }
0x127c   : > { %18694 = vst [vmem:[#allocation44_spill] sm:$0xff] %v17675_v8  ;;  %7730 = vmatprep.subr.bf16.mxu1 %v14381_v61  ;;  %v14400_v56 = vld [vmem:[#allocation18 + $0x248] ss:$48 sps:$4 sm:$0xff]   ;;  %v14405_v43 = vld [vmem:[#allocation18 + $0x2a4] ss:$48 sps:$4 sm:$0xff]  }
0x127d   : > { %18695 = vst [vmem:[#allocation45_spill] sm:$0xff] %v17682_v14  ;;  %v5697_v10 = vadd.f32 %v5696_v46, %v17679_v11  ;;  %v5700_v53 = vadd.f32 %v17682_v14, %v17675_v8  ;;  %v14403_v42 = vld [vmem:[#allocation18 + $0x2a0] ss:$48 sps:$4 sm:$0xff]   ;;  %v14406_v46 = vld [vmem:[#allocation18 + $0x2a8] ss:$48 sps:$4 sm:$0xff]  }
0x127e   : > { %7877 = vmatpush1.bf16.msra.mxu0 %v14382_v5  ;;  %v14420_v22 = vld [vmem:[#allocation18 + $0x36c] ss:$48 sps:$4 sm:$0xff]   ;;  %v14415_v39 = vld [vmem:[#allocation18 + $0x360] ss:$48 sps:$4 sm:$0xff]   ;;  %v14418_v35 = vld [vmem:[#allocation18 + $0x368] ss:$48 sps:$4 sm:$0xff]  }
0x127f   : > { %5698 = vadd.xlane.f32.xlu0 %v5697_v10  ;;  %v5701_v3 = vadd.f32 %v5700_v53, %v17688_v26  ;;  %7731 = vmatpush1.bf16.msra.mxu1 %v14379_v37  ;;  %v14414_v10 = vld [vmem:[#allocation18 + $0x30c] ss:$48 sps:$4 sm:$0xff]   ;;  %v14409_v53 = vld [vmem:[#allocation18 + $0x300] ss:$48 sps:$4 sm:$0xff]  }
0x1280   : > { %7732 = vmatprep.subr.bf16.mxu1 %v14387_v60  ;;  %7878 = vmatprep.subr.bf16.mxu0 %v14390_v63 }
0x1281   : > { %5702 = vadd.xlane.f32.xlu1 %v5701_v3  ;;  %v14412_v3 = vld [vmem:[#allocation18 + $0x308] ss:$48 sps:$4 sm:$0xff]  }
0x1282   : > { %7879 = vmatpush1.bf16.msra.mxu0 %v14388_v12 }
0x1283   : > { %7733 = vmatpush1.bf16.msra.mxu1 %v14385_v16  ;;  %7880 = vmatprep.subr.bf16.mxu0 %v14396_v38 }
0x1284   : > { %7734 = vmatprep.subr.bf16.mxu1 %v14393_v40 }
0x1286   : > { %7881 = vmatpush1.bf16.msra.mxu0 %v14394_v52 }
0x1287   : > { %7735 = vmatpush1.bf16.msra.mxu1 %v14391_v62  ;;  %7882 = vmatprep.subr.bf16.mxu0 %v14402_v7 }
0x1288   : > { %7736 = vmatprep.subr.bf16.mxu1 %v14399_v15 }
0x128a   : > { %7883 = vmatpush1.bf16.msra.mxu0 %v14400_v56 }
0x128b   : > { %7737 = vmatpush1.bf16.msra.mxu1 %v14397_v1  ;;  %7884 = vmatprep.subr.bf16.mxu0 %v14408_v31 }
0x128c   : > { %7738 = vmatprep.subr.bf16.mxu1 %v14405_v43 }
0x128e   : > { %7885 = vmatpush1.bf16.msra.mxu0 %v14406_v46 }
0x128f   : > { %7739 = vmatpush1.bf16.msra.mxu1 %v14403_v42  ;;  %7886 = vmatprep.subr.bf16.mxu0 %v14414_v10 }
0x1290   : > { %7740 = vmatprep.subr.bf16.mxu1 %v14411_v32 }
0x1292   : > { %7887 = vmatpush1.bf16.msra.mxu0 %v14412_v3 }
0x1293   : > { %7741 = vmatpush1.bf16.msra.mxu1 %v14409_v53  ;;  %7888 = vmatprep.subr.bf16.mxu0 %v14420_v22 }
0x1294   : > { %7742 = vmatprep.subr.bf16.mxu1 %v14417_v33 }
0x1296   : > { %7889 = vmatpush1.bf16.msra.mxu0 %v14418_v35 }
0x1297   : > { %7743 = vmatpush1.bf16.msra.mxu1 %v14415_v39 }
0x12f4   : > { %v5675_v55 = vpop.xlane.xlu0 %5674 }
0x12f5   : > { %v5704_v6 = vmul.f32 0.0026041667, %v5675_v55 }
0x12f6   : > { %v5679_v2 = vpop.xlane.xlu1 %5678 }
0x12f7   : > { %v17695_v24 = vsub.f32 %v17574_v44, %v5704_v6  ;;  %v17698_v41 = vsub.f32 %v17579_v9, %v5704_v6  ;;  %v17701_v0 = vsub.f32 %v17586_v27, %v5704_v6  ;;  %v5705_v4 = vmul.f32 0.0026041667, %v5679_v2 }
0x12f9   : > { %v5736_v18 = vmul.f32 %v17695_v24, %v17695_v24  ;;  %v5737_v61 = vmul.f32 %v17698_v41, %v17698_v41  ;;  %v17708_v48 = vsub.f32 %v17583_v36, %v5705_v4  ;;  %v17711_v37 = vsub.f32 %v17589_v19, %v5705_v4 }
0x12fa   : > { %v17714_v5 = vsub.f32 %v17594_v29, %v5705_v4  ;;  %v5738_v16 = vmul.f32 %v17701_v0, %v17701_v0 }
0x12fb   : > { %v5739_v60 = vmul.f32 %v17708_v48, %v17708_v48  ;;  %v5740_v63 = vmul.f32 %v17711_v37, %v17711_v37  ;;  %v5760_v12 = vadd.f32 %v5737_v61, %v5736_v18 }
0x12fc   : > { %v5683_v40 = vpop.xlane.xlu0 %5682  ;;  %v5741_v52 = vmul.f32 %v17714_v5, %v17714_v5 }
0x12fd   : > { %v5706_v38 = vmul.f32 0.0026041667, %v5683_v40  ;;  %v5761_v62 = vadd.f32 %v5760_v12, %v5738_v16  ;;  %v5764_v15 = vadd.f32 %v5740_v63, %v5739_v60 }
0x12ff   : > { %v17725_v7 = vsub.f32 %v17608_v28, %v5706_v38  ;;  %v17728_v1 = vsub.f32 %v17613_v13, %v5706_v38  ;;  %v17731_v56 = vsub.f32 %v17622_v17, %v5706_v38  ;;  %5762 = vadd.xlane.f32.xlu0 %v5761_v62  ;;  %v5765_v43 = vadd.f32 %v5764_v15, %v5741_v52 }
0x1300   : > { %v5687_v31 = vpop.xlane.xlu0 %5686 }
0x1301   : > { %v5742_v42 = vmul.f32 %v17725_v7, %v17725_v7  ;;  %v5743_v46 = vmul.f32 %v17728_v1, %v17728_v1  ;;  %v5707_v32 = vmul.f32 0.0026041667, %v5687_v31  ;;  %5766 = vadd.xlane.f32.xlu1 %v5765_v43  ;;  %v5744_v3 = vmul.f32 %v17731_v56, %v17731_v56 }
0x1303   : > { %v17738_v10 = vsub.f32 %v17619_v30, %v5707_v32  ;;  %v17741_v53 = vsub.f32 %v17625_v58, %v5707_v32  ;;  %v5768_v33 = vadd.f32 %v5743_v46, %v5742_v42  ;;  %v17746_v22 = vsub.f32 %v17634_v59, %v5707_v32  ;;  %v14474_v30 = vld [vmem:[#allocation18 + $0x6cc] ss:$48 sps:$4 sm:$0xff]  }
0x1304   : > { %v5691_v39 = vpop.xlane.xlu0 %5690 }
0x1305   : > { %v5745_v35 = vmul.f32 %v17738_v10, %v17738_v10  ;;  %v5746_v55 = vmul.f32 %v17741_v53, %v17741_v53  ;;  %v5708_v6 = vmul.f32 0.0026041667, %v5691_v39  ;;  %v5769_v2 = vadd.f32 %v5768_v33, %v5744_v3 }
0x1306   : > { %v5695_v4 = vpop.xlane.xlu1 %5694  ;;  %v5747_v16 = vmul.f32 %v17746_v22, %v17746_v22 }
0x1307   : > { %v17753_v18 = vsub.f32 %v17638_v51, %v5708_v6  ;;  %v17756_v61 = vsub.f32 %v17642_v23, %v5708_v6  ;;  %v17759_v60 = vsub.f32 %v17650_v50, %v5708_v6  ;;  %v5709_v63 = vmul.f32 0.0026041667, %v5695_v4  ;;  %5770 = vadd.xlane.f32.xlu0 %v5769_v2 }
0x1308   : > { %v5772_v12 = vadd.f32 %v5746_v55, %v5745_v35 }
0x1309   : > { %v5748_v40 = vmul.f32 %v17753_v18, %v17753_v18  ;;  %v5749_v38 = vmul.f32 %v17756_v61, %v17756_v61  ;;  %v17768_v62 = vsub.f32 %v17647_v54, %v5709_v63  ;;  %v17771_v52 = vsub.f32 %v17653_v45, %v5709_v63  ;;  %v14430_v54 = vld [vmem:[#allocation18 + $0x428] ss:$48 sps:$4 sm:$0xff]  }
0x130a   : > { %v17774_v15 = vsub.f32 %v17658_v57, %v5709_v63  ;;  %v5773_v43 = vadd.f32 %v5772_v12, %v5747_v16  ;;  %v5750_v46 = vmul.f32 %v17759_v60, %v17759_v60 }
0x130b   : > { %v5751_v31 = vmul.f32 %v17768_v62, %v17768_v62  ;;  %v5752_v42 = vmul.f32 %v17771_v52, %v17771_v52  ;;  %v5776_v32 = vadd.f32 %v5749_v38, %v5748_v40 }
0x130c   : > { %5774 = vadd.xlane.f32.xlu1 %v5773_v43  ;;  %v5699_v3 = vpop.xlane.xlu0 %5698  ;;  %v5753_v6 = vmul.f32 %v17774_v15, %v17774_v15 }
0x130d   : > { %v5710_v33 = vmul.f32 0.0026041667, %v5699_v3  ;;  %v5777_v39 = vadd.f32 %v5776_v32, %v5750_v46  ;;  %v5780_v35 = vadd.f32 %v5752_v42, %v5751_v31 }
0x130e   : > { %v5703_v55 = vpop.xlane.xlu1 %5702 }
0x130f   : > { %v17785_v2 = vsub.f32 %v17667_v47, %v5710_v33  ;;  %v17788_v4 = vsub.f32 %v17671_v21, %v5710_v33  ;;  %v17791_v63 = vsub.f32 %v17679_v11, %v5710_v33  ;;  %v5711_v16 = vmul.f32 0.0026041667, %v5703_v55  ;;  %5778 = vadd.xlane.f32.xlu0 %v5777_v39  ;;  %v14421_v39 = vld [vmem:[#allocation18 + $0x3c0] ss:$48 sps:$4 sm:$0xff]   ;;  %v14424_v55 = vld [vmem:[#allocation18 + $0x3c8] ss:$48 sps:$4 sm:$0xff]  }
0x1310   : > { %v5781_v12 = vadd.f32 %v5780_v35, %v5753_v6  ;;  %v14423_v35 = vld [vmem:[#allocation18 + $0x3c4] ss:$48 sps:$4 sm:$0xff]   ;;  %v14426_v6 = vld [vmem:[#allocation18 + $0x3cc] ss:$48 sps:$4 sm:$0xff]   ;;  %v14427_v47 = vld [vmem:[#allocation18 + $0x420] ss:$48 sps:$4 sm:$0xff]  }
0x1311   : > { %v5754_v40 = vmul.f32 %v17785_v2, %v17785_v2  ;;  %v5755_v38 = vmul.f32 %v17788_v4, %v17788_v4  ;;  %v17798_v43 = vsub.f32 %v17675_v8, %v5711_v16  ;;  %v17801_v31 = vsub.f32 %v17682_v14, %v5711_v16  ;;  %v14429_v14 = vld [vmem:[#allocation18 + $0x424] ss:$48 sps:$4 sm:$0xff]   ;;  %7744 = vmatprep.subr.bf16.mxu1 %v14423_v35  ;;  %v14432_v21 = vld [vmem:[#allocation18 + $0x42c] ss:$48 sps:$4 sm:$0xff]  }
0x1312   : > { %v17804_v42 = vsub.f32 %v17688_v26, %v5711_v16  ;;  %5782 = vadd.xlane.f32.xlu1 %v5781_v12  ;;  %v5756_v3 = vmul.f32 %v17791_v63, %v17791_v63  ;;  %7890 = vmatprep.subr.bf16.mxu0 %v14426_v6  ;;  %v14453_v35 = vld [vmem:[#allocation18 + $0x5a4] ss:$48 sps:$4 sm:$0xff]   ;;  %v14454_v6 = vld [vmem:[#allocation18 + $0x5a8] ss:$48 sps:$4 sm:$0xff]  }
0x1313   : > { %v5757_v46 = vmul.f32 %v17798_v43, %v17798_v43  ;;  %v5758_v32 = vmul.f32 %v17801_v31, %v17801_v31  ;;  %v5784_v33 = vadd.f32 %v5755_v38, %v5754_v40  ;;  %7745 = vmatpush1.bf16.msra.mxu1 %v14421_v39  ;;  %7891 = vmatpush1.bf16.msra.mxu0 %v14424_v55  ;;  %v14435_v40 = vld [vmem:[#allocation18 + $0x484] ss:$48 sps:$4 sm:$0xff]   ;;  %v14433_v38 = vld [vmem:[#allocation18 + $0x480] ss:$48 sps:$4 sm:$0xff]   ;;  %v14442_v39 = vld [vmem:[#allocation18 + $0x4e8] ss:$48 sps:$4 sm:$0xff]  }
0x1314   : > { %v5759_v16 = vmul.f32 %v17804_v42, %v17804_v42  ;;  %7746 = vmatprep.subr.bf16.mxu1 %v14429_v14  ;;  %7892 = vmatprep.subr.bf16.mxu0 %v14432_v21  ;;  %v14445_v21 = vld [vmem:[#allocation18 + $0x540] ss:$48 sps:$4 sm:$0xff]   ;;  %v14448_v14 = vld [vmem:[#allocation18 + $0x548] ss:$48 sps:$4 sm:$0xff]  }
0x1315   : > { %v5785_v8 = vadd.f32 %v5784_v33, %v5756_v3  ;;  %v5788_v12 = vadd.f32 %v5758_v32, %v5757_v46  ;;  %v14438_v3 = vld [vmem:[#allocation18 + $0x48c] ss:$48 sps:$4 sm:$0xff]   ;;  %v14436_v33 = vld [vmem:[#allocation18 + $0x488] ss:$48 sps:$4 sm:$0xff]   ;;  %v14439_v46 = vld [vmem:[#allocation18 + $0x4e0] ss:$48 sps:$4 sm:$0xff]  }
0x1316   : > { %v14441_v32 = vld [vmem:[#allocation18 + $0x4e4] ss:$48 sps:$4 sm:$0xff]   ;;  %v14451_v55 = vld [vmem:[#allocation18 + $0x5a0] ss:$48 sps:$4 sm:$0xff]  }
0x1317   : > { %5786 = vadd.xlane.f32.xlu0 %v5785_v8  ;;  %v5789_v45 = vadd.f32 %v5788_v12, %v5759_v16  ;;  %7747 = vmatpush1.bf16.msra.mxu1 %v14427_v47  ;;  %v14444_v8 = vld [vmem:[#allocation18 + $0x4ec] ss:$48 sps:$4 sm:$0xff]   ;;  %v14459_v16 = vld [vmem:[#allocation18 + $0x604] ss:$48 sps:$4 sm:$0xff]  }
0x1318   : > { %7893 = vmatpush1.bf16.msra.mxu0 %v14430_v54  ;;  %7748 = vmatprep.subr.bf16.mxu1 %v14435_v40  ;;  %v14450_v47 = vld [vmem:[#allocation18 + $0x54c] ss:$48 sps:$4 sm:$0xff]  }
0x1319   : > { %5790 = vadd.xlane.f32.xlu1 %v5789_v45  ;;  %7894 = vmatprep.subr.bf16.mxu0 %v14438_v3  ;;  %v14447_v45 = vld [vmem:[#allocation18 + $0x544] ss:$48 sps:$4 sm:$0xff]   ;;  %v14456_v54 = vld [vmem:[#allocation18 + $0x5ac] ss:$48 sps:$4 sm:$0xff]  }
0x131a   : > { %v14462_v12 = vld [vmem:[#allocation18 + $0x60c] ss:$48 sps:$4 sm:$0xff]  }
0x131b   : > { %7749 = vmatpush1.bf16.msra.mxu1 %v14433_v38 }
0x131c   : > { %7895 = vmatpush1.bf16.msra.mxu0 %v14436_v33  ;;  %7750 = vmatprep.subr.bf16.mxu1 %v14441_v32 }
0x131d   : > { %7896 = vmatprep.subr.bf16.mxu0 %v14444_v8 }
0x131f   : > { %7751 = vmatpush1.bf16.msra.mxu1 %v14439_v46 }
0x1320   : > { %7897 = vmatpush1.bf16.msra.mxu0 %v14442_v39  ;;  %7752 = vmatprep.subr.bf16.mxu1 %v14447_v45  ;;  %v17814_v45 = vld [vmem:[#allocation15] sm:$0x7] }
0x1321   : > { %7898 = vmatprep.subr.bf16.mxu0 %v14450_v47 }
0x1323   : > { %7753 = vmatpush1.bf16.msra.mxu1 %v14445_v21 }
0x1324   : > { %7899 = vmatpush1.bf16.msra.mxu0 %v14448_v14  ;;  %7754 = vmatprep.subr.bf16.mxu1 %v14453_v35  ;;  %v17816_v35 = vld [vmem:[#allocation16] sm:$0x7] }
0x1325   : > { %7900 = vmatprep.subr.bf16.mxu0 %v14456_v54  ;;  %v17820_v54 = vrot.slane %v17814_v45, %v18684_v49 }
0x1327   : > { %7755 = vmatpush1.bf16.msra.mxu1 %v14451_v55 }
0x1328   : > { %7901 = vmatpush1.bf16.msra.mxu0 %v14454_v6  ;;  %7797 = vmatprep.subr.bf16.mxu1 %v14459_v16  ;;  %v17826_v6 = vrot.slane %v17814_v45, %v18682_v25 }
0x1329   : > { %7943 = vmatprep.subr.bf16.mxu0 %v14462_v12 }
0x138c   : > { %v5763_v40 = vpop.xlane.xlu0 %5762 }
0x138d   : > { %v5792_v38 = vmul.f32 0.0026041667, %v5763_v40 }
0x138e   : > { %v5767_v3 = vpop.xlane.xlu1 %5766 }
0x138f   : > { %v5800_v33 = vadd.f32 1e-05, %v5792_v38  ;;  %v5793_v46 = vmul.f32 0.0026041667, %v5767_v3 }
0x1391   : > { %15385 = vrsqrt.f32 %v5800_v33  ;;  %v5801_v32 = vadd.f32 1e-05, %v5793_v46  ;;  %v17836_v46 = vrot.slane %v17816_v35, %v18684_v49 }
0x1393   : > { %15387 = vrsqrt.f32 %v5801_v32  ;;  %v17840_v32 = vrot.slane %v17816_v35, %v18682_v25 }
0x1394   : > { %v5771_v39 = vpop.xlane.xlu0 %5770 }
0x1395   : > { %v5794_v8 = vmul.f32 0.0026041667, %v5771_v39 }
0x1397   : > { %v5802_v21 = vadd.f32 1e-05, %v5794_v8 }
0x1399   : > { %15389 = vrsqrt.f32 %v5802_v21  ;;  %v5775_v14 = vpop.xlane.xlu1 %5774 }
0x139a   : > { %v5795_v47 = vmul.f32 0.0026041667, %v5775_v14 }
0x139b   : > { %v17822_v55 = vpop.eup %15385 }
0x139c   : > { %v5803_v16 = vadd.f32 1e-05, %v5795_v47  ;;  %v5779_v12 = vpop.xlane.xlu0 %5778  ;;  %v5817_v40 = vmul.f32 %v17822_v55, %v17698_v41  ;;  %v5816_v38 = vmul.f32 %v17822_v55, %v17695_v24 }
0x139d   : > { %v17832_v3 = vpop.eup %15387  ;;  %v5796_v33 = vmul.f32 0.0026041667, %v5779_v12 }
0x139e   : > { %15391 = vrsqrt.f32 %v5803_v16  ;;  %v5820_v39 = vmul.f32 %v17832_v3, %v17711_v37  ;;  %v5857_v41 = vmul.f32 %v17820_v54, %v5817_v40  ;;  %v5819_v24 = vmul.f32 %v17832_v3, %v17708_v48 }
0x139f   : > { %v5804_v8 = vadd.f32 1e-05, %v5796_v33  ;;  %v5783_v21 = vpop.xlane.xlu1 %5782  ;;  %v5856_v14 = vmul.f32 %v17826_v6, %v5816_v38 }
0x13a0   : > { %v5797_v47 = vmul.f32 0.0026041667, %v5783_v21  ;;  %v5860_v12 = vmul.f32 %v17820_v54, %v5820_v39  ;;  %v5859_v23 = vmul.f32 %v17826_v6, %v5819_v24  ;;  %v5897_v16 = vadd.f32 %v17836_v46, %v5857_v41  ;;  %v14457_v39 = vld [vmem:[#allocation18 + $0x600] ss:$48 sps:$4 sm:$0xff]   ;;  %v14460_v24 = vld [vmem:[#allocation18 + $0x608] ss:$48 sps:$4 sm:$0xff]  }
0x13a1   : > { %15393 = vrsqrt.f32 %v5804_v8  ;;  %v5896_v40 = vadd.f32 %v17840_v32, %v5856_v14 }
0x13a2   : > { %v5805_v51 = vadd.f32 1e-05, %v5797_v47  ;;  %v5900_v37 = vadd.f32 %v17836_v46, %v5860_v12  ;;  %v5899_v58 = vadd.f32 %v17840_v32, %v5859_v23  ;;  %v14465_v47 = vld [vmem:[#allocation18 + $0x664] ss:$48 sps:$4 sm:$0xff]   ;;  %v14468_v12 = vld [vmem:[#allocation18 + $0x66c] ss:$48 sps:$4 sm:$0xff]  }
0x13a3   : > { %v17854_v48 = vpop.eup %15389 }
0x13a4   : > { %15395 = vrsqrt.f32 %v5805_v51  ;;  %v5787_v33 = vpop.xlane.xlu0 %5786  ;;  %v17856_v38 = vpack.c.bf16 %v5900_v37, %v5897_v16  ;;  %v17858_v21 = vpack.c.bf16 %v5899_v58, %v5896_v40  ;;  %v5823_v41 = vmul.f32 %v17854_v48, %v17728_v1  ;;  %v14463_v1 = vld [vmem:[#allocation18 + $0x660] ss:$48 sps:$4 sm:$0xff]   ;;  %v14466_v37 = vld [vmem:[#allocation18 + $0x668] ss:$48 sps:$4 sm:$0xff]  }
0x13a5   : > { %v5798_v8 = vmul.f32 0.0026041667, %v5787_v33  ;;  %v5822_v14 = vmul.f32 %v17854_v48, %v17725_v7 }
0x13a6   : > { %7756 = vmatprep.mubr.bf16.mxu1 %v17856_v38  ;;  %7902 = vmatprep.mubr.bf16.mxu0 %v17856_v38  ;;  %v5791_v51 = vpop.xlane.xlu1 %5790  ;;  %v5863_v40 = vmul.f32 %v17820_v54, %v5823_v41 }
0x13a7   : > { %v5806_v23 = vadd.f32 1e-05, %v5798_v8  ;;  %v5799_v16 = vmul.f32 0.0026041667, %v5791_v51  ;;  %7757 = vmatmul.mubr.bf16.vlgmr.msra.gmra.mrb[104].mxu1 %v17858_v21  ;;  %7903 = vmatmul.mubr.bf16.vlgmr.msra.gmra.mrb[136].mxu0 %v17858_v21  ;;  %v5862_v7 = vmul.f32 %v17826_v6, %v5822_v14  ;;  %v14471_v51 = vld [vmem:[#allocation18 + $0x6c4] ss:$48 sps:$4 sm:$0xff]  }
0x13a8   : > { %v17868_v58 = vpop.eup %15391  ;;  %7798 = vmatpush1.bf16.msra.mxu1 %v14457_v39  ;;  %7944 = vmatpush1.bf16.msra.mxu0 %v14460_v24  ;;  %v14472_v14 = vld [vmem:[#allocation18 + $0x6c8] ss:$48 sps:$4 sm:$0xff]  }
0x13a9   : > { %15397 = vrsqrt.f32 %v5806_v23  ;;  %v5807_v33 = vadd.f32 1e-05, %v5799_v16  ;;  %7799 = vmatprep.subr.bf16.mxu1 %v14465_v47  ;;  %7945 = vmatprep.subr.bf16.mxu0 %v14468_v12  ;;  %v5826_v8 = vmul.f32 %v17868_v58, %v17741_v53  ;;  %v5825_v13 = vmul.f32 %v17868_v58, %v17738_v10  ;;  %v14469_v12 = vld [vmem:[#allocation18 + $0x6c0] ss:$48 sps:$4 sm:$0xff]  }
0x13aa   : > { %v5903_v47 = vadd.f32 %v17836_v46, %v5863_v40  ;;  %v5902_v53 = vadd.f32 %v17840_v32, %v5862_v7  ;;  %v14477_v7 = vld [vmem:[#allocation18 + $0x724] ss:$48 sps:$4 sm:$0xff]  }
0x13ab   : > { %v17876_v39 = vpop.eup %15393  ;;  %15399 = vrsqrt.f32 %v5807_v33  ;;  %v5866_v24 = vmul.f32 %v17820_v54, %v5826_v8  ;;  %v5865_v41 = vmul.f32 %v17826_v6, %v5825_v13  ;;  %v14480_v8 = vld [vmem:[#allocation18 + $0x72c] ss:$48 sps:$4 sm:$0xff]  }
0x13ac   : > { %7800 = vmatpush1.bf16.msra.mxu1 %v14463_v1  ;;  %7946 = vmatpush1.bf16.msra.mxu0 %v14466_v37  ;;  %v5829_v23 = vmul.f32 %v17876_v39, %v17756_v61  ;;  %v5828_v13 = vmul.f32 %v17876_v39, %v17753_v18  ;;  %v14478_v18 = vld [vmem:[#allocation18 + $0x728] ss:$48 sps:$4 sm:$0xff]  }
0x13ad   : > { %v5906_v10 = vadd.f32 %v17836_v46, %v5866_v24  ;;  %7801 = vmatprep.subr.bf16.mxu1 %v14471_v51  ;;  %7947 = vmatprep.subr.bf16.mxu0 %v14474_v30  ;;  %v5905_v16 = vadd.f32 %v17840_v32, %v5865_v41  ;;  %v14475_v51 = vld [vmem:[#allocation18 + $0x720] ss:$48 sps:$4 sm:$0xff]   ;;  %v14483_v41 = vld [vmem:[#allocation18 + $0x784] ss:$48 sps:$4 sm:$0xff]  }
0x13ae   : > { %v17888_v1 = vpop.eup %15395  ;;  %v5869_v37 = vmul.f32 %v17820_v54, %v5829_v23 }
0x13af   : > { %v17891_v40 = vpack.c.bf16 %v5906_v10, %v5903_v47  ;;  %v17893_v33 = vpack.c.bf16 %v5905_v16, %v5902_v53  ;;  %v5832_v61 = vmul.f32 %v17888_v1, %v17771_v52  ;;  %v5831_v30 = vmul.f32 %v17888_v1, %v17768_v62  ;;  %v14486_v47 = vld [vmem:[#allocation18 + $0x78c] ss:$48 sps:$4 sm:$0xff]   ;;  %v14484_v10 = vld [vmem:[#allocation18 + $0x788] ss:$48 sps:$4 sm:$0xff]  }
0x13b0   : > { %7802 = vmatpush1.bf16.msra.mxu1 %v14469_v12  ;;  %7948 = vmatpush1.bf16.msra.mxu0 %v14472_v14  ;;  %v5868_v53 = vmul.f32 %v17826_v6, %v5828_v13  ;;  %v5909_v52 = vadd.f32 %v17836_v46, %v5869_v37  ;;  %v14481_v14 = vld [vmem:[#allocation18 + $0x780] ss:$48 sps:$4 sm:$0xff]   ;;  %v14489_v37 = vld [vmem:[#allocation18 + $0x7e4] ss:$48 sps:$4 sm:$0xff]  }
0x13b1   : > { %7766 = vmatprep.mubr.bf16.mxu1 %v17891_v40  ;;  %7912 = vmatprep.mubr.bf16.mxu0 %v17891_v40  ;;  %v5872_v24 = vmul.f32 %v17820_v54, %v5832_v61  ;;  %v5871_v23 = vmul.f32 %v17826_v6, %v5831_v30 }
0x13b2   : > { %7767 = vmatmul.mubr.bf16.gmra.mrb[108].mxu1 %v17893_v33  ;;  %7913 = vmatmul.mubr.bf16.gmra.mrb[140].mxu0 %v17893_v33 }
0x13b3   : > { %v17906_v62 = vpop.eup %15397  ;;  %7803 = vmatprep.subr.bf16.mxu1 %v14477_v7  ;;  %7949 = vmatprep.subr.bf16.mxu0 %v14480_v8  ;;  %v5912_v12 = vadd.f32 %v17836_v46, %v5872_v24  ;;  %v5911_v16 = vadd.f32 %v17840_v32, %v5871_v23  ;;  %v5908_v7 = vadd.f32 %v17840_v32, %v5868_v53  ;;  %v14492_v8 = vld [vmem:[#allocation18 + $0x7ec] ss:$48 sps:$4 sm:$0xff]   ;;  %v14490_v53 = vld [vmem:[#allocation18 + $0x7e8] ss:$48 sps:$4 sm:$0xff]  }
0x13b4   : > { %7804 = vmatpush1.bf16.msra.mxu1 %v14475_v51  ;;  %7950 = vmatpush1.bf16.msra.mxu0 %v14478_v18  ;;  %v5835_v13 = vmul.f32 %v17906_v62, %v17788_v4  ;;  %v5834_v24 = vmul.f32 %v17906_v62, %v17785_v2  ;;  %v14495_v2 = vld [vmem:[#allocation18 + $0x844] ss:$48 sps:$4 sm:$0xff]  }
0x13b5   : > { %v17913_v61 = vpop.eup %15399  ;;  %v17915_v30 = vpack.c.bf16 %v5912_v12, %v5909_v52  ;;  %7805 = vmatprep.subr.bf16.mxu1 %v14483_v41  ;;  %7951 = vmatprep.subr.bf16.mxu0 %v14486_v47  ;;  %v17927_v41 = vpack.c.bf16 %v5911_v16, %v5908_v7  ;;  %v14487_v47 = vld [vmem:[#allocation18 + $0x7e0] ss:$48 sps:$4 sm:$0xff]   ;;  %v14498_v52 = vld [vmem:[#allocation18 + $0x84c] ss:$48 sps:$4 sm:$0xff]   ;;  %v14496_v16 = vld [vmem:[#allocation18 + $0x848] ss:$48 sps:$4 sm:$0xff]   ;;  %v5821_v7 = vmul.f32 %v17832_v3, %v17714_v5 }
0x13b6   : > { %v5838_v51 = vmul.f32 %v17913_v61, %v17801_v31  ;;  %v5875_v18 = vmul.f32 %v17820_v54, %v5835_v13  ;;  %v5837_v4 = vmul.f32 %v17913_v61, %v17798_v43  ;;  %v14499_v5 = vld [vmem:[#allocation18 + $0x8a0] ss:$48 sps:$4 sm:$0xff]   ;;  %v14502_v3 = vld [vmem:[#allocation18 + $0x8a8] ss:$48 sps:$4 sm:$0xff]  }
0x13b7   : > { %7776 = vmatprep.mubr.bf16.mxu1 %v17915_v30  ;;  %7922 = vmatprep.mubr.bf16.mxu0 %v17915_v30 }
0x13b8   : > { %7806 = vmatpush1.bf16.msra.mxu1 %v14481_v14  ;;  %7952 = vmatpush1.bf16.msra.mxu0 %v14484_v10  ;;  %v5878_v31 = vmul.f32 %v17820_v54, %v5838_v51  ;;  %v5877_v23 = vmul.f32 %v17826_v6, %v5837_v4  ;;  %v5915_v43 = vadd.f32 %v17836_v46, %v5875_v18  ;;  %v14493_v54 = vld [vmem:[#allocation18 + $0x840] ss:$48 sps:$4 sm:$0xff]   ;;  %v14507_v4 = vld [vmem:[#allocation18 + $0x14] ss:$48 sps:$4 sm:$0xff]  }
0x13b9   : > { %7807 = vmatprep.subr.bf16.mxu1 %v14489_v37  ;;  %7953 = vmatprep.subr.bf16.mxu0 %v14492_v8  ;;  %v5874_v14 = vmul.f32 %v17826_v6, %v5834_v24  ;;  %v14501_v37 = vld [vmem:[#allocation18 + $0x8a4] ss:$48 sps:$4 sm:$0xff]   ;;  %v14504_v8 = vld [vmem:[#allocation18 + $0x8ac] ss:$48 sps:$4 sm:$0xff]   ;;  %v17948_v51 = vrot.slane %v17814_v45, %v18683_v20  ;;  %v17958_v45 = vrot.slane %v17816_v35, %v18683_v20  ;;  %v14505_v35 = vld [vmem:[#allocation18 + $0x10] ss:$48 sps:$4 sm:$0xff]  }
0x13ba   : > { %7777 = vmatmul.mubr.bf16.gmra.mrb[112].mxu1 %v17927_v41  ;;  %7923 = vmatmul.mubr.bf16.gmra.mrb[144].mxu0 %v17927_v41  ;;  %v5918_v12 = vadd.f32 %v17836_v46, %v5878_v31  ;;  %v5917_v13 = vadd.f32 %v17840_v32, %v5877_v23  ;;  %v5818_v46 = vmul.f32 %v17822_v55, %v17701_v0  ;;  %v14508_v23 = vld [vmem:[#allocation18 + $0x18] ss:$48 sps:$4 sm:$0xff]  }
0x13bb   : > { %v5914_v6 = vadd.f32 %v17840_v32, %v5874_v14  ;;  %v5861_v24 = vmul.f32 %v17948_v51, %v5821_v7  ;;  %v5827_v32 = vmul.f32 %v17868_v58, %v17746_v22  ;;  %v5824_v31 = vmul.f32 %v17854_v48, %v17731_v56  ;;  %v14511_v58 = vld [vmem:[#allocation18 + $0x70] ss:$48 sps:$4 sm:$0xff]   ;;  %v14514_v14 = vld [vmem:[#allocation18 + $0x78] ss:$48 sps:$4 sm:$0xff]   ;;  %v14519_v56 = vld [vmem:[#allocation18 + $0xd4] ss:$48 sps:$4 sm:$0xff]  }
0x13bc   : > { %7808 = vmatpush1.bf16.msra.mxu1 %v14487_v47  ;;  %7954 = vmatpush1.bf16.msra.mxu0 %v14490_v53  ;;  %v17936_v10 = vpack.c.bf16 %v5918_v12, %v5915_v43  ;;  %v14510_v47 = vld [vmem:[#allocation18 + $0x1c] ss:$48 sps:$4 sm:$0xff]   ;;  %v5858_v0 = vmul.f32 %v17948_v51, %v5818_v46  ;;  %v5830_v7 = vmul.f32 %v17876_v39, %v17759_v60  ;;  %v14525_v46 = vld [vmem:[#allocation18 + $0x134] ss:$48 sps:$4 sm:$0xff]   ;;  %v14523_v60 = vld [vmem:[#allocation18 + $0x130] ss:$48 sps:$4 sm:$0xff]  }
0x13bd   : > { %7809 = vmatprep.subr.bf16.mxu1 %v14495_v2  ;;  %7955 = vmatprep.subr.bf16.mxu0 %v14498_v52  ;;  %v17950_v18 = vpack.c.bf16 %v5917_v13, %v5914_v6  ;;  %v5901_v55 = vadd.f32 %v17958_v45, %v5861_v24  ;;  %v14513_v52 = vld [vmem:[#allocation18 + $0x74] ss:$48 sps:$4 sm:$0xff]   ;;  %v14516_v43 = vld [vmem:[#allocation18 + $0x7c] ss:$48 sps:$4 sm:$0xff]   ;;  %v5867_v12 = vmul.f32 %v17948_v51, %v5827_v32  ;;  %v14526_v39 = vld [vmem:[#allocation18 + $0x138] ss:$48 sps:$4 sm:$0xff]  }
0x13be   : > { %7786 = vmatprep.mubr.bf16.mxu1 %v17936_v10  ;;  %7932 = vmatprep.mubr.bf16.mxu0 %v17936_v10  ;;  %v5898_v53 = vadd.f32 %v17958_v45, %v5858_v0  ;;  %v5864_v22 = vmul.f32 %v17948_v51, %v5824_v31  ;;  %v14522_v48 = vld [vmem:[#allocation18 + $0xdc] ss:$48 sps:$4 sm:$0xff]   ;;  %v14529_v32 = vld [vmem:[#allocation18 + $0x190] ss:$48 sps:$4 sm:$0xff]  }
0x13bf   : > { %v14534_v24 = vld [vmem:[#allocation18 + $0x19c] ss:$48 sps:$4 sm:$0xff]  }
0x13c0   : > { %7810 = vmatpush1.bf16.msra.mxu1 %v14493_v54  ;;  %7956 = vmatpush1.bf16.msra.mxu0 %v14496_v16  ;;  %v17968_v2 = vpack.c.bf16 %v5901_v55, %v5898_v53  ;;  %v5907_v54 = vadd.f32 %v17958_v45, %v5867_v12  ;;  %v5833_v16 = vmul.f32 %v17888_v1, %v17774_v15  ;;  %v14532_v53 = vld [vmem:[#allocation18 + $0x198] ss:$48 sps:$4 sm:$0xff]  }
0x13c1   : > { %7811 = vmatprep.subr.bf16.mxu1 %v14501_v37  ;;  %7957 = vmatprep.subr.bf16.mxu0 %v14504_v8  ;;  %v5904_v13 = vadd.f32 %v17958_v45, %v5864_v22  ;;  %v14517_v37 = vld [vmem:[#allocation18 + $0xd0] ss:$48 sps:$4 sm:$0xff]   ;;  %v14520_v8 = vld [vmem:[#allocation18 + $0xd8] ss:$48 sps:$4 sm:$0xff]   ;;  %v5870_v1 = vmul.f32 %v17948_v51, %v5830_v7  ;;  %v5836_v55 = vmul.f32 %v17906_v62, %v17791_v63 }
0x13c2   : > { %7787 = vmatmul.mubr.bf16.gmra.mrb[116].mxu1 %v17950_v18  ;;  %7933 = vmatmul.mubr.bf16.gmra.mrb[148].mxu0 %v17950_v18  ;;  %v5873_v15 = vmul.f32 %v17948_v51, %v5833_v16  ;;  %v14535_v63 = vld [vmem:[#allocation18 + $0x1f0] ss:$48 sps:$4 sm:$0xff]   ;;  %v14538_v62 = vld [vmem:[#allocation18 + $0x1f8] ss:$48 sps:$4 sm:$0xff]  }
0x13c3   : > { %7829 = vmatprep.mubr.bf16.mxu1 %v18681_v34  ;;  %7975 = vmatprep.mubr.bf16.mxu0 %v18681_v34  ;;  %v17982_v6 = vpack.c.bf16 %v5907_v54, %v5904_v13  ;;  %v5910_v0 = vadd.f32 %v17958_v45, %v5870_v1  ;;  %v14547_v54 = vld [vmem:[#allocation18 + $0x2b0] ss:$48 sps:$4 sm:$0xff]   ;;  %v14550_v16 = vld [vmem:[#allocation18 + $0x2b8] ss:$48 sps:$4 sm:$0xff]   ;;  %v14558_v13 = vld [vmem:[#allocation18 + $0x31c] ss:$48 sps:$4 sm:$0xff]  }
0x13c4   : > { %7812 = vmatpush1.bf16.msra.mxu1 %v14499_v5  ;;  %7958 = vmatpush1.bf16.msra.mxu0 %v14502_v3  ;;  %v14528_v5 = vld [vmem:[#allocation18 + $0x13c] ss:$48 sps:$4 sm:$0xff]   ;;  %v14531_v3 = vld [vmem:[#allocation18 + $0x194] ss:$48 sps:$4 sm:$0xff]   ;;  %v14553_v7 = vld [vmem:[#allocation18 + $0x310] ss:$48 sps:$4 sm:$0xff]  }
0x13c5   : > { %8016 = vmatprep.subr.bf16.mxu1 %v14507_v4  ;;  %8162 = vmatprep.subr.bf16.mxu0 %v14510_v47  ;;  %v5913_v4 = vadd.f32 %v17958_v45, %v5873_v15  ;;  %v5839_v47 = vmul.f32 %v17913_v61, %v17804_v42  ;;  %v5876_v61 = vmul.f32 %v17948_v51, %v5836_v55  ;;  %v14562_v15 = vld [vmem:[#allocation18 + $0x378] ss:$48 sps:$4 sm:$0xff]   ;;  %v14567_v1 = vld [vmem:[#allocation18 + $0x3d4] ss:$48 sps:$4 sm:$0xff]  }
0x13c6   : > { %v14579_v55 = vld [vmem:[#allocation18 + $0x494] ss:$48 sps:$4 sm:$0xff]  }
0x13c7   : > { %v17996_v31 = vpack.c.bf16 %v5913_v4, %v5910_v0  ;;  %v5879_v42 = vmul.f32 %v17948_v51, %v5839_v47  ;;  %v5916_v22 = vadd.f32 %v17958_v45, %v5876_v61  ;;  %v14544_v51 = vld [vmem:[#allocation18 + $0x258] ss:$48 sps:$4 sm:$0xff]   ;;  %v14576_v4 = vld [vmem:[#allocation18 + $0x43c] ss:$48 sps:$4 sm:$0xff]   ;;  %v14571_v47 = vld [vmem:[#allocation18 + $0x430] ss:$48 sps:$4 sm:$0xff]  }
0x13c8   : > { %v14574_v0 = vld [vmem:[#allocation18 + $0x438] ss:$48 sps:$4 sm:$0xff]   ;;  %v14583_v61 = vld [vmem:[#allocation18 + $0x4f0] ss:$48 sps:$4 sm:$0xff]  }
0x13c9   : > { %v5919_v12 = vadd.f32 %v17958_v45, %v5879_v42  ;;  %v14555_v45 = vld [vmem:[#allocation18 + $0x314] ss:$48 sps:$4 sm:$0xff]   ;;  %v14588_v42 = vld [vmem:[#allocation18 + $0x4fc] ss:$48 sps:$4 sm:$0xff]  }
0x13ca   : > { %7830 = vmatmul.mubr.bf16.vlgmr.msra.gmra.mrb[104].mxu1 %v17968_v2  ;;  %7976 = vmatmul.mubr.bf16.vlgmr.msra.gmra.mrb[136].mxu0 %v17968_v2 }
0x13cb   : > { %8017 = vmatpush1.bf16.msra.mxu1 %v14505_v35  ;;  %8163 = vmatpush1.bf16.msra.mxu0 %v14508_v23  ;;  %v14537_v35 = vld [vmem:[#allocation18 + $0x1f4] ss:$48 sps:$4 sm:$0xff]   ;;  %v14540_v23 = vld [vmem:[#allocation18 + $0x1fc] ss:$48 sps:$4 sm:$0xff]  }
0x13cc   : > { %8018 = vmatprep.subr.bf16.mxu1 %v14513_v52  ;;  %8164 = vmatprep.subr.bf16.mxu0 %v14516_v43  ;;  %v14543_v52 = vld [vmem:[#allocation18 + $0x254] ss:$48 sps:$4 sm:$0xff]   ;;  %v14546_v43 = vld [vmem:[#allocation18 + $0x25c] ss:$48 sps:$4 sm:$0xff]  }
0x13cd   : > { %7839 = vmatprep.mubr.bf16.mxu1 %v18681_v34  ;;  %7985 = vmatprep.mubr.bf16.mxu0 %v18681_v34 }
0x13cf   : > { %8019 = vmatpush1.bf16.msra.mxu1 %v14511_v58  ;;  %8165 = vmatpush1.bf16.msra.mxu0 %v14514_v14  ;;  %v14541_v58 = vld [vmem:[#allocation18 + $0x250] ss:$48 sps:$4 sm:$0xff]   ;;  %v18006_v14 = vpack.c.bf16 %v5919_v12, %v5916_v22  ;;  %v14592_v12 = vld [vmem:[#allocation18 + $0x558] ss:$48 sps:$4 sm:$0xff]   ;;  %v14597_v22 = vld [vmem:[#allocation18 + $0x5b4] ss:$48 sps:$4 sm:$0xff]  }
0x13d0   : > { %8020 = vmatprep.subr.bf16.mxu1 %v14519_v56  ;;  %8166 = vmatprep.subr.bf16.mxu0 %v14522_v48  ;;  %v14549_v56 = vld [vmem:[#allocation18 + $0x2b4] ss:$48 sps:$4 sm:$0xff]   ;;  %v14552_v48 = vld [vmem:[#allocation18 + $0x2bc] ss:$48 sps:$4 sm:$0xff]  }
0x13d2   : > { %7840 = vmatmul.mubr.bf16.gmra.mrb[108].mxu1 %v17982_v6  ;;  %7986 = vmatmul.mubr.bf16.gmra.mrb[140].mxu0 %v17982_v6 }
0x13d3   : > { %8021 = vmatpush1.bf16.msra.mxu1 %v14517_v37  ;;  %8167 = vmatpush1.bf16.msra.mxu0 %v14520_v8  ;;  %v14556_v37 = vld [vmem:[#allocation18 + $0x318] ss:$48 sps:$4 sm:$0xff]   ;;  %v14561_v8 = vld [vmem:[#allocation18 + $0x374] ss:$48 sps:$4 sm:$0xff]  }
0x13d4   : > { %8022 = vmatprep.subr.bf16.mxu1 %v14525_v46  ;;  %8168 = vmatprep.subr.bf16.mxu0 %v14528_v5  ;;  %v14564_v46 = vld [vmem:[#allocation18 + $0x37c] ss:$48 sps:$4 sm:$0xff]   ;;  %v14559_v5 = vld [vmem:[#allocation18 + $0x370] ss:$48 sps:$4 sm:$0xff]  }
0x13d5   : > { %7849 = vmatprep.mubr.bf16.mxu1 %v18681_v34  ;;  %7995 = vmatprep.mubr.bf16.mxu0 %v18681_v34 }
0x13d7   : > { %8023 = vmatpush1.bf16.msra.mxu1 %v14523_v60  ;;  %8169 = vmatpush1.bf16.msra.mxu0 %v14526_v39  ;;  %v14570_v60 = vld [vmem:[#allocation18 + $0x3dc] ss:$48 sps:$4 sm:$0xff]   ;;  %v14565_v39 = vld [vmem:[#allocation18 + $0x3d0] ss:$48 sps:$4 sm:$0xff]  }
0x13d8   : > { %8024 = vmatprep.subr.bf16.mxu1 %v14531_v3  ;;  %8170 = vmatprep.subr.bf16.mxu0 %v14534_v24  ;;  %v14568_v3 = vld [vmem:[#allocation18 + $0x3d8] ss:$48 sps:$4 sm:$0xff]   ;;  %v14573_v24 = vld [vmem:[#allocation18 + $0x434] ss:$48 sps:$4 sm:$0xff]  }
0x13da   : > { %7850 = vmatmul.mubr.bf16.gmra.mrb[112].mxu1 %v17996_v31  ;;  %7996 = vmatmul.mubr.bf16.gmra.mrb[144].mxu0 %v17996_v31 }
0x13db   : > { %8025 = vmatpush1.bf16.msra.mxu1 %v14529_v32  ;;  %8171 = vmatpush1.bf16.msra.mxu0 %v14532_v53  ;;  %v14582_v32 = vld [vmem:[#allocation18 + $0x49c] ss:$48 sps:$4 sm:$0xff]   ;;  %v14577_v53 = vld [vmem:[#allocation18 + $0x490] ss:$48 sps:$4 sm:$0xff]  }
0x13dc   : > { %8026 = vmatprep.subr.bf16.mxu1 %v14537_v35  ;;  %8172 = vmatprep.subr.bf16.mxu0 %v14540_v23  ;;  %v14580_v35 = vld [vmem:[#allocation18 + $0x498] ss:$48 sps:$4 sm:$0xff]   ;;  %v14585_v23 = vld [vmem:[#allocation18 + $0x4f4] ss:$48 sps:$4 sm:$0xff]  }
0x13dd   : > { %7859 = vmatprep.mubr.bf16.mxu1 %v18681_v34  ;;  %8005 = vmatprep.mubr.bf16.mxu0 %v18681_v34 }
0x13df   : > { %8027 = vmatpush1.bf16.msra.mxu1 %v14535_v63  ;;  %8173 = vmatpush1.bf16.msra.mxu0 %v14538_v62  ;;  %v14586_v63 = vld [vmem:[#allocation18 + $0x4f8] ss:$48 sps:$4 sm:$0xff]   ;;  %v14591_v62 = vld [vmem:[#allocation18 + $0x554] ss:$48 sps:$4 sm:$0xff]  }
0x13e0   : > { %8028 = vmatprep.subr.bf16.mxu1 %v14543_v52  ;;  %8174 = vmatprep.subr.bf16.mxu0 %v14546_v43  ;;  %v14594_v52 = vld [vmem:[#allocation18 + $0x55c] ss:$48 sps:$4 sm:$0xff]   ;;  %v14589_v43 = vld [vmem:[#allocation18 + $0x550] ss:$48 sps:$4 sm:$0xff]  }
0x13e2   : > { %7860 = vmatmul.mubr.bf16.gmra.mrb[116].mxu1 %v18006_v14  ;;  %8006 = vmatmul.mubr.bf16.gmra.mrb[148].mxu0 %v18006_v14 }
0x13e3   : > { %8029 = vmatpush1.bf16.msra.mxu1 %v14541_v58  ;;  %8175 = vmatpush1.bf16.msra.mxu0 %v14544_v51  ;;  %v14600_v58 = vld [vmem:[#allocation18 + $0x5bc] ss:$48 sps:$4 sm:$0xff]   ;;  %v14595_v51 = vld [vmem:[#allocation18 + $0x5b0] ss:$48 sps:$4 sm:$0xff]  }
0x13e4   : > { %8048 = vmatprep.mubr.bf16.mxu1 %v17856_v38  ;;  %8194 = vmatprep.mubr.bf16.mxu0 %v17856_v38 }
0x13e5   : > { %8030 = vmatprep.subr.bf16.mxu1 %v14549_v56  ;;  %8176 = vmatprep.subr.bf16.mxu0 %v14552_v48  ;;  %v14598_v56 = vld [vmem:[#allocation18 + $0x5b8] ss:$48 sps:$4 sm:$0xff]   ;;  %v14603_v48 = vld [vmem:[#allocation18 + $0x614] ss:$48 sps:$4 sm:$0xff]  }
0x13e7   : > { %8031 = vmatpush1.bf16.msra.mxu1 %v14547_v54  ;;  %8177 = vmatpush1.bf16.msra.mxu0 %v14550_v16  ;;  %v14606_v54 = vld [vmem:[#allocation18 + $0x61c] ss:$48 sps:$4 sm:$0xff]   ;;  %v14601_v16 = vld [vmem:[#allocation18 + $0x610] ss:$48 sps:$4 sm:$0xff]  }
0x13e8   : > { %8032 = vmatprep.subr.bf16.mxu1 %v14555_v45  ;;  %8178 = vmatprep.subr.bf16.mxu0 %v14558_v13  ;;  %v14604_v45 = vld [vmem:[#allocation18 + $0x618] ss:$48 sps:$4 sm:$0xff]   ;;  %v14609_v13 = vld [vmem:[#allocation18 + $0x674] ss:$48 sps:$4 sm:$0xff]  }
0x13eb   : > { %8033 = vmatpush1.bf16.msra.mxu1 %v14553_v7  ;;  %8179 = vmatpush1.bf16.msra.mxu0 %v14556_v37  ;;  %v14612_v7 = vld [vmem:[#allocation18 + $0x67c] ss:$48 sps:$4 sm:$0xff]   ;;  %v14607_v37 = vld [vmem:[#allocation18 + $0x670] ss:$48 sps:$4 sm:$0xff]  }
0x13ec   : > { %8034 = vmatprep.subr.bf16.mxu1 %v14561_v8  ;;  %8180 = vmatprep.subr.bf16.mxu0 %v14564_v46  ;;  %v14610_v8 = vld [vmem:[#allocation18 + $0x678] ss:$48 sps:$4 sm:$0xff]   ;;  %v14615_v46 = vld [vmem:[#allocation18 + $0x6d4] ss:$48 sps:$4 sm:$0xff]  }
0x13ef   : > { %8035 = vmatpush1.bf16.msra.mxu1 %v14559_v5  ;;  %8181 = vmatpush1.bf16.msra.mxu0 %v14562_v15  ;;  %v14618_v5 = vld [vmem:[#allocation18 + $0x6dc] ss:$48 sps:$4 sm:$0xff]   ;;  %v14613_v15 = vld [vmem:[#allocation18 + $0x6d0] ss:$48 sps:$4 sm:$0xff]  }
0x13f0   : > { %8036 = vmatprep.subr.bf16.mxu1 %v14567_v1  ;;  %8182 = vmatprep.subr.bf16.mxu0 %v14570_v60  ;;  %v14616_v1 = vld [vmem:[#allocation18 + $0x6d8] ss:$48 sps:$4 sm:$0xff]   ;;  %v14621_v60 = vld [vmem:[#allocation18 + $0x734] ss:$48 sps:$4 sm:$0xff]  }
0x13f3   : > { %8037 = vmatpush1.bf16.msra.mxu1 %v14565_v39  ;;  %8183 = vmatpush1.bf16.msra.mxu0 %v14568_v3  ;;  %v14624_v39 = vld [vmem:[#allocation18 + $0x73c] ss:$48 sps:$4 sm:$0xff]   ;;  %v14619_v3 = vld [vmem:[#allocation18 + $0x730] ss:$48 sps:$4 sm:$0xff]  }
0x13f4   : > { %8038 = vmatprep.subr.bf16.mxu1 %v14573_v24  ;;  %8184 = vmatprep.subr.bf16.mxu0 %v14576_v4  ;;  %v14622_v24 = vld [vmem:[#allocation18 + $0x738] ss:$48 sps:$4 sm:$0xff]   ;;  %v14627_v4 = vld [vmem:[#allocation18 + $0x794] ss:$48 sps:$4 sm:$0xff]  }
0x13f7   : > { %8039 = vmatpush1.bf16.msra.mxu1 %v14571_v47  ;;  %8185 = vmatpush1.bf16.msra.mxu0 %v14574_v0  ;;  %v14630_v47 = vld [vmem:[#allocation18 + $0x79c] ss:$48 sps:$4 sm:$0xff]   ;;  %v14625_v0 = vld [vmem:[#allocation18 + $0x790] ss:$48 sps:$4 sm:$0xff]  }
0x13f8   : > { %8040 = vmatprep.subr.bf16.mxu1 %v14579_v55  ;;  %8186 = vmatprep.subr.bf16.mxu0 %v14582_v32  ;;  %v14628_v55 = vld [vmem:[#allocation18 + $0x798] ss:$48 sps:$4 sm:$0xff]   ;;  %v14633_v32 = vld [vmem:[#allocation18 + $0x7f4] ss:$48 sps:$4 sm:$0xff]  }
0x13fb   : > { %8041 = vmatpush1.bf16.msra.mxu1 %v14577_v53  ;;  %8187 = vmatpush1.bf16.msra.mxu0 %v14580_v35  ;;  %v14636_v53 = vld [vmem:[#allocation18 + $0x7fc] ss:$48 sps:$4 sm:$0xff]   ;;  %v14631_v35 = vld [vmem:[#allocation18 + $0x7f0] ss:$48 sps:$4 sm:$0xff]  }
0x13fc   : > { %8042 = vmatprep.subr.bf16.mxu1 %v14585_v23  ;;  %8188 = vmatprep.subr.bf16.mxu0 %v14588_v42  ;;  %v14634_v23 = vld [vmem:[#allocation18 + $0x7f8] ss:$48 sps:$4 sm:$0xff]   ;;  %v14639_v42 = vld [vmem:[#allocation18 + $0x854] ss:$48 sps:$4 sm:$0xff]  }
0x13ff   : > { %8043 = vmatpush1.bf16.msra.mxu1 %v14583_v61  ;;  %8189 = vmatpush1.bf16.msra.mxu0 %v14586_v63  ;;  %v14642_v61 = vld [vmem:[#allocation18 + $0x85c] ss:$48 sps:$4 sm:$0xff]   ;;  %v14637_v63 = vld [vmem:[#allocation18 + $0x850] ss:$48 sps:$4 sm:$0xff]  }
0x1400   : > { %8044 = vmatprep.subr.bf16.mxu1 %v14591_v62  ;;  %8190 = vmatprep.subr.bf16.mxu0 %v14594_v52  ;;  %v14640_v62 = vld [vmem:[#allocation18 + $0x858] ss:$48 sps:$4 sm:$0xff]   ;;  %v14645_v52 = vld [vmem:[#allocation18 + $0x8b4] ss:$48 sps:$4 sm:$0xff]  }
0x1403   : > { %8045 = vmatpush1.bf16.msra.mxu1 %v14589_v43  ;;  %8191 = vmatpush1.bf16.msra.mxu0 %v14592_v12  ;;  %v14648_v43 = vld [vmem:[#allocation18 + $0x8bc] ss:$48 sps:$4 sm:$0xff]   ;;  %v14643_v12 = vld [vmem:[#allocation18 + $0x8b0] ss:$48 sps:$4 sm:$0xff]  }
0x1404   : > { %8046 = vmatprep.subr.bf16.mxu1 %v14597_v22  ;;  %8192 = vmatprep.subr.bf16.mxu0 %v14600_v58  ;;  %v14646_v22 = vld [vmem:[#allocation18 + $0x8b8] ss:$48 sps:$4 sm:$0xff]   ;;  %v14651_v58 = vld [vmem:[#allocation18 + $0x24] ss:$48 sps:$4 sm:$0xff]  }
0x1407   : > { %8047 = vmatpush1.bf16.msra.mxu1 %v14595_v51  ;;  %8193 = vmatpush1.bf16.msra.mxu0 %v14598_v56  ;;  %v14654_v51 = vld [vmem:[#allocation18 + $0x2c] ss:$48 sps:$4 sm:$0xff]   ;;  %v14649_v56 = vld [vmem:[#allocation18 + $0x20] ss:$48 sps:$4 sm:$0xff]  }
0x1408   : > { %8089 = vmatprep.subr.bf16.mxu1 %v14603_v48  ;;  %8235 = vmatprep.subr.bf16.mxu0 %v14606_v54  ;;  %v14652_v48 = vld [vmem:[#allocation18 + $0x28] ss:$48 sps:$4 sm:$0xff]   ;;  %v14657_v54 = vld [vmem:[#allocation18 + $0x84] ss:$48 sps:$4 sm:$0xff]  }
0x140a   : > { %8049 = vmatmul.mubr.bf16.vlgmr.msra.gmra.mrb[120].mxu1 %v17858_v21  ;;  %8195 = vmatmul.mubr.bf16.vlgmr.msra.gmra.mrb[152].mxu0 %v17858_v21 }
0x140b   : > { %8058 = vmatprep.mubr.bf16.mxu1 %v17891_v40  ;;  %8090 = vmatpush1.bf16.msra.mxu1 %v14601_v16  ;;  %v14660_v16 = vld [vmem:[#allocation18 + $0x8c] ss:$48 sps:$4 sm:$0xff]  }
0x140c   : > { %8204 = vmatprep.mubr.bf16.mxu0 %v17891_v40  ;;  %8236 = vmatpush1.bf16.msra.mxu0 %v14604_v45  ;;  %v14655_v45 = vld [vmem:[#allocation18 + $0x80] ss:$48 sps:$4 sm:$0xff]  }
0x140d   : > { %8091 = vmatprep.subr.bf16.mxu1 %v14609_v13  ;;  %8237 = vmatprep.subr.bf16.mxu0 %v14612_v7  ;;  %v14658_v13 = vld [vmem:[#allocation18 + $0x88] ss:$48 sps:$4 sm:$0xff]   ;;  %v14663_v7 = vld [vmem:[#allocation18 + $0xe4] ss:$48 sps:$4 sm:$0xff]  }
0x140f   : > { %8092 = vmatpush1.bf16.msra.mxu1 %v14607_v37  ;;  %v14666_v37 = vld [vmem:[#allocation18 + $0xec] ss:$48 sps:$4 sm:$0xff]  }
0x1410   : > { %8238 = vmatpush1.bf16.msra.mxu0 %v14610_v8  ;;  %8093 = vmatprep.subr.bf16.mxu1 %v14615_v46  ;;  %v14661_v8 = vld [vmem:[#allocation18 + $0xe0] ss:$48 sps:$4 sm:$0xff]   ;;  %v14664_v46 = vld [vmem:[#allocation18 + $0xe8] ss:$48 sps:$4 sm:$0xff]  }
0x1411   : > { %8239 = vmatprep.subr.bf16.mxu0 %v14618_v5  ;;  %v14669_v5 = vld [vmem:[#allocation18 + $0x144] ss:$48 sps:$4 sm:$0xff]  }
0x1412   : > { %8059 = vmatmul.mubr.bf16.gmra.mrb[124].mxu1 %v17893_v33  ;;  %8205 = vmatmul.mubr.bf16.gmra.mrb[156].mxu0 %v17893_v33 }
0x1413   : > { %8068 = vmatprep.mubr.bf16.mxu1 %v17915_v30  ;;  %8094 = vmatpush1.bf16.msra.mxu1 %v14613_v15  ;;  %v14672_v15 = vld [vmem:[#allocation18 + $0x14c] ss:$48 sps:$4 sm:$0xff]  }
0x1414   : > { %8214 = vmatprep.mubr.bf16.mxu0 %v17915_v30  ;;  %8240 = vmatpush1.bf16.msra.mxu0 %v14616_v1  ;;  %v14667_v1 = vld [vmem:[#allocation18 + $0x140] ss:$48 sps:$4 sm:$0xff]  }
0x1415   : > { %8095 = vmatprep.subr.bf16.mxu1 %v14621_v60  ;;  %8241 = vmatprep.subr.bf16.mxu0 %v14624_v39  ;;  %v14670_v60 = vld [vmem:[#allocation18 + $0x148] ss:$48 sps:$4 sm:$0xff]   ;;  %v14675_v39 = vld [vmem:[#allocation18 + $0x1a4] ss:$48 sps:$4 sm:$0xff]  }
0x1417   : > { %8096 = vmatpush1.bf16.msra.mxu1 %v14619_v3  ;;  %v14678_v3 = vld [vmem:[#allocation18 + $0x1ac] ss:$48 sps:$4 sm:$0xff]  }
0x1418   : > { %8242 = vmatpush1.bf16.msra.mxu0 %v14622_v24  ;;  %8097 = vmatprep.subr.bf16.mxu1 %v14627_v4  ;;  %v14673_v24 = vld [vmem:[#allocation18 + $0x1a0] ss:$48 sps:$4 sm:$0xff]   ;;  %v14676_v4 = vld [vmem:[#allocation18 + $0x1a8] ss:$48 sps:$4 sm:$0xff]  }
0x1419   : > { %8243 = vmatprep.subr.bf16.mxu0 %v14630_v47  ;;  %v14681_v47 = vld [vmem:[#allocation18 + $0x204] ss:$48 sps:$4 sm:$0xff]  }
0x141a   : > { %8069 = vmatmul.mubr.bf16.gmra.mrb[128].mxu1 %v17927_v41  ;;  %8215 = vmatmul.mubr.bf16.gmra.mrb[160].mxu0 %v17927_v41 }
0x141b   : > { %8078 = vmatprep.mubr.bf16.mxu1 %v17936_v10  ;;  %8098 = vmatpush1.bf16.msra.mxu1 %v14625_v0  ;;  %v14684_v0 = vld [vmem:[#allocation18 + $0x20c] ss:$48 sps:$4 sm:$0xff]  }
0x141c   : > { %8224 = vmatprep.mubr.bf16.mxu0 %v17936_v10  ;;  %8244 = vmatpush1.bf16.msra.mxu0 %v14628_v55  ;;  %v14679_v55 = vld [vmem:[#allocation18 + $0x200] ss:$48 sps:$4 sm:$0xff]  }
0x141d   : > { %8099 = vmatprep.subr.bf16.mxu1 %v14633_v32  ;;  %8245 = vmatprep.subr.bf16.mxu0 %v14636_v53  ;;  %v14682_v32 = vld [vmem:[#allocation18 + $0x208] ss:$48 sps:$4 sm:$0xff]   ;;  %v14687_v53 = vld [vmem:[#allocation18 + $0x264] ss:$48 sps:$4 sm:$0xff]  }
0x141f   : > { %8100 = vmatpush1.bf16.msra.mxu1 %v14631_v35  ;;  %v14690_v35 = vld [vmem:[#allocation18 + $0x26c] ss:$48 sps:$4 sm:$0xff]  }
0x1420   : > { %8246 = vmatpush1.bf16.msra.mxu0 %v14634_v23  ;;  %8101 = vmatprep.subr.bf16.mxu1 %v14639_v42  ;;  %v14685_v23 = vld [vmem:[#allocation18 + $0x260] ss:$48 sps:$4 sm:$0xff]   ;;  %v14688_v42 = vld [vmem:[#allocation18 + $0x268] ss:$48 sps:$4 sm:$0xff]  }
0x1421   : > { %8247 = vmatprep.subr.bf16.mxu0 %v14642_v61  ;;  %v14693_v61 = vld [vmem:[#allocation18 + $0x2c4] ss:$48 sps:$4 sm:$0xff]  }
0x1422   : > { %8079 = vmatmul.mubr.bf16.gmra.mrb[132].mxu1 %v17950_v18  ;;  %8225 = vmatmul.mubr.bf16.gmra.mrb[164].mxu0 %v17950_v18 }
0x1423   : > { %8102 = vmatpush1.bf16.msra.mxu1 %v14637_v63  ;;  %8121 = vmatprep.mubr.bf16.mxu1 %v18681_v34  ;;  %v14696_v63 = vld [vmem:[#allocation18 + $0x2cc] ss:$48 sps:$4 sm:$0xff]  }
0x1424   : > { %8248 = vmatpush1.bf16.msra.mxu0 %v14640_v62  ;;  %8103 = vmatprep.subr.bf16.mxu1 %v14645_v52  ;;  %v14691_v62 = vld [vmem:[#allocation18 + $0x2c0] ss:$48 sps:$4 sm:$0xff]   ;;  %v14694_v52 = vld [vmem:[#allocation18 + $0x2c8] ss:$48 sps:$4 sm:$0xff]  }
0x1425   : > { %8249 = vmatprep.subr.bf16.mxu0 %v14648_v43  ;;  %8267 = vmatprep.mubr.bf16.mxu0 %v18681_v34  ;;  %v14699_v43 = vld [vmem:[#allocation18 + $0x324] ss:$48 sps:$4 sm:$0xff]  }
0x1427   : > { %8104 = vmatpush1.bf16.msra.mxu1 %v14643_v12  ;;  %v14702_v12 = vld [vmem:[#allocation18 + $0x32c] ss:$48 sps:$4 sm:$0xff]  }
0x1428   : > { %8250 = vmatpush1.bf16.msra.mxu0 %v14646_v22  ;;  %8308 = vmatprep.subr.bf16.mxu1 %v14651_v58  ;;  %v14697_v22 = vld [vmem:[#allocation18 + $0x320] ss:$48 sps:$4 sm:$0xff]   ;;  %v14700_v58 = vld [vmem:[#allocation18 + $0x328] ss:$48 sps:$4 sm:$0xff]  }
0x1429   : > { %8454 = vmatprep.subr.bf16.mxu0 %v14654_v51  ;;  %v14705_v51 = vld [vmem:[#allocation18 + $0x384] ss:$48 sps:$4 sm:$0xff]  }
0x142a   : > { %8122 = vmatmul.mubr.bf16.vlgmr.msra.gmra.mrb[120].mxu1 %v17968_v2 }
0x142b   : > { %8268 = vmatmul.mubr.bf16.vlgmr.msra.gmra.mrb[152].mxu0 %v17968_v2  ;;  %8309 = vmatpush1.bf16.msra.mxu1 %v14649_v56  ;;  %v14708_v56 = vld [vmem:[#allocation18 + $0x38c] ss:$48 sps:$4 sm:$0xff]  }
0x142c   : > { %8455 = vmatpush1.bf16.msra.mxu0 %v14652_v48  ;;  %8310 = vmatprep.subr.bf16.mxu1 %v14657_v54  ;;  %v14703_v48 = vld [vmem:[#allocation18 + $0x380] ss:$48 sps:$4 sm:$0xff]   ;;  %v14706_v54 = vld [vmem:[#allocation18 + $0x388] ss:$48 sps:$4 sm:$0xff]  }
0x142d   : > { %8456 = vmatprep.subr.bf16.mxu0 %v14660_v16  ;;  %8131 = vmatprep.mubr.bf16.mxu1 %v18681_v34  ;;  %v14711_v16 = vld [vmem:[#allocation18 + $0x3e4] ss:$48 sps:$4 sm:$0xff]  }
0x142e   : > { %8277 = vmatprep.mubr.bf16.mxu0 %v18681_v34 }
0x142f   : > { %8311 = vmatpush1.bf16.msra.mxu1 %v14655_v45  ;;  %v14714_v45 = vld [vmem:[#allocation18 + $0x3ec] ss:$48 sps:$4 sm:$0xff]  }
0x1430   : > { %8457 = vmatpush1.bf16.msra.mxu0 %v14658_v13  ;;  %8312 = vmatprep.subr.bf16.mxu1 %v14663_v7  ;;  %v14712_v13 = vld [vmem:[#allocation18 + $0x3e8] ss:$48 sps:$4 sm:$0xff]   ;;  %v14717_v7 = vld [vmem:[#allocation18 + $0x444] ss:$48 sps:$4 sm:$0xff]  }
0x1431   : > { %8458 = vmatprep.subr.bf16.mxu0 %v14666_v37  ;;  %v14720_v37 = vld [vmem:[#allocation18 + $0x44c] ss:$48 sps:$4 sm:$0xff]  }
0x1432   : > { %8132 = vmatmul.mubr.bf16.gmra.mrb[124].mxu1 %v17982_v6 }
0x1433   : > { %8278 = vmatmul.mubr.bf16.gmra.mrb[156].mxu0 %v17982_v6  ;;  %8313 = vmatpush1.bf16.msra.mxu1 %v14661_v8  ;;  %v14715_v8 = vld [vmem:[#allocation18 + $0x440] ss:$48 sps:$4 sm:$0xff]  }
0x1434   : > { %8459 = vmatpush1.bf16.msra.mxu0 %v14664_v46  ;;  %8314 = vmatprep.subr.bf16.mxu1 %v14669_v5  ;;  %v14718_v46 = vld [vmem:[#allocation18 + $0x448] ss:$48 sps:$4 sm:$0xff]   ;;  %v14723_v5 = vld [vmem:[#allocation18 + $0x4a4] ss:$48 sps:$4 sm:$0xff]  }
0x1435   : > { %8460 = vmatprep.subr.bf16.mxu0 %v14672_v15  ;;  %8141 = vmatprep.mubr.bf16.mxu1 %v18681_v34  ;;  %v14726_v15 = vld [vmem:[#allocation18 + $0x4ac] ss:$48 sps:$4 sm:$0xff]  }
0x1436   : > { %8287 = vmatprep.mubr.bf16.mxu0 %v18681_v34 }
0x1437   : > { %8315 = vmatpush1.bf16.msra.mxu1 %v14667_v1  ;;  %v14721_v1 = vld [vmem:[#allocation18 + $0x4a0] ss:$48 sps:$4 sm:$0xff]  }
0x1438   : > { %8461 = vmatpush1.bf16.msra.mxu0 %v14670_v60  ;;  %8316 = vmatprep.subr.bf16.mxu1 %v14675_v39  ;;  %v14724_v60 = vld [vmem:[#allocation18 + $0x4a8] ss:$48 sps:$4 sm:$0xff]   ;;  %v14729_v39 = vld [vmem:[#allocation18 + $0x504] ss:$48 sps:$4 sm:$0xff]  }
0x1439   : > { %8462 = vmatprep.subr.bf16.mxu0 %v14678_v3  ;;  %v14732_v3 = vld [vmem:[#allocation18 + $0x50c] ss:$48 sps:$4 sm:$0xff]  }
0x143a   : > { %8142 = vmatmul.mubr.bf16.gmra.mrb[128].mxu1 %v17996_v31 }
0x143b   : > { %8288 = vmatmul.mubr.bf16.gmra.mrb[160].mxu0 %v17996_v31  ;;  %8317 = vmatpush1.bf16.msra.mxu1 %v14673_v24  ;;  %v14727_v24 = vld [vmem:[#allocation18 + $0x500] ss:$48 sps:$4 sm:$0xff]  }
0x143c   : > { %8463 = vmatpush1.bf16.msra.mxu0 %v14676_v4  ;;  %8318 = vmatprep.subr.bf16.mxu1 %v14681_v47  ;;  %v14730_v4 = vld [vmem:[#allocation18 + $0x508] ss:$48 sps:$4 sm:$0xff]   ;;  %v14735_v47 = vld [vmem:[#allocation18 + $0x564] ss:$48 sps:$4 sm:$0xff]  }
0x143d   : > { %8464 = vmatprep.subr.bf16.mxu0 %v14684_v0  ;;  %8151 = vmatprep.mubr.bf16.mxu1 %v18681_v34  ;;  %v14738_v0 = vld [vmem:[#allocation18 + $0x56c] ss:$48 sps:$4 sm:$0xff]  }
0x143e   : > { %8297 = vmatprep.mubr.bf16.mxu0 %v18681_v34 }
0x143f   : > { %8319 = vmatpush1.bf16.msra.mxu1 %v14679_v55  ;;  %v14733_v55 = vld [vmem:[#allocation18 + $0x560] ss:$48 sps:$4 sm:$0xff]  }
0x1440   : > { %8465 = vmatpush1.bf16.msra.mxu0 %v14682_v32  ;;  %8320 = vmatprep.subr.bf16.mxu1 %v14687_v53  ;;  %v14736_v32 = vld [vmem:[#allocation18 + $0x568] ss:$48 sps:$4 sm:$0xff]   ;;  %v14741_v53 = vld [vmem:[#allocation18 + $0x5c4] ss:$48 sps:$4 sm:$0xff]  }
0x1441   : > { %8466 = vmatprep.subr.bf16.mxu0 %v14690_v35  ;;  %v14744_v35 = vld [vmem:[#allocation18 + $0x5cc] ss:$48 sps:$4 sm:$0xff]  }
0x1442   : > { %8152 = vmatmul.mubr.bf16.gmra.mrb[132].mxu1 %v18006_v14 }
0x1443   : > { %8298 = vmatmul.mubr.bf16.gmra.mrb[164].mxu0 %v18006_v14  ;;  %8321 = vmatpush1.bf16.msra.mxu1 %v14685_v23  ;;  %v14739_v23 = vld [vmem:[#allocation18 + $0x5c0] ss:$48 sps:$4 sm:$0xff]  }
0x1444   : > { %8340 = vmatprep.mubr.bf16.mxu1 %v17856_v38  ;;  %8467 = vmatpush1.bf16.msra.mxu0 %v14688_v42  ;;  %v14742_v42 = vld [vmem:[#allocation18 + $0x5c8] ss:$48 sps:$4 sm:$0xff]  }
0x1445   : > { %8486 = vmatprep.mubr.bf16.mxu0 %v17856_v38  ;;  %8322 = vmatprep.subr.bf16.mxu1 %v14693_v61  ;;  %v14709_v38 = vld [vmem:[#allocation18 + $0x3e0] ss:$48 sps:$4 sm:$0xff]   ;;  %v14747_v61 = vld [vmem:[#allocation18 + $0x624] ss:$48 sps:$4 sm:$0xff]  }
0x1446   : > { %8468 = vmatprep.subr.bf16.mxu0 %v14696_v63  ;;  %v14750_v63 = vld [vmem:[#allocation18 + $0x62c] ss:$48 sps:$4 sm:$0xff]  }
0x1447   : > { %8323 = vmatpush1.bf16.msra.mxu1 %v14691_v62  ;;  %v14745_v62 = vld [vmem:[#allocation18 + $0x620] ss:$48 sps:$4 sm:$0xff]  }
0x1448   : > { %8469 = vmatpush1.bf16.msra.mxu0 %v14694_v52  ;;  %8324 = vmatprep.subr.bf16.mxu1 %v14699_v43  ;;  %v14748_v52 = vld [vmem:[#allocation18 + $0x628] ss:$48 sps:$4 sm:$0xff]   ;;  %v14753_v43 = vld [vmem:[#allocation18 + $0x684] ss:$48 sps:$4 sm:$0xff]  }
0x1449   : > { %8470 = vmatprep.subr.bf16.mxu0 %v14702_v12  ;;  %v14756_v12 = vld [vmem:[#allocation18 + $0x68c] ss:$48 sps:$4 sm:$0xff]  }
0x144b   : > { %8325 = vmatpush1.bf16.msra.mxu1 %v14697_v22  ;;  %v14751_v22 = vld [vmem:[#allocation18 + $0x680] ss:$48 sps:$4 sm:$0xff]  }
0x144c   : > { %8471 = vmatpush1.bf16.msra.mxu0 %v14700_v58  ;;  %8326 = vmatprep.subr.bf16.mxu1 %v14705_v51  ;;  %v14754_v58 = vld [vmem:[#allocation18 + $0x688] ss:$48 sps:$4 sm:$0xff]   ;;  %v14759_v51 = vld [vmem:[#allocation18 + $0x6e4] ss:$48 sps:$4 sm:$0xff]  }
0x144d   : > { %8472 = vmatprep.subr.bf16.mxu0 %v14708_v56  ;;  %v14762_v56 = vld [vmem:[#allocation18 + $0x6ec] ss:$48 sps:$4 sm:$0xff]  }
0x144f   : > { %8327 = vmatpush1.bf16.msra.mxu1 %v14703_v48  ;;  %v14757_v48 = vld [vmem:[#allocation18 + $0x6e0] ss:$48 sps:$4 sm:$0xff]  }
0x1450   : > { %8473 = vmatpush1.bf16.msra.mxu0 %v14706_v54  ;;  %8328 = vmatprep.subr.bf16.mxu1 %v14711_v16  ;;  %v14760_v54 = vld [vmem:[#allocation18 + $0x6e8] ss:$48 sps:$4 sm:$0xff]   ;;  %v14765_v16 = vld [vmem:[#allocation18 + $0x744] ss:$48 sps:$4 sm:$0xff]  }
0x1451   : > { %8474 = vmatprep.subr.bf16.mxu0 %v14714_v45  ;;  %v14766_v45 = vld [vmem:[#allocation18 + $0x748] ss:$48 sps:$4 sm:$0xff]  }
0x1453   : > { %8329 = vmatpush1.bf16.msra.mxu1 %v14709_v38  ;;  %v14771_v38 = vld [vmem:[#allocation18 + $0x7a4] ss:$48 sps:$4 sm:$0xff]  }
0x1454   : > { %8475 = vmatpush1.bf16.msra.mxu0 %v14712_v13  ;;  %8330 = vmatprep.subr.bf16.mxu1 %v14717_v7  ;;  %v14774_v13 = vld [vmem:[#allocation18 + $0x7ac] ss:$48 sps:$4 sm:$0xff]   ;;  %v14769_v7 = vld [vmem:[#allocation18 + $0x7a0] ss:$48 sps:$4 sm:$0xff]  }
0x1455   : > { %8476 = vmatprep.subr.bf16.mxu0 %v14720_v37  ;;  %v14772_v37 = vld [vmem:[#allocation18 + $0x7a8] ss:$48 sps:$4 sm:$0xff]  }
0x1457   : > { %8331 = vmatpush1.bf16.msra.mxu1 %v14715_v8  ;;  %v14777_v8 = vld [vmem:[#allocation18 + $0x804] ss:$48 sps:$4 sm:$0xff]  }
0x1458   : > { %8477 = vmatpush1.bf16.msra.mxu0 %v14718_v46  ;;  %8332 = vmatprep.subr.bf16.mxu1 %v14723_v5  ;;  %v14778_v46 = vld [vmem:[#allocation18 + $0x808] ss:$48 sps:$4 sm:$0xff]   ;;  %v14783_v5 = vld [vmem:[#allocation18 + $0x864] ss:$48 sps:$4 sm:$0xff]  }
0x1459   : > { %8478 = vmatprep.subr.bf16.mxu0 %v14726_v15  ;;  %v14786_v15 = vld [vmem:[#allocation18 + $0x86c] ss:$48 sps:$4 sm:$0xff]  }
0x145b   : > { %8333 = vmatpush1.bf16.msra.mxu1 %v14721_v1  ;;  %v14781_v1 = vld [vmem:[#allocation18 + $0x860] ss:$48 sps:$4 sm:$0xff]  }
0x145c   : > { %8479 = vmatpush1.bf16.msra.mxu0 %v14724_v60  ;;  %8334 = vmatprep.subr.bf16.mxu1 %v14729_v39  ;;  %v14784_v60 = vld [vmem:[#allocation18 + $0x868] ss:$48 sps:$4 sm:$0xff]   ;;  %v14789_v39 = vld [vmem:[#allocation18 + $0x8c4] ss:$48 sps:$4 sm:$0xff]  }
0x145d   : > { %8480 = vmatprep.subr.bf16.mxu0 %v14732_v3  ;;  %v14790_v3 = vld [vmem:[#allocation18 + $0x8c8] ss:$48 sps:$4 sm:$0xff]  }
0x145f   : > { %8335 = vmatpush1.bf16.msra.mxu1 %v14727_v24  ;;  %v14795_v24 = vld [vmem:[#allocation21 + $0x4] ss:$12 sps:$4 sm:$0xff]  }
0x1460   : > { %8481 = vmatpush1.bf16.msra.mxu0 %v14730_v4  ;;  %8336 = vmatprep.subr.bf16.mxu1 %v14735_v47  ;;  %v14796_v4 = vld [vmem:[#allocation21 + $0xc8] ss:$12 sps:$4 sm:$0xff]   ;;  %v14793_v47 = vld [vmem:[#allocation21] ss:$12 sps:$4 sm:$0xff]  }
0x1461   : > { %8482 = vmatprep.subr.bf16.mxu0 %v14738_v0  ;;  %v14797_v0 = vld [vmem:[#allocation21 + $0x8] ss:$12 sps:$4 sm:$0xff]  }
0x1463   : > { %8337 = vmatpush1.bf16.msra.mxu1 %v14733_v55  ;;  %v14800_v55 = vld [vmem:[#allocation21 + $0x1c] ss:$12 sps:$4 sm:$0xff]  }
0x1464   : > { %8483 = vmatpush1.bf16.msra.mxu0 %v14736_v32  ;;  %8338 = vmatprep.subr.bf16.mxu1 %v14741_v53  ;;  %v14798_v32 = vld [vmem:[#allocation21 + $0x18] ss:$12 sps:$4 sm:$0xff]   ;;  %v14802_v53 = vld [vmem:[#allocation21 + $0x20] ss:$12 sps:$4 sm:$0xff]  }
0x1465   : > { %8484 = vmatprep.subr.bf16.mxu0 %v14744_v35  ;;  %v14805_v35 = vld [vmem:[#allocation21 + $0x34] ss:$12 sps:$4 sm:$0xff]  }
0x1467   : > { %8339 = vmatpush1.bf16.msra.mxu1 %v14739_v23  ;;  %v14806_v23 = vld [vmem:[#allocation21 + $0xf8] ss:$12 sps:$4 sm:$0xff]  }
0x1468   : > { %8485 = vmatpush1.bf16.msra.mxu0 %v14742_v42  ;;  %8381 = vmatprep.subr.bf16.mxu1 %v14747_v61  ;;  %v14803_v42 = vld [vmem:[#allocation21 + $0x30] ss:$12 sps:$4 sm:$0xff]   ;;  %v14807_v61 = vld [vmem:[#allocation21 + $0x38] ss:$12 sps:$4 sm:$0xff]  }
0x1469   : > { %8527 = vmatprep.subr.bf16.mxu0 %v14750_v63  ;;  %v14810_v63 = vld [vmem:[#allocation21 + $0x4c] ss:$12 sps:$4 sm:$0xff]  }
0x146a   : > { %8341 = vmatmul.mubr.bf16.vlgmr.msra.gmra.mrb[136].mxu1 %v17858_v21 }
0x146b   : > { %8487 = vmatmul.mubr.bf16.vlgmr.msra.gmra.mrb[168].mxu0 %v17858_v21  ;;  %8350 = vmatprep.mubr.bf16.mxu1 %v17891_v40  ;;  %v14768_v21 = vld [vmem:[#allocation18 + $0x74c] ss:$48 sps:$4 sm:$0xff]  }
0x146c   : > { %8382 = vmatpush1.bf16.msra.mxu1 %v14745_v62  ;;  %8496 = vmatprep.mubr.bf16.mxu0 %v17891_v40  ;;  %v14763_v40 = vld [vmem:[#allocation18 + $0x740] ss:$48 sps:$4 sm:$0xff]  }
0x146d   : > { %8528 = vmatpush1.bf16.msra.mxu0 %v14748_v52  ;;  %8383 = vmatprep.subr.bf16.mxu1 %v14753_v43  ;;  %v14808_v62 = vld [vmem:[#allocation21 + $0x48] ss:$12 sps:$4 sm:$0xff]   ;;  %v14812_v52 = vld [vmem:[#allocation21 + $0x50] ss:$12 sps:$4 sm:$0xff]  }
0x146e   : > { %8529 = vmatprep.subr.bf16.mxu0 %v14756_v12  ;;  %v14815_v43 = vld [vmem:[#allocation21 + $0x64] ss:$12 sps:$4 sm:$0xff]   ;;  %v14816_v12 = vld [vmem:[#allocation21 + $0x128] ss:$12 sps:$4 sm:$0xff]  }
0x1470   : > { %8384 = vmatpush1.bf16.msra.mxu1 %v14751_v22  ;;  %v18068_v22 = vld [vmem:[#allocation19] sm:$0xff] }
0x1471   : > { %8530 = vmatpush1.bf16.msra.mxu0 %v14754_v58  ;;  %8385 = vmatprep.subr.bf16.mxu1 %v14759_v51  ;;  %v18696_v58 = vld [vmem:[#allocation34_spill] sm:$0xff] }
0x1472   : > { %8351 = vmatmul.mubr.bf16.gmra.mrb[140].mxu1 %v17893_v33  ;;  %8531 = vmatprep.subr.bf16.mxu0 %v14762_v56  ;;  %v6238_v51 = vsub.s32 3, %v18696_v58  ;;  %v14813_v56 = vld [vmem:[#allocation21 + $0x60] ss:$12 sps:$4 sm:$0xff]  }
0x1473   : > { %8497 = vmatmul.mubr.bf16.gmra.mrb[172].mxu0 %v17893_v33  ;;  %8360 = vmatprep.mubr.bf16.mxu1 %v17915_v30  ;;  %v14780_v33 = vld [vmem:[#allocation18 + $0x80c] ss:$48 sps:$4 sm:$0xff]  }
0x1474   : > { %8386 = vmatpush1.bf16.msra.mxu1 %v14757_v48  ;;  %8506 = vmatprep.mubr.bf16.mxu0 %v17915_v30  ;;  %v14775_v30 = vld [vmem:[#allocation18 + $0x800] ss:$48 sps:$4 sm:$0xff]   ;;  %v14820_v48 = vld [vmem:[#allocation21 + $0x7c] ss:$12 sps:$4 sm:$0xff]  }
0x1475   : > { %8532 = vmatpush1.bf16.msra.mxu0 %v14760_v54  ;;  %8387 = vmatprep.subr.bf16.mxu1 %v14765_v16  ;;  %v18073_v54 = vrot.slane %v18068_v22, %v18682_v25  ;;  %v18077_v16 = vrot.slane %v18068_v22, %v18683_v20 }
0x1476   : > { %8533 = vmatprep.subr.bf16.mxu0 %v14768_v21  ;;  %v14821_v21 = vld [vmem:[#allocation21 + $0x140] ss:$12 sps:$4 sm:$0xff]  }
0x1478   : > { %8388 = vmatpush1.bf16.msra.mxu1 %v14763_v40  ;;  %v18082_v40 = vrot.slane %v18068_v22, %v18684_v49 }
0x1479   : > { %8534 = vmatpush1.bf16.msra.mxu0 %v14766_v45  ;;  %8389 = vmatprep.subr.bf16.mxu1 %v14771_v38  ;;  %v18087_v45 = vrot.slane %v18068_v22, %v6238_v51  ;;  %v14818_v38 = vld [vmem:[#allocation21 + $0x78] ss:$12 sps:$4 sm:$0xff]  }
0x147a   : > { %8361 = vmatmul.mubr.bf16.gmra.mrb[144].mxu1 %v17927_v41  ;;  %8535 = vmatprep.subr.bf16.mxu0 %v14774_v13 }
0x147b   : > { %8507 = vmatmul.mubr.bf16.gmra.mrb[176].mxu0 %v17927_v41  ;;  %8370 = vmatprep.mubr.bf16.mxu1 %v17936_v10  ;;  %v14792_v41 = vld [vmem:[#allocation18 + $0x8cc] ss:$48 sps:$4 sm:$0xff]  }
0x147c   : > { %8390 = vmatpush1.bf16.msra.mxu1 %v14769_v7  ;;  %8516 = vmatprep.mubr.bf16.mxu0 %v17936_v10  ;;  %v14787_v10 = vld [vmem:[#allocation18 + $0x8c0] ss:$48 sps:$4 sm:$0xff]  }
0x147d   : > { %8536 = vmatpush1.bf16.msra.mxu0 %v14772_v37  ;;  %8391 = vmatprep.subr.bf16.mxu1 %v14777_v8  ;;  %v14822_v37 = vld [vmem:[#allocation21 + $0x80] ss:$12 sps:$4 sm:$0xff]  }
0x147e   : > { %8537 = vmatprep.subr.bf16.mxu0 %v14780_v33  ;;  %v14825_v8 = vld [vmem:[#allocation21 + $0x94] ss:$12 sps:$4 sm:$0xff]  }
0x1480   : > { %8392 = vmatpush1.bf16.msra.mxu1 %v14775_v30 }
0x1481   : > { %8538 = vmatpush1.bf16.msra.mxu0 %v14778_v46  ;;  %8393 = vmatprep.subr.bf16.mxu1 %v14783_v5 }
0x1482   : > { %8371 = vmatmul.mubr.bf16.gmra.mrb[148].mxu1 %v17950_v18  ;;  %8539 = vmatprep.subr.bf16.mxu0 %v14786_v15  ;;  %v14826_v15 = vld [vmem:[#allocation21 + $0x158] ss:$12 sps:$4 sm:$0xff]  }
0x1483   : > { %8517 = vmatmul.mubr.bf16.gmra.mrb[180].mxu0 %v17950_v18  ;;  %8413 = vmatprep.mubr.bf16.mxu1 %v18681_v34  ;;  %v14801_v18 = vld [vmem:[#allocation21 + $0xe0] ss:$12 sps:$4 sm:$0xff]  }
0x1484   : > { %8394 = vmatpush1.bf16.msra.mxu1 %v14781_v1  ;;  %8559 = vmatprep.mubr.bf16.mxu0 %v18681_v34 }
0x1485   : > { %8540 = vmatpush1.bf16.msra.mxu0 %v14784_v60  ;;  %8395 = vmatprep.subr.bf16.mxu1 %v14789_v39 }
0x1486   : > { %8541 = vmatprep.subr.bf16.mxu0 %v14792_v41 }
0x1488   : > { %8396 = vmatpush1.bf16.msra.mxu1 %v14787_v10 }
0x1489   : > { %8542 = vmatpush1.bf16.msra.mxu0 %v14790_v3  ;;  %10681 = vmatprep.subr.bf16.mxu1 %v14795_v24 }
0x148a   : > { %12891 = vmatprep.subr.bf16.mxu0 %v14796_v4  ;;  %v14823_v4 = vld [vmem:[#allocation21 + $0x90] ss:$12 sps:$4 sm:$0xff]  }
0x148b   : > { %8414 = vmatmul.mubr.bf16.vlgmr.msra.gmra.mrb[136].mxu1 %v17968_v2 }
0x148c   : > { %8560 = vmatmul.mubr.bf16.vlgmr.msra.gmra.mrb[168].mxu0 %v17968_v2  ;;  %10682 = vmatpush1.bf16.msra.mxu1 %v14793_v47  ;;  %v14811_v2 = vld [vmem:[#allocation21 + $0x110] ss:$12 sps:$4 sm:$0xff]  }
0x148d   : > { %12892 = vmatpush3.bf16.msra.mxu0 %v14797_v0  ;;  %10683 = vmatprep.subr.bf16.mxu1 %v14800_v55  ;;  %v14827_v55 = vld [vmem:[#allocation21 + $0x98] ss:$12 sps:$4 sm:$0xff]  }
0x148e   : > { %12893 = vmatprep.subr.bf16.mxu0 %v14801_v18  ;;  %8423 = vmatprep.mubr.bf16.mxu1 %v18681_v34  ;;  %v14830_v18 = vld [vmem:[#allocation21 + $0xac] ss:$12 sps:$4 sm:$0xff]  }
0x148f   : > { %8569 = vmatprep.mubr.bf16.mxu0 %v18681_v34 }
0x1490   : > { %10684 = vmatpush1.bf16.msra.mxu1 %v14798_v32 }
0x1491   : > { %12894 = vmatpush3.bf16.msra.mxu0 %v14802_v53  ;;  %10685 = vmatprep.subr.bf16.mxu1 %v14805_v35 }
0x1492   : > { %12895 = vmatprep.subr.bf16.mxu0 %v14806_v23  ;;  %v14831_v23 = vld [vmem:[#allocation21 + $0x170] ss:$12 sps:$4 sm:$0xff]  }
0x1493   : > { %8424 = vmatmul.mubr.bf16.gmra.mrb[140].mxu1 %v17982_v6 }
0x1494   : > { %8570 = vmatmul.mubr.bf16.gmra.mrb[172].mxu0 %v17982_v6  ;;  %10686 = vmatpush1.bf16.msra.mxu1 %v14803_v42  ;;  %v14817_v6 = vld [vmem:[#allocation21 + $0x68] ss:$12 sps:$4 sm:$0xff]  }
0x1495   : > { %12896 = vmatpush3.bf16.msra.mxu0 %v14807_v61  ;;  %10687 = vmatprep.subr.bf16.mxu1 %v14810_v63 }
0x1496   : > { %12897 = vmatprep.subr.bf16.mxu0 %v14811_v2  ;;  %8433 = vmatprep.mubr.bf16.mxu1 %v18681_v34 }
0x1497   : > { %8579 = vmatprep.mubr.bf16.mxu0 %v18681_v34 }
0x1498   : > { %10688 = vmatpush1.bf16.msra.mxu1 %v14808_v62 }
0x1499   : > { %12898 = vmatpush3.bf16.msra.mxu0 %v14812_v52  ;;  %10689 = vmatprep.subr.bf16.mxu1 %v14815_v43  ;;  %v14828_v43 = vld [vmem:[#allocation21 + $0xa8] ss:$12 sps:$4 sm:$0xff]  }
0x149a   : > { %12899 = vmatprep.subr.bf16.mxu0 %v14816_v12 }
0x149b   : > { %8434 = vmatmul.mubr.bf16.gmra.mrb[144].mxu1 %v17996_v31 }
0x149c   : > { %8580 = vmatmul.mubr.bf16.gmra.mrb[176].mxu0 %v17996_v31  ;;  %10690 = vmatpush1.bf16.msra.mxu1 %v14813_v56 }
0x149d   : > { %12900 = vmatpush3.bf16.msra.mxu0 %v14817_v6  ;;  %v7831_v13 = vpop.f32.mrb[104].mxu1  ;;  %v7977_v7 = vpop.f32.mrb[136].mxu0  ;;  %10691 = vmatprep.subr.bf16.mxu1 %v14820_v48 }
0x149e   : > { %v13403_v33 = vadd.f32 %v7831_v13, %v18073_v54  ;;  %v13419_v30 = vadd.f32 %v7977_v7, %v18077_v16  ;;  %12901 = vmatprep.subr.bf16.mxu0 %v14821_v21  ;;  %v7833_v46 = vpop.f32.mrb[105].mxu1  ;;  %v7979_v5 = vpop.f32.mrb[137].mxu0  ;;  %8443 = vmatprep.mubr.bf16.mxu1 %v18681_v34  ;;  %v14832_v21 = vld [vmem:[#allocation21 + $0xb0] ss:$12 sps:$4 sm:$0xff]  }
0x149f   : > { %v13404_v31 = vadd.f32 %v7833_v46, %v18082_v40  ;;  %v13420_v1 = vadd.f32 %v7979_v5, %v18087_v45  ;;  %v7835_v60 = vpop.f32.mrb[106].mxu1  ;;  %v7981_v39 = vpop.f32.mrb[138].mxu0  ;;  %8589 = vmatprep.mubr.bf16.mxu0 %v18681_v34 }
0x14a0   : > { %10692 = vmatpush1.bf16.msra.mxu1 %v14818_v38  ;;  %v13405_v41 = vadd.f32 %v7835_v60, %v18073_v54  ;;  %v13421_v10 = vadd.f32 %v7981_v39, %v18077_v16  ;;  %v7837_v3 = vpop.f32.mrb[107].mxu1  ;;  %v7983_v24 = vpop.f32.mrb[139].mxu0  ;;  %v8600_v32 = vmax.f32 %v13403_v33, 0.0  ;;  %v8602_v53 = vmax.f32 %v13419_v30, 0.0  ;;  %v14835_v38 = vld [vmem:[#allocation21 + $0xc4] ss:$12 sps:$4 sm:$0xff]  }
0x14a1   : > { %12902 = vmatpush3.bf16.msra.mxu0 %v14822_v37  ;;  %v13406_v47 = vadd.f32 %v7837_v3, %v18082_v40  ;;  %v13422_v0 = vadd.f32 %v7983_v24, %v18087_v45  ;;  %10693 = vmatprep.subr.bf16.mxu1 %v14825_v8  ;;  %v8601_v42 = vmax.f32 %v13404_v31, 0.0  ;;  %v8603_v61 = vmax.f32 %v13420_v1, 0.0  ;;  %v14836_v33 = vld [vmem:[#allocation21 + $0x248] ss:$12 sps:$4 sm:$0xff]   ;;  %v14833_v39 = vld [vmem:[#allocation21 + $0xc0] ss:$12 sps:$4 sm:$0xff]  }
0x14a2   : > { %v8612_v35 = vmax.f32 %v13405_v41, 0.0  ;;  %v8614_v34 = vmax.f32 %v13421_v10, 0.0  ;;  %12903 = vmatprep.subr.bf16.mxu0 %v14826_v15  ;;  %v14837_v3 = vld [vmem:[#allocation21 + $0x188] ss:$12 sps:$4 sm:$0xff]  }
0x14a3   : > { %v8613_v63 = vmax.f32 %v13406_v47, 0.0  ;;  %v8615_v2 = vmax.f32 %v13422_v0, 0.0  ;;  %8444 = vmatmul.mubr.bf16.gmra.mrb[148].mxu1 %v18006_v14  ;;  %v14840_v24 = vld [vmem:[#allocation21 + $0xdc] ss:$12 sps:$4 sm:$0xff]  }
0x14a4   : > { %v18101_v62 = vpack.c.bf16 %v8612_v35, %v8600_v32  ;;  %v18103_v52 = vpack.c.bf16 %v8614_v34, %v8602_v53  ;;  %8590 = vmatmul.mubr.bf16.gmra.mrb[180].mxu0 %v18006_v14  ;;  %10694 = vmatpush1.bf16.msra.mxu1 %v14823_v4 }
0x14a5   : > { %v8697_v12 = vpack.c.bf16 %v8613_v63, %v8601_v42  ;;  %v18106_v56 = vpack.c.bf16 %v8615_v2, %v8603_v61  ;;  %12904 = vmatpush3.bf16.msra.mxu0 %v14827_v55  ;;  %v7841_v6 = vpop.f32.mrb[108].mxu1  ;;  %v7987_v48 = vpop.f32.mrb[140].mxu0  ;;  %10695 = vmatprep.subr.bf16.mxu1 %v14830_v18  ;;  %v14841_v18 = vld [vmem:[#allocation21 + $0x260] ss:$12 sps:$4 sm:$0xff]   ;;  %v14838_v61 = vld [vmem:[#allocation21 + $0xd8] ss:$12 sps:$4 sm:$0xff]  }
0x14a6   : > { %v13407_v13 = vadd.f32 %v7841_v6, %v18073_v54  ;;  %v13423_v7 = vadd.f32 %v7987_v48, %v18077_v16  ;;  %12905 = vmatprep.subr.bf16.mxu0 %v14831_v23  ;;  %v7843_v37 = vpop.f32.mrb[109].mxu1  ;;  %v7989_v8 = vpop.f32.mrb[141].mxu0  ;;  %v14842_v6 = vld [vmem:[#allocation21 + $0x1a0] ss:$12 sps:$4 sm:$0xff]  }
0x14a7   : > { %v13408_v14 = vadd.f32 %v7843_v37, %v18082_v40  ;;  %v13424_v30 = vadd.f32 %v7989_v8, %v18087_v45  ;;  %v7845_v46 = vpop.f32.mrb[110].mxu1  ;;  %v7991_v5 = vpop.f32.mrb[142].mxu0  ;;  %10713 = vmatprep.mubr.bf16.mxu1 %v8697_v12  ;;  %11151 = vmatprep.mubr.bf16.mxu0 %v8697_v12  ;;  %v14845_v48 = vld [vmem:[#allocation21 + $0xf4] ss:$12 sps:$4 sm:$0xff]   ;;  %v14846_v37 = vld [vmem:[#allocation21 + $0x278] ss:$12 sps:$4 sm:$0xff]  }
0x14a8   : > { %10696 = vmatpush1.bf16.msra.mxu1 %v14828_v43  ;;  %v13409_v15 = vadd.f32 %v7845_v46, %v18073_v54  ;;  %v13425_v31 = vadd.f32 %v7991_v5, %v18077_v16  ;;  %v7847_v1 = vpop.f32.mrb[111].mxu1  ;;  %v7993_v60 = vpop.f32.mrb[143].mxu0  ;;  %v8624_v4 = vmax.f32 %v13407_v13, 0.0  ;;  %v8626_v47 = vmax.f32 %v13423_v7, 0.0 }
0x14a9   : > { %12906 = vmatpush3.bf16.msra.mxu0 %v14832_v21  ;;  %v13410_v41 = vadd.f32 %v7847_v1, %v18082_v40  ;;  %v13426_v10 = vadd.f32 %v7993_v60, %v18087_v45  ;;  %10697 = vmatprep.subr.bf16.mxu1 %v14835_v38  ;;  %v8625_v32 = vmax.f32 %v13408_v14, 0.0  ;;  %v8627_v53 = vmax.f32 %v13424_v30, 0.0  ;;  %v14843_v1 = vld [vmem:[#allocation21 + $0xf0] ss:$12 sps:$4 sm:$0xff]  }
0x14aa   : > { %v8636_v0 = vmax.f32 %v13409_v15, 0.0  ;;  %v8638_v55 = vmax.f32 %v13425_v31, 0.0  ;;  %12931 = vmatprep.subr.bf16.mxu0 %v14836_v33 }
0x14ab   : > { %v8637_v35 = vmax.f32 %v13410_v41, 0.0  ;;  %v8639_v34 = vmax.f32 %v13426_v10, 0.0  ;;  %v14847_v41 = vld [vmem:[#allocation21 + $0x1b8] ss:$12 sps:$4 sm:$0xff]  }
0x14ac   : > { %v18116_v23 = vpack.c.bf16 %v8636_v0, %v8624_v4  ;;  %v18118_v42 = vpack.c.bf16 %v8638_v55, %v8626_v47  ;;  %11152 = vmatmul.mubr.bf16.vlgmr.msra.gmra.mrb[184].mxu0 %v18101_v62  ;;  %10698 = vmatpush1.bf16.msra.mxu1 %v14833_v39  ;;  %v14850_v10 = vld [vmem:[#allocation21 + $0x10c] ss:$12 sps:$4 sm:$0xff]   ;;  %v14851_v0 = vld [vmem:[#allocation21 + $0x290] ss:$12 sps:$4 sm:$0xff]  }
0x14ad   : > { %v18121_v63 = vpack.c.bf16 %v8637_v35, %v8625_v32  ;;  %v18123_v2 = vpack.c.bf16 %v8639_v34, %v8627_v53  ;;  %12932 = vmatpush3.bf16.msra.mxu0 %v14837_v3  ;;  %v7851_v43 = vpop.f32.mrb[112].mxu1  ;;  %v7997_v12 = vpop.f32.mrb[144].mxu0  ;;  %10699 = vmatprep.subr.bf16.mxu1 %v14840_v24 }
0x14ae   : > { %v13411_v21 = vadd.f32 %v7851_v43, %v18073_v54  ;;  %v13427_v38 = vadd.f32 %v7997_v12, %v18077_v16  ;;  %12933 = vmatprep.subr.bf16.mxu0 %v14841_v18  ;;  %v7853_v13 = vpop.f32.mrb[113].mxu1  ;;  %v7999_v7 = vpop.f32.mrb[145].mxu0 }
0x14af   : > { %v13412_v8 = vadd.f32 %v7853_v13, %v18082_v40  ;;  %v13428_v33 = vadd.f32 %v7999_v7, %v18087_v45  ;;  %v7855_v14 = vpop.f32.mrb[114].mxu1  ;;  %v8001_v30 = vpop.f32.mrb[146].mxu0  ;;  %11159 = vmatprep.mubr.bf16.mxu0 %v18121_v63 }
0x14b0   : > { %10700 = vmatpush1.bf16.msra.mxu1 %v14838_v61  ;;  %v13413_v46 = vadd.f32 %v7855_v14, %v18073_v54  ;;  %v13429_v5 = vadd.f32 %v8001_v30, %v18077_v16  ;;  %v7857_v15 = vpop.f32.mrb[115].mxu1  ;;  %v8003_v31 = vpop.f32.mrb[147].mxu0  ;;  %v8648_v3 = vmax.f32 %v13411_v21, 0.0  ;;  %v8650_v24 = vmax.f32 %v13427_v38, 0.0  ;;  %v14848_v61 = vld [vmem:[#allocation21 + $0x108] ss:$12 sps:$4 sm:$0xff]  }
0x14b1   : > { %12934 = vmatpush3.bf16.msra.mxu0 %v14842_v6  ;;  %v13414_v60 = vadd.f32 %v7857_v15, %v18082_v40  ;;  %v13430_v39 = vadd.f32 %v8003_v31, %v18087_v45  ;;  %10701 = vmatprep.subr.bf16.mxu1 %v14845_v48  ;;  %v8649_v55 = vmax.f32 %v13412_v8, 0.0  ;;  %v8651_v18 = vmax.f32 %v13428_v33, 0.0  ;;  %v14852_v21 = vld [vmem:[#allocation21 + $0x1d0] ss:$12 sps:$4 sm:$0xff]   ;;  %v14856_v33 = vld [vmem:[#allocation21 + $0x2a8] ss:$12 sps:$4 sm:$0xff]  }
0x14b2   : > { %v8660_v4 = vmax.f32 %v13413_v46, 0.0  ;;  %v8662_v47 = vmax.f32 %v13429_v5, 0.0  ;;  %12935 = vmatprep.subr.bf16.mxu0 %v14846_v37  ;;  %v14855_v38 = vld [vmem:[#allocation21 + $0x124] ss:$12 sps:$4 sm:$0xff]  }
0x14b3   : > { %v8661_v32 = vmax.f32 %v13414_v60, 0.0  ;;  %v8663_v53 = vmax.f32 %v13430_v39, 0.0  ;;  %v14853_v39 = vld [vmem:[#allocation21 + $0x120] ss:$12 sps:$4 sm:$0xff]  }
0x14b4   : > { %v18134_v35 = vpack.c.bf16 %v8660_v4, %v8648_v3  ;;  %v18136_v34 = vpack.c.bf16 %v8662_v47, %v8650_v24  ;;  %11160 = vmatmul.mubr.bf16.gmra.mrb[188].mxu0 %v18116_v23  ;;  %10702 = vmatpush1.bf16.msra.mxu1 %v14843_v1  ;;  %v14857_v3 = vld [vmem:[#allocation21 + $0x1e8] ss:$12 sps:$4 sm:$0xff]  }
0x14b5   : > { %v18139_v43 = vpack.c.bf16 %v8661_v32, %v8649_v55  ;;  %v18141_v12 = vpack.c.bf16 %v8663_v53, %v8651_v18  ;;  %12936 = vmatpush3.bf16.msra.mxu0 %v14847_v41  ;;  %v7861_v6 = vpop.f32.mrb[116].mxu1  ;;  %v8007_v48 = vpop.f32.mrb[148].mxu0  ;;  %10703 = vmatprep.subr.bf16.mxu1 %v14850_v10  ;;  %v14860_v24 = vld [vmem:[#allocation21 + $0x13c] ss:$12 sps:$4 sm:$0xff]   ;;  %v14861_v18 = vld [vmem:[#allocation21 + $0x2c0] ss:$12 sps:$4 sm:$0xff]  }
0x14b6   : > { %v13415_v13 = vadd.f32 %v7861_v6, %v18073_v54  ;;  %v13431_v7 = vadd.f32 %v8007_v48, %v18077_v16  ;;  %12937 = vmatprep.subr.bf16.mxu0 %v14851_v0  ;;  %v7863_v37 = vpop.f32.mrb[117].mxu1  ;;  %v8009_v8 = vpop.f32.mrb[149].mxu0 }
0x14b7   : > { %v13416_v14 = vadd.f32 %v7863_v37, %v18082_v40  ;;  %v13432_v30 = vadd.f32 %v8009_v8, %v18087_v45  ;;  %v7865_v46 = vpop.f32.mrb[118].mxu1  ;;  %v8011_v5 = vpop.f32.mrb[150].mxu0  ;;  %11167 = vmatprep.mubr.bf16.mxu0 %v18139_v43  ;;  %v14867_v37 = vld [vmem:[#allocation21 + $0x218] ss:$12 sps:$4 sm:$0xff]  }
0x14b8   : > { %10704 = vmatpush1.bf16.msra.mxu1 %v14848_v61  ;;  %v13417_v15 = vadd.f32 %v7865_v46, %v18073_v54  ;;  %v13433_v31 = vadd.f32 %v8011_v5, %v18077_v16  ;;  %v7867_v1 = vpop.f32.mrb[119].mxu1  ;;  %v8013_v60 = vpop.f32.mrb[151].mxu0  ;;  %v8672_v4 = vmax.f32 %v13415_v13, 0.0  ;;  %v8674_v47 = vmax.f32 %v13431_v7, 0.0  ;;  %v14866_v13 = vld [vmem:[#allocation21 + $0x2d8] ss:$12 sps:$4 sm:$0xff]  }
0x14b9   : > { %12938 = vmatpush3.bf16.msra.mxu0 %v14852_v21  ;;  %v13418_v41 = vadd.f32 %v7867_v1, %v18082_v40  ;;  %v13434_v10 = vadd.f32 %v8013_v60, %v18087_v45  ;;  %10705 = vmatprep.subr.bf16.mxu1 %v14855_v38  ;;  %v8673_v54 = vmax.f32 %v13416_v14, 0.0  ;;  %v8675_v32 = vmax.f32 %v13432_v30, 0.0  ;;  %v14858_v40 = vld [vmem:[#allocation21 + $0x138] ss:$12 sps:$4 sm:$0xff]   ;;  %v14862_v21 = vld [vmem:[#allocation21 + $0x200] ss:$12 sps:$4 sm:$0xff]  }
0x14ba   : > { %v8684_v0 = vmax.f32 %v13417_v15, 0.0  ;;  %v8686_v55 = vmax.f32 %v13433_v31, 0.0  ;;  %12939 = vmatprep.subr.bf16.mxu0 %v14856_v33  ;;  %v14865_v38 = vld [vmem:[#allocation21 + $0x154] ss:$12 sps:$4 sm:$0xff]   ;;  %v14863_v7 = vld [vmem:[#allocation21 + $0x150] ss:$12 sps:$4 sm:$0xff]  }
0x14bb   : > { %v8685_v16 = vmax.f32 %v13418_v41, 0.0  ;;  %v8687_v53 = vmax.f32 %v13434_v10, 0.0  ;;  %v14870_v8 = vld [vmem:[#allocation21 + $0x16c] ss:$12 sps:$4 sm:$0xff]   ;;  %v14871_v33 = vld [vmem:[#allocation21 + $0x2f0] ss:$12 sps:$4 sm:$0xff]  }
0x14bc   : > { %v18152_v61 = vpack.c.bf16 %v8684_v0, %v8672_v4  ;;  %v18154_v6 = vpack.c.bf16 %v8686_v55, %v8674_v47  ;;  %11168 = vmatmul.mubr.bf16.gmra.mrb[192].mxu0 %v18134_v35  ;;  %10706 = vmatpush1.bf16.msra.mxu1 %v14853_v39  ;;  %v14868_v14 = vld [vmem:[#allocation21 + $0x168] ss:$12 sps:$4 sm:$0xff]   ;;  %v14872_v30 = vld [vmem:[#allocation21 + $0x230] ss:$12 sps:$4 sm:$0xff]   ;;  %v14873_v15 = vld [vmem:[#allocation21 + $0x180] ss:$12 sps:$4 sm:$0xff]  }
0x14bd   : > { %v18157_v45 = vpack.c.bf16 %v8685_v16, %v8673_v54  ;;  %v18159_v48 = vpack.c.bf16 %v8687_v53, %v8675_v32  ;;  %12940 = vmatpush3.bf16.msra.mxu0 %v14857_v3  ;;  %10707 = vmatprep.subr.bf16.mxu1 %v14860_v24  ;;  %v14875_v46 = vld [vmem:[#allocation21 + $0x184] ss:$12 sps:$4 sm:$0xff]   ;;  %v14897_v5 = vld [vmem:[#allocation21 + $0x3c8] ss:$12 sps:$4 sm:$0xff]   ;;  %v14902_v60 = vld [vmem:[#allocation21 + $0x3e0] ss:$12 sps:$4 sm:$0xff]  }
0x14be   : > { %12941 = vmatprep.subr.bf16.mxu0 %v14861_v18  ;;  %v14878_v31 = vld [vmem:[#allocation21 + $0x19c] ss:$12 sps:$4 sm:$0xff]   ;;  %v14876_v39 = vld [vmem:[#allocation21 + $0x198] ss:$12 sps:$4 sm:$0xff]   ;;  %v14881_v41 = vld [vmem:[#allocation21 + $0x1b4] ss:$12 sps:$4 sm:$0xff]  }
0x14bf   : > { %11175 = vmatprep.mubr.bf16.mxu0 %v18157_v45  ;;  %v14898_v1 = vld [vmem:[#allocation21 + $0x308] ss:$12 sps:$4 sm:$0xff]   ;;  %v14903_v10 = vld [vmem:[#allocation21 + $0x320] ss:$12 sps:$4 sm:$0xff]   ;;  %v14907_v3 = vld [vmem:[#allocation21 + $0x3f8] ss:$12 sps:$4 sm:$0xff]  }
0x14c0   : > { %10708 = vmatpush1.bf16.msra.mxu1 %v14858_v40  ;;  %v14879_v24 = vld [vmem:[#allocation21 + $0x1b0] ss:$12 sps:$4 sm:$0xff]   ;;  %v14884_v4 = vld [vmem:[#allocation21 + $0x1cc] ss:$12 sps:$4 sm:$0xff]   ;;  %v14882_v47 = vld [vmem:[#allocation21 + $0x1c8] ss:$12 sps:$4 sm:$0xff]  }
0x14c1   : > { %12942 = vmatpush3.bf16.msra.mxu0 %v14862_v21  ;;  %10709 = vmatprep.subr.bf16.mxu1 %v14865_v38  ;;  %v14887_v0 = vld [vmem:[#allocation21 + $0x1e4] ss:$12 sps:$4 sm:$0xff]   ;;  %v14917_v18 = vld [vmem:[#allocation21 + $0x428] ss:$12 sps:$4 sm:$0xff]   ;;  %v14885_v54 = vld [vmem:[#allocation21 + $0x1e0] ss:$12 sps:$4 sm:$0xff]  }
0x14c2   : > { %12943 = vmatprep.subr.bf16.mxu0 %v14866_v13  ;;  %v14913_v55 = vld [vmem:[#allocation21 + $0x350] ss:$12 sps:$4 sm:$0xff]   ;;  %v14918_v32 = vld [vmem:[#allocation21 + $0x368] ss:$12 sps:$4 sm:$0xff]   ;;  %v14888_v16 = vld [vmem:[#allocation21 + $0x1f8] ss:$12 sps:$4 sm:$0xff]  }
0x14c3   : > { %v14893_v53 = vld [vmem:[#allocation21 + $0x214] ss:$12 sps:$4 sm:$0xff]   ;;  %v14927_v21 = vld [vmem:[#allocation21 + $0x458] ss:$12 sps:$4 sm:$0xff]   ;;  %v14891_v38 = vld [vmem:[#allocation21 + $0x210] ss:$12 sps:$4 sm:$0xff]  }
0x14c4   : > { %11176 = vmatmul.mubr.bf16.gmra.mrb[196].mxu0 %v18152_v61  ;;  %10710 = vmatpush1.bf16.msra.mxu1 %v14863_v7  ;;  %v14923_v40 = vld [vmem:[#allocation21 + $0x380] ss:$12 sps:$4 sm:$0xff]   ;;  %v14928_v13 = vld [vmem:[#allocation21 + $0x398] ss:$12 sps:$4 sm:$0xff]   ;;  %v14894_v7 = vld [vmem:[#allocation21 + $0x228] ss:$12 sps:$4 sm:$0xff]  }
0x14c5   : > { %12944 = vmatpush3.bf16.msra.mxu0 %v14867_v37  ;;  %11216 = vmatprep.mubr.bf16.mxu0 %v18106_v56  ;;  %v14901_v37 = vld [vmem:[#allocation21 + $0x244] ss:$12 sps:$4 sm:$0xff]  }
0x14c6   : > { %10711 = vmatprep.subr.bf16.mxu1 %v14870_v8  ;;  %12945 = vmatprep.subr.bf16.mxu0 %v14871_v33  ;;  %v14933_v8 = vld [vmem:[#allocation21 + $0x3b0] ss:$12 sps:$4 sm:$0xff]   ;;  %v14937_v33 = vld [vmem:[#allocation21 + $0x548] ss:$12 sps:$4 sm:$0xff]  }
0x14c8   : > { %10712 = vmatpush1.bf16.msra.mxu1 %v14868_v14  ;;  %v14899_v14 = vld [vmem:[#allocation21 + $0x240] ss:$12 sps:$4 sm:$0xff]  }
0x14c9   : > { %12946 = vmatpush3.bf16.msra.mxu0 %v14872_v30  ;;  %10754 = vmatprep.subr.bf16.mxu1 %v14875_v46  ;;  %v14906_v30 = vld [vmem:[#allocation21 + $0x25c] ss:$12 sps:$4 sm:$0xff]   ;;  %v14911_v46 = vld [vmem:[#allocation21 + $0x274] ss:$12 sps:$4 sm:$0xff]  }
0x14ca   : > { %12971 = vmatprep.subr.bf16.mxu0 %v14897_v5  ;;  %v14916_v5 = vld [vmem:[#allocation21 + $0x28c] ss:$12 sps:$4 sm:$0xff]  }
0x14cb   : > { %10714 = vmatmul.mubr.bf16.vlgmr.msra.gmra.mrb[152].mxu1 %v18101_v62  ;;  %v14908_v62 = vld [vmem:[#allocation21 + $0x338] ss:$12 sps:$4 sm:$0xff]  }
0x14cc   : > { %11217 = vmatmul.mubr.bf16.vlgmr.msra.gmra.mrb[200].mxu0 %v18103_v52  ;;  %10723 = vmatprep.mubr.bf16.mxu1 %v18121_v63  ;;  %v14912_v63 = vld [vmem:[#allocation21 + $0x410] ss:$12 sps:$4 sm:$0xff]  }
0x14cd   : > { %10755 = vmatpush1.bf16.msra.mxu1 %v14873_v15  ;;  %11224 = vmatprep.mubr.bf16.mxu0 %v18123_v2  ;;  %v14914_v15 = vld [vmem:[#allocation21 + $0x288] ss:$12 sps:$4 sm:$0xff]  }
0x14ce   : > { %10756 = vmatprep.subr.bf16.mxu1 %v14878_v31  ;;  %12972 = vmatpush3.bf16.msra.mxu0 %v14898_v1  ;;  %v14921_v31 = vld [vmem:[#allocation21 + $0x2a4] ss:$12 sps:$4 sm:$0xff]   ;;  %v6242_v1 = vsub.s32 4, %v18696_v58 }
0x14cf   : > { %12973 = vmatprep.subr.bf16.mxu0 %v14902_v60  ;;  %v6250_v60 = vsub.s32 6, %v18696_v58 }
0x14d1   : > { %10757 = vmatpush1.bf16.msra.mxu1 %v14876_v39  ;;  %v6246_v39 = vsub.s32 5, %v18696_v58 }
0x14d2   : > { %10758 = vmatprep.subr.bf16.mxu1 %v14881_v41  ;;  %12974 = vmatpush3.bf16.msra.mxu0 %v14903_v10  ;;  %v6254_v41 = vsub.s32 7, %v18696_v58  ;;  %v14919_v10 = vld [vmem:[#allocation21 + $0x2a0] ss:$12 sps:$4 sm:$0xff]  }
0x14d3   : > { %10724 = vmatmul.mubr.bf16.gmra.mrb[156].mxu1 %v18116_v23  ;;  %12975 = vmatprep.subr.bf16.mxu0 %v14907_v3  ;;  %v14890_v23 = vld [vmem:[#allocation21 + $0x1fc] ss:$12 sps:$4 sm:$0xff]   ;;  %v18184_v3 = vrot.slane %v18068_v22, %v6242_v1 }
0x14d4   : > { %11225 = vmatmul.mubr.bf16.gmra.mrb[204].mxu0 %v18118_v42  ;;  %10733 = vmatprep.mubr.bf16.mxu1 %v18139_v43  ;;  %v14922_v43 = vld [vmem:[#allocation21 + $0x440] ss:$12 sps:$4 sm:$0xff]  }
0x14d5   : > { %10759 = vmatpush1.bf16.msra.mxu1 %v14879_v24  ;;  %11232 = vmatprep.mubr.bf16.mxu0 %v18141_v12  ;;  %v14926_v24 = vld [vmem:[#allocation21 + $0x2bc] ss:$12 sps:$4 sm:$0xff]  }
0x14d6   : > { %10760 = vmatprep.subr.bf16.mxu1 %v14884_v4  ;;  %12976 = vmatpush3.bf16.msra.mxu0 %v14908_v62  ;;  %v18187_v4 = vrot.slane %v18068_v22, %v6250_v60  ;;  %v18190_v62 = vrot.slane %v18068_v22, %v6246_v39 }
0x14d7   : > { %12977 = vmatprep.subr.bf16.mxu0 %v14912_v63  ;;  %v18193_v63 = vrot.slane %v18068_v22, %v6254_v41  ;;  %v14934_v41 = vld [vmem:[#allocation21 + $0x2e8] ss:$12 sps:$4 sm:$0xff]  }
0x14d9   : > { %10761 = vmatpush1.bf16.msra.mxu1 %v14882_v47 }
0x14da   : > { %10762 = vmatprep.subr.bf16.mxu1 %v14887_v0  ;;  %12978 = vmatpush3.bf16.msra.mxu0 %v14913_v55  ;;  %v14924_v0 = vld [vmem:[#allocation21 + $0x2b8] ss:$12 sps:$4 sm:$0xff]  }
0x14db   : > { %10734 = vmatmul.mubr.bf16.gmra.mrb[160].mxu1 %v18134_v35  ;;  %12979 = vmatprep.subr.bf16.mxu0 %v14917_v18  ;;  %v14896_v35 = vld [vmem:[#allocation21 + $0x22c] ss:$12 sps:$4 sm:$0xff]  }
0x14dc   : > { %11233 = vmatmul.mubr.bf16.gmra.mrb[208].mxu0 %v18136_v34  ;;  %10743 = vmatprep.mubr.bf16.mxu1 %v18157_v45  ;;  %v14932_v45 = vld [vmem:[#allocation21 + $0x470] ss:$12 sps:$4 sm:$0xff]  }
0x14dd   : > { %10763 = vmatpush1.bf16.msra.mxu1 %v14885_v54  ;;  %11240 = vmatprep.mubr.bf16.mxu0 %v18159_v48 }
0x14de   : > { %10764 = vmatprep.subr.bf16.mxu1 %v14890_v23  ;;  %12980 = vmatpush3.bf16.msra.mxu0 %v14918_v32  ;;  %v14931_v23 = vld [vmem:[#allocation21 + $0x2d4] ss:$12 sps:$4 sm:$0xff]  }
0x14df   : > { %12981 = vmatprep.subr.bf16.mxu0 %v14922_v43 }
0x14e1   : > { %10765 = vmatpush1.bf16.msra.mxu1 %v14888_v16 }
0x14e2   : > { %10766 = vmatprep.subr.bf16.mxu1 %v14893_v53  ;;  %12982 = vmatpush3.bf16.msra.mxu0 %v14923_v40 }
0x14e3   : > { %10744 = vmatmul.mubr.bf16.gmra.mrb[164].mxu1 %v18152_v61  ;;  %12983 = vmatprep.subr.bf16.mxu0 %v14927_v21  ;;  %v14904_v61 = vld [vmem:[#allocation21 + $0x258] ss:$12 sps:$4 sm:$0xff]  }
0x14e4   : > { %11241 = vmatmul.mubr.bf16.gmra.mrb[212].mxu0 %v18154_v6  ;;  %10786 = vmatprep.mubr.bf16.mxu1 %v18106_v56  ;;  %v14909_v56 = vld [vmem:[#allocation21 + $0x270] ss:$12 sps:$4 sm:$0xff]  }
0x14e5   : > { %10767 = vmatpush1.bf16.msra.mxu1 %v14891_v38 }
0x14e6   : > { %10768 = vmatprep.subr.bf16.mxu1 %v14896_v35  ;;  %12984 = vmatpush3.bf16.msra.mxu0 %v14928_v13 }
0x14e7   : > { %12985 = vmatprep.subr.bf16.mxu0 %v14932_v45 }
0x14e9   : > { %10769 = vmatpush1.bf16.msra.mxu1 %v14894_v7  ;;  %v14929_v7 = vld [vmem:[#allocation21 + $0x2d0] ss:$12 sps:$4 sm:$0xff]  }
0x14ea   : > { %10770 = vmatprep.subr.bf16.mxu1 %v14901_v37  ;;  %12986 = vmatpush3.bf16.msra.mxu0 %v14933_v8 }
0x14eb   : > { %13011 = vmatprep.subr.bf16.mxu0 %v14937_v33 }
0x14ed   : > { %10771 = vmatpush1.bf16.msra.mxu1 %v14899_v14  ;;  %v14936_v14 = vld [vmem:[#allocation21 + $0x2ec] ss:$12 sps:$4 sm:$0xff]  }
0x14ee   : > { %10772 = vmatprep.subr.bf16.mxu1 %v14906_v30 }
0x14f1   : > { %10773 = vmatpush1.bf16.msra.mxu1 %v14904_v61 }
0x14f2   : > { %10774 = vmatprep.subr.bf16.mxu1 %v14911_v46 }
0x14f5   : > { %10775 = vmatpush1.bf16.msra.mxu1 %v14909_v56 }
0x14f6   : > { %10776 = vmatprep.subr.bf16.mxu1 %v14916_v5 }
0x14f9   : > { %10777 = vmatpush1.bf16.msra.mxu1 %v14914_v15 }
0x14fa   : > { %10778 = vmatprep.subr.bf16.mxu1 %v14921_v31 }
0x14fd   : > { %10779 = vmatpush1.bf16.msra.mxu1 %v14919_v10  ;;  %v8123_v47 = vpop.f32.mrb[120].mxu1  ;;  %v14938_v10 = vld [vmem:[#allocation21 + $0x488] ss:$12 sps:$4 sm:$0xff]  }
0x14fe   : > { %v13435_v55 = vadd.f32 %v8123_v47, %v18184_v3  ;;  %v8269_v18 = vpop.f32.mrb[152].mxu0  ;;  %v8125_v54 = vpop.f32.mrb[121].mxu1  ;;  %10780 = vmatprep.subr.bf16.mxu1 %v14926_v24 }
0x14ff   : > { %v13451_v32 = vadd.f32 %v8269_v18, %v18187_v4  ;;  %v13436_v43 = vadd.f32 %v8125_v54, %v18190_v62  ;;  %v8271_v16 = vpop.f32.mrb[153].mxu0  ;;  %v8127_v53 = vpop.f32.mrb[122].mxu1  ;;  %v14941_v18 = vld [vmem:[#allocation21 + $0x304] ss:$12 sps:$4 sm:$0xff]   ;;  %v14942_v54 = vld [vmem:[#allocation21 + $0x560] ss:$12 sps:$4 sm:$0xff]  }
0x1500   : > { %v13452_v40 = vadd.f32 %v8271_v16, %v18193_v63  ;;  %v13437_v22 = vadd.f32 %v8127_v53, %v18184_v3  ;;  %v8273_v21 = vpop.f32.mrb[154].mxu0  ;;  %v8129_v38 = vpop.f32.mrb[123].mxu1  ;;  %v8604_v37 = vmax.f32 %v13435_v55, 0.0 }
0x1501   : > { %v13453_v35 = vadd.f32 %v8273_v21, %v18187_v4  ;;  %10781 = vmatpush1.bf16.msra.mxu1 %v14924_v0  ;;  %v13438_v13 = vadd.f32 %v8129_v38, %v18190_v62  ;;  %v8275_v45 = vpop.f32.mrb[155].mxu0  ;;  %v8606_v30 = vmax.f32 %v13451_v32, 0.0  ;;  %v8605_v61 = vmax.f32 %v13436_v43, 0.0 }
0x1502   : > { %v8616_v8 = vmax.f32 %v13437_v22, 0.0  ;;  %v13454_v33 = vadd.f32 %v8275_v45, %v18193_v63  ;;  %10782 = vmatprep.subr.bf16.mxu1 %v14931_v23  ;;  %v8607_v5 = vmax.f32 %v13452_v40, 0.0  ;;  %v14939_v45 = vld [vmem:[#allocation21 + $0x300] ss:$12 sps:$4 sm:$0xff]  }
0x1503   : > { %v8618_v46 = vmax.f32 %v13453_v35, 0.0  ;;  %v8617_v56 = vmax.f32 %v13438_v13, 0.0 }
0x1504   : > { %v18203_v15 = vpack.c.bf16 %v8616_v8, %v8604_v37  ;;  %v8619_v31 = vmax.f32 %v13454_v33, 0.0  ;;  %v14943_v33 = vld [vmem:[#allocation21 + $0x4a0] ss:$12 sps:$4 sm:$0xff]  }
0x1505   : > { %v18205_v1 = vpack.c.bf16 %v8618_v46, %v8606_v30  ;;  %v18207_v60 = vpack.c.bf16 %v8617_v56, %v8605_v61  ;;  %10783 = vmatpush1.bf16.msra.mxu1 %v14929_v7  ;;  %v8133_v39 = vpop.f32.mrb[124].mxu1 }
0x1506   : > { %v18209_v24 = vpack.c.bf16 %v8619_v31, %v8607_v5  ;;  %v13439_v47 = vadd.f32 %v8133_v39, %v18184_v3  ;;  %v8279_v0 = vpop.f32.mrb[156].mxu0  ;;  %v8135_v55 = vpop.f32.mrb[125].mxu1  ;;  %10784 = vmatprep.subr.bf16.mxu1 %v14936_v14  ;;  %v14946_v14 = vld [vmem:[#allocation21 + $0x31c] ss:$12 sps:$4 sm:$0xff]   ;;  %v14947_v5 = vld [vmem:[#allocation21 + $0x578] ss:$12 sps:$4 sm:$0xff]  }
0x1507   : > { %v13455_v23 = vadd.f32 %v8279_v0, %v18187_v4  ;;  %v13440_v32 = vadd.f32 %v8135_v55, %v18190_v62  ;;  %v8281_v43 = vpop.f32.mrb[157].mxu0  ;;  %v8137_v16 = vpop.f32.mrb[126].mxu1  ;;  %11281 = vmatprep.mubr.bf16.mxu0 %v18207_v60  ;;  %v14944_v55 = vld [vmem:[#allocation21 + $0x318] ss:$12 sps:$4 sm:$0xff]  }
0x1508   : > { %v13456_v53 = vadd.f32 %v8281_v43, %v18193_v63  ;;  %v13441_v40 = vadd.f32 %v8137_v16, %v18184_v3  ;;  %v8283_v22 = vpop.f32.mrb[158].mxu0  ;;  %v8139_v21 = vpop.f32.mrb[127].mxu1  ;;  %11282 = vmatmul.mubr.bf16.vlgmr.msra.gmra.mrb[216].mxu0 %v18203_v15  ;;  %v8628_v7 = vmax.f32 %v13439_v47, 0.0  ;;  %v14948_v43 = vld [vmem:[#allocation21 + $0x4b8] ss:$12 sps:$4 sm:$0xff]  }
0x1509   : > { %v13457_v38 = vadd.f32 %v8283_v22, %v18187_v4  ;;  %10785 = vmatpush1.bf16.msra.mxu1 %v14934_v41  ;;  %v13442_v35 = vadd.f32 %v8139_v21, %v18190_v62  ;;  %v8285_v13 = vpop.f32.mrb[159].mxu0  ;;  %13012 = vmatpush3.bf16.msra.mxu0 %v14938_v10  ;;  %v8630_v30 = vmax.f32 %v13455_v23, 0.0  ;;  %v8629_v61 = vmax.f32 %v13440_v32, 0.0  ;;  %v14951_v16 = vld [vmem:[#allocation21 + $0x334] ss:$12 sps:$4 sm:$0xff]  }
0x150a   : > { %v8640_v37 = vmax.f32 %v13441_v40, 0.0  ;;  %v13458_v8 = vadd.f32 %v8285_v13, %v18193_v63  ;;  %10827 = vmatprep.subr.bf16.mxu1 %v14941_v18  ;;  %13013 = vmatprep.subr.bf16.mxu0 %v14942_v54  ;;  %v8631_v31 = vmax.f32 %v13456_v53, 0.0 }
0x150b   : > { %v8642_v46 = vmax.f32 %v13457_v38, 0.0  ;;  %v8641_v56 = vmax.f32 %v13442_v35, 0.0 }
0x150c   : > { %v18221_v39 = vpack.c.bf16 %v8640_v37, %v8628_v7  ;;  %v8643_v41 = vmax.f32 %v13458_v8, 0.0  ;;  %10787 = vmatmul.mubr.bf16.vlgmr.msra.gmra.mrb[152].mxu1 %v18103_v52  ;;  %v14949_v8 = vld [vmem:[#allocation21 + $0x330] ss:$12 sps:$4 sm:$0xff]  }
0x150d   : > { %v18224_v10 = vpack.c.bf16 %v8642_v46, %v8630_v30  ;;  %v18226_v47 = vpack.c.bf16 %v8641_v56, %v8629_v61  ;;  %10796 = vmatprep.mubr.bf16.mxu1 %v18123_v2  ;;  %10828 = vmatpush1.bf16.msra.mxu1 %v14939_v45  ;;  %v8143_v0 = vpop.f32.mrb[128].mxu1  ;;  %v14952_v2 = vld [vmem:[#allocation21 + $0x590] ss:$12 sps:$4 sm:$0xff]   ;;  %v14956_v46 = vld [vmem:[#allocation21 + $0x34c] ss:$12 sps:$4 sm:$0xff]  }
0x150e   : > { %v18229_v18 = vpack.c.bf16 %v8643_v41, %v8631_v31  ;;  %v13443_v54 = vadd.f32 %v8143_v0, %v18184_v3  ;;  %v8289_v23 = vpop.f32.mrb[160].mxu0  ;;  %13014 = vmatpush3.bf16.msra.mxu0 %v14943_v33  ;;  %v8145_v32 = vpop.f32.mrb[129].mxu1  ;;  %10829 = vmatprep.subr.bf16.mxu1 %v14946_v14  ;;  %v14953_v61 = vld [vmem:[#allocation21 + $0x4d0] ss:$12 sps:$4 sm:$0xff]   ;;  %v14957_v0 = vld [vmem:[#allocation21 + $0x5a8] ss:$12 sps:$4 sm:$0xff]  }
0x150f   : > { %v13459_v52 = vadd.f32 %v8289_v23, %v18187_v4  ;;  %v13444_v53 = vadd.f32 %v8145_v32, %v18190_v62  ;;  %v8291_v40 = vpop.f32.mrb[161].mxu0  ;;  %v8147_v22 = vpop.f32.mrb[130].mxu1  ;;  %11289 = vmatprep.mubr.bf16.mxu0 %v18226_v47  ;;  %13015 = vmatprep.subr.bf16.mxu0 %v14947_v5 }
0x1510   : > { %v13460_v21 = vadd.f32 %v8291_v40, %v18193_v63  ;;  %v13445_v38 = vadd.f32 %v8147_v22, %v18184_v3  ;;  %v8293_v35 = vpop.f32.mrb[162].mxu0  ;;  %v8149_v13 = vpop.f32.mrb[131].mxu1  ;;  %11290 = vmatmul.mubr.bf16.gmra.mrb[220].mxu0 %v18221_v39  ;;  %v8652_v33 = vmax.f32 %v13443_v54, 0.0 }
0x1511   : > { %v13461_v45 = vadd.f32 %v8293_v35, %v18187_v4  ;;  %10830 = vmatpush1.bf16.msra.mxu1 %v14944_v55  ;;  %v13446_v7 = vadd.f32 %v8149_v13, %v18190_v62  ;;  %v8295_v37 = vpop.f32.mrb[163].mxu0  ;;  %v8654_v56 = vmax.f32 %v13459_v52, 0.0  ;;  %v8653_v5 = vmax.f32 %v13444_v53, 0.0 }
0x1512   : > { %v8664_v14 = vmax.f32 %v13445_v38, 0.0  ;;  %v13462_v30 = vadd.f32 %v8295_v37, %v18193_v63  ;;  %13016 = vmatpush3.bf16.msra.mxu0 %v14948_v43  ;;  %10831 = vmatprep.subr.bf16.mxu1 %v14951_v16  ;;  %v8655_v23 = vmax.f32 %v13460_v21, 0.0  ;;  %v14954_v16 = vld [vmem:[#allocation21 + $0x348] ss:$12 sps:$4 sm:$0xff]   ;;  %v14961_v38 = vld [vmem:[#allocation21 + $0x364] ss:$12 sps:$4 sm:$0xff]  }
0x1513   : > { %v8666_v31 = vmax.f32 %v13461_v45, 0.0  ;;  %v8665_v41 = vmax.f32 %v13446_v7, 0.0  ;;  %13017 = vmatprep.subr.bf16.mxu0 %v14952_v2  ;;  %v14958_v21 = vld [vmem:[#allocation21 + $0x4e8] ss:$12 sps:$4 sm:$0xff]  }
0x1514   : > { %v18241_v55 = vpack.c.bf16 %v8664_v14, %v8652_v33  ;;  %v8667_v32 = vmax.f32 %v13462_v30, 0.0  ;;  %10797 = vmatmul.mubr.bf16.gmra.mrb[156].mxu1 %v18118_v42 }
0x1515   : > { %v18244_v54 = vpack.c.bf16 %v8666_v31, %v8654_v56  ;;  %v18246_v40 = vpack.c.bf16 %v8665_v41, %v8653_v5  ;;  %10806 = vmatprep.mubr.bf16.mxu1 %v18141_v12  ;;  %10832 = vmatpush1.bf16.msra.mxu1 %v14949_v8  ;;  %v8153_v43 = vpop.f32.mrb[132].mxu1  ;;  %v14962_v12 = vld [vmem:[#allocation21 + $0x5c0] ss:$12 sps:$4 sm:$0xff]  }
0x1516   : > { %v18249_v52 = vpack.c.bf16 %v8667_v32, %v8655_v23  ;;  %v13447_v53 = vadd.f32 %v8153_v43, %v18184_v3  ;;  %v8299_v22 = vpop.f32.mrb[164].mxu0  ;;  %13018 = vmatpush3.bf16.msra.mxu0 %v14953_v61  ;;  %v8155_v2 = vpop.f32.mrb[133].mxu1  ;;  %10833 = vmatprep.subr.bf16.mxu1 %v14956_v46  ;;  %v14959_v46 = vld [vmem:[#allocation21 + $0x360] ss:$12 sps:$4 sm:$0xff]  }
0x1517   : > { %v13463_v42 = vadd.f32 %v8299_v22, %v18187_v4  ;;  %v13448_v35 = vadd.f32 %v8155_v2, %v18190_v62  ;;  %v8301_v13 = vpop.f32.mrb[165].mxu0  ;;  %v8157_v45 = vpop.f32.mrb[134].mxu1  ;;  %11297 = vmatprep.mubr.bf16.mxu0 %v18246_v40  ;;  %13019 = vmatprep.subr.bf16.mxu0 %v14957_v0  ;;  %v14963_v41 = vld [vmem:[#allocation21 + $0x500] ss:$12 sps:$4 sm:$0xff]   ;;  %v14966_v0 = vld [vmem:[#allocation21 + $0x37c] ss:$12 sps:$4 sm:$0xff]  }
0x1518   : > { %v13464_v7 = vadd.f32 %v8301_v13, %v18193_v63  ;;  %v13449_v37 = vadd.f32 %v8157_v45, %v18184_v3  ;;  %v8303_v8 = vpop.f32.mrb[166].mxu0  ;;  %v8159_v33 = vpop.f32.mrb[135].mxu1  ;;  %11298 = vmatmul.mubr.bf16.gmra.mrb[224].mxu0 %v18241_v55  ;;  %v8676_v56 = vmax.f32 %v13447_v53, 0.0  ;;  %v14967_v22 = vld [vmem:[#allocation21 + $0x5d8] ss:$12 sps:$4 sm:$0xff]  }
0x1519   : > { %v13465_v14 = vadd.f32 %v8303_v8, %v18187_v4  ;;  %10834 = vmatpush1.bf16.msra.mxu1 %v14954_v16  ;;  %v13450_v30 = vadd.f32 %v8159_v33, %v18190_v62  ;;  %v8305_v61 = vpop.f32.mrb[167].mxu0  ;;  %v8678_v3 = vmax.f32 %v13463_v42, 0.0  ;;  %v8677_v23 = vmax.f32 %v13448_v35, 0.0  ;;  %v14971_v42 = vld [vmem:[#allocation21 + $0x394] ss:$12 sps:$4 sm:$0xff]  }
0x151a   : > { %v8688_v5 = vmax.f32 %v13449_v37, 0.0  ;;  %v13466_v31 = vadd.f32 %v8305_v61, %v18193_v63  ;;  %13020 = vmatpush3.bf16.msra.mxu0 %v14958_v21  ;;  %10835 = vmatprep.subr.bf16.mxu1 %v14961_v38  ;;  %v8679_v4 = vmax.f32 %v13464_v7, 0.0  ;;  %v14964_v63 = vld [vmem:[#allocation21 + $0x378] ss:$12 sps:$4 sm:$0xff]   ;;  %v14972_v35 = vld [vmem:[#allocation21 + $0x5f0] ss:$12 sps:$4 sm:$0xff]  }
0x151b   : > { %v8690_v32 = vmax.f32 %v13465_v14, 0.0  ;;  %v8689_v43 = vmax.f32 %v13450_v30, 0.0  ;;  %13021 = vmatprep.subr.bf16.mxu0 %v14962_v12  ;;  %v14968_v38 = vld [vmem:[#allocation21 + $0x518] ss:$12 sps:$4 sm:$0xff]   ;;  %v15001_v45 = vld [vmem:[#allocation21 + $0x6c8] ss:$12 sps:$4 sm:$0xff]  }
0x151c   : > { %v18261_v16 = vpack.c.bf16 %v8688_v5, %v8676_v56  ;;  %v8691_v62 = vmax.f32 %v13466_v31, 0.0  ;;  %10807 = vmatmul.mubr.bf16.gmra.mrb[160].mxu1 %v18136_v34  ;;  %v14969_v34 = vld [vmem:[#allocation21 + $0x390] ss:$12 sps:$4 sm:$0xff]   ;;  %v14976_v13 = vld [vmem:[#allocation21 + $0x3ac] ss:$12 sps:$4 sm:$0xff]  }
0x151d   : > { %v18264_v53 = vpack.c.bf16 %v8690_v32, %v8678_v3  ;;  %v18266_v2 = vpack.c.bf16 %v8689_v43, %v8677_v23  ;;  %10816 = vmatprep.mubr.bf16.mxu1 %v18159_v48  ;;  %10836 = vmatpush1.bf16.msra.mxu1 %v14959_v46  ;;  %v14973_v48 = vld [vmem:[#allocation21 + $0x530] ss:$12 sps:$4 sm:$0xff]   ;;  %v14974_v12 = vld [vmem:[#allocation21 + $0x3a8] ss:$12 sps:$4 sm:$0xff]   ;;  %v15006_v8 = vld [vmem:[#allocation21 + $0x6e0] ss:$12 sps:$4 sm:$0xff]  }
0x151e   : > { %v18269_v21 = vpack.c.bf16 %v8691_v62, %v8679_v4  ;;  %13022 = vmatpush3.bf16.msra.mxu0 %v14963_v41  ;;  %10837 = vmatprep.subr.bf16.mxu1 %v14966_v0  ;;  %v14979_v7 = vld [vmem:[#allocation21 + $0x3c4] ss:$12 sps:$4 sm:$0xff]   ;;  %v15002_v37 = vld [vmem:[#allocation21 + $0x608] ss:$12 sps:$4 sm:$0xff]   ;;  %v14977_v33 = vld [vmem:[#allocation21 + $0x3c0] ss:$12 sps:$4 sm:$0xff]  }
0x151f   : > { %11305 = vmatprep.mubr.bf16.mxu0 %v18266_v2  ;;  %13023 = vmatprep.subr.bf16.mxu0 %v14967_v22  ;;  %v14982_v14 = vld [vmem:[#allocation21 + $0x3dc] ss:$12 sps:$4 sm:$0xff]   ;;  %v15011_v30 = vld [vmem:[#allocation21 + $0x6f8] ss:$12 sps:$4 sm:$0xff]   ;;  %v14985_v61 = vld [vmem:[#allocation21 + $0x3f4] ss:$12 sps:$4 sm:$0xff]  }
0x1520   : > { %11306 = vmatmul.mubr.bf16.gmra.mrb[228].mxu0 %v18261_v16  ;;  %v15012_v46 = vld [vmem:[#allocation21 + $0x638] ss:$12 sps:$4 sm:$0xff]   ;;  %v15016_v56 = vld [vmem:[#allocation21 + $0x710] ss:$12 sps:$4 sm:$0xff]   ;;  %v15021_v0 = vld [vmem:[#allocation21 + $0x728] ss:$12 sps:$4 sm:$0xff]  }
0x1521   : > { %10838 = vmatpush1.bf16.msra.mxu1 %v14964_v63  ;;  %11346 = vmatprep.mubr.bf16.mxu0 %v18209_v24  ;;  %v14983_v5 = vld [vmem:[#allocation21 + $0x3f0] ss:$12 sps:$4 sm:$0xff]   ;;  %v14988_v31 = vld [vmem:[#allocation21 + $0x40c] ss:$12 sps:$4 sm:$0xff]   ;;  %v14986_v3 = vld [vmem:[#allocation21 + $0x408] ss:$12 sps:$4 sm:$0xff]  }
0x1522   : > { %13024 = vmatpush3.bf16.msra.mxu0 %v14968_v38  ;;  %10839 = vmatprep.subr.bf16.mxu1 %v14971_v42  ;;  %v15017_v41 = vld [vmem:[#allocation21 + $0x650] ss:$12 sps:$4 sm:$0xff]   ;;  %v15022_v32 = vld [vmem:[#allocation21 + $0x668] ss:$12 sps:$4 sm:$0xff]   ;;  %v15026_v43 = vld [vmem:[#allocation21 + $0x740] ss:$12 sps:$4 sm:$0xff]  }
0x1523   : > { %13025 = vmatprep.subr.bf16.mxu0 %v14972_v35  ;;  %v14991_v23 = vld [vmem:[#allocation21 + $0x424] ss:$12 sps:$4 sm:$0xff]   ;;  %v14989_v22 = vld [vmem:[#allocation21 + $0x420] ss:$12 sps:$4 sm:$0xff]   ;;  %v14994_v4 = vld [vmem:[#allocation21 + $0x43c] ss:$12 sps:$4 sm:$0xff]  }
0x1524   : > { %10817 = vmatmul.mubr.bf16.gmra.mrb[164].mxu1 %v18154_v6  ;;  %v15007_v6 = vld [vmem:[#allocation21 + $0x620] ss:$12 sps:$4 sm:$0xff]   ;;  %v15031_v63 = vld [vmem:[#allocation21 + $0x758] ss:$12 sps:$4 sm:$0xff]  }
0x1525   : > { %10840 = vmatpush1.bf16.msra.mxu1 %v14969_v34  ;;  %10859 = vmatprep.mubr.bf16.mxu1 %v18207_v60  ;;  %v14980_v60 = vld [vmem:[#allocation21 + $0x3d8] ss:$12 sps:$4 sm:$0xff]   ;;  %v15027_v62 = vld [vmem:[#allocation21 + $0x680] ss:$12 sps:$4 sm:$0xff]   ;;  %v15036_v34 = vld [vmem:[#allocation21 + $0x770] ss:$12 sps:$4 sm:$0xff]  }
0x1526   : > { %13026 = vmatpush3.bf16.msra.mxu0 %v14973_v48  ;;  %10841 = vmatprep.subr.bf16.mxu1 %v14976_v13  ;;  %v14992_v38 = vld [vmem:[#allocation21 + $0x438] ss:$12 sps:$4 sm:$0xff]   ;;  %v14997_v42 = vld [vmem:[#allocation21 + $0x454] ss:$12 sps:$4 sm:$0xff]   ;;  %v14995_v48 = vld [vmem:[#allocation21 + $0x450] ss:$12 sps:$4 sm:$0xff]  }
0x1527   : > { %13051 = vmatprep.subr.bf16.mxu0 %v15001_v45  ;;  %v15032_v35 = vld [vmem:[#allocation21 + $0x698] ss:$12 sps:$4 sm:$0xff]   ;;  %v15037_v45 = vld [vmem:[#allocation21 + $0x6b0] ss:$12 sps:$4 sm:$0xff]  }
0x1528   : > { %v15000_v13 = vld [vmem:[#allocation21 + $0x46c] ss:$12 sps:$4 sm:$0xff]  }
0x1529   : > { %10842 = vmatpush1.bf16.msra.mxu1 %v14974_v12  ;;  %11347 = vmatmul.mubr.bf16.vlgmr.msra.gmra.mrb[232].mxu0 %v18205_v1  ;;  %v15041_v12 = vld [vmem:[#allocation21 + $0x848] ss:$12 sps:$4 sm:$0xff]  }
0x152a   : > { %11354 = vmatprep.mubr.bf16.mxu0 %v18229_v18  ;;  %10843 = vmatprep.subr.bf16.mxu1 %v14979_v7  ;;  %v14998_v7 = vld [vmem:[#allocation21 + $0x468] ss:$12 sps:$4 sm:$0xff]  }
0x152b   : > { %13052 = vmatpush3.bf16.msra.mxu0 %v15002_v37  ;;  %v15005_v37 = vld [vmem:[#allocation21 + $0x484] ss:$12 sps:$4 sm:$0xff]  }
0x152c   : > { %13053 = vmatprep.subr.bf16.mxu0 %v15006_v8  ;;  %v15003_v8 = vld [vmem:[#allocation21 + $0x480] ss:$12 sps:$4 sm:$0xff]  }
0x152d   : > { %10844 = vmatpush1.bf16.msra.mxu1 %v14977_v33  ;;  %v15010_v33 = vld [vmem:[#allocation21 + $0x49c] ss:$12 sps:$4 sm:$0xff]  }
0x152e   : > { %10845 = vmatprep.subr.bf16.mxu1 %v14982_v14  ;;  %v15008_v14 = vld [vmem:[#allocation21 + $0x498] ss:$12 sps:$4 sm:$0xff]  }
0x152f   : > { %13054 = vmatpush3.bf16.msra.mxu0 %v15007_v6  ;;  %v15015_v6 = vld [vmem:[#allocation21 + $0x4b4] ss:$12 sps:$4 sm:$0xff]  }
0x1530   : > { %13055 = vmatprep.subr.bf16.mxu0 %v15011_v30  ;;  %v15013_v30 = vld [vmem:[#allocation21 + $0x4b0] ss:$12 sps:$4 sm:$0xff]  }
0x1531   : > { %10846 = vmatpush1.bf16.msra.mxu1 %v14980_v60  ;;  %11355 = vmatmul.mubr.bf16.gmra.mrb[236].mxu0 %v18224_v10  ;;  %v15020_v60 = vld [vmem:[#allocation21 + $0x4cc] ss:$12 sps:$4 sm:$0xff]  }
0x1532   : > { %11362 = vmatprep.mubr.bf16.mxu0 %v18249_v52  ;;  %10847 = vmatprep.subr.bf16.mxu1 %v14985_v61  ;;  %v15018_v61 = vld [vmem:[#allocation21 + $0x4c8] ss:$12 sps:$4 sm:$0xff]  }
0x1533   : > { %13056 = vmatpush3.bf16.msra.mxu0 %v15012_v46  ;;  %v15025_v46 = vld [vmem:[#allocation21 + $0x4e4] ss:$12 sps:$4 sm:$0xff]  }
0x1534   : > { %13057 = vmatprep.subr.bf16.mxu0 %v15016_v56  ;;  %v6221_v56 = vld [vmem:[#allocation19 + $0x8] sm:$0xf] }
0x1535   : > { %10848 = vmatpush1.bf16.msra.mxu1 %v14983_v5  ;;  %v18288_v5 = vrot.slane %v6221_v56, %v18682_v25 }
0x1536   : > { %10849 = vmatprep.subr.bf16.mxu1 %v14988_v31  ;;  %v18292_v31 = vrot.slane %v6221_v56, %v18683_v20 }
0x1537   : > { %13058 = vmatpush3.bf16.msra.mxu0 %v15017_v41  ;;  %v15028_v41 = vld [vmem:[#allocation21 + $0x4f8] ss:$12 sps:$4 sm:$0xff]  }
0x1538   : > { %13059 = vmatprep.subr.bf16.mxu0 %v15021_v0 }
0x1539   : > { %10850 = vmatpush1.bf16.msra.mxu1 %v14986_v3  ;;  %11363 = vmatmul.mubr.bf16.gmra.mrb[240].mxu0 %v18244_v54  ;;  %v15035_v3 = vld [vmem:[#allocation21 + $0x514] ss:$12 sps:$4 sm:$0xff]  }
0x153a   : > { %11370 = vmatprep.mubr.bf16.mxu0 %v18269_v21  ;;  %10851 = vmatprep.subr.bf16.mxu1 %v14991_v23 }
0x153b   : > { %13060 = vmatpush3.bf16.msra.mxu0 %v15022_v32 }
0x153c   : > { %13061 = vmatprep.subr.bf16.mxu0 %v15026_v43 }
0x153d   : > { %10852 = vmatpush1.bf16.msra.mxu1 %v14989_v22 }
0x153e   : > { %10853 = vmatprep.subr.bf16.mxu1 %v14994_v4 }
0x153f   : > { %13062 = vmatpush3.bf16.msra.mxu0 %v15027_v62 }
0x1540   : > { %13063 = vmatprep.subr.bf16.mxu0 %v15031_v63 }
0x1541   : > { %10854 = vmatpush1.bf16.msra.mxu1 %v14992_v38  ;;  %11371 = vmatmul.mubr.bf16.gmra.mrb[244].mxu0 %v18264_v53  ;;  %v15033_v38 = vld [vmem:[#allocation21 + $0x510] ss:$12 sps:$4 sm:$0xff]  }
0x1542   : > { %10855 = vmatprep.subr.bf16.mxu1 %v14997_v42 }
0x1543   : > { %13064 = vmatpush3.bf16.msra.mxu0 %v15032_v35 }
0x1544   : > { %13065 = vmatprep.subr.bf16.mxu0 %v15036_v34 }
0x1545   : > { %10856 = vmatpush1.bf16.msra.mxu1 %v14995_v48  ;;  %v15040_v48 = vld [vmem:[#allocation21 + $0x52c] ss:$12 sps:$4 sm:$0xff]  }
0x1546   : > { %10857 = vmatprep.subr.bf16.mxu1 %v15000_v13 }
0x1547   : > { %13066 = vmatpush3.bf16.msra.mxu0 %v15037_v45 }
0x1548   : > { %13091 = vmatprep.subr.bf16.mxu0 %v15041_v12 }
0x1549   : > { %10858 = vmatpush1.bf16.msra.mxu1 %v14998_v7 }
0x154a   : > { %10900 = vmatprep.subr.bf16.mxu1 %v15005_v37 }
0x154c   : > { %10860 = vmatmul.mubr.bf16.vlgmr.msra.gmra.mrb[152].mxu1 %v18203_v15  ;;  %v15023_v15 = vld [vmem:[#allocation21 + $0x4e0] ss:$12 sps:$4 sm:$0xff]  }
0x154d   : > { %10869 = vmatprep.mubr.bf16.mxu1 %v18226_v47  ;;  %10901 = vmatpush1.bf16.msra.mxu1 %v15003_v8  ;;  %v15030_v47 = vld [vmem:[#allocation21 + $0x4fc] ss:$12 sps:$4 sm:$0xff]  }
0x154e   : > { %10902 = vmatprep.subr.bf16.mxu1 %v15010_v33 }
0x1551   : > { %10903 = vmatpush1.bf16.msra.mxu1 %v15008_v14 }
0x1552   : > { %10904 = vmatprep.subr.bf16.mxu1 %v15015_v6 }
0x1554   : > { %10870 = vmatmul.mubr.bf16.gmra.mrb[156].mxu1 %v18221_v39  ;;  %v18295_v39 = vrot.slane %v6221_v56, %v18684_v49 }
0x1555   : > { %10879 = vmatprep.mubr.bf16.mxu1 %v18246_v40  ;;  %10905 = vmatpush1.bf16.msra.mxu1 %v15013_v30  ;;  %v18300_v40 = vrot.slane %v6221_v56, %v6238_v51 }
0x1556   : > { %10906 = vmatprep.subr.bf16.mxu1 %v15020_v60  ;;  %v15038_v60 = vld [vmem:[#allocation21 + $0x528] ss:$12 sps:$4 sm:$0xff]  }
0x1559   : > { %10907 = vmatpush1.bf16.msra.mxu1 %v15018_v61 }
0x155a   : > { %10908 = vmatprep.subr.bf16.mxu1 %v15025_v46 }
0x155c   : > { %10880 = vmatmul.mubr.bf16.gmra.mrb[160].mxu1 %v18241_v55 }
0x155d   : > { %10889 = vmatprep.mubr.bf16.mxu1 %v18266_v2  ;;  %10909 = vmatpush1.bf16.msra.mxu1 %v15023_v15  ;;  %v15042_v15 = vld [vmem:[#allocation21 + $0x788] ss:$12 sps:$4 sm:$0xff]  }
0x155e   : > { %v8415_v0 = vpop.f32.mrb[136].mxu1  ;;  %10910 = vmatprep.subr.bf16.mxu1 %v15030_v47  ;;  %v15045_v47 = vld [vmem:[#allocation21 + $0x544] ss:$12 sps:$4 sm:$0xff]  }
0x155f   : > { %v13467_v23 = vadd.f32 %v8415_v0, %v18288_v5  ;;  %v8561_v55 = vpop.f32.mrb[168].mxu0  ;;  %v8417_v32 = vpop.f32.mrb[137].mxu1 }
0x1560   : > { %v13483_v43 = vadd.f32 %v8561_v55, %v18292_v31  ;;  %v13468_v22 = vadd.f32 %v8417_v32, %v18295_v39  ;;  %v8563_v4 = vpop.f32.mrb[169].mxu0  ;;  %v8419_v62 = vpop.f32.mrb[138].mxu1 }
0x1561   : > { %v13484_v2 = vadd.f32 %v8563_v4, %v18300_v40  ;;  %v13469_v58 = vadd.f32 %v8419_v62, %v18288_v5  ;;  %v8565_v51 = vpop.f32.mrb[170].mxu0  ;;  %10911 = vmatpush1.bf16.msra.mxu1 %v15028_v41  ;;  %v8421_v63 = vpop.f32.mrb[139].mxu1  ;;  %v8608_v13 = vmax.f32 %v13467_v23, 0.0  ;;  %v15046_v23 = vld [vmem:[#allocation21 + $0x860] ss:$12 sps:$4 sm:$0xff]  }
0x1562   : > { %v13485_v42 = vadd.f32 %v8565_v51, %v18292_v31  ;;  %v13470_v35 = vadd.f32 %v8421_v63, %v18295_v39  ;;  %v8567_v34 = vpop.f32.mrb[171].mxu0  ;;  %10912 = vmatprep.subr.bf16.mxu1 %v15035_v3  ;;  %v8610_v7 = vmax.f32 %v13483_v43, 0.0  ;;  %v8609_v37 = vmax.f32 %v13468_v22, 0.0 }
0x1563   : > { %v8620_v45 = vmax.f32 %v13469_v58, 0.0  ;;  %v13486_v12 = vadd.f32 %v8567_v34, %v18300_v40  ;;  %v8611_v14 = vmax.f32 %v13484_v2, 0.0  ;;  %v15043_v58 = vld [vmem:[#allocation21 + $0x540] ss:$12 sps:$4 sm:$0xff]  }
0x1564   : > { %v8622_v8 = vmax.f32 %v13485_v42, 0.0  ;;  %v8621_v33 = vmax.f32 %v13470_v35, 0.0  ;;  %10890 = vmatmul.mubr.bf16.gmra.mrb[164].mxu1 %v18261_v16  ;;  %v15047_v42 = vld [vmem:[#allocation21 + $0x7a0] ss:$12 sps:$4 sm:$0xff]   ;;  %v15050_v35 = vld [vmem:[#allocation21 + $0x55c] ss:$12 sps:$4 sm:$0xff]  }
0x1565   : > { %v18311_v6 = vpack.c.bf16 %v8620_v45, %v8608_v13  ;;  %v8623_v30 = vmax.f32 %v13486_v12, 0.0  ;;  %10913 = vmatpush1.bf16.msra.mxu1 %v15033_v38  ;;  %10932 = vmatprep.mubr.bf16.mxu1 %v18209_v24  ;;  %v15051_v45 = vld [vmem:[#allocation21 + $0x878] ss:$12 sps:$4 sm:$0xff]  }
0x1566   : > { %v18314_v61 = vpack.c.bf16 %v8622_v8, %v8610_v7  ;;  %v18316_v46 = vpack.c.bf16 %v8621_v33, %v8609_v37  ;;  %v8425_v56 = vpop.f32.mrb[140].mxu1  ;;  %10914 = vmatprep.subr.bf16.mxu1 %v15040_v48 }
0x1567   : > { %v18318_v41 = vpack.c.bf16 %v8623_v30, %v8611_v14  ;;  %v13471_v16 = vadd.f32 %v8425_v56, %v18288_v5  ;;  %v8571_v0 = vpop.f32.mrb[172].mxu0  ;;  %v8427_v3 = vpop.f32.mrb[141].mxu1 }
0x1568   : > { %v13487_v55 = vadd.f32 %v8571_v0, %v18292_v31  ;;  %v13472_v24 = vadd.f32 %v8427_v3, %v18295_v39  ;;  %v8573_v32 = vpop.f32.mrb[173].mxu0  ;;  %v8429_v43 = vpop.f32.mrb[142].mxu1  ;;  %11411 = vmatprep.mubr.bf16.mxu0 %v18316_v46  ;;  %v15055_v0 = vld [vmem:[#allocation21 + $0x574] ss:$12 sps:$4 sm:$0xff]  }
0x1569   : > { %v13488_v22 = vadd.f32 %v8573_v32, %v18300_v40  ;;  %v13473_v4 = vadd.f32 %v8429_v43, %v18288_v5  ;;  %v8575_v62 = vpop.f32.mrb[174].mxu0  ;;  %10915 = vmatpush1.bf16.msra.mxu1 %v15038_v60  ;;  %v8431_v2 = vpop.f32.mrb[143].mxu1  ;;  %11412 = vmatmul.mubr.bf16.vlgmr.msra.gmra.mrb[248].mxu0 %v18311_v6  ;;  %v8632_v34 = vmax.f32 %v13471_v16, 0.0  ;;  %v15048_v60 = vld [vmem:[#allocation21 + $0x558] ss:$12 sps:$4 sm:$0xff]  }
0x156a   : > { %v13489_v51 = vadd.f32 %v8575_v62, %v18292_v31  ;;  %v13474_v63 = vadd.f32 %v8431_v2, %v18295_v39  ;;  %v8577_v38 = vpop.f32.mrb[175].mxu0  ;;  %13092 = vmatpush3.bf16.msra.mxu0 %v15042_v15  ;;  %10916 = vmatprep.subr.bf16.mxu1 %v15045_v47  ;;  %v8634_v12 = vmax.f32 %v13487_v55, 0.0  ;;  %v8633_v7 = vmax.f32 %v13472_v24, 0.0  ;;  %v15052_v16 = vld [vmem:[#allocation21 + $0x7b8] ss:$12 sps:$4 sm:$0xff]  }
0x156b   : > { %v8644_v48 = vmax.f32 %v13473_v4, 0.0  ;;  %v13490_v13 = vadd.f32 %v8577_v38, %v18300_v40  ;;  %13093 = vmatprep.subr.bf16.mxu0 %v15046_v23  ;;  %v8635_v33 = vmax.f32 %v13488_v22, 0.0  ;;  %v15056_v32 = vld [vmem:[#allocation21 + $0x890] ss:$12 sps:$4 sm:$0xff]  }
0x156c   : > { %v8646_v37 = vmax.f32 %v13489_v51, 0.0  ;;  %v8645_v8 = vmax.f32 %v13474_v63, 0.0  ;;  %v15053_v38 = vld [vmem:[#allocation21 + $0x570] ss:$12 sps:$4 sm:$0xff]  }
0x156d   : > { %v18330_v14 = vpack.c.bf16 %v8644_v48, %v8632_v34  ;;  %v8647_v30 = vmax.f32 %v13490_v13, 0.0  ;;  %10917 = vmatpush1.bf16.msra.mxu1 %v15043_v58  ;;  %v15057_v48 = vld [vmem:[#allocation21 + $0x7d0] ss:$12 sps:$4 sm:$0xff]   ;;  %v15060_v13 = vld [vmem:[#allocation21 + $0x58c] ss:$12 sps:$4 sm:$0xff]  }
0x156e   : > { %v18332_v56 = vpack.c.bf16 %v8646_v37, %v8634_v12  ;;  %v18334_v15 = vpack.c.bf16 %v8645_v8, %v8633_v7  ;;  %v8435_v47 = vpop.f32.mrb[144].mxu1  ;;  %13094 = vmatpush3.bf16.msra.mxu0 %v15047_v42  ;;  %10918 = vmatprep.subr.bf16.mxu1 %v15050_v35  ;;  %v15061_v37 = vld [vmem:[#allocation21 + $0x8a8] ss:$12 sps:$4 sm:$0xff]  }
0x156f   : > { %v18336_v3 = vpack.c.bf16 %v8647_v30, %v8635_v33  ;;  %v13475_v23 = vadd.f32 %v8435_v47, %v18288_v5  ;;  %v8581_v55 = vpop.f32.mrb[176].mxu0  ;;  %v8437_v24 = vpop.f32.mrb[145].mxu1  ;;  %13095 = vmatprep.subr.bf16.mxu0 %v15051_v45 }
0x1570   : > { %v13491_v43 = vadd.f32 %v8581_v55, %v18292_v31  ;;  %v13476_v22 = vadd.f32 %v8437_v24, %v18295_v39  ;;  %v8583_v4 = vpop.f32.mrb[177].mxu0  ;;  %v8439_v62 = vpop.f32.mrb[146].mxu1  ;;  %11419 = vmatprep.mubr.bf16.mxu0 %v18334_v15 }
0x1571   : > { %v13492_v2 = vadd.f32 %v8583_v4, %v18300_v40  ;;  %v13477_v58 = vadd.f32 %v8439_v62, %v18288_v5  ;;  %v8585_v51 = vpop.f32.mrb[178].mxu0  ;;  %10919 = vmatpush1.bf16.msra.mxu1 %v15048_v60  ;;  %v8441_v63 = vpop.f32.mrb[147].mxu1  ;;  %11420 = vmatmul.mubr.bf16.gmra.mrb[252].mxu0 %v18330_v14  ;;  %v8656_v45 = vmax.f32 %v13475_v23, 0.0  ;;  %v15058_v4 = vld [vmem:[#allocation21 + $0x588] ss:$12 sps:$4 sm:$0xff]  }
0x1572   : > { %v13493_v42 = vadd.f32 %v8585_v51, %v18292_v31  ;;  %v13478_v35 = vadd.f32 %v8441_v63, %v18295_v39  ;;  %v8587_v34 = vpop.f32.mrb[179].mxu0  ;;  %13096 = vmatpush3.bf16.msra.mxu0 %v15052_v16  ;;  %10920 = vmatprep.subr.bf16.mxu1 %v15055_v0  ;;  %v8658_v8 = vmax.f32 %v13491_v43, 0.0  ;;  %v8657_v33 = vmax.f32 %v13476_v22, 0.0  ;;  %v15062_v62 = vld [vmem:[#allocation21 + $0x7e8] ss:$12 sps:$4 sm:$0xff]  }
0x1573   : > { %v8668_v12 = vmax.f32 %v13477_v58, 0.0  ;;  %v13494_v7 = vadd.f32 %v8587_v34, %v18300_v40  ;;  %13097 = vmatprep.subr.bf16.mxu0 %v15056_v32  ;;  %v8659_v47 = vmax.f32 %v13492_v2, 0.0  ;;  %v15065_v32 = vld [vmem:[#allocation21 + $0x5a4] ss:$12 sps:$4 sm:$0xff]   ;;  %v15066_v51 = vld [vmem:[#allocation21 + $0x8c0] ss:$12 sps:$4 sm:$0xff]  }
0x1574   : > { %v8670_v30 = vmax.f32 %v13493_v42, 0.0  ;;  %v8669_v60 = vmax.f32 %v13478_v35, 0.0 }
0x1575   : > { %v18348_v55 = vpack.c.bf16 %v8668_v12, %v8656_v45  ;;  %v8671_v24 = vmax.f32 %v13494_v7, 0.0  ;;  %10921 = vmatpush1.bf16.msra.mxu1 %v15053_v38  ;;  %v15063_v12 = vld [vmem:[#allocation21 + $0x5a0] ss:$12 sps:$4 sm:$0xff]  }
0x1576   : > { %v18350_v16 = vpack.c.bf16 %v8670_v30, %v8658_v8  ;;  %v18352_v0 = vpack.c.bf16 %v8669_v60, %v8657_v33  ;;  %v8445_v23 = vpop.f32.mrb[148].mxu1  ;;  %13098 = vmatpush3.bf16.msra.mxu0 %v15057_v48  ;;  %10922 = vmatprep.subr.bf16.mxu1 %v15060_v13  ;;  %v15067_v33 = vld [vmem:[#allocation21 + $0x800] ss:$12 sps:$4 sm:$0xff]   ;;  %v15070_v30 = vld [vmem:[#allocation21 + $0x5bc] ss:$12 sps:$4 sm:$0xff]  }
0x1577   : > { %v18354_v58 = vpack.c.bf16 %v8671_v24, %v8659_v47  ;;  %v13479_v43 = vadd.f32 %v8445_v23, %v18288_v5  ;;  %v8591_v22 = vpop.f32.mrb[180].mxu0  ;;  %v8447_v2 = vpop.f32.mrb[149].mxu1  ;;  %13099 = vmatprep.subr.bf16.mxu0 %v15061_v37 }
0x1578   : > { %v13495_v63 = vadd.f32 %v8591_v22, %v18292_v31  ;;  %v13480_v38 = vadd.f32 %v8447_v2, %v18295_v39  ;;  %v8593_v42 = vpop.f32.mrb[181].mxu0  ;;  %v8449_v35 = vpop.f32.mrb[150].mxu1  ;;  %11427 = vmatprep.mubr.bf16.mxu0 %v18352_v0 }
0x1579   : > { %v13496_v34 = vadd.f32 %v8593_v42, %v18300_v40  ;;  %v13481_v48 = vadd.f32 %v8449_v35, %v18288_v5  ;;  %v8595_v13 = vpop.f32.mrb[182].mxu0  ;;  %10923 = vmatpush1.bf16.msra.mxu1 %v15058_v4  ;;  %v8451_v45 = vpop.f32.mrb[151].mxu1  ;;  %11428 = vmatmul.mubr.bf16.gmra.mrb[0].mxu0 %v18348_v55  ;;  %v8680_v60 = vmax.f32 %v13479_v43, 0.0  ;;  %v15071_v5 = vld [vmem:[#allocation21 + $0x8d8] ss:$12 sps:$4 sm:$0xff]  }
0x157a   : > { %v13497_v7 = vadd.f32 %v8595_v13, %v18292_v31  ;;  %v13482_v37 = vadd.f32 %v8451_v45, %v18295_v39  ;;  %v8597_v8 = vpop.f32.mrb[183].mxu0  ;;  %13100 = vmatpush3.bf16.msra.mxu0 %v15062_v62  ;;  %10924 = vmatprep.subr.bf16.mxu1 %v15065_v32  ;;  %v8682_v4 = vmax.f32 %v13495_v63, 0.0  ;;  %v8681_v23 = vmax.f32 %v13480_v38, 0.0  ;;  %v15068_v39 = vld [vmem:[#allocation21 + $0x5b8] ss:$12 sps:$4 sm:$0xff]  }
0x157b   : > { %v8692_v47 = vmax.f32 %v13481_v48, 0.0  ;;  %v13498_v24 = vadd.f32 %v8597_v8, %v18300_v40  ;;  %13101 = vmatprep.subr.bf16.mxu0 %v15066_v51  ;;  %v8683_v42 = vmax.f32 %v13496_v34, 0.0  ;;  %v15072_v43 = vld [vmem:[#allocation21 + $0x818] ss:$12 sps:$4 sm:$0xff]   ;;  %v15075_v63 = vld [vmem:[#allocation21 + $0x5d4] ss:$12 sps:$4 sm:$0xff]  }
0x157c   : > { %v8694_v22 = vmax.f32 %v13497_v7, 0.0  ;;  %v8693_v2 = vmax.f32 %v13482_v37, 0.0  ;;  %v15076_v38 = vld [vmem:[#allocation21 + $0x8f0] ss:$12 sps:$4 sm:$0xff]   ;;  %v15080_v37 = vld [vmem:[#allocation21 + $0x5ec] ss:$12 sps:$4 sm:$0xff]  }
0x157d   : > { %v18366_v35 = vpack.c.bf16 %v8692_v47, %v8680_v60  ;;  %v8695_v31 = vmax.f32 %v13498_v24, 0.0  ;;  %10925 = vmatpush1.bf16.msra.mxu1 %v15063_v12  ;;  %v15073_v45 = vld [vmem:[#allocation21 + $0x5d0] ss:$12 sps:$4 sm:$0xff]  }
0x157e   : > { %v18368_v62 = vpack.c.bf16 %v8694_v22, %v8682_v4  ;;  %v18370_v32 = vpack.c.bf16 %v8693_v2, %v8681_v23  ;;  %13102 = vmatpush3.bf16.msra.mxu0 %v15067_v33  ;;  %10926 = vmatprep.subr.bf16.mxu1 %v15070_v30  ;;  %v15077_v7 = vld [vmem:[#allocation21 + $0x830] ss:$12 sps:$4 sm:$0xff]   ;;  %v15078_v33 = vld [vmem:[#allocation21 + $0x5e8] ss:$12 sps:$4 sm:$0xff]   ;;  %v15081_v4 = vld [vmem:[#allocation21 + $0x600] ss:$12 sps:$4 sm:$0xff]  }
0x157f   : > { %v18372_v40 = vpack.c.bf16 %v8695_v31, %v8683_v42  ;;  %v12907_v51 = vpop.f32.mrb[184].mxu0  ;;  %13103 = vmatprep.subr.bf16.mxu0 %v15071_v5  ;;  %v15083_v30 = vld [vmem:[#allocation21 + $0x604] ss:$12 sps:$4 sm:$0xff]   ;;  %v15086_v22 = vld [vmem:[#allocation21 + $0x61c] ss:$12 sps:$4 sm:$0xff]  }
0x1580   : > { %v12908_v48 = vpop.f32.mrb[185].mxu0  ;;  %11435 = vmatprep.mubr.bf16.mxu0 %v18370_v32  ;;  %v15084_v42 = vld [vmem:[#allocation21 + $0x618] ss:$12 sps:$4 sm:$0xff]   ;;  %v15089_v31 = vld [vmem:[#allocation21 + $0x634] ss:$12 sps:$4 sm:$0xff]  }
0x1581   : > { %v18375_v34 = vadd.f32 %v12908_v48, %v12907_v51  ;;  %10927 = vmatpush1.bf16.msra.mxu1 %v15068_v39  ;;  %v12910_v13 = vpop.f32.mrb[186].mxu0  ;;  %11436 = vmatmul.mubr.bf16.gmra.mrb[4].mxu0 %v18366_v35 }
0x1582   : > { %v12911_v12 = vpop.f32.mrb[187].mxu0  ;;  %13104 = vmatpush3.bf16.msra.mxu0 %v15072_v43  ;;  %11476 = vmatprep.mubr.bf16.mxu0 %v18318_v41 }
0x1583   : > { %v18379_v8 = vadd.f32 %v12911_v12, %v12910_v13  ;;  %10928 = vmatprep.subr.bf16.mxu1 %v15075_v63  ;;  %13105 = vmatprep.subr.bf16.mxu0 %v15076_v38  ;;  %v15087_v38 = vld [vmem:[#allocation21 + $0x630] ss:$12 sps:$4 sm:$0xff]  }
0x1585   : > { %10929 = vmatpush1.bf16.msra.mxu1 %v15073_v45  ;;  %v15095_v45 = vld [vmem:[#allocation21 + $0x664] ss:$12 sps:$4 sm:$0xff]  }
0x1586   : > { %13106 = vmatpush3.bf16.msra.mxu0 %v15077_v7  ;;  %10930 = vmatprep.subr.bf16.mxu1 %v15080_v37 }
0x1587   : > { %v12913_v60 = vpop.f32.mrb[188].mxu0 }
0x1588   : > { %v12914_v47 = vpop.f32.mrb[189].mxu0 }
0x1589   : > { %v18381_v24 = vadd.f32 %v12914_v47, %v12913_v60  ;;  %10931 = vmatpush1.bf16.msra.mxu1 %v15078_v33  ;;  %v12916_v5 = vpop.f32.mrb[190].mxu0  ;;  %11477 = vmatmul.mubr.bf16.vlgmr.msra.gmra.mrb[8].mxu0 %v18314_v61  ;;  %v18400_v60 = vld [vmem:[#allocation22] sm:$0x7] }
0x158a   : > { %v12917_v23 = vpop.f32.mrb[191].mxu0  ;;  %11484 = vmatprep.mubr.bf16.mxu0 %v18336_v3  ;;  %10973 = vmatprep.subr.bf16.mxu1 %v15083_v30  ;;  %v15093_v30 = vld [vmem:[#allocation21 + $0x660] ss:$12 sps:$4 sm:$0xff]  }
0x158b   : > { %v18385_v2 = vadd.f32 %v12917_v23, %v12916_v5  ;;  %v18408_v5 = vrot.slane %v18400_v60, %v18683_v20  ;;  %v15101_v23 = vld [vmem:[#allocation21 + $0x694] ss:$12 sps:$4 sm:$0xff]   ;;  %v15104_v20 = vld [vmem:[#allocation21 + $0x6ac] ss:$12 sps:$4 sm:$0xff]  }
0x158c   : > { %10933 = vmatmul.mubr.bf16.vlgmr.msra.gmra.mrb[152].mxu1 %v18205_v1  ;;  %v15092_v1 = vld [vmem:[#allocation21 + $0x64c] ss:$12 sps:$4 sm:$0xff]  }
0x158d   : > { %10942 = vmatprep.mubr.bf16.mxu1 %v18229_v18  ;;  %10974 = vmatpush1.bf16.msra.mxu1 %v15081_v4  ;;  %v15090_v18 = vld [vmem:[#allocation21 + $0x648] ss:$12 sps:$4 sm:$0xff]   ;;  %v15096_v4 = vld [vmem:[#allocation21 + $0x678] ss:$12 sps:$4 sm:$0xff]  }
0x158e   : > { %10975 = vmatprep.subr.bf16.mxu1 %v15086_v22 }
0x158f   : > { %v12919_v39 = vpop.f32.mrb[192].mxu0 }
0x1590   : > { %v12920_v43 = vpop.f32.mrb[193].mxu0 }
0x1591   : > { %v18389_v51 = vadd.f32 %v12920_v43, %v12919_v39  ;;  %10976 = vmatpush1.bf16.msra.mxu1 %v15084_v42  ;;  %v12922_v63 = vpop.f32.mrb[194].mxu0  ;;  %11485 = vmatmul.mubr.bf16.gmra.mrb[12].mxu0 %v18332_v56 }
0x1592   : > { %v12923_v48 = vpop.f32.mrb[195].mxu0  ;;  %11492 = vmatprep.mubr.bf16.mxu0 %v18354_v58  ;;  %10977 = vmatprep.subr.bf16.mxu1 %v15089_v31  ;;  %v11154_v31 = vadd.f32 %v18375_v34, %v18408_v5  ;;  %v15102_v34 = vld [vmem:[#allocation21 + $0x6a8] ss:$12 sps:$4 sm:$0xff]  }
0x1593   : > { %v18393_v13 = vadd.f32 %v12923_v48, %v12922_v63 }
0x1594   : > { %10943 = vmatmul.mubr.bf16.gmra.mrb[156].mxu1 %v18224_v10  ;;  %v15098_v10 = vld [vmem:[#allocation21 + $0x67c] ss:$12 sps:$4 sm:$0xff]  }
0x1595   : > { %10952 = vmatprep.mubr.bf16.mxu1 %v18249_v52  ;;  %10978 = vmatpush1.bf16.msra.mxu1 %v15087_v38 }
0x1596   : > { %10979 = vmatprep.subr.bf16.mxu1 %v15092_v1 }
0x1597   : > { %v12925_v12 = vpop.f32.mrb[196].mxu0 }
0x1598   : > { %v12926_v7 = vpop.f32.mrb[197].mxu0 }
0x1599   : > { %v18397_v37 = vadd.f32 %v12926_v7, %v12925_v12  ;;  %10980 = vmatpush1.bf16.msra.mxu1 %v15090_v18  ;;  %v12928_v33 = vpop.f32.mrb[198].mxu0  ;;  %11493 = vmatmul.mubr.bf16.gmra.mrb[16].mxu0 %v18350_v16  ;;  %v15107_v18 = vld [vmem:[#allocation21 + $0x6c4] ss:$12 sps:$4 sm:$0xff]   ;;  %v11162_v7 = vadd.f32 %v18381_v24, %v18408_v5 }
0x159a   : > { %v12929_v47 = vpop.f32.mrb[199].mxu0  ;;  %11500 = vmatprep.mubr.bf16.mxu0 %v18372_v40  ;;  %10981 = vmatprep.subr.bf16.mxu1 %v15095_v45 }
0x159b   : > { %v18403_v52 = vadd.f32 %v12929_v47, %v12928_v33 }
0x159c   : > { %10953 = vmatmul.mubr.bf16.gmra.mrb[160].mxu1 %v18244_v54  ;;  %v15099_v54 = vld [vmem:[#allocation21 + $0x690] ss:$12 sps:$4 sm:$0xff]  }
0x159d   : > { %10962 = vmatprep.mubr.bf16.mxu1 %v18269_v21  ;;  %10982 = vmatpush1.bf16.msra.mxu1 %v15093_v30  ;;  %v11157_v21 = vadd.f32 %v18379_v8, %v18408_v5  ;;  %v15105_v30 = vld [vmem:[#allocation21 + $0x6c0] ss:$12 sps:$4 sm:$0xff]  }
0x159e   : > { %10983 = vmatprep.subr.bf16.mxu1 %v15098_v10  ;;  %v11165_v10 = vadd.f32 %v18385_v2, %v18408_v5  ;;  %v15116_v2 = vld [vmem:[#allocation21 + $0x70c] ss:$12 sps:$4 sm:$0xff]  }
0x159f   : > { %v12947_v22 = vpop.f32.mrb[200].mxu0 }
0x15a0   : > { %v12948_v42 = vpop.f32.mrb[201].mxu0 }
0x15a1   : > { %v12949_v39 = vadd.f32 %v12948_v42, %v12947_v22  ;;  %10984 = vmatpush1.bf16.msra.mxu1 %v15096_v4  ;;  %v12950_v43 = vpop.f32.mrb[202].mxu0  ;;  %11501 = vmatmul.mubr.bf16.gmra.mrb[20].mxu0 %v18368_v62  ;;  %v15108_v22 = vld [vmem:[#allocation21 + $0x6d8] ss:$12 sps:$4 sm:$0xff]   ;;  %v15113_v42 = vld [vmem:[#allocation21 + $0x6f4] ss:$12 sps:$4 sm:$0xff]  }
0x15a2   : > { %v12951_v63 = vpop.f32.mrb[203].mxu0  ;;  %10985 = vmatprep.subr.bf16.mxu1 %v15101_v23 }
0x15a3   : > { %v18416_v38 = vadd.f32 %v12949_v39, %v11154_v31  ;;  %v12952_v48 = vadd.f32 %v12951_v63, %v12950_v43  ;;  %v11170_v39 = vadd.f32 %v18389_v51, %v18408_v5  ;;  %v15111_v63 = vld [vmem:[#allocation21 + $0x6f0] ss:$12 sps:$4 sm:$0xff]  }
0x15a4   : > { %10963 = vmatmul.mubr.bf16.gmra.mrb[164].mxu1 %v18264_v53  ;;  %v15110_v53 = vld [vmem:[#allocation21 + $0x6dc] ss:$12 sps:$4 sm:$0xff]  }
0x15a5   : > { %v18419_v1 = vadd.f32 %v12952_v48, %v11157_v21  ;;  %10986 = vmatpush1.bf16.msra.mxu1 %v15099_v54  ;;  %11005 = vmatprep.mubr.bf16.mxu1 %v18316_v46  ;;  %v11173_v21 = vadd.f32 %v18393_v13, %v18408_v5  ;;  %v15122_v13 = vld [vmem:[#allocation21 + $0x73c] ss:$12 sps:$4 sm:$0xff]  }
0x15a6   : > { %10987 = vmatprep.subr.bf16.mxu1 %v15104_v20 }
0x15a7   : > { %v12953_v45 = vpop.f32.mrb[204].mxu0 }
0x15a8   : > { %v12954_v12 = vpop.f32.mrb[205].mxu0 }
0x15a9   : > { %v12955_v33 = vadd.f32 %v12954_v12, %v12953_v45  ;;  %10988 = vmatpush1.bf16.msra.mxu1 %v15102_v34  ;;  %v12956_v8 = vpop.f32.mrb[206].mxu0  ;;  %v15114_v45 = vld [vmem:[#allocation21 + $0x708] ss:$12 sps:$4 sm:$0xff]   ;;  %v15119_v12 = vld [vmem:[#allocation21 + $0x724] ss:$12 sps:$4 sm:$0xff]  }
0x15aa   : > { %v12957_v47 = vpop.f32.mrb[207].mxu0  ;;  %10989 = vmatprep.subr.bf16.mxu1 %v15107_v18 }
0x15ab   : > { %v18426_v4 = vadd.f32 %v12955_v33, %v11162_v7  ;;  %v12958_v46 = vadd.f32 %v12957_v47, %v12956_v8  ;;  %v11178_v33 = vadd.f32 %v18397_v37, %v18408_v5  ;;  %v15117_v47 = vld [vmem:[#allocation21 + $0x720] ss:$12 sps:$4 sm:$0xff]   ;;  %v15123_v37 = vld [vmem:[#allocation21 + $0x750] ss:$12 sps:$4 sm:$0xff]  }
0x15ad   : > { %v18428_v23 = vadd.f32 %v12958_v46, %v11165_v10  ;;  %10990 = vmatpush1.bf16.msra.mxu1 %v15105_v30  ;;  %v11181_v10 = vadd.f32 %v18403_v52, %v18408_v5  ;;  %v15134_v52 = vld [vmem:[#allocation21 + $0x79c] ss:$12 sps:$4 sm:$0xff]   ;;  %v15132_v5 = vld [vmem:[#allocation21 + $0x798] ss:$12 sps:$4 sm:$0xff]  }
0x15ae   : > { %10991 = vmatprep.subr.bf16.mxu1 %v15110_v53 }
0x15af   : > { %v12959_v24 = vpop.f32.mrb[208].mxu0 }
0x15b0   : > { %v12960_v31 = vpop.f32.mrb[209].mxu0 }
0x15b1   : > { %v12961_v43 = vadd.f32 %v12960_v31, %v12959_v24  ;;  %10992 = vmatpush1.bf16.msra.mxu1 %v15108_v22  ;;  %v12962_v54 = vpop.f32.mrb[210].mxu0  ;;  %v15120_v24 = vld [vmem:[#allocation21 + $0x738] ss:$12 sps:$4 sm:$0xff]   ;;  %v15125_v31 = vld [vmem:[#allocation21 + $0x754] ss:$12 sps:$4 sm:$0xff]  }
0x15b2   : > { %v12963_v20 = vpop.f32.mrb[211].mxu0  ;;  %10993 = vmatprep.subr.bf16.mxu1 %v15113_v42 }
0x15b3   : > { %v18434_v48 = vadd.f32 %v12961_v43, %v11170_v39  ;;  %v12964_v34 = vadd.f32 %v12963_v20, %v12962_v54  ;;  %v15128_v39 = vld [vmem:[#allocation21 + $0x76c] ss:$12 sps:$4 sm:$0xff]   ;;  %v15126_v43 = vld [vmem:[#allocation21 + $0x768] ss:$12 sps:$4 sm:$0xff]   ;;  %v15131_v54 = vld [vmem:[#allocation21 + $0x784] ss:$12 sps:$4 sm:$0xff]  }
0x15b4   : > { %v15137_v20 = vld [vmem:[#allocation21 + $0x7b4] ss:$12 sps:$4 sm:$0xff]  }
0x15b5   : > { %v18436_v18 = vadd.f32 %v12964_v34, %v11173_v21  ;;  %10994 = vmatpush1.bf16.msra.mxu1 %v15111_v63  ;;  %v15129_v63 = vld [vmem:[#allocation21 + $0x780] ss:$12 sps:$4 sm:$0xff]   ;;  %v15138_v34 = vld [vmem:[#allocation21 + $0x7c8] ss:$12 sps:$4 sm:$0xff]  }
0x15b6   : > { %10995 = vmatprep.subr.bf16.mxu1 %v15116_v2  ;;  %v15135_v2 = vld [vmem:[#allocation21 + $0x7b0] ss:$12 sps:$4 sm:$0xff]   ;;  %v15140_v21 = vld [vmem:[#allocation21 + $0x7cc] ss:$12 sps:$4 sm:$0xff]  }
0x15b7   : > { %v12965_v51 = vpop.f32.mrb[212].mxu0 }
0x15b8   : > { %v12966_v7 = vpop.f32.mrb[213].mxu0 }
0x15b9   : > { %v12967_v8 = vadd.f32 %v12966_v7, %v12965_v51  ;;  %10996 = vmatpush1.bf16.msra.mxu1 %v15114_v45  ;;  %v12968_v30 = vpop.f32.mrb[214].mxu0  ;;  %v15143_v45 = vld [vmem:[#allocation21 + $0x7e4] ss:$12 sps:$4 sm:$0xff]  }
0x15ba   : > { %v12969_v53 = vpop.f32.mrb[215].mxu0  ;;  %10997 = vmatprep.subr.bf16.mxu1 %v15119_v12 }
0x15bb   : > { %v18442_v46 = vadd.f32 %v12967_v8, %v11178_v33  ;;  %v12970_v22 = vadd.f32 %v12969_v53, %v12968_v30  ;;  %v15149_v8 = vld [vmem:[#allocation21 + $0x814] ss:$12 sps:$4 sm:$0xff]  }
0x15bd   : > { %v18444_v42 = vadd.f32 %v12970_v22, %v11181_v10  ;;  %10998 = vmatpush1.bf16.msra.mxu1 %v15117_v47 }
0x15be   : > { %10999 = vmatprep.subr.bf16.mxu1 %v15122_v13  ;;  %v15147_v13 = vld [vmem:[#allocation21 + $0x810] ss:$12 sps:$4 sm:$0xff]  }
0x15c1   : > { %11000 = vmatpush1.bf16.msra.mxu1 %v15120_v24 }
0x15c2   : > { %11001 = vmatprep.subr.bf16.mxu1 %v15125_v31  ;;  %v15150_v31 = vld [vmem:[#allocation21 + $0x828] ss:$12 sps:$4 sm:$0xff]  }
0x15c5   : > { %11002 = vmatpush1.bf16.msra.mxu1 %v15123_v37  ;;  %v15155_v37 = vld [vmem:[#allocation21 + $0x844] ss:$12 sps:$4 sm:$0xff]  }
0x15c6   : > { %11003 = vmatprep.subr.bf16.mxu1 %v15128_v39 }
0x15c9   : > { %11004 = vmatpush1.bf16.msra.mxu1 %v15126_v43 }
0x15ca   : > { %11046 = vmatprep.subr.bf16.mxu1 %v15131_v54  ;;  %v15153_v54 = vld [vmem:[#allocation21 + $0x840] ss:$12 sps:$4 sm:$0xff]  }
0x15cc   : > { %11006 = vmatmul.mubr.bf16.vlgmr.msra.gmra.mrb[152].mxu1 %v18311_v6  ;;  %v15141_v6 = vld [vmem:[#allocation21 + $0x7e0] ss:$12 sps:$4 sm:$0xff]  }
0x15cd   : > { %11015 = vmatprep.mubr.bf16.mxu1 %v18334_v15  ;;  %11047 = vmatpush1.bf16.msra.mxu1 %v15129_v63  ;;  %v15146_v15 = vld [vmem:[#allocation21 + $0x7fc] ss:$12 sps:$4 sm:$0xff]  }
0x15ce   : > { %11048 = vmatprep.subr.bf16.mxu1 %v15134_v52 }
0x15d1   : > { %11049 = vmatpush1.bf16.msra.mxu1 %v15132_v5 }
0x15d2   : > { %11050 = vmatprep.subr.bf16.mxu1 %v15137_v20  ;;  %v15156_v20 = vld [vmem:[#allocation21 + $0x858] ss:$12 sps:$4 sm:$0xff]  }
0x15d4   : > { %11016 = vmatmul.mubr.bf16.gmra.mrb[156].mxu1 %v18330_v14  ;;  %v15144_v14 = vld [vmem:[#allocation21 + $0x7f8] ss:$12 sps:$4 sm:$0xff]  }
0x15d5   : > { %11025 = vmatprep.mubr.bf16.mxu1 %v18352_v0  ;;  %11051 = vmatpush1.bf16.msra.mxu1 %v15135_v2 }
0x15d6   : > { %11052 = vmatprep.subr.bf16.mxu1 %v15140_v21  ;;  %v15161_v21 = vld [vmem:[#allocation21 + $0x874] ss:$12 sps:$4 sm:$0xff]  }
0x15d9   : > { %11053 = vmatpush1.bf16.msra.mxu1 %v15138_v34 }
0x15da   : > { %11054 = vmatprep.subr.bf16.mxu1 %v15143_v45 }
0x15db   : > { %v12987_v12 = vpop.f32.mrb[216].mxu0 }
0x15dc   : > { %11026 = vmatmul.mubr.bf16.gmra.mrb[160].mxu1 %v18348_v55  ;;  %v12988_v51 = vpop.f32.mrb[217].mxu0  ;;  %v15152_v55 = vld [vmem:[#allocation21 + $0x82c] ss:$12 sps:$4 sm:$0xff]  }
0x15dd   : > { %11035 = vmatprep.mubr.bf16.mxu1 %v18370_v32  ;;  %11055 = vmatpush1.bf16.msra.mxu1 %v15141_v6  ;;  %v12989_v7 = vadd.f32 %v12988_v51, %v12987_v12  ;;  %v12990_v33 = vpop.f32.mrb[218].mxu0  ;;  %v15164_v6 = vld [vmem:[#allocation21 + $0x88c] ss:$12 sps:$4 sm:$0xff]  }
0x15de   : > { %11056 = vmatprep.subr.bf16.mxu1 %v15146_v15  ;;  %v12991_v0 = vpop.f32.mrb[219].mxu0 }
0x15df   : > { %v18453_v30 = vadd.f32 %v12989_v7, %v18416_v38  ;;  %v12992_v47 = vadd.f32 %v12991_v0, %v12990_v33  ;;  %v15162_v33 = vld [vmem:[#allocation21 + $0x888] ss:$12 sps:$4 sm:$0xff]   ;;  %v15167_v0 = vld [vmem:[#allocation21 + $0x8a4] ss:$12 sps:$4 sm:$0xff]  }
0x15e1   : > { %v18456_v53 = vadd.f32 %v12992_v47, %v18419_v1  ;;  %11057 = vmatpush1.bf16.msra.mxu1 %v15144_v14 }
0x15e2   : > { %11058 = vmatprep.subr.bf16.mxu1 %v15149_v8 }
0x15e3   : > { %v12993_v10 = vpop.f32.mrb[220].mxu0 }
0x15e4   : > { %11036 = vmatmul.mubr.bf16.gmra.mrb[164].mxu1 %v18366_v35  ;;  %v12994_v32 = vpop.f32.mrb[221].mxu0  ;;  %v15158_v35 = vld [vmem:[#allocation21 + $0x85c] ss:$12 sps:$4 sm:$0xff]  }
0x15e5   : > { %11059 = vmatpush1.bf16.msra.mxu1 %v15147_v13  ;;  %11078 = vmatprep.mubr.bf16.mxu1 %v18318_v41  ;;  %v12995_v22 = vadd.f32 %v12994_v32, %v12993_v10  ;;  %v12996_v24 = vpop.f32.mrb[222].mxu0  ;;  %v15170_v13 = vld [vmem:[#allocation21 + $0x8bc] ss:$12 sps:$4 sm:$0xff]   ;;  %v15168_v32 = vld [vmem:[#allocation21 + $0x8b8] ss:$12 sps:$4 sm:$0xff]  }
0x15e6   : > { %11060 = vmatprep.subr.bf16.mxu1 %v15152_v55  ;;  %v12997_v38 = vpop.f32.mrb[223].mxu0 }
0x15e7   : > { %v18461_v1 = vadd.f32 %v12995_v22, %v18426_v4  ;;  %v12998_v39 = vadd.f32 %v12997_v38, %v12996_v24 }
0x15e9   : > { %v18464_v43 = vadd.f32 %v12998_v39, %v18428_v23  ;;  %11061 = vmatpush1.bf16.msra.mxu1 %v15150_v31  ;;  %v15159_v23 = vld [vmem:[#allocation21 + $0x870] ss:$12 sps:$4 sm:$0xff]   ;;  %v15173_v31 = vld [vmem:[#allocation21 + $0x8d4] ss:$12 sps:$4 sm:$0xff]  }
0x15ea   : > { %11062 = vmatprep.subr.bf16.mxu1 %v15155_v37 }
0x15eb   : > { %v12999_v63 = vpop.f32.mrb[224].mxu0 }
0x15ec   : > { %v13000_v52 = vpop.f32.mrb[225].mxu0 }
0x15ed   : > { %11063 = vmatpush1.bf16.msra.mxu1 %v15153_v54  ;;  %v13001_v41 = vadd.f32 %v13000_v52, %v12999_v63  ;;  %v13002_v5 = vpop.f32.mrb[226].mxu0  ;;  %v15176_v54 = vld [vmem:[#allocation21 + $0x8ec] ss:$12 sps:$4 sm:$0xff]   ;;  %v15174_v52 = vld [vmem:[#allocation21 + $0x8e8] ss:$12 sps:$4 sm:$0xff]  }
0x15ee   : > { %11064 = vmatprep.subr.bf16.mxu1 %v15158_v35  ;;  %v13003_v2 = vpop.f32.mrb[227].mxu0 }
0x15ef   : > { %v11300_v4 = vadd.f32 %v13001_v41, %v18434_v48  ;;  %v13004_v34 = vadd.f32 %v13003_v2, %v13002_v5 }
0x15f1   : > { %v11303_v45 = vadd.f32 %v13004_v34, %v18436_v18  ;;  %11065 = vmatpush1.bf16.msra.mxu1 %v15156_v20  ;;  %v15165_v18 = vld [vmem:[#allocation21 + $0x8a0] ss:$12 sps:$4 sm:$0xff]  }
0x15f2   : > { %11066 = vmatprep.subr.bf16.mxu1 %v15161_v21 }
0x15f3   : > { %v13005_v15 = vpop.f32.mrb[228].mxu0 }
0x15f4   : > { %v13006_v12 = vpop.f32.mrb[229].mxu0 }
0x15f5   : > { %11067 = vmatpush1.bf16.msra.mxu1 %v15159_v23  ;;  %v13007_v51 = vadd.f32 %v13006_v12, %v13005_v15  ;;  %v13008_v7 = vpop.f32.mrb[230].mxu0 }
0x15f6   : > { %11068 = vmatprep.subr.bf16.mxu1 %v15164_v6  ;;  %v13009_v14 = vpop.f32.mrb[231].mxu0 }
0x15f7   : > { %v11308_v8 = vadd.f32 %v13007_v51, %v18442_v46  ;;  %v13010_v47 = vadd.f32 %v13009_v14, %v13008_v7  ;;  %v15171_v46 = vld [vmem:[#allocation21 + $0x8d0] ss:$12 sps:$4 sm:$0xff]  }
0x15f9   : > { %v11311_v48 = vadd.f32 %v13010_v47, %v18444_v42  ;;  %11069 = vmatpush1.bf16.msra.mxu1 %v15162_v33 }
0x15fa   : > { %11070 = vmatprep.subr.bf16.mxu1 %v15167_v0 }
0x15fc   : > { %v13027_v55 = vpop.f32.mrb[232].mxu0 }
0x15fd   : > { %11071 = vmatpush1.bf16.msra.mxu1 %v15165_v18  ;;  %v13028_v10 = vpop.f32.mrb[233].mxu0 }
0x15fe   : > { %v13029_v22 = vadd.f32 %v13028_v10, %v13027_v55  ;;  %v13030_v24 = vpop.f32.mrb[234].mxu0  ;;  %11072 = vmatprep.subr.bf16.mxu1 %v15170_v13 }
0x15ff   : > { %v13031_v38 = vpop.f32.mrb[235].mxu0 }
0x1600   : > { %v11349_v37 = vadd.f32 %v13029_v22, %v18453_v30  ;;  %v13032_v39 = vadd.f32 %v13031_v38, %v13030_v24 }
0x1601   : > { %11073 = vmatpush1.bf16.msra.mxu1 %v15168_v32 }
0x1602   : > { %v11352_v42 = vadd.f32 %v13032_v39, %v18456_v53  ;;  %11074 = vmatprep.subr.bf16.mxu1 %v15173_v31 }
0x1604   : > { %v13033_v35 = vpop.f32.mrb[236].mxu0 }
0x1605   : > { %11075 = vmatpush1.bf16.msra.mxu1 %v15171_v46  ;;  %v13034_v63 = vpop.f32.mrb[237].mxu0 }
0x1606   : > { %v13035_v41 = vadd.f32 %v13034_v63, %v13033_v35  ;;  %v13036_v5 = vpop.f32.mrb[238].mxu0  ;;  %11076 = vmatprep.subr.bf16.mxu1 %v15176_v54 }
0x1607   : > { %v13037_v20 = vpop.f32.mrb[239].mxu0 }
0x1608   : > { %v11357_v2 = vadd.f32 %v13035_v41, %v18461_v1  ;;  %v13038_v21 = vadd.f32 %v13037_v20, %v13036_v5 }
0x1609   : > { %11077 = vmatpush1.bf16.msra.mxu1 %v15174_v52 }
0x160a   : > { %v11360_v30 = vadd.f32 %v13038_v21, %v18464_v43 }
0x160c   : > { %11079 = vmatmul.mubr.bf16.vlgmr.msra.gmra.mrb[152].mxu1 %v18314_v61  ;;  %v13039_v34 = vpop.f32.mrb[240].mxu0 }
0x160d   : > { %11088 = vmatprep.mubr.bf16.mxu1 %v18336_v3  ;;  %v13040_v53 = vpop.f32.mrb[241].mxu0 }
0x160e   : > { %v13041_v23 = vadd.f32 %v13040_v53, %v13039_v34  ;;  %v13042_v6 = vpop.f32.mrb[242].mxu0 }
0x160f   : > { %v13043_v15 = vpop.f32.mrb[243].mxu0 }
0x1610   : > { %v11365_v12 = vadd.f32 %v13041_v23, %v11300_v4  ;;  %v13044_v51 = vadd.f32 %v13043_v15, %v13042_v6 }
0x1612   : > { %v11368_v7 = vadd.f32 %v13044_v51, %v11303_v45 }
0x1614   : > { %11089 = vmatmul.mubr.bf16.gmra.mrb[156].mxu1 %v18332_v56  ;;  %v13045_v33 = vpop.f32.mrb[244].mxu0 }
0x1615   : > { %11098 = vmatprep.mubr.bf16.mxu1 %v18354_v58  ;;  %v13046_v1 = vpop.f32.mrb[245].mxu0 }
0x1616   : > { %v13047_v14 = vadd.f32 %v13046_v1, %v13045_v33  ;;  %v13048_v43 = vpop.f32.mrb[246].mxu0 }
0x1617   : > { %v13049_v0 = vpop.f32.mrb[247].mxu0 }
0x1618   : > { %v11373_v61 = vadd.f32 %v13047_v14, %v11308_v8  ;;  %v13050_v47 = vadd.f32 %v13049_v0, %v13048_v43 }
0x161a   : > { %v11376_v18 = vadd.f32 %v13050_v47, %v11311_v48 }
0x161c   : > { %11099 = vmatmul.mubr.bf16.gmra.mrb[160].mxu1 %v18350_v16 }
0x161d   : > { %11108 = vmatprep.mubr.bf16.mxu1 %v18372_v40 }
0x1624   : > { %11109 = vmatmul.mubr.bf16.gmra.mrb[164].mxu1 %v18368_v62 }
0x163c   : > { %v13067_v3 = vpop.f32.mrb[248].mxu0 }
0x163d   : > { %v13068_v4 = vpop.f32.mrb[249].mxu0 }
0x163e   : > { %v13069_v45 = vadd.f32 %v13068_v4, %v13067_v3  ;;  %v13070_v56 = vpop.f32.mrb[250].mxu0 }
0x163f   : > { %v13071_v13 = vpop.f32.mrb[251].mxu0 }
0x1640   : > { %v11414_v55 = vadd.f32 %v13069_v45, %v11349_v37  ;;  %v13072_v58 = vadd.f32 %v13071_v13, %v13070_v56 }
0x1642   : > { %v11417_v10 = vadd.f32 %v13072_v58, %v11352_v42 }
0x1644   : > { %v13073_v32 = vpop.f32.mrb[252].mxu0 }
0x1645   : > { %v13074_v22 = vpop.f32.mrb[253].mxu0 }
0x1646   : > { %v13075_v24 = vadd.f32 %v13074_v22, %v13073_v32  ;;  %v13076_v8 = vpop.f32.mrb[254].mxu0 }
0x1647   : > { %v13077_v31 = vpop.f32.mrb[255].mxu0 }
0x1648   : > { %v11422_v48 = vadd.f32 %v13075_v24, %v11357_v2  ;;  %v13078_v38 = vadd.f32 %v13077_v31, %v13076_v8 }
0x164a   : > { %v11425_v16 = vadd.f32 %v13078_v38, %v11360_v30 }
0x164c   : > { %v13079_v39 = vpop.f32.mrb[0].mxu0 }
0x164d   : > { %v13080_v40 = vpop.f32.mrb[1].mxu0 }
0x164e   : > { %v13081_v46 = vadd.f32 %v13080_v40, %v13079_v39  ;;  %v13082_v62 = vpop.f32.mrb[2].mxu0 }
0x164f   : > { %v13083_v54 = vpop.f32.mrb[3].mxu0 }
0x1650   : > { %v11430_v35 = vadd.f32 %v13081_v46, %v11365_v12  ;;  %v13084_v63 = vadd.f32 %v13083_v54, %v13082_v62  ;;  %v9137_v62 = vrot.slane %v18400_v60, %v18684_v49 }
0x1652   : > { %v11433_v52 = vadd.f32 %v13084_v63, %v11368_v7 }
0x1654   : > { %v13085_v41 = vpop.f32.mrb[4].mxu0 }
0x1655   : > { %v13086_v37 = vpop.f32.mrb[5].mxu0 }
0x1656   : > { %v13087_v42 = vadd.f32 %v13086_v37, %v13085_v41  ;;  %v13088_v5 = vpop.f32.mrb[6].mxu0 }
0x1657   : > { %v13089_v20 = vpop.f32.mrb[7].mxu0 }
0x1658   : > { %v11438_v21 = vadd.f32 %v13087_v42, %v11373_v61  ;;  %v13090_v34 = vadd.f32 %v13089_v20, %v13088_v5 }
0x165a   : > { %v11441_v53 = vadd.f32 %v13090_v34, %v11376_v18 }
0x165c   : > { %v13107_v2 = vpop.f32.mrb[8].mxu0 }
0x165d   : > { %v13108_v23 = vpop.f32.mrb[9].mxu0 }
0x165e   : > { %v13109_v30 = vadd.f32 %v13108_v23, %v13107_v2  ;;  %v13110_v6 = vpop.f32.mrb[10].mxu0  ;;  %v18697_v23 = vld [vmem:[#allocation38_spill] sm:$0xff] }
0x165f   : > { %v13111_v15 = vpop.f32.mrb[11].mxu0 }
0x1660   : > { %v11479_v51 = vadd.f32 %v13109_v30, %v11414_v55  ;;  %v13112_v33 = vadd.f32 %v13111_v15, %v13110_v6  ;;  %v18698_v6 = vld [vmem:[#allocation39_spill] sm:$0xff]  ;;  %v18699_v15 = vld [vmem:[#allocation40_spill] sm:$0xff] }
0x1662   : > { %v11511_v12 = vadd.f32 %v11479_v51, %v17586_v27  ;;  %v11482_v1 = vadd.f32 %v13112_v33, %v11417_v10 }
0x1664   : > { %11535 = vst [vmem:[%s18484_s5 + $0x10] sm:$0xff] %v11511_v12  ;;  %v11514_v7 = vadd.f32 %v11482_v1, %v17594_v29  ;;  %v13113_v14 = vpop.f32.mrb[12].mxu0 }
0x1665   : > { %v13114_v43 = vpop.f32.mrb[13].mxu0 }
0x1666   : > { %11538 = vst [vmem:[%s18484_s5 + $0x28] sm:$0xff] %v11514_v7  ;;  %v13115_v0 = vadd.f32 %v13114_v43, %v13113_v14  ;;  %v13116_v61 = vpop.f32.mrb[14].mxu0  ;;  %v18700_v14 = vld [vmem:[#allocation37_spill] sm:$0xff] }
0x1667   : > { %v13117_v47 = vpop.f32.mrb[15].mxu0 }
0x1668   : > { %v11487_v18 = vadd.f32 %v13115_v0, %v11422_v48  ;;  %v13118_v27 = vadd.f32 %v13117_v47, %v13116_v61  ;;  %v18701_v47 = vld [vmem:[#allocation36_spill] sm:$0xff] }
0x166a   : > { %v11517_v3 = vadd.f32 %v11487_v18, %v17622_v17  ;;  %v11490_v4 = vadd.f32 %v13118_v27, %v11425_v16 }
0x166c   : > { %11541 = vst [vmem:[%s18484_s5 + $0x40] sm:$0xff] %v11517_v3  ;;  %v11520_v45 = vadd.f32 %v11490_v4, %v17634_v59  ;;  %v13119_v56 = vpop.f32.mrb[16].mxu0  ;;  %v18702_v3 = vld [vmem:[#allocation35_spill] sm:$0xff] }
0x166d   : > { %v13120_v13 = vpop.f32.mrb[17].mxu0 }
0x166e   : > { %11544 = vst [vmem:[%s18484_s5 + $0x58] sm:$0xff] %v11520_v45  ;;  %v13121_v29 = vadd.f32 %v13120_v13, %v13119_v56  ;;  %v13122_v55 = vpop.f32.mrb[18].mxu0  ;;  %v18703_v45 = vld [vmem:[#allocation41_spill] sm:$0xff] }
0x166f   : > { %v13123_v58 = vpop.f32.mrb[19].mxu0 }
0x1670   : > { %v11495_v10 = vadd.f32 %v13121_v29, %v11430_v35  ;;  %v13124_v32 = vadd.f32 %v13123_v58, %v13122_v55 }
0x1672   : > { %v11523_v22 = vadd.f32 %v11495_v10, %v17650_v50  ;;  %v11498_v24 = vadd.f32 %v13124_v32, %v11433_v52  ;;  %v18704_v32 = vld [vmem:[#allocation42_spill] sm:$0xff] }
0x1674   : > { %11547 = vst [vmem:[%s18484_s5 + $0x70] sm:$0xff] %v11523_v22  ;;  %v11526_v17 = vadd.f32 %v11498_v24, %v17658_v57  ;;  %v13125_v8 = vpop.f32.mrb[20].mxu0  ;;  %v9133_v57 = vrot.slane %v18400_v60, %v18682_v25 }
0x1675   : > { %v13126_v31 = vpop.f32.mrb[21].mxu0 }
0x1676   : > { %11550 = vst [vmem:[%s18484_s5 + $0x88] sm:$0xff] %v11526_v17  ;;  %v13127_v59 = vadd.f32 %v13126_v31, %v13125_v8  ;;  %v13128_v48 = vpop.f32.mrb[22].mxu0  ;;  %v18705_v8 = vld [vmem:[#allocation43_spill] sm:$0xff] }
0x1677   : > { %v13129_v38 = vpop.f32.mrb[23].mxu0 }
0x1678   : > { %v11503_v16 = vadd.f32 %v13127_v59, %v11438_v21  ;;  %v13130_v39 = vadd.f32 %v13129_v38, %v13128_v48  ;;  %v18706_v48 = vld [vmem:[#allocation44_spill] sm:$0xff] }
0x167a   : > { %v11529_v40 = vadd.f32 %v11503_v16, %v17679_v11  ;;  %v11506_v46 = vadd.f32 %v13130_v39, %v11441_v53  ;;  %v18708_v16 = vld [vmem:[#allocation45_spill] sm:$0xff] }
0x167c   : > { %11553 = vst [vmem:[%s18484_s5 + $0xa0] sm:$0xff] %v11529_v40  ;;  %v11532_v50 = vadd.f32 %v11506_v46, %v17688_v26 }
0x167e   : > { %11556 = vst [vmem:[%s18484_s5 + $0xb8] sm:$0xff] %v11532_v50 }
0x16df   : > { %v11080_v54 = vpop.f32.mrb[152].mxu1 }
0x16e0   : > { %v13499_v35 = vadd.f32 %v11080_v54, %v9133_v57  ;;  %v11082_v63 = vpop.f32.mrb[153].mxu1 }
0x16e1   : > { %v13500_v52 = vadd.f32 %v11082_v63, %v9137_v62  ;;  %v11084_v11 = vpop.f32.mrb[154].mxu1 }
0x16e2   : > { %v11509_v41 = vadd.f32 %v13499_v35, %v17574_v44  ;;  %v13501_v37 = vadd.f32 %v11084_v11, %v9133_v57  ;;  %v11086_v42 = vpop.f32.mrb[155].mxu1 }
0x16e3   : > { %v11510_v26 = vadd.f32 %v13500_v52, %v17579_v9  ;;  %v13502_v5 = vadd.f32 %v11086_v42, %v9137_v62 }
0x16e4   : > { %11533 = vst [vmem:[%s18484_s5] sm:$0xff] %v11509_v41  ;;  %v11512_v25 = vadd.f32 %v13501_v37, %v17583_v36 }
0x16e5   : > { %11534 = vst [vmem:[%s18484_s5 + $0x8] sm:$0xff] %v11510_v26  ;;  %v11513_v49 = vadd.f32 %v13502_v5, %v17589_v19 }
0x16e6   : > { %11536 = vst [vmem:[%s18484_s5 + $0x18] sm:$0xff] %v11512_v25 }
0x16e7   : > { %11537 = vst [vmem:[%s18484_s5 + $0x20] sm:$0xff] %v11513_v49  ;;  %v11090_v60 = vpop.f32.mrb[156].mxu1 }
0x16e8   : > { %v13503_v20 = vadd.f32 %v11090_v60, %v9133_v57  ;;  %v11092_v44 = vpop.f32.mrb[157].mxu1 }
0x16e9   : > { %v13504_v21 = vadd.f32 %v11092_v44, %v9137_v62  ;;  %v11094_v34 = vpop.f32.mrb[158].mxu1 }
0x16ea   : > { %v11515_v9 = vadd.f32 %v13503_v20, %v17608_v28  ;;  %v13505_v53 = vadd.f32 %v11094_v34, %v9133_v57  ;;  %v11096_v2 = vpop.f32.mrb[159].mxu1 }
0x16eb   : > { %v11516_v30 = vadd.f32 %v13504_v21, %v18697_v23  ;;  %v13506_v36 = vadd.f32 %v11096_v2, %v9137_v62 }
0x16ec   : > { %11539 = vst [vmem:[%s18484_s5 + $0x30] sm:$0xff] %v11515_v9  ;;  %v11518_v19 = vadd.f32 %v13505_v53, %v18698_v6 }
0x16ed   : > { %11540 = vst [vmem:[%s18484_s5 + $0x38] sm:$0xff] %v11516_v30  ;;  %v11519_v51 = vadd.f32 %v13506_v36, %v18699_v15 }
0x16ee   : > { %11542 = vst [vmem:[%s18484_s5 + $0x48] sm:$0xff] %v11518_v19 }
0x16ef   : > { %11543 = vst [vmem:[%s18484_s5 + $0x50] sm:$0xff] %v11519_v51  ;;  %v11100_v33 = vpop.f32.mrb[160].mxu1 }
0x16f0   : > { %v13507_v12 = vadd.f32 %v11100_v33, %v9133_v57  ;;  %v11102_v28 = vpop.f32.mrb[161].mxu1 }
0x16f1   : > { %v13508_v1 = vadd.f32 %v11102_v28, %v9137_v62  ;;  %v11104_v7 = vpop.f32.mrb[162].mxu1 }
0x16f2   : > { %v11521_v43 = vadd.f32 %v13507_v12, %v18700_v14  ;;  %v13509_v0 = vadd.f32 %v11104_v7, %v9133_v57  ;;  %v11106_v61 = vpop.f32.mrb[163].mxu1 }
0x16f3   : > { %v11522_v18 = vadd.f32 %v13508_v1, %v18701_v47  ;;  %v13510_v27 = vadd.f32 %v11106_v61, %v9137_v62 }
0x16f4   : > { %11545 = vst [vmem:[%s18484_s5 + $0x60] sm:$0xff] %v11521_v43  ;;  %v11524_v4 = vadd.f32 %v13509_v0, %v18702_v3 }
0x16f5   : > { %11546 = vst [vmem:[%s18484_s5 + $0x68] sm:$0xff] %v11522_v18  ;;  %v11525_v56 = vadd.f32 %v13510_v27, %v18703_v45 }
0x16f6   : > { %11548 = vst [vmem:[%s18484_s5 + $0x78] sm:$0xff] %v11524_v4 }
0x16f7   : > { %11549 = vst [vmem:[%s18484_s5 + $0x80] sm:$0xff] %v11525_v56  ;;  %v11110_v13 = vpop.f32.mrb[164].mxu1 }
0x16f8   : > { %v13511_v29 = vadd.f32 %v11110_v13, %v9133_v57  ;;  %v11112_v55 = vpop.f32.mrb[165].mxu1 }
0x16f9   : > { %v13512_v58 = vadd.f32 %v11112_v55, %v9137_v62  ;;  %v11114_v10 = vpop.f32.mrb[166].mxu1 }
0x16fa   : > { %v11527_v22 = vadd.f32 %v13511_v29, %v18704_v32  ;;  %v13513_v24 = vadd.f32 %v11114_v10, %v9133_v57  ;;  %v11116_v17 = vpop.f32.mrb[167].mxu1 }
0x16fb   : > { %v11528_v31 = vadd.f32 %v13512_v58, %v18705_v8  ;;  %v13514_v59 = vadd.f32 %v11116_v17, %v9137_v62 }
0x16fc   : > { %11551 = vst [vmem:[%s18484_s5 + $0x90] sm:$0xff] %v11527_v22  ;;  %v11530_v38 = vadd.f32 %v13513_v24, %v18706_v48 }
0x16fd   : > { %11552 = vst [vmem:[%s18484_s5 + $0x98] sm:$0xff] %v11528_v31  ;;  %v11531_v39 = vadd.f32 %v13514_v59, %v18708_v16 }
0x16fe   : > { %11554 = vst [vmem:[%s18484_s5 + $0xa8] sm:$0xff] %v11530_v38 }
0x16ff   : > { %11555 = vst [vmem:[%s18484_s5 + $0xb0] sm:$0xff] %v11531_v39 }
0x1700   : > { %15794 = shalt.err (!%p15791_p9)
}
0x1701   : > { %s15795_s14 = scalar_lea.hbm %s18538_s27, 3072  ;;  %s15799_s19 = scalar_lea.hbm %s18707_s26, 6144 }
0x1702   : > { %p15796_p7 = scmp.ne.s32.totalorder %s18538_s27, %s15795_s14  ;;  %p15800_p13 = scmp.lt.u32.totalorder %s18538_s27, %s18707_s26 }
0x1703   : > { %p15801_p1 = scmp.lt.u32.totalorder %s15799_s19, %s15795_s14  ;;  %p15803_p2 = scmp.lt.u32.totalorder %s15795_s14, %s18538_s27 }
0x1704   : > { %p15797_p10 = pnand %p15796_p7, %p18709_p8 }
0x1705   : > { %p15802_p3 = por %p15801_p1, %p15800_p13 }
0x1706   : > { %p15798_p4 = pneg %p15797_p10 }
0x1707   : > { %p15804_p6 = por %p15803_p2, %p15802_p3 }
0x1709   : > { %p15805_p11 = pnand %p15804_p6, %p15798_p4 }
0x170b   : > { %15808 = shalt.err (!%p15805_p11)
}
0x170c   : > { %s15897_s16 = smov 384   ;;  %s15898_s30 = smov 24  }
0x170d   : > { %13829 = dma.vmem_to_hbm [thread:$0]  (%p18709_p8), %s18542_s29, 3072, %s18538_s27, %s11558_s25, %s15897_s16, %s15897_s16, %s15898_s30  }
0x170e PF: > { %s11586_s15 = sand.u32 1, %s15859_s21   ;;  %p18710_p12 = scmp.ne.s32.totalorder %s18650_s2, 0 }
0x170f   : > { %p18711_p0 = scmp.ge.s32.totalorder %s15871_s24, 2  ;;  %s11587_s18 = scalar_lea.sflag [#allocation6], %s11586_s15 }
0x1711   : > { %p13870_p5 = pnand %p18711_p0, %p18710_p12 }
0x1713   : > { %15854 = dma.done.wait (!%p13870_p5), %s11587_s18, 3072  }
0x1714   : > { %15856 = vsyncadd (!%p13870_p5), %s11587_s18, 4294964224  ;;  %p31_p9 = scmp.ge.s32.totalorder %s16238_s13, 4   ;;  %s18712_s21 = smov %s15863_s22 }
0x1715   : > { %s18713_s22 = smov %s15867_s23  ;;  %s18714_s23 = smov %s16250_s20 }
0x1716   : > { %s18715_s24 = smov %s16238_s13  ;;  %33 = sbr.rel (!%p31_p9) target bundleno = 17 (0x11), region = 157 }
0x171d   :  { %11592 = vsyncpa [#allocation5], 1 }
0x171e   :  { %11594 = vsyncpa [#allocation5 + $0x1], 1 }
0x171f   :  { %11595 = vsyncpa [#allocation8], 1 }
0x1720   :  { %11596 = vsyncpa [#allocation11], 1 }
0x1721   :  { %11597 = vsyncpa [#allocation14], 1 }
0x1722   :  { %11598 = vsyncpa [#allocation17], 1 }
0x1723   :  { %11599 = vsyncpa [#allocation20], 1 }
0x1724   :  { %11600 = vsyncpa [#allocation23], 1 }
0x1725   :  { %11601 = vsyncpa [#allocation6], 1 }
0x1726   :  { %11603 = vsyncpa [#allocation6 + $0x1], 1 }

</bundles_post_ra>
